<compile_context>
chip_gen: v5e
topology: v5e:2x2
jax: 0.10.0
libtpu: 0.0.40
codegen_flags: <defaults>
</compile_context>

<pallas_src>
import jax
import jax.numpy as jnp
import numpy as np
from jax import lax
from jax.experimental import pallas as pl
from jax.experimental.pallas import tpu as pltpu

FEAT_C = 1920            # densenet201 feature channels (hard-coded by x.view((1, 1920)))
POOL_K = 7               # AvgPool2d(kernel_size=7, stride=1) on a 7x7 map -> 1x1
HW = POOL_K * POOL_K     # 49 spatial positions
NUM_CLASSES = 1000       # densenet201.classifier = Linear(1920, 1000)
N_PAD = 1024             # classes padded to a multiple of 128 (lane-dense stores)


def _n_class_tiles() -> int:
    """Trace-time choice of how many independent class-dim tiles to emit.

    Multi-TensorCore chips (v7x, v4/v5p megacore) benefit from splitting the
    class dimension across cores (halves the per-core weight DMA).  On
    single-core chips (v5e/v6e) the split only adds a serial grid step and a
    duplicated pooling matvec, so use a single full-width tile there.
    """
    try:
        dev = jax.devices()[0]
        n = getattr(dev, "num_cores", None)
        if isinstance(n, int) and n >= 2:
            return 2
        kind = str(getattr(dev, "device_kind", "")).lower()
        if "lite" not in kind and (
            "v7" in kind or "7x" in kind or "v4" in kind or "v5p" in kind
        ):
            return 2
    except Exception:
        pass
    return 1


def densenet_head_kernel(x_ref, w_ref, s_ref, b_ref, o_ref):
    # x_ref : (1920, 49)      f32   backbone activations (pure reshape of NCHW)
    # w_ref : (1920, n_tile)  int8  per-class-quantized classifier weight, (in, out) layout
    # s_ref : (1, n_tile)     f32   per-class dequant scales (zero on padded classes)
    # b_ref : (1, n_tile)     f32   bias slice (zero on padded classes)
    # o_ref : (1, n_tile)     f32   logits slice
    #
    # AvgPool2d(7, stride=1) over a 7x7 map == mean over all 49 positions.
    # Done as a (1,49)·(1920,49)ᵀ MXU contraction (flash-attention-style q·kᵀ)
    # so the pooled vector is produced directly in lane-dense (1, 1920) layout.
    pool_w = jnp.full((1, HW), 1.0 / HW, dtype=jnp.float32)
    pooled = lax.dot_general(                                   # (1, 1920) f32
        pool_w, x_ref[...],
        dimension_numbers=(((1,), (1,)), ((), ())),
        preferred_element_type=jnp.float32)

    # Dequantize the int8 weight tile to bf16 (values are integers <= 127, so
    # the bf16 representation is exact); canonical (1,K)x(K,N) MXU matmul with
    # f32 accumulate, then apply the per-class scale and bias.
    w_bf16 = w_ref[...].astype(jnp.float32).astype(jnp.bfloat16)
    acc = jnp.dot(pooled.astype(jnp.bfloat16), w_bf16,          # (1, n_tile) f32
                  preferred_element_type=jnp.float32)
    o_ref[...] = acc * s_ref[...] + b_ref[...]


def densenet_forward(feats_nchw, wq_t_pad, scale_pad, b_pad):
    """feats_nchw: (1, 1920, 7, 7) f32 backbone output -> logits (1, 1000) f32.

    wq_t_pad : (1920, 1024) int8  pre-transposed, per-class-quantized weight
    scale_pad: (1, 1024)    f32   per-class dequant scales
    b_pad    : (1, 1024)    f32   zero-padded bias
    """
    n, c, h, w = feats_nchw.shape
    assert n == 1 and c == FEAT_C and h == POOL_K and w == POOL_K, (
        "expected contiguous NCHW (1, 1920, 7, 7) densenet201 activations")
    # Pure reshape of contiguous NCHW -> (C, H*W); no transpose dispatch.
    x_c_hw = feats_nchw.reshape(c, h * w)

    n_tiles = _n_class_tiles()         # 1 on v5e/v6e, 2 on v7x / megacore
    n_tile = N_PAD // n_tiles

    out_pad = pl.pallas_call(
        densenet_head_kernel,
        out_shape=jax.ShapeDtypeStruct((1, N_PAD), jnp.float32),
        grid_spec=pl.GridSpec(
            grid=(n_tiles,),
            in_specs=[
                pl.BlockSpec((c, h * w), lambda i: (0, 0)),      # full activations
                pl.BlockSpec((c, n_tile), lambda i: (0, i)),     # weight N-slice (K, N)
                pl.BlockSpec((1, n_tile), lambda i: (0, i)),     # scale N-slice
                pl.BlockSpec((1, n_tile), lambda i: (0, i)),     # bias N-slice
            ],
            out_specs=pl.BlockSpec((1, n_tile), lambda i: (0, i)),
        ),
        compiler_params=pltpu.CompilerParams(
            dimension_semantics=("parallel",),   # 2-TC split on v7x; trivial for grid=(1,)
            vmem_limit_bytes=32 << 20,           # actual need ~10 MiB worst case
        ),
        cost_estimate=pl.CostEstimate(
            flops=2 * HW * FEAT_C + 2 * FEAT_C * N_PAD,
            transcendentals=0,
            bytes_accessed=(FEAT_C * HW * 4        # activations f32
                            + FEAT_C * N_PAD * 1   # int8 weight
                            + N_PAD * 4 * 3),      # scale + bias + logits
        ),
    )(x_c_hw, wq_t_pad, scale_pad, b_pad)

    return out_pad[:, :NUM_CLASSES]


if __name__ == "__main__":
    key = jax.random.PRNGKey(0)
    k_feat, k_w, k_b = jax.random.split(key, 3)

    # Synthetic backbone activations (what self.features_conv would produce).
    feats = jax.random.normal(k_feat, (1, FEAT_C, POOL_K, POOL_K), jnp.float32)

    # Synthetic classifier params in PyTorch Linear layout: weight (out, in), bias (out,).
    w = jax.random.normal(k_w, (NUM_CLASSES, FEAT_C), jnp.float32) * 0.02
    bias = jax.random.normal(k_b, (NUM_CLASSES,), jnp.float32) * 0.02

    # One-time (load-time) parameter prep:
    #  * transpose PyTorch (out, in) -> (in, out) so the kernel matmul is canonical (K, N)
    #  * per-class symmetric int8 quantization (dequant scale applied post-MXU in-kernel)
    #  * zero-pad classes 1000 -> 1024 along the lane (column) axis
    w_t = w.T                                                    # (1920, 1000) f32
    absmax = jnp.max(jnp.abs(w_t), axis=0)                       # (1000,)
    scale = jnp.where(absmax > 0, absmax / 127.0, 1.0)           # (1000,)
    wq = jnp.clip(jnp.round(w_t / scale), -127, 127).astype(jnp.int8)
    wq_pad = jnp.zeros((FEAT_C, N_PAD), jnp.int8).at[:, :NUM_CLASSES].set(wq)
    scale_pad = jnp.zeros((1, N_PAD), jnp.float32).at[0, :NUM_CLASSES].set(scale)
    b_pad = jnp.zeros((1, N_PAD), jnp.float32).at[0, :NUM_CLASSES].set(bias)

    fwd = jax.jit(densenet_forward)
    out = jax.block_until_ready(fwd(feats, wq_pad, scale_pad, b_pad))

    # Pure-JAX reference of the head (pool -> view -> linear) using the SAME
    # dequantized weight in f32, so only the kernel's bf16 pooled rounding and
    # MXU accumulation order differ (well inside the 1e-2 tolerance).
    pooled_ref = jnp.mean(feats, axis=(2, 3))                    # (1, 1920)
    w_deq = wq.astype(jnp.float32) * scale                       # (1920, 1000)
    out_ref = pooled_ref @ w_deq + bias

    np.testing.assert_allclose(np.asarray(out), np.asarray(out_ref),
                               rtol=1e-2, atol=1e-2)
    assert out.shape == (1, NUM_CLASSES)
    print("KERNEL_OK")
</pallas_src>

<mosaic_0001>
module attributes {stable_mosaic.version = 11 : i64} {
  func.func @densenet_head_kernel(%arg0: i32, %arg1: memref<1920x49xf32, #tpu.memory_space<vmem>>, %arg2: memref<1920x1024xi8, #tpu.memory_space<vmem>>, %arg3: memref<1x1024xf32, #tpu.memory_space<vmem>>, %arg4: memref<1x1024xf32, #tpu.memory_space<vmem>>, %arg5: memref<1x1024xf32, #tpu.memory_space<vmem>>) attributes {dimension_semantics = [#tpu.dimension_semantics<parallel>], iteration_bounds = array<i64: 1>, scalar_prefetch = 0 : i64, scratch_operands = 0 : i64, tpu.core_type = #tpu.core_type<tc>, window_params = [{pipeline_mode = #tpu.pipeline_mode<synchronous>, transform_indices = @transform_0, window_bounds = array<i64: 1920, 49>}, {transform_indices = @transform_1, window_bounds = array<i64: 1920, 1024>}, {transform_indices = @transform_2, window_bounds = array<i64: 1, 1024>}, {transform_indices = @transform_3, window_bounds = array<i64: 1, 1024>}, {transform_indices = @transform_4, window_bounds = array<i64: 1, 1024>}]} {
    %cst = arith.constant 0.0204081628 : f32
    %0 = vector.broadcast %cst : f32 to vector<1x49xf32>
    %c0 = arith.constant 0 : index
    %c0_0 = arith.constant 0 : index
    %1 = vector.load %arg1[%c0, %c0_0] : memref<1920x49xf32, #tpu.memory_space<vmem>>, vector<1920x49xf32>
    %cst_1 = arith.constant dense<0.000000e+00> : vector<1x1920xf32>
    %2 = tpu.matmul %0, %1, %cst_1 {dimension_numbers = #tpu.dot_dimension_numbers<[1], [1], [0], [0], [0, 0, 1, 0], [], []>} : vector<1x49xf32>, vector<1920x49xf32>, vector<1x1920xf32> -> vector<1x1920xf32>
    %c0_2 = arith.constant 0 : index
    %c0_3 = arith.constant 0 : index
    %3 = vector.load %arg2[%c0_2, %c0_3] : memref<1920x1024xi8, #tpu.memory_space<vmem>>, vector<1920x1024xi8>
    %4 = arith.sitofp %3 : vector<1920x1024xi8> to vector<1920x1024xf32>
    %5 = arith.truncf %4 : vector<1920x1024xf32> to vector<1920x1024xbf16>
    %6 = arith.truncf %2 : vector<1x1920xf32> to vector<1x1920xbf16>
    %cst_4 = arith.constant dense<0.000000e+00> : vector<1x1024xf32>
    %7 = tpu.matmul %6, %5, %cst_4 {dimension_numbers = #tpu.dot_dimension_numbers<[1], [0], [0], [1], [0, 0, 1, 1], [], []>} : vector<1x1920xbf16>, vector<1920x1024xbf16>, vector<1x1024xf32> -> vector<1x1024xf32>
    %c0_5 = arith.constant 0 : index
    %c0_6 = arith.constant 0 : index
    %8 = vector.load %arg3[%c0_5, %c0_6] : memref<1x1024xf32, #tpu.memory_space<vmem>>, vector<1x1024xf32>
    %9 = arith.mulf %7, %8 : vector<1x1024xf32>
    %c0_7 = arith.constant 0 : index
    %c0_8 = arith.constant 0 : index
    %10 = vector.load %arg4[%c0_7, %c0_8] : memref<1x1024xf32, #tpu.memory_space<vmem>>, vector<1x1024xf32>
    %11 = arith.addf %9, %10 : vector<1x1024xf32>
    %c0_9 = arith.constant 0 : index
    %c0_10 = arith.constant 0 : index
    %12 = vector.load %arg5[%c0_9, %c0_10] : memref<1x1024xf32, #tpu.memory_space<vmem>>, vector<1x1024xf32>
    tpu.vector_store %arg5[%c0_9, %c0_10], %11 {strides = array<i32>} : memref<1x1024xf32, #tpu.memory_space<vmem>>, vector<1x1024xf32>,
    return
  }
  func.func @transform_0(%arg0: i32) -> (i32, i32) {
    %c0_i32 = arith.constant 0 : i32
    %c0_i32_0 = arith.constant 0 : i32
    %c0_i32_1 = arith.constant 0 : i32
    return %c0_i32, %c0_i32_0 : i32, i32
  }
  func.func @transform_1(%arg0: i32) -> (i32, i32) {
    %c0_i32 = arith.constant 0 : i32
    %c0_i32_0 = arith.constant 0 : i32
    return %c0_i32, %arg0 : i32, i32
  }
  func.func @transform_2(%arg0: i32) -> (i32, i32) {
    %c0_i32 = arith.constant 0 : i32
    %c0_i32_0 = arith.constant 0 : i32
    return %c0_i32, %arg0 : i32, i32
  }
  func.func @transform_3(%arg0: i32) -> (i32, i32) {
    %c0_i32 = arith.constant 0 : i32
    %c0_i32_0 = arith.constant 0 : i32
    return %c0_i32, %arg0 : i32, i32
  }
  func.func @transform_4(%arg0: i32) -> (i32, i32) {
    %c0_i32 = arith.constant 0 : i32
    %c0_i32_0 = arith.constant 0 : i32
    return %c0_i32, %arg0 : i32, i32
  }
}

</mosaic_0001>

<bundles_post_ra>
// kernel: densenet_forward.1
= control target key start
LH: loop header
LB: loop body
LE: loop exit
PB: predicated region body
PF: predicated region fallthrough
CT: control target
= control target key end

     0   :  { %vm258_vm0 = vcmask 400384   ;;  %s12558_s0 = inlined_call_operand.vmem [shape: f32[1920,49], index: 0, kind: input, shape index: {}]   ;;  %s12559_s1 = inlined_call_operand.vmem [shape: s8[1920,1024], index: 1, kind: input, shape index: {}]   ;;  %s12560_s2 = inlined_call_operand.vmem [shape: f32[1,1024], index: 2, kind: input, shape index: {}]   ;;  %s12561_s3 = inlined_call_operand.vmem [shape: f32[1,1024], index: 3, kind: input, shape index: {}]   ;;  %s12562_s4 = inlined_call_operand.hbm [shape: f32[1,1024], index: 4, kind: output, shape index: {}]  }
   0x1   :  { %v33_v0 = vld [vmem:[%s12558_s0 + $0x78] sm:$0xff]  ;;  %v32_v4 = vld [vmem:[%s12558_s0 + $0x70] sm:$0xff]  ;;  %v31_v8 = vld [vmem:[%s12558_s0 + $0x68] sm:$0xff] }
   0x2   :  { %v49_v1 = vld [vmem:[%s12558_s0 + $0xf8] sm:$0xff]  ;;  %8236 = vmatpush.xpose.msk.msra.mxu0 %vm258_vm0, %v33_v0  ;;  %v48_v5 = vld [vmem:[%s12558_s0 + $0xf0] sm:$0xff]  ;;  %v47_v9 = vld [vmem:[%s12558_s0 + $0xe8] sm:$0xff] }
   0x3   :  { %v65_v2 = vld [vmem:[%s12558_s0 + $0x178] sm:$0xff]  ;;  %8253 = vmatpush.xpose.msk.msra.mxu1 %vm258_vm0, %v49_v1  ;;  %v64_v6 = vld [vmem:[%s12558_s0 + $0x170] sm:$0xff]  ;;  %v63_v10 = vld [vmem:[%s12558_s0 + $0x168] sm:$0xff] }
   0x4   :  { %v81_v3 = vld [vmem:[%s12558_s0 + $0x1f8] sm:$0xff]  ;;  %8270 = vmatpush.xpose.msk.msra.mxu2 %vm258_vm0, %v65_v2  ;;  %v80_v7 = vld [vmem:[%s12558_s0 + $0x1f0] sm:$0xff]  ;;  %v79_v11 = vld [vmem:[%s12558_s0 + $0x1e8] sm:$0xff] }
   0x5   :  { %8287 = vmatpush.xpose.msk.msra.mxu3 %vm258_vm0, %v81_v3  ;;  %v30_v12 = vld [vmem:[%s12558_s0 + $0x60] sm:$0xff]  ;;  %v29_v16 = vld [vmem:[%s12558_s0 + $0x58] sm:$0xff] }
   0x6   :  { %8237 = vmatpush.xpose.msk.msra.mxu0 %vm258_vm0, %v32_v4  ;;  %v46_v13 = vld [vmem:[%s12558_s0 + $0xe0] sm:$0xff]  ;;  %v45_v17 = vld [vmem:[%s12558_s0 + $0xd8] sm:$0xff] }
   0x7   :  { %8254 = vmatpush.xpose.msk.msra.mxu1 %vm258_vm0, %v48_v5  ;;  %v62_v14 = vld [vmem:[%s12558_s0 + $0x160] sm:$0xff]  ;;  %v61_v18 = vld [vmem:[%s12558_s0 + $0x158] sm:$0xff] }
   0x8   :  { %8271 = vmatpush.xpose.msk.msra.mxu2 %vm258_vm0, %v64_v6  ;;  %v78_v15 = vld [vmem:[%s12558_s0 + $0x1e0] sm:$0xff]  ;;  %v77_v19 = vld [vmem:[%s12558_s0 + $0x1d8] sm:$0xff] }
   0x9   :  { %8288 = vmatpush.xpose.msk.msra.mxu3 %vm258_vm0, %v80_v7 }
   0xa   :  { %8238 = vmatpush.xpose.msk.msra.mxu0 %vm258_vm0, %v31_v8 }
   0xb   :  { %8255 = vmatpush.xpose.msk.msra.mxu1 %vm258_vm0, %v47_v9 }
   0xc   :  { %8272 = vmatpush.xpose.msk.msra.mxu2 %vm258_vm0, %v63_v10 }
   0xd   :  { %8289 = vmatpush.xpose.msk.msra.mxu3 %vm258_vm0, %v79_v11 }
   0xe   :  { %8239 = vmatpush.xpose.msk.msra.mxu0 %vm258_vm0, %v30_v12 }
   0xf   :  { %8256 = vmatpush.xpose.msk.msra.mxu1 %vm258_vm0, %v46_v13 }
  0x10   :  { %8273 = vmatpush.xpose.msk.msra.mxu2 %vm258_vm0, %v62_v14 }
  0x11   :  { %8290 = vmatpush.xpose.msk.msra.mxu3 %vm258_vm0, %v78_v15 }
  0x12   :  { %9 = vsyncpa [#allocation3], 0  ;;  %8240 = vmatpush.xpose.msk.msra.mxu0 %vm258_vm0, %v29_v16  ;;  %v28_v20 = vld [vmem:[%s12558_s0 + $0x50] sm:$0xff]  ;;  %v27_v24 = vld [vmem:[%s12558_s0 + $0x48] sm:$0xff]  ;;  %v12563_v12 = vmov 0.020408163  }
  0x13   :  { %8257 = vmatpush.xpose.msk.msra.mxu1 %vm258_vm0, %v45_v17  ;;  %v44_v21 = vld [vmem:[%s12558_s0 + $0xd0] sm:$0xff]  ;;  %v43_v25 = vld [vmem:[%s12558_s0 + $0xc8] sm:$0xff]  ;;  %v26_v28 = vld [vmem:[%s12558_s0 + $0x40] sm:$0xff]  ;;  %vm8204_vm1 = vcmask 1040384   ;;  %vm8206_vm2 = vcmask 1042434   ;;  %vm8208_vm3 = vcmask 1041408  }
  0x14   :  { %8274 = vmatpush.xpose.msk.msra.mxu2 %vm258_vm0, %v61_v18  ;;  %v60_v22 = vld [vmem:[%s12558_s0 + $0x150] sm:$0xff]  ;;  %v59_v26 = vld [vmem:[%s12558_s0 + $0x148] sm:$0xff]  ;;  %v42_v29 = vld [vmem:[%s12558_s0 + $0xc0] sm:$0xff]  ;;  %vm8210_vm4 = vcmask 1044484   ;;  %vm8212_vm5 = vcmask 1046534   ;;  %vm8214_vm6 = vcmask 1045508  }
  0x15   :  { %8291 = vmatpush.xpose.msk.msra.mxu3 %vm258_vm0, %v77_v19  ;;  %v76_v23 = vld [vmem:[%s12558_s0 + $0x1d0] sm:$0xff]  ;;  %v75_v27 = vld [vmem:[%s12558_s0 + $0x1c8] sm:$0xff]  ;;  %v58_v30 = vld [vmem:[%s12558_s0 + $0x140] sm:$0xff]  ;;  %s8227_s29 = sshll.u32 %s12562_s4, 4  ;;  %vm8216_vm7 = vcmask 1043456   ;;  %s8228_s29 = int_to_ptr.hbm [resolvable:$true] %s8227_s29 }
  0x16   :  { %8241 = vmatpush.xpose.msk.msra.mxu0 %vm258_vm0, %v28_v20  ;;  %v74_v31 = vld [vmem:[%s12558_s0 + $0x1c0] sm:$0xff]  ;;  %v25_v32 = vld [vmem:[%s12558_s0 + $0x38] sm:$0xff]  ;;  %v24_v36 = vld [vmem:[%s12558_s0 + $0x30] sm:$0xff] }
  0x17   :  { %8258 = vmatpush.xpose.msk.msra.mxu1 %vm258_vm0, %v44_v21  ;;  %v41_v33 = vld [vmem:[%s12558_s0 + $0xb8] sm:$0xff]  ;;  %v40_v37 = vld [vmem:[%s12558_s0 + $0xb0] sm:$0xff]  ;;  %v23_v40 = vld [vmem:[%s12558_s0 + $0x28] sm:$0xff] }
  0x18   :  { %8275 = vmatpush.xpose.msk.msra.mxu2 %vm258_vm0, %v60_v22  ;;  %v57_v34 = vld [vmem:[%s12558_s0 + $0x138] sm:$0xff]  ;;  %v56_v38 = vld [vmem:[%s12558_s0 + $0x130] sm:$0xff]  ;;  %v39_v41 = vld [vmem:[%s12558_s0 + $0xa8] sm:$0xff] }
  0x19   :  { %8292 = vmatpush.xpose.msk.msra.mxu3 %vm258_vm0, %v76_v23  ;;  %v73_v35 = vld [vmem:[%s12558_s0 + $0x1b8] sm:$0xff]  ;;  %v72_v39 = vld [vmem:[%s12558_s0 + $0x1b0] sm:$0xff]  ;;  %v55_v42 = vld [vmem:[%s12558_s0 + $0x128] sm:$0xff] }
  0x1a   :  { %8242 = vmatpush.xpose.msk.msra.mxu0 %vm258_vm0, %v27_v24  ;;  %v71_v43 = vld [vmem:[%s12558_s0 + $0x1a8] sm:$0xff]  ;;  %v22_v44 = vld [vmem:[%s12558_s0 + $0x20] sm:$0xff]  ;;  %v21_v48 = vld [vmem:[%s12558_s0 + $0x18] sm:$0xff] }
  0x1b   :  { %8259 = vmatpush.xpose.msk.msra.mxu1 %vm258_vm0, %v43_v25  ;;  %v38_v45 = vld [vmem:[%s12558_s0 + $0xa0] sm:$0xff]  ;;  %v37_v49 = vld [vmem:[%s12558_s0 + $0x98] sm:$0xff]  ;;  %v20_v52 = vld [vmem:[%s12558_s0 + $0x10] sm:$0xff] }
  0x1c   :  { %8276 = vmatpush.xpose.msk.msra.mxu2 %vm258_vm0, %v59_v26  ;;  %v54_v46 = vld [vmem:[%s12558_s0 + $0x120] sm:$0xff]  ;;  %v53_v50 = vld [vmem:[%s12558_s0 + $0x118] sm:$0xff]  ;;  %v36_v53 = vld [vmem:[%s12558_s0 + $0x90] sm:$0xff] }
  0x1d   :  { %8293 = vmatpush.xpose.msk.msra.mxu3 %vm258_vm0, %v75_v27  ;;  %v70_v47 = vld [vmem:[%s12558_s0 + $0x1a0] sm:$0xff]  ;;  %v69_v51 = vld [vmem:[%s12558_s0 + $0x198] sm:$0xff]  ;;  %v52_v54 = vld [vmem:[%s12558_s0 + $0x110] sm:$0xff] }
  0x1e   :  { %8243 = vmatpush.xpose.msk.msra.mxu0 %vm258_vm0, %v26_v28  ;;  %v68_v55 = vld [vmem:[%s12558_s0 + $0x190] sm:$0xff]  ;;  %v19_v56 = vld [vmem:[%s12558_s0 + $0x8] sm:$0xff]  ;;  %v18_v60 = vld [vmem:[%s12558_s0] sm:$0xff] }
  0x1f   :  { %8260 = vmatpush.xpose.msk.msra.mxu1 %vm258_vm0, %v42_v29  ;;  %v35_v57 = vld [vmem:[%s12558_s0 + $0x88] sm:$0xff]  ;;  %v34_v61 = vld [vmem:[%s12558_s0 + $0x80] sm:$0xff]  ;;  %v97_v0 = vld [vmem:[%s12558_s0 + $0x278] sm:$0xff] }
  0x20   :  { %8277 = vmatpush.xpose.msk.msra.mxu2 %vm258_vm0, %v58_v30  ;;  %v51_v58 = vld [vmem:[%s12558_s0 + $0x108] sm:$0xff]  ;;  %v50_v62 = vld [vmem:[%s12558_s0 + $0x100] sm:$0xff]  ;;  %v113_v1 = vld [vmem:[%s12558_s0 + $0x2f8] sm:$0xff] }
  0x21   :  { %8294 = vmatpush.xpose.msk.msra.mxu3 %vm258_vm0, %v74_v31  ;;  %v67_v59 = vld [vmem:[%s12558_s0 + $0x188] sm:$0xff]  ;;  %v66_v63 = vld [vmem:[%s12558_s0 + $0x180] sm:$0xff]  ;;  %v129_v2 = vld [vmem:[%s12558_s0 + $0x378] sm:$0xff] }
  0x22   :  { %8244 = vmatpush.xpose.msk.msra.mxu0 %vm258_vm0, %v25_v32  ;;  %v145_v3 = vld [vmem:[%s12558_s0 + $0x3f8] sm:$0xff]  ;;  %v96_v4 = vld [vmem:[%s12558_s0 + $0x270] sm:$0xff]  ;;  %v95_v8 = vld [vmem:[%s12558_s0 + $0x268] sm:$0xff] }
  0x23   :  { %8261 = vmatpush.xpose.msk.msra.mxu1 %vm258_vm0, %v41_v33  ;;  %v112_v5 = vld [vmem:[%s12558_s0 + $0x2f0] sm:$0xff]  ;;  %v111_v9 = vld [vmem:[%s12558_s0 + $0x2e8] sm:$0xff]  ;;  %v94_v13 = vld [vmem:[%s12558_s0 + $0x260] sm:$0xff] }
  0x24   :  { %8278 = vmatpush.xpose.msk.msra.mxu2 %vm258_vm0, %v57_v34  ;;  %v128_v6 = vld [vmem:[%s12558_s0 + $0x370] sm:$0xff]  ;;  %v127_v10 = vld [vmem:[%s12558_s0 + $0x368] sm:$0xff]  ;;  %v110_v14 = vld [vmem:[%s12558_s0 + $0x2e0] sm:$0xff] }
  0x25   :  { %8295 = vmatpush.xpose.msk.msra.mxu3 %vm258_vm0, %v73_v35  ;;  %v144_v7 = vld [vmem:[%s12558_s0 + $0x3f0] sm:$0xff]  ;;  %v143_v11 = vld [vmem:[%s12558_s0 + $0x3e8] sm:$0xff]  ;;  %v126_v15 = vld [vmem:[%s12558_s0 + $0x360] sm:$0xff] }
  0x26   :  { %8245 = vmatpush.xpose.msk.msra.mxu0 %vm258_vm0, %v24_v36  ;;  %v142_v16 = vld [vmem:[%s12558_s0 + $0x3e0] sm:$0xff]  ;;  %v93_v17 = vld [vmem:[%s12558_s0 + $0x258] sm:$0xff]  ;;  %v92_v21 = vld [vmem:[%s12558_s0 + $0x250] sm:$0xff] }
  0x27   :  { %8262 = vmatpush.xpose.msk.msra.mxu1 %vm258_vm0, %v40_v37  ;;  %v109_v18 = vld [vmem:[%s12558_s0 + $0x2d8] sm:$0xff]  ;;  %v108_v22 = vld [vmem:[%s12558_s0 + $0x2d0] sm:$0xff]  ;;  %v91_v25 = vld [vmem:[%s12558_s0 + $0x248] sm:$0xff] }
  0x28   :  { %8279 = vmatpush.xpose.msk.msra.mxu2 %vm258_vm0, %v56_v38  ;;  %v125_v19 = vld [vmem:[%s12558_s0 + $0x358] sm:$0xff]  ;;  %v124_v23 = vld [vmem:[%s12558_s0 + $0x350] sm:$0xff]  ;;  %v107_v26 = vld [vmem:[%s12558_s0 + $0x2c8] sm:$0xff] }
  0x29   :  { %8296 = vmatpush.xpose.msk.msra.mxu3 %vm258_vm0, %v72_v39  ;;  %v141_v20 = vld [vmem:[%s12558_s0 + $0x3d8] sm:$0xff]  ;;  %v140_v24 = vld [vmem:[%s12558_s0 + $0x3d0] sm:$0xff]  ;;  %v123_v27 = vld [vmem:[%s12558_s0 + $0x348] sm:$0xff] }
  0x2a   :  { %8246 = vmatpush.xpose.msk.msra.mxu0 %vm258_vm0, %v23_v40  ;;  %v139_v28 = vld [vmem:[%s12558_s0 + $0x3c8] sm:$0xff]  ;;  %v90_v29 = vld [vmem:[%s12558_s0 + $0x240] sm:$0xff]  ;;  %v89_v33 = vld [vmem:[%s12558_s0 + $0x238] sm:$0xff] }
  0x2b   :  { %8263 = vmatpush.xpose.msk.msra.mxu1 %vm258_vm0, %v39_v41  ;;  %v106_v30 = vld [vmem:[%s12558_s0 + $0x2c0] sm:$0xff]  ;;  %v105_v34 = vld [vmem:[%s12558_s0 + $0x2b8] sm:$0xff]  ;;  %v88_v37 = vld [vmem:[%s12558_s0 + $0x230] sm:$0xff] }
  0x2c   :  { %8280 = vmatpush.xpose.msk.msra.mxu2 %vm258_vm0, %v55_v42  ;;  %v122_v31 = vld [vmem:[%s12558_s0 + $0x340] sm:$0xff]  ;;  %v121_v35 = vld [vmem:[%s12558_s0 + $0x338] sm:$0xff]  ;;  %v104_v38 = vld [vmem:[%s12558_s0 + $0x2b0] sm:$0xff] }
  0x2d   :  { %8297 = vmatpush.xpose.msk.msra.mxu3 %vm258_vm0, %v71_v43  ;;  %v138_v32 = vld [vmem:[%s12558_s0 + $0x3c0] sm:$0xff]  ;;  %v137_v36 = vld [vmem:[%s12558_s0 + $0x3b8] sm:$0xff]  ;;  %v120_v39 = vld [vmem:[%s12558_s0 + $0x330] sm:$0xff] }
  0x2e   :  { %8247 = vmatpush.xpose.msk.msra.mxu0 %vm258_vm0, %v22_v44  ;;  %v136_v40 = vld [vmem:[%s12558_s0 + $0x3b0] sm:$0xff]  ;;  %v87_v41 = vld [vmem:[%s12558_s0 + $0x228] sm:$0xff] }
  0x2f   :  { %8264 = vmatpush.xpose.msk.msra.mxu1 %vm258_vm0, %v38_v45  ;;  %v103_v42 = vld [vmem:[%s12558_s0 + $0x2a8] sm:$0xff]  ;;  %v86_v45 = vld [vmem:[%s12558_s0 + $0x220] sm:$0xff] }
  0x30   :  { %8281 = vmatpush.xpose.msk.msra.mxu2 %vm258_vm0, %v54_v46  ;;  %v119_v43 = vld [vmem:[%s12558_s0 + $0x328] sm:$0xff]  ;;  %v102_v46 = vld [vmem:[%s12558_s0 + $0x2a0] sm:$0xff] }
  0x31   :  { %8298 = vmatpush.xpose.msk.msra.mxu3 %vm258_vm0, %v70_v47  ;;  %v135_v44 = vld [vmem:[%s12558_s0 + $0x3a8] sm:$0xff]  ;;  %v118_v47 = vld [vmem:[%s12558_s0 + $0x320] sm:$0xff] }
  0x32   :  { %8248 = vmatpush.xpose.msk.msra.mxu0 %vm258_vm0, %v21_v48  ;;  %v134_v48 = vld [vmem:[%s12558_s0 + $0x3a0] sm:$0xff] }
  0x33   :  { %8265 = vmatpush.xpose.msk.msra.mxu1 %vm258_vm0, %v37_v49  ;;  %v85_v49 = vld [vmem:[%s12558_s0 + $0x218] sm:$0xff] }
  0x34   :  { %8282 = vmatpush.xpose.msk.msra.mxu2 %vm258_vm0, %v53_v50  ;;  %v101_v50 = vld [vmem:[%s12558_s0 + $0x298] sm:$0xff] }
  0x35   :  { %8299 = vmatpush.xpose.msk.msra.mxu3 %vm258_vm0, %v69_v51  ;;  %v117_v51 = vld [vmem:[%s12558_s0 + $0x318] sm:$0xff] }
  0x36   :  { %8249 = vmatpush.xpose.msk.msra.mxu0 %vm258_vm0, %v20_v52  ;;  %v133_v52 = vld [vmem:[%s12558_s0 + $0x398] sm:$0xff] }
  0x37   :  { %8266 = vmatpush.xpose.msk.msra.mxu1 %vm258_vm0, %v36_v53  ;;  %v84_v53 = vld [vmem:[%s12558_s0 + $0x210] sm:$0xff] }
  0x38   :  { %8283 = vmatpush.xpose.msk.msra.mxu2 %vm258_vm0, %v52_v54  ;;  %v100_v54 = vld [vmem:[%s12558_s0 + $0x290] sm:$0xff] }
  0x39   :  { %8300 = vmatpush.xpose.msk.msra.mxu3 %vm258_vm0, %v68_v55  ;;  %v116_v55 = vld [vmem:[%s12558_s0 + $0x310] sm:$0xff] }
  0x3a   :  { %8250 = vmatpush.xpose.msk.msra.mxu0 %vm258_vm0, %v19_v56  ;;  %v132_v56 = vld [vmem:[%s12558_s0 + $0x390] sm:$0xff] }
  0x3b   :  { %8267 = vmatpush.xpose.msk.msra.mxu1 %vm258_vm0, %v35_v57  ;;  %v83_v57 = vld [vmem:[%s12558_s0 + $0x208] sm:$0xff] }
  0x3c   :  { %8284 = vmatpush.xpose.msk.msra.mxu2 %vm258_vm0, %v51_v58  ;;  %v99_v58 = vld [vmem:[%s12558_s0 + $0x288] sm:$0xff] }
  0x3d   :  { %8301 = vmatpush.xpose.msk.msra.mxu3 %vm258_vm0, %v67_v59  ;;  %v115_v59 = vld [vmem:[%s12558_s0 + $0x308] sm:$0xff] }
  0x3e   :  { %8251 = vmatpush.xpose.msk.msra.mxu0 %vm258_vm0, %v18_v60  ;;  %v131_v60 = vld [vmem:[%s12558_s0 + $0x388] sm:$0xff] }
  0x3f   :  { %8268 = vmatpush.xpose.msk.msra.mxu1 %vm258_vm0, %v34_v61  ;;  %v82_v61 = vld [vmem:[%s12558_s0 + $0x200] sm:$0xff] }
  0x40   :  { %8285 = vmatpush.xpose.msk.msra.mxu2 %vm258_vm0, %v50_v62  ;;  %v98_v62 = vld [vmem:[%s12558_s0 + $0x280] sm:$0xff] }
  0x41   :  { %8302 = vmatpush.xpose.msk.msra.mxu3 %vm258_vm0, %v66_v63  ;;  %8252 = vmatmul.msk.f32.vlgmr.msra.gmra.mxu0 %vm258_vm0, %v12563_v12  ;;  %v114_v63 = vld [vmem:[%s12558_s0 + $0x300] sm:$0xff] }
  0x42   :  { %8304 = vmatpush.xpose.msk.msrb.mxu0 %vm258_vm0, %v97_v0  ;;  %8269 = vmatmul.msk.f32.vlgmr.msra.gmra.mxu1 %vm258_vm0, %v12563_v12  ;;  %v130_v0 = vld [vmem:[%s12558_s0 + $0x380] sm:$0xff] }
  0x43   :  { %8321 = vmatpush.xpose.msk.msrb.mxu1 %vm258_vm0, %v113_v1  ;;  %8286 = vmatmul.msk.f32.vlgmr.msra.gmra.mxu2 %vm258_vm0, %v12563_v12  ;;  %v161_v1 = vld [vmem:[%s12558_s0 + $0x478] sm:$0xff] }
  0x44   :  { %8338 = vmatpush.xpose.msk.msrb.mxu2 %vm258_vm0, %v129_v2  ;;  %8303 = vmatmul.msk.f32.vlgmr.msra.gmra.mxu3 %vm258_vm0, %v12563_v12  ;;  %v177_v2 = vld [vmem:[%s12558_s0 + $0x4f8] sm:$0xff] }
  0x45   :  { %8355 = vmatpush.xpose.msk.msrb.mxu3 %vm258_vm0, %v145_v3  ;;  %v193_v3 = vld [vmem:[%s12558_s0 + $0x578] sm:$0xff] }
  0x46   :  { %8305 = vmatpush.xpose.msk.msrb.mxu0 %vm258_vm0, %v96_v4  ;;  %v209_v4 = vld [vmem:[%s12558_s0 + $0x5f8] sm:$0xff] }
  0x47   :  { %8322 = vmatpush.xpose.msk.msrb.mxu1 %vm258_vm0, %v112_v5  ;;  %v160_v5 = vld [vmem:[%s12558_s0 + $0x470] sm:$0xff] }
  0x48   :  { %8339 = vmatpush.xpose.msk.msrb.mxu2 %vm258_vm0, %v128_v6  ;;  %v176_v6 = vld [vmem:[%s12558_s0 + $0x4f0] sm:$0xff] }
  0x49   :  { %8356 = vmatpush.xpose.msk.msrb.mxu3 %vm258_vm0, %v144_v7  ;;  %v192_v7 = vld [vmem:[%s12558_s0 + $0x570] sm:$0xff] }
  0x4a   :  { %8306 = vmatpush.xpose.msk.msrb.mxu0 %vm258_vm0, %v95_v8  ;;  %v208_v8 = vld [vmem:[%s12558_s0 + $0x5f0] sm:$0xff] }
  0x4b   :  { %8323 = vmatpush.xpose.msk.msrb.mxu1 %vm258_vm0, %v111_v9  ;;  %v159_v9 = vld [vmem:[%s12558_s0 + $0x468] sm:$0xff] }
  0x4c   :  { %8340 = vmatpush.xpose.msk.msrb.mxu2 %vm258_vm0, %v127_v10  ;;  %v175_v10 = vld [vmem:[%s12558_s0 + $0x4e8] sm:$0xff] }
  0x4d   :  { %8357 = vmatpush.xpose.msk.msrb.mxu3 %vm258_vm0, %v143_v11  ;;  %v191_v11 = vld [vmem:[%s12558_s0 + $0x568] sm:$0xff] }
  0x4e   :  { %8307 = vmatpush.xpose.msk.msrb.mxu0 %vm258_vm0, %v94_v13  ;;  %v207_v13 = vld [vmem:[%s12558_s0 + $0x5e8] sm:$0xff] }
  0x4f   :  { %8324 = vmatpush.xpose.msk.msrb.mxu1 %vm258_vm0, %v110_v14  ;;  %v158_v14 = vld [vmem:[%s12558_s0 + $0x460] sm:$0xff] }
  0x50   :  { %8341 = vmatpush.xpose.msk.msrb.mxu2 %vm258_vm0, %v126_v15  ;;  %v174_v15 = vld [vmem:[%s12558_s0 + $0x4e0] sm:$0xff] }
  0x51   :  { %8358 = vmatpush.xpose.msk.msrb.mxu3 %vm258_vm0, %v142_v16  ;;  %v190_v16 = vld [vmem:[%s12558_s0 + $0x560] sm:$0xff] }
  0x52   :  { %8308 = vmatpush.xpose.msk.msrb.mxu0 %vm258_vm0, %v93_v17  ;;  %v206_v17 = vld [vmem:[%s12558_s0 + $0x5e0] sm:$0xff] }
  0x53   :  { %8325 = vmatpush.xpose.msk.msrb.mxu1 %vm258_vm0, %v109_v18  ;;  %v157_v18 = vld [vmem:[%s12558_s0 + $0x458] sm:$0xff] }
  0x54   :  { %8342 = vmatpush.xpose.msk.msrb.mxu2 %vm258_vm0, %v125_v19  ;;  %v173_v19 = vld [vmem:[%s12558_s0 + $0x4d8] sm:$0xff] }
  0x55   :  { %8359 = vmatpush.xpose.msk.msrb.mxu3 %vm258_vm0, %v141_v20  ;;  %v189_v20 = vld [vmem:[%s12558_s0 + $0x558] sm:$0xff] }
  0x56   :  { %8309 = vmatpush.xpose.msk.msrb.mxu0 %vm258_vm0, %v92_v21  ;;  %v205_v21 = vld [vmem:[%s12558_s0 + $0x5d8] sm:$0xff] }
  0x57   :  { %8326 = vmatpush.xpose.msk.msrb.mxu1 %vm258_vm0, %v108_v22  ;;  %v156_v22 = vld [vmem:[%s12558_s0 + $0x450] sm:$0xff] }
  0x58   :  { %8343 = vmatpush.xpose.msk.msrb.mxu2 %vm258_vm0, %v124_v23  ;;  %v172_v23 = vld [vmem:[%s12558_s0 + $0x4d0] sm:$0xff] }
  0x59   :  { %8360 = vmatpush.xpose.msk.msrb.mxu3 %vm258_vm0, %v140_v24  ;;  %v188_v24 = vld [vmem:[%s12558_s0 + $0x550] sm:$0xff] }
  0x5a   :  { %8310 = vmatpush.xpose.msk.msrb.mxu0 %vm258_vm0, %v91_v25  ;;  %v204_v25 = vld [vmem:[%s12558_s0 + $0x5d0] sm:$0xff] }
  0x5b   :  { %8327 = vmatpush.xpose.msk.msrb.mxu1 %vm258_vm0, %v107_v26  ;;  %v155_v26 = vld [vmem:[%s12558_s0 + $0x448] sm:$0xff] }
  0x5c   :  { %8344 = vmatpush.xpose.msk.msrb.mxu2 %vm258_vm0, %v123_v27  ;;  %v171_v27 = vld [vmem:[%s12558_s0 + $0x4c8] sm:$0xff] }
  0x5d   :  { %8361 = vmatpush.xpose.msk.msrb.mxu3 %vm258_vm0, %v139_v28  ;;  %v187_v28 = vld [vmem:[%s12558_s0 + $0x548] sm:$0xff] }
  0x5e   :  { %8311 = vmatpush.xpose.msk.msrb.mxu0 %vm258_vm0, %v90_v29  ;;  %v203_v29 = vld [vmem:[%s12558_s0 + $0x5c8] sm:$0xff] }
  0x5f   :  { %8328 = vmatpush.xpose.msk.msrb.mxu1 %vm258_vm0, %v106_v30  ;;  %v154_v30 = vld [vmem:[%s12558_s0 + $0x440] sm:$0xff] }
  0x60   :  { %8345 = vmatpush.xpose.msk.msrb.mxu2 %vm258_vm0, %v122_v31  ;;  %v170_v31 = vld [vmem:[%s12558_s0 + $0x4c0] sm:$0xff] }
  0x61   :  { %8362 = vmatpush.xpose.msk.msrb.mxu3 %vm258_vm0, %v138_v32  ;;  %v186_v32 = vld [vmem:[%s12558_s0 + $0x540] sm:$0xff] }
  0x62   :  { %8312 = vmatpush.xpose.msk.msrb.mxu0 %vm258_vm0, %v89_v33  ;;  %v202_v33 = vld [vmem:[%s12558_s0 + $0x5c0] sm:$0xff] }
  0x63   :  { %8329 = vmatpush.xpose.msk.msrb.mxu1 %vm258_vm0, %v105_v34  ;;  %v153_v34 = vld [vmem:[%s12558_s0 + $0x438] sm:$0xff] }
  0x64   :  { %8346 = vmatpush.xpose.msk.msrb.mxu2 %vm258_vm0, %v121_v35  ;;  %v169_v35 = vld [vmem:[%s12558_s0 + $0x4b8] sm:$0xff] }
  0x65   :  { %8363 = vmatpush.xpose.msk.msrb.mxu3 %vm258_vm0, %v137_v36  ;;  %v185_v36 = vld [vmem:[%s12558_s0 + $0x538] sm:$0xff] }
  0x66   :  { %8313 = vmatpush.xpose.msk.msrb.mxu0 %vm258_vm0, %v88_v37  ;;  %v201_v37 = vld [vmem:[%s12558_s0 + $0x5b8] sm:$0xff] }
  0x67   :  { %8330 = vmatpush.xpose.msk.msrb.mxu1 %vm258_vm0, %v104_v38  ;;  %v152_v38 = vld [vmem:[%s12558_s0 + $0x430] sm:$0xff] }
  0x68   :  { %8347 = vmatpush.xpose.msk.msrb.mxu2 %vm258_vm0, %v120_v39  ;;  %v168_v39 = vld [vmem:[%s12558_s0 + $0x4b0] sm:$0xff] }
  0x69   :  { %8364 = vmatpush.xpose.msk.msrb.mxu3 %vm258_vm0, %v136_v40  ;;  %v184_v40 = vld [vmem:[%s12558_s0 + $0x530] sm:$0xff] }
  0x6a   :  { %8314 = vmatpush.xpose.msk.msrb.mxu0 %vm258_vm0, %v87_v41  ;;  %v200_v41 = vld [vmem:[%s12558_s0 + $0x5b0] sm:$0xff] }
  0x6b   :  { %8331 = vmatpush.xpose.msk.msrb.mxu1 %vm258_vm0, %v103_v42  ;;  %v151_v42 = vld [vmem:[%s12558_s0 + $0x428] sm:$0xff] }
  0x6c   :  { %8348 = vmatpush.xpose.msk.msrb.mxu2 %vm258_vm0, %v119_v43  ;;  %v167_v43 = vld [vmem:[%s12558_s0 + $0x4a8] sm:$0xff] }
  0x6d   :  { %8365 = vmatpush.xpose.msk.msrb.mxu3 %vm258_vm0, %v135_v44  ;;  %v183_v44 = vld [vmem:[%s12558_s0 + $0x528] sm:$0xff] }
  0x6e   :  { %8315 = vmatpush.xpose.msk.msrb.mxu0 %vm258_vm0, %v86_v45  ;;  %v199_v45 = vld [vmem:[%s12558_s0 + $0x5a8] sm:$0xff] }
  0x6f   :  { %8332 = vmatpush.xpose.msk.msrb.mxu1 %vm258_vm0, %v102_v46  ;;  %v150_v46 = vld [vmem:[%s12558_s0 + $0x420] sm:$0xff] }
  0x70   :  { %8349 = vmatpush.xpose.msk.msrb.mxu2 %vm258_vm0, %v118_v47  ;;  %v166_v47 = vld [vmem:[%s12558_s0 + $0x4a0] sm:$0xff] }
  0x71   :  { %8366 = vmatpush.xpose.msk.msrb.mxu3 %vm258_vm0, %v134_v48  ;;  %v182_v48 = vld [vmem:[%s12558_s0 + $0x520] sm:$0xff] }
  0x72   :  { %8316 = vmatpush.xpose.msk.msrb.mxu0 %vm258_vm0, %v85_v49  ;;  %v198_v49 = vld [vmem:[%s12558_s0 + $0x5a0] sm:$0xff] }
  0x73   :  { %8333 = vmatpush.xpose.msk.msrb.mxu1 %vm258_vm0, %v101_v50  ;;  %v149_v50 = vld [vmem:[%s12558_s0 + $0x418] sm:$0xff] }
  0x74   :  { %8350 = vmatpush.xpose.msk.msrb.mxu2 %vm258_vm0, %v117_v51  ;;  %v165_v51 = vld [vmem:[%s12558_s0 + $0x498] sm:$0xff] }
  0x75   :  { %8367 = vmatpush.xpose.msk.msrb.mxu3 %vm258_vm0, %v133_v52  ;;  %v181_v52 = vld [vmem:[%s12558_s0 + $0x518] sm:$0xff] }
  0x76   :  { %8317 = vmatpush.xpose.msk.msrb.mxu0 %vm258_vm0, %v84_v53  ;;  %v197_v53 = vld [vmem:[%s12558_s0 + $0x598] sm:$0xff] }
  0x77   :  { %8334 = vmatpush.xpose.msk.msrb.mxu1 %vm258_vm0, %v100_v54  ;;  %v1306_v54 = vld [vmem:[%s12559_s1 + $0xc0] sm:$0xff] }
  0x78   :  { %8351 = vmatpush.xpose.msk.msrb.mxu2 %vm258_vm0, %v116_v55  ;;  %v148_v55 = vld [vmem:[%s12558_s0 + $0x410] sm:$0xff] }
  0x79   :  { %8368 = vmatpush.xpose.msk.msrb.mxu3 %vm258_vm0, %v132_v56  ;;  %v164_v56 = vld [vmem:[%s12558_s0 + $0x490] sm:$0xff] }
  0x7a   :  { %8318 = vmatpush.xpose.msk.msrb.mxu0 %vm258_vm0, %v83_v57  ;;  %v180_v57 = vld [vmem:[%s12558_s0 + $0x510] sm:$0xff] }
  0x7b   :  { %8335 = vmatpush.xpose.msk.msrb.mxu1 %vm258_vm0, %v99_v58  ;;  %v196_v58 = vld [vmem:[%s12558_s0 + $0x590] sm:$0xff] }
  0x7c   :  { %8352 = vmatpush.xpose.msk.msrb.mxu2 %vm258_vm0, %v115_v59  ;;  %v1874_v59 = vunpack.c.2.s8 %v1306_v54 }
  0x7d   :  { %8369 = vmatpush.xpose.msk.msrb.mxu3 %vm258_vm0, %v131_v60  ;;  %v1882_v60 = vunpack.c.3.s8 %v1306_v54 }
  0x7e   :  { %8319 = vmatpush.xpose.msk.msrb.mxu0 %vm258_vm0, %v82_v61  ;;  %v147_v61 = vld [vmem:[%s12558_s0 + $0x408] sm:$0xff] }
  0x7f   :  { %8336 = vmatpush.xpose.msk.msrb.mxu1 %vm258_vm0, %v98_v62  ;;  %v163_v62 = vld [vmem:[%s12558_s0 + $0x488] sm:$0xff] }
  0x80   :  { %8353 = vmatpush.xpose.msk.msrb.mxu2 %vm258_vm0, %v114_v63  ;;  %v179_v63 = vld [vmem:[%s12558_s0 + $0x508] sm:$0xff] }
  0x81   :  { %8370 = vmatpush.xpose.msk.msrb.mxu3 %vm258_vm0, %v130_v0  ;;  %8320 = vmatmul.msk.f32.vlgmr.msrb.gmra.mxu0 %vm258_vm0, %v12563_v12  ;;  %v195_v0 = vld [vmem:[%s12558_s0 + $0x588] sm:$0xff] }
  0x82   :  { %8372 = vmatpush.xpose.msk.msra.mxu0 %vm258_vm0, %v161_v1  ;;  %8337 = vmatmul.msk.f32.vlgmr.msrb.gmra.mxu1 %vm258_vm0, %v12563_v12  ;;  %v3794_v1 = vcvt.s32.f32 %v1874_v59 }
  0x83   :  { %8389 = vmatpush.xpose.msk.msra.mxu1 %vm258_vm0, %v177_v2  ;;  %8354 = vmatmul.msk.f32.vlgmr.msrb.gmra.mxu2 %vm258_vm0, %v12563_v12  ;;  %v3802_v2 = vcvt.s32.f32 %v1882_v60 }
  0x84   :  { %8406 = vmatpush.xpose.msk.msra.mxu2 %vm258_vm0, %v193_v3  ;;  %8371 = vmatmul.msk.f32.vlgmr.msrb.gmra.mxu3 %vm258_vm0, %v12563_v12  ;;  %v1858_v3 = vunpack.c.0.s8 %v1306_v54 }
  0x85   :  { %8423 = vmatpush.xpose.msk.msra.mxu3 %vm258_vm0, %v209_v4  ;;  %v1866_v4 = vunpack.c.1.s8 %v1306_v54 }
  0x86   :  { %8373 = vmatpush.xpose.msk.msra.mxu0 %vm258_vm0, %v160_v5  ;;  %v1298_v5 = vld [vmem:[%s12559_s1 + $0x80] sm:$0xff] }
  0x87   :  { %8390 = vmatpush.xpose.msk.msra.mxu1 %vm258_vm0, %v176_v6  ;;  %v146_v6 = vld [vmem:[%s12558_s0 + $0x400] sm:$0xff] }
  0x88   :  { %8407 = vmatpush.xpose.msk.msra.mxu2 %vm258_vm0, %v192_v7  ;;  %v162_v7 = vld [vmem:[%s12558_s0 + $0x480] sm:$0xff] }
  0x89   :  { %8424 = vmatpush.xpose.msk.msra.mxu3 %vm258_vm0, %v208_v8  ;;  %v178_v8 = vld [vmem:[%s12558_s0 + $0x500] sm:$0xff] }
  0x8a   :  { %8374 = vmatpush.xpose.msk.msra.mxu0 %vm258_vm0, %v159_v9  ;;  %v194_v9 = vld [vmem:[%s12558_s0 + $0x580] sm:$0xff] }
  0x8b   :  { %8391 = vmatpush.xpose.msk.msra.mxu1 %vm258_vm0, %v175_v10  ;;  %v1842_v10 = vunpack.c.2.s8 %v1298_v5 }
  0x8c   :  { %8408 = vmatpush.xpose.msk.msra.mxu2 %vm258_vm0, %v191_v11  ;;  %v1850_v11 = vunpack.c.3.s8 %v1298_v5 }
  0x8d   :  { %8425 = vmatpush.xpose.msk.msra.mxu3 %vm258_vm0, %v207_v13  ;;  %v225_v13 = vld [vmem:[%s12558_s0 + $0x678] sm:$0xff] }
  0x8e   :  { %8375 = vmatpush.xpose.msk.msra.mxu0 %vm258_vm0, %v158_v14  ;;  %v241_v14 = vld [vmem:[%s12558_s0 + $0x6f8] sm:$0xff] }
  0x8f   :  { %8392 = vmatpush.xpose.msk.msra.mxu1 %vm258_vm0, %v174_v15  ;;  %v5658_v15 = vpack.c.bf16 %v3802_v2, %v3794_v1 }
  0x90   :  { %8409 = vmatpush.xpose.msk.msra.mxu2 %vm258_vm0, %v190_v16  ;;  %v3778_v16 = vcvt.s32.f32 %v1858_v3 }
  0x91   :  { %8426 = vmatpush.xpose.msk.msra.mxu3 %vm258_vm0, %v206_v17  ;;  %v3786_v17 = vcvt.s32.f32 %v1866_v4 }
  0x92   :  { %8376 = vmatpush.xpose.msk.msra.mxu0 %vm258_vm0, %v157_v18  ;;  %v257_v18 = vld [vmem:[%s12558_s0 + $0x778] sm:$0xff] }
  0x93   :  { %8393 = vmatpush.xpose.msk.msra.mxu1 %vm258_vm0, %v173_v19  ;;  %v3762_v19 = vcvt.s32.f32 %v1842_v10 }
  0x94   :  { %8410 = vmatpush.xpose.msk.msra.mxu2 %vm258_vm0, %v189_v20  ;;  %v3770_v20 = vcvt.s32.f32 %v1850_v11  ;;  %v1314_v11 = vld [vmem:[%s12559_s1 + $0x100] sm:$0xff] }
  0x95   :  { %8427 = vmatpush.xpose.msk.msra.mxu3 %vm258_vm0, %v205_v21  ;;  %v1826_v21 = vunpack.c.0.s8 %v1298_v5 }
  0x96   :  { %8377 = vmatpush.xpose.msk.msra.mxu0 %vm258_vm0, %v156_v22  ;;  %v1834_v22 = vunpack.c.1.s8 %v1298_v5 }
  0x97   :  { %8394 = vmatpush.xpose.msk.msra.mxu1 %vm258_vm0, %v172_v23  ;;  %v224_v23 = vld [vmem:[%s12558_s0 + $0x670] sm:$0xff] }
  0x98   :  { %8411 = vmatpush.xpose.msk.msra.mxu2 %vm258_vm0, %v188_v24  ;;  %v240_v24 = vld [vmem:[%s12558_s0 + $0x6f0] sm:$0xff] }
  0x99   :  { %8428 = vmatpush.xpose.msk.msra.mxu3 %vm258_vm0, %v204_v25  ;;  %v5650_v25 = vpack.c.bf16 %v3786_v17, %v3778_v16 }
  0x9a   :  { %8378 = vmatpush.xpose.msk.msra.mxu0 %vm258_vm0, %v155_v26  ;;  %v256_v26 = vld [vmem:[%s12558_s0 + $0x770] sm:$0xff] }
  0x9b   :  { %8395 = vmatpush.xpose.msk.msra.mxu1 %vm258_vm0, %v171_v27  ;;  %v1290_v27 = vld [vmem:[%s12559_s1 + $0x40] sm:$0xff] }
  0x9c   :  { %8412 = vmatpush.xpose.msk.msra.mxu2 %vm258_vm0, %v187_v28  ;;  %v5642_v28 = vpack.c.bf16 %v3770_v20, %v3762_v19  ;;  %v252_v19 = vld [vmem:[%s12558_s0 + $0x750] sm:$0xff] }
  0x9d   :  { %8429 = vmatpush.xpose.msk.msra.mxu3 %vm258_vm0, %v203_v29  ;;  %v3746_v29 = vcvt.s32.f32 %v1826_v21 }
  0x9e   :  { %8379 = vmatpush.xpose.msk.msra.mxu0 %vm258_vm0, %v154_v30  ;;  %v3754_v30 = vcvt.s32.f32 %v1834_v22  ;;  %v1906_v22 = vunpack.c.2.s8 %v1314_v11 }
  0x9f   :  { %8396 = vmatpush.xpose.msk.msra.mxu1 %vm258_vm0, %v170_v31  ;;  %v223_v31 = vld [vmem:[%s12558_s0 + $0x668] sm:$0xff] }
  0xa0   :  { %8413 = vmatpush.xpose.msk.msra.mxu2 %vm258_vm0, %v186_v32  ;;  %v239_v32 = vld [vmem:[%s12558_s0 + $0x6e8] sm:$0xff] }
  0xa1   :  { %8430 = vmatpush.xpose.msk.msra.mxu3 %vm258_vm0, %v202_v33  ;;  %v1810_v33 = vunpack.c.2.s8 %v1290_v27 }
  0xa2   :  { %8380 = vmatpush.xpose.msk.msra.mxu0 %vm258_vm0, %v153_v34  ;;  %v1818_v34 = vunpack.c.3.s8 %v1290_v27 }
  0xa3   :  { %8397 = vmatpush.xpose.msk.msra.mxu1 %vm258_vm0, %v169_v35  ;;  %v1794_v35 = vunpack.c.0.s8 %v1290_v27 }
  0xa4   :  { %8414 = vmatpush.xpose.msk.msra.mxu2 %vm258_vm0, %v185_v36  ;;  %v1802_v36 = vunpack.c.1.s8 %v1290_v27 }
  0xa5   :  { %8431 = vmatpush.xpose.msk.msra.mxu3 %vm258_vm0, %v201_v37  ;;  %v255_v37 = vld [vmem:[%s12558_s0 + $0x768] sm:$0xff] }
  0xa6   :  { %8381 = vmatpush.xpose.msk.msra.mxu0 %vm258_vm0, %v152_v38  ;;  %v1282_v38 = vld [vmem:[%s12559_s1] sm:$0xff] }
  0xa7   :  { %8398 = vmatpush.xpose.msk.msra.mxu1 %vm258_vm0, %v168_v39  ;;  %v5634_v39 = vpack.c.bf16 %v3754_v30, %v3746_v29 }
  0xa8   :  { %8415 = vmatpush.xpose.msk.msra.mxu2 %vm258_vm0, %v184_v40  ;;  %v222_v40 = vld [vmem:[%s12558_s0 + $0x660] sm:$0xff] }
  0xa9   :  { %8432 = vmatpush.xpose.msk.msra.mxu3 %vm258_vm0, %v200_v41  ;;  %v238_v41 = vld [vmem:[%s12558_s0 + $0x6e0] sm:$0xff] }
  0xaa   :  { %8382 = vmatpush.xpose.msk.msra.mxu0 %vm258_vm0, %v151_v42  ;;  %v3730_v42 = vcvt.s32.f32 %v1810_v33  ;;  %v235_v33 = vld [vmem:[%s12558_s0 + $0x6c8] sm:$0xff] }
  0xab   :  { %8399 = vmatpush.xpose.msk.msra.mxu1 %vm258_vm0, %v167_v43  ;;  %v3738_v43 = vcvt.s32.f32 %v1818_v34 }
  0xac   :  { %8416 = vmatpush.xpose.msk.msra.mxu2 %vm258_vm0, %v183_v44  ;;  %v3714_v44 = vcvt.s32.f32 %v1794_v35 }
  0xad   :  { %8433 = vmatpush.xpose.msk.msra.mxu3 %vm258_vm0, %v199_v45  ;;  %v3722_v45 = vcvt.s32.f32 %v1802_v36  ;;  %v1890_v36 = vunpack.c.0.s8 %v1314_v11 }
  0xae   :  { %8383 = vmatpush.xpose.msk.msra.mxu0 %vm258_vm0, %v150_v46  ;;  %v1338_v46 = vld [vmem:[%s12559_s1 + $0x1c0] sm:$0xff] }
  0xaf   :  { %8400 = vmatpush.xpose.msk.msra.mxu1 %vm258_vm0, %v166_v47  ;;  %v254_v47 = vld [vmem:[%s12558_s0 + $0x760] sm:$0xff]  ;;  %v2010_v54 = vunpack.c.3.s8 %v1338_v46  ;;  %v1986_v59 = vunpack.c.0.s8 %v1338_v46  ;;  %v1994_v60 = vunpack.c.1.s8 %v1338_v46 }
  0xb0   :  { %8417 = vmatpush.xpose.msk.msra.mxu2 %vm258_vm0, %v182_v48  ;;  %v1778_v48 = vunpack.c.2.s8 %v1282_v38 }
  0xb1   :  { %8434 = vmatpush.xpose.msk.msra.mxu3 %vm258_vm0, %v198_v49  ;;  %v1786_v49 = vunpack.c.3.s8 %v1282_v38  ;;  %v9446_v16 = vcvt.s32.f32 %v1994_v60 }
  0xb2   :  { %8384 = vmatpush.xpose.msk.msra.mxu0 %vm258_vm0, %v149_v50  ;;  %v1762_v50 = vunpack.c.0.s8 %v1282_v38 }
  0xb3   :  { %8401 = vmatpush.xpose.msk.msra.mxu1 %vm258_vm0, %v165_v51  ;;  %v1770_v51 = vunpack.c.1.s8 %v1282_v38  ;;  %v251_v38 = vld [vmem:[%s12558_s0 + $0x748] sm:$0xff] }
  0xb4   :  { %8418 = vmatpush.xpose.msk.msra.mxu2 %vm258_vm0, %v181_v52  ;;  %v1330_v52 = vld [vmem:[%s12559_s1 + $0x180] sm:$0xff]  ;;  %v9424_v3 = vcvt.s32.f32 %v1762_v50 }
  0xb5   :  { %8435 = vmatpush.xpose.msk.msra.mxu3 %vm258_vm0, %v197_v53  ;;  %v2002_v53 = vunpack.c.2.s8 %v1338_v46  ;;  %v1970_v1 = vunpack.c.2.s8 %v1330_v52  ;;  %v1978_v2 = vunpack.c.3.s8 %v1330_v52  ;;  %v9426_v4 = vcvt.s32.f32 %v1770_v51 }
  0xb6   :  { %8385 = vmatpush.xpose.msk.msra.mxu0 %vm258_vm0, %v148_v55  ;;  %v221_v55 = vld [vmem:[%s12558_s0 + $0x658] sm:$0xff]  ;;  %v1954_v5 = vunpack.c.0.s8 %v1330_v52 }
  0xb7   :  { %8402 = vmatpush.xpose.msk.msra.mxu1 %vm258_vm0, %v164_v56  ;;  %v237_v56 = vld [vmem:[%s12558_s0 + $0x6d8] sm:$0xff]  ;;  %v9451_v20 = vcvt.s32.f32 %v1970_v1  ;;  %v9453_v21 = vcvt.s32.f32 %v1978_v2  ;;  %v5602_v27 = vpack.c.bf16 %v9426_v4, %v9424_v3  ;;  %v1466_v2 = vld [vmem:[%s12559_s1 + $0x5c0] sm:$0xff] }
  0xb8   :  { %8419 = vmatpush.xpose.msk.msra.mxu2 %vm258_vm0, %v180_v57  ;;  %v5626_v57 = vpack.c.bf16 %v3738_v43, %v3730_v42 }
  0xb9   :  { %8436 = vmatpush.xpose.msk.msra.mxu3 %vm258_vm0, %v196_v58  ;;  %v5618_v58 = vpack.c.bf16 %v3722_v45, %v3714_v44  ;;  %v9497_v45 = vcvt.s32.f32 %v1890_v36 }
  0xba   :  { %8386 = vmatpush.xpose.msk.msra.mxu0 %vm258_vm0, %v147_v61  ;;  %v1322_v61 = vld [vmem:[%s12559_s1 + $0x140] sm:$0xff] }
  0xbb   :  { %8403 = vmatpush.xpose.msk.msra.mxu1 %vm258_vm0, %v163_v62  ;;  %v253_v62 = vld [vmem:[%s12558_s0 + $0x758] sm:$0xff]  ;;  %v1946_v10 = vunpack.c.3.s8 %v1322_v61  ;;  %v1922_v17 = vunpack.c.0.s8 %v1322_v61 }
  0xbc   :  { %8420 = vmatpush.xpose.msk.msra.mxu2 %vm258_vm0, %v179_v63  ;;  %v9420_v63 = vcvt.s32.f32 %v1778_v48  ;;  %v1402_v48 = vld [vmem:[%s12559_s1 + $0x3c0] sm:$0xff] }
  0xbd   :  { %8437 = vmatpush.xpose.msk.msra.mxu3 %vm258_vm0, %v195_v0  ;;  %v9422_v0 = vcvt.s32.f32 %v1786_v49  ;;  %v9478_v34 = vcvt.s32.f32 %v1922_v17  ;;  %v9510_v49 = vld [vmem:[%s12559_s1 + $0x4c0] sm:$0xff] }
  0xbe   :  { %8387 = vmatpush.xpose.msk.msra.mxu0 %vm258_vm0, %v146_v6  ;;  %v1962_v6 = vunpack.c.1.s8 %v1330_v52  ;;  %v999_v29 = vpop.f32.mrf.mxu0  ;;  %v2258_v52 = vunpack.c.2.s8 %v1402_v48  ;;  %v2394_v60 = vunpack.c.3.s8 %v9510_v49  ;;  %v2378_v36 = vunpack.c.1.s8 %v9510_v49 }
  0xbf   :  { %8404 = vmatpush.xpose.msk.msra.mxu1 %vm258_vm0, %v162_v7  ;;  %v9430_v7 = vcvt.s32.f32 %v2002_v53  ;;  %v9493_v43 = vpack.c.bf16 %v999_v29, %v999_v29  ;;  %v2266_v53 = vunpack.c.3.s8 %v1402_v48  ;;  %v2250_v29 = vunpack.c.1.s8 %v1402_v48 }
  0xc0   :  { %8421 = vmatpush.xpose.msk.msra.mxu2 %vm258_vm0, %v178_v8  ;;  %v9432_v8 = vcvt.s32.f32 %v2010_v54  ;;  %v218_v54 = vld [vmem:[%s12558_s0 + $0x640] sm:$0xff]  ;;  %v9536_v1 = vcvt.s32.f32 %v2258_v52  ;;  %v232_v52 = vld [vmem:[%s12558_s0 + $0x6b0] sm:$0xff] }
  0xc1   :  { %8438 = vmatpush.xpose.msk.msra.mxu3 %vm258_vm0, %v194_v9  ;;  %8388 = vmatmul.msk.f32.vlgmr.msra.gmra.mxu0 %vm258_vm0, %v12563_v12  ;;  %v1938_v9 = vunpack.c.2.s8 %v1322_v61  ;;  %12580 = vst [vmem:[#allocation5_spill] sm:$0xff] %v9493_v43  ;;  %v9541_v3 = vcvt.s32.f32 %v2266_v53 }
  0xc2   :  { %8440 = vmatpush.xpose.msk.msrb.mxu0 %vm258_vm0, %v225_v13  ;;  %8405 = vmatmul.msk.f32.vlgmr.msra.gmra.mxu1 %vm258_vm0, %v12563_v12  ;;  %v220_v13 = vld [vmem:[%s12558_s0 + $0x650] sm:$0xff] }
  0xc3   :  { %8457 = vmatpush.xpose.msk.msrb.mxu1 %vm258_vm0, %v241_v14  ;;  %8422 = vmatmul.msk.f32.vlgmr.msra.gmra.mxu2 %vm258_vm0, %v12563_v12  ;;  %v236_v14 = vld [vmem:[%s12558_s0 + $0x6d0] sm:$0xff]  ;;  %v9467_v30 = vcvt.s32.f32 %v1938_v9 }
  0xc4   :  { %8474 = vmatpush.xpose.msk.msrb.mxu2 %vm258_vm0, %v257_v18  ;;  %8439 = vmatmul.msk.f32.vlgmr.msra.gmra.mxu3 %vm258_vm0, %v12563_v12  ;;  %v1930_v18 = vunpack.c.1.s8 %v1322_v61  ;;  %v250_v61 = vld [vmem:[%s12558_s0 + $0x740] sm:$0xff] }
  0xc5   :  { %6577 = vmatpush.bf16.msrb.mxu3 %v5658_v15  ;;  %v9444_v15 = vcvt.s32.f32 %v1986_v59  ;;  %v2386_v59 = vunpack.c.2.s8 %v9510_v49 }
  0xc6   :  { %8441 = vmatpush.xpose.msk.msrb.mxu0 %vm258_vm0, %v224_v23  ;;  %v1914_v23 = vunpack.c.3.s8 %v1314_v11  ;;  %v9480_v35 = vcvt.s32.f32 %v1930_v18 }
  0xc7   :  { %8458 = vmatpush.xpose.msk.msrb.mxu1 %vm258_vm0, %v240_v24  ;;  %v5610_v24 = vpack.c.bf16 %v9422_v0, %v9420_v63  ;;  %v9543_v4 = vcvt.s32.f32 %v2386_v59  ;;  %v1426_v59 = vld [vmem:[%s12559_s1 + $0x480] sm:$0xff] }
  0xc8   :  { %8475 = vmatpush.xpose.msk.msrb.mxu2 %vm258_vm0, %v256_v26  ;;  %v9459_v26 = vcvt.s32.f32 %v1962_v6  ;;  %v9491_v42 = vcvt.s32.f32 %v1914_v23  ;;  %v2514_v6 = vunpack.c.2.s8 %v1466_v2 }
  0xc9   :  { %6578 = vmatpush.bf16.msrb.mxu3 %v5650_v25  ;;  %v9457_v25 = vcvt.s32.f32 %v1954_v5  ;;  %v9545_v5 = vcvt.s32.f32 %v2394_v60  ;;  %v248_v60 = vld [vmem:[%s12558_s0 + $0x730] sm:$0xff] }
  0xca   :  { %8442 = vmatpush.xpose.msk.msrb.mxu0 %vm258_vm0, %v223_v31  ;;  %v9469_v31 = vcvt.s32.f32 %v1946_v10  ;;  %v2522_v10 = vunpack.c.3.s8 %v1466_v2  ;;  %v9566_v18 = vcvt.s32.f32 %v2514_v6 }
  0xcb   :  { %8459 = vmatpush.xpose.msk.msrb.mxu1 %vm258_vm0, %v239_v32  ;;  %v219_v32 = vld [vmem:[%s12558_s0 + $0x648] sm:$0xff]  ;;  %v5698_v44 = vpack.c.bf16 %v9459_v26, %v9457_v25 }
  0xcc   :  { %8476 = vmatpush.xpose.msk.msrb.mxu2 %vm258_vm0, %v255_v37  ;;  %v1898_v37 = vunpack.c.1.s8 %v1314_v11  ;;  %v217_v11 = vld [vmem:[%s12558_s0 + $0x638] sm:$0xff]  ;;  %v9571_v23 = vcvt.s32.f32 %v2522_v10 }
  0xcd   :  { %6579 = vmatpush.bf16.msrb.mxu3 %v5642_v28  ;;  %v5722_v28 = vpack.c.bf16 %v9432_v8, %v9430_v7  ;;  %v1039_v8 = vpop.f32.mrf.mxu2 }
  0xce   :  { %8443 = vmatpush.xpose.msk.msrb.mxu0 %vm258_vm0, %v222_v40  ;;  %v5706_v40 = vpack.c.bf16 %v9453_v21, %v9451_v20  ;;  %v9499_v46 = vcvt.s32.f32 %v1898_v37  ;;  %v2498_v37 = vunpack.c.0.s8 %v1466_v2 }
  0xcf   :  { %8460 = vmatpush.xpose.msk.msrb.mxu1 %vm258_vm0, %v238_v41  ;;  %v9489_v41 = vcvt.s32.f32 %v1906_v22  ;;  %v249_v22 = vld [vmem:[%s12558_s0 + $0x738] sm:$0xff] }
  0xd0   :  { %8477 = vmatpush.xpose.msk.msrb.mxu2 %vm258_vm0, %v254_v47  ;;  %v1370_v47 = vld [vmem:[%s12559_s1 + $0x2c0] sm:$0xff] }
  0xd1   :  { %6580 = vmatpush.bf16.msrb.mxu3 %v5634_v39  ;;  %v5714_v39 = vpack.c.bf16 %v9446_v16, %v9444_v15  ;;  %v2130_v50 = vunpack.c.2.s8 %v1370_v47  ;;  %v2138_v51 = vunpack.c.3.s8 %v1370_v47 }
  0xd2   :  { %8444 = vmatpush.xpose.msk.msrb.mxu0 %vm258_vm0, %v221_v55  ;;  %v234_v55 = vld [vmem:[%s12558_s0 + $0x6c0] sm:$0xff] }
  0xd3   :  { %8461 = vmatpush.xpose.msk.msrb.mxu1 %vm258_vm0, %v237_v56  ;;  %v5690_v56 = vpack.c.bf16 %v9469_v31, %v9467_v30  ;;  %v9532_v63 = vcvt.s32.f32 %v2130_v50  ;;  %v9534_v0 = vcvt.s32.f32 %v2138_v51  ;;  %v216_v51 = vld [vmem:[%s12558_s0 + $0x630] sm:$0xff] }
  0xd4   :  { %8478 = vmatpush.xpose.msk.msrb.mxu2 %vm258_vm0, %v253_v62 }
  0xd5   :  { %6581 = vmatpush.bf16.msrb.mxu3 %v5626_v57  ;;  %v5682_v57 = vpack.c.bf16 %v9480_v35, %v9478_v34  ;;  %v9794_v34 = vld [vmem:[%s12559_s1 + $0x200] sm:$0xff] }
  0xd6   :  { %8445 = vmatpush.xpose.msk.msrb.mxu0 %vm258_vm0, %v220_v13  ;;  %v233_v13 = vld [vmem:[%s12558_s0 + $0x6b8] sm:$0xff] }
  0xd7   :  { %8462 = vmatpush.xpose.msk.msrb.mxu1 %vm258_vm0, %v236_v14 }
  0xd8   :  { %8479 = vmatpush.xpose.msk.msrb.mxu2 %vm258_vm0, %v252_v19  ;;  %v2114_v19 = vunpack.c.0.s8 %v1370_v47 }
  0xd9   :  { %6582 = vmatpush.bf16.msrb.mxu3 %v5618_v58  ;;  %v1019_v58 = vpop.f32.mrf.mxu1 }
  0xda   :  { %8446 = vmatpush.xpose.msk.msrb.mxu0 %vm258_vm0, %v219_v32  ;;  %v9549_v7 = vpack.c.bf16 %v1019_v58, %v1019_v58  ;;  %v9573_v32 = vcvt.s32.f32 %v2114_v19  ;;  %v9605_v58 = vcvt.s32.f32 %v2498_v37 }
  0xdb   :  { %8463 = vmatpush.xpose.msk.msrb.mxu1 %vm258_vm0, %v235_v33  ;;  %v2370_v33 = vunpack.c.0.s8 %v9510_v49  ;;  %v1394_v49 = vld [vmem:[%s12559_s1 + $0x380] sm:$0xff] }
  0xdc   :  { %8480 = vmatpush.xpose.msk.msrb.mxu2 %vm258_vm0, %v251_v38  ;;  %12581 = vst [vmem:[#allocation6_spill] sm:$0xff] %v9549_v7 }
  0xdd   :  { %6583 = vmatpush.bf16.msrb.mxu3 %v5610_v24  ;;  %v2122_v24 = vunpack.c.1.s8 %v1370_v47  ;;  %v9585_v47 = vcvt.s32.f32 %v2250_v29  ;;  %v9601_v53 = vcvt.s32.f32 %v2370_v33  ;;  %v215_v29 = vld [vmem:[%s12558_s0 + $0x628] sm:$0xff] }
  0xde   :  { %8447 = vmatpush.xpose.msk.msrb.mxu0 %vm258_vm0, %v218_v54  ;;  %v9603_v54 = vcvt.s32.f32 %v2378_v36  ;;  %v231_v33 = vld [vmem:[%s12558_s0 + $0x6a8] sm:$0xff] }
  0xdf   :  { %8464 = vmatpush.xpose.msk.msrb.mxu1 %vm258_vm0, %v234_v55  ;;  %v9581_v38 = vcvt.s32.f32 %v2122_v24  ;;  %v2506_v55 = vunpack.c.1.s8 %v1466_v2  ;;  %v2354_v24 = vunpack.c.2.s8 %v1426_v59  ;;  %v1386_v2 = vld [vmem:[%s12559_s1 + $0x340] sm:$0xff] }
  0xe0   :  { %8481 = vmatpush.xpose.msk.msrb.mxu2 %vm258_vm0, %v250_v61  ;;  %v2194_v25 = vunpack.c.2.s8 %v1386_v2  ;;  %v2202_v36 = vunpack.c.3.s8 %v1386_v2 }
  0xe1   :  { %6584 = vmatpush.bf16.msrb.mxu3 %v5602_v27  ;;  %v2242_v27 = vunpack.c.0.s8 %v1402_v48  ;;  %v1362_v48 = vld [vmem:[%s12559_s1 + $0x280] sm:$0xff]  ;;  %v9627_v16 = vcvt.s32.f32 %v2506_v55  ;;  %v247_v55 = vld [vmem:[%s12558_s0 + $0x728] sm:$0xff] }
  0xe2   :  { %8448 = vmatpush.xpose.msk.msrb.mxu0 %vm258_vm0, %v217_v11  ;;  %v2098_v6 = vunpack.c.2.s8 %v1362_v48  ;;  %v2106_v10 = vunpack.c.3.s8 %v1362_v48  ;;  %v9623_v11 = vld [vmem:[%s12559_s1 + $0x580] sm:$0xff]  ;;  %v2082_v20 = vunpack.c.0.s8 %v1362_v48  ;;  %v2090_v21 = vunpack.c.1.s8 %v1362_v48 }
  0xe3   :  { %8465 = vmatpush.xpose.msk.msrb.mxu1 %vm258_vm0, %v233_v13  ;;  %v9583_v50 = vcvt.s32.f32 %v2242_v27  ;;  %v2234_v13 = vunpack.c.3.s8 %v1394_v49  ;;  %v2362_v27 = vunpack.c.3.s8 %v1426_v59  ;;  %v230_v48 = vld [vmem:[%s12558_s0 + $0x6a0] sm:$0xff]  ;;  %v2474_v61 = vunpack.c.1.s8 %v9623_v11 }
  0xe4   :  { %8482 = vmatpush.xpose.msk.msrb.mxu2 %vm258_vm0, %v249_v22  ;;  %6585 = vmatmul.bf16.vlgmr.msrb.gmra.mxu3 %v9493_v43  ;;  %v9631_v19 = vcvt.s32.f32 %v2098_v6  ;;  %v9633_v22 = vcvt.s32.f32 %v2106_v10  ;;  %v9657_v6 = vcvt.s32.f32 %v2354_v24 }
  0xe5   :  { %6590 = vmatpush.bf16.msra.mxu3 %v5722_v28  ;;  %v9659_v10 = vcvt.s32.f32 %v2362_v27  ;;  %v2210_v27 = vunpack.c.0.s8 %v1394_v49  ;;  %v9752_v28 = vcvt.s32.f32 %v2202_v36  ;;  %v212_v36 = vld [vmem:[%s12558_s0 + $0x610] sm:$0xff] }
  0xe6   :  { %8449 = vmatpush.xpose.msk.msrb.mxu0 %vm258_vm0, %v216_v51  ;;  %v9646_v51 = vcvt.s32.f32 %v2234_v13  ;;  %v2338_v13 = vunpack.c.0.s8 %v1426_v59 }
  0xe7   :  { %8466 = vmatpush.xpose.msk.msrb.mxu1 %vm258_vm0, %v232_v52  ;;  %v2482_v52 = vunpack.c.2.s8 %v9623_v11 }
  0xe8   :  { %8483 = vmatpush.xpose.msk.msrb.mxu2 %vm258_vm0, %v248_v60  ;;  %v2218_v60 = vunpack.c.1.s8 %v1394_v49  ;;  %v9706_v26 = vcvt.s32.f32 %v2338_v13 }
  0xe9   :  { %6591 = vmatpush.bf16.msra.mxu3 %v5714_v39  ;;  %v2226_v39 = vunpack.c.2.s8 %v1394_v49  ;;  %v9664_v15 = vcvt.s32.f32 %v2482_v52  ;;  %v214_v52 = vld [vmem:[%s12558_s0 + $0x620] sm:$0xff] }
  0xea   :  { %8450 = vmatpush.xpose.msk.msrb.mxu0 %vm258_vm0, %v215_v29  ;;  %v9679_v29 = vcvt.s32.f32 %v2082_v20  ;;  %v9686_v49 = vld [vmem:[%s12559_s1 + $0x240] sm:$0xff]  ;;  %v9696_v20 = vcvt.s32.f32 %v2210_v27  ;;  %v9736_v27 = vcvt.s32.f32 %v2474_v61  ;;  %v2186_v61 = vunpack.c.1.s8 %v1386_v2 }
  0xeb   :  { %v9644_v37 = vcvt.s32.f32 %v2226_v39  ;;  %v2490_v39 = vunpack.c.3.s8 %v9623_v11  ;;  %8467 = vmatpush.xpose.msk.msrb.mxu1 %vm258_vm0, %v231_v33  ;;  %v9681_v33 = vcvt.s32.f32 %v2090_v21  ;;  %v9698_v21 = vcvt.s32.f32 %v2218_v60  ;;  %v1418_v60 = vld [vmem:[%s12559_s1 + $0x440] sm:$0xff] }
  0xec   :  { %8484 = vmatpush.xpose.msk.msrb.mxu2 %vm258_vm0, %v247_v55  ;;  %v246_v55 = vld [vmem:[%s12558_s0 + $0x720] sm:$0xff]  ;;  %v2066_v13 = vunpack.c.2.s8 %v9686_v49  ;;  %v2322_v14 = vunpack.c.2.s8 %v1418_v60  ;;  %v2330_v9 = vunpack.c.3.s8 %v1418_v60  ;;  %v2058_v31 = vunpack.c.1.s8 %v9686_v49 }
  0xed   :  { %6592 = vmatpush.bf16.msra.mxu3 %v5706_v40  ;;  %v9670_v24 = vcvt.s32.f32 %v2490_v39  ;;  %v2346_v40 = vunpack.c.1.s8 %v1426_v59  ;;  %v2466_v59 = vunpack.c.0.s8 %v9623_v11  ;;  %v9725_v11 = vld [vmem:[%s12559_s1 + $0x540] sm:$0xff]  ;;  %v2306_v43 = vunpack.c.0.s8 %v1418_v60 }
  0xee   :  { %8451 = vmatpush.xpose.msk.msrb.mxu0 %vm258_vm0, %v214_v52  ;;  %v213_v52 = vld [vmem:[%s12558_s0 + $0x618] sm:$0xff]  ;;  %v9744_v12 = vcvt.s32.f32 %v2066_v13  ;;  %v2450_v30 = vunpack.c.2.s8 %v9725_v11  ;;  %v9761_v13 = vcvt.s32.f32 %v2330_v9  ;;  %v244_v9 = vld [vmem:[%s12558_s0 + $0x710] sm:$0xff]  ;;  %v9798_v35 = vcvt.s32.f32 %v2058_v31  ;;  %v227_v31 = vld [vmem:[%s12558_s0 + $0x688] sm:$0xff] }
  0xef   :  { %8468 = vmatpush.xpose.msk.msrb.mxu1 %vm258_vm0, %v230_v48  ;;  %v9718_v39 = vcvt.s32.f32 %v2466_v59  ;;  %v229_v48 = vld [vmem:[%s12558_s0 + $0x698] sm:$0xff]  ;;  %v9750_v59 = vcvt.s32.f32 %v2194_v25  ;;  %v228_v25 = vld [vmem:[%s12558_s0 + $0x690] sm:$0xff] }
  0xf0   :  { %8485 = vmatpush.xpose.msk.msrb.mxu2 %vm258_vm0, %v246_v55  ;;  %v245_v55 = vld [vmem:[%s12558_s0 + $0x718] sm:$0xff]  ;;  %12584 = vst [vmem:[#allocation9_spill] sm:$0xff] %v9761_v13 }
  0xf1   :  { %6593 = vmatpush.bf16.msra.mxu3 %v5698_v44  ;;  %v9708_v44 = vcvt.s32.f32 %v2346_v40  ;;  %v2074_v40 = vunpack.c.3.s8 %v9686_v49  ;;  %12582 = vst [vmem:[#allocation7_spill] sm:$0xff] %v9750_v59 }
  0xf2   :  { %8452 = vmatpush.xpose.msk.msrb.mxu0 %vm258_vm0, %v213_v52  ;;  %v2178_v52 = vunpack.c.0.s8 %v1386_v2  ;;  %12587 = vst [vmem:[#allocation12_spill] sm:$0xff] %v9798_v35  ;;  %v9802_v2 = vcvt.s32.f32 %v2186_v61  ;;  %v2034_v61 = vunpack.c.2.s8 %v9794_v34 }
  0xf3   :  { %v9746_v17 = vcvt.s32.f32 %v2074_v40  ;;  %8469 = vmatpush.xpose.msk.msrb.mxu1 %vm258_vm0, %v229_v48  ;;  %v9763_v40 = vpack.c.bf16 %v1039_v8, %v1039_v8  ;;  %v9775_v48 = vcvt.s32.f32 %v2450_v30  ;;  %v2050_v8 = vunpack.c.0.s8 %v9686_v49 }
  0xf4   :  { %8486 = vmatpush.xpose.msk.msrb.mxu2 %vm258_vm0, %v245_v55  ;;  %12589 = vst [vmem:[#allocation14_spill] sm:$0xff] %v9802_v2  ;;  %v2434_v49 = vunpack.c.0.s8 %v9725_v11  ;;  %v243_v55 = vld [vmem:[%s12558_s0 + $0x708] sm:$0xff] }
  0xf5   :  { %6594 = vmatpush.bf16.msra.mxu3 %v5690_v56  ;;  %v9759_v56 = vcvt.s32.f32 %v2322_v14  ;;  %12585 = vst [vmem:[#allocation10_spill] sm:$0xff] %v9763_v40  ;;  %v2458_v14 = vunpack.c.3.s8 %v9725_v11  ;;  %v9789_v30 = vcvt.s32.f32 %v2050_v8  ;;  %v2314_v40 = vunpack.c.1.s8 %v1418_v60  ;;  %v9808_v60 = vld [vmem:[%s12559_s1 + $0x300] sm:$0xff] }
  0xf6   :  { %8453 = vmatpush.xpose.msk.msrb.mxu0 %vm258_vm0, %v212_v36  ;;  %v211_v36 = vld [vmem:[%s12558_s0 + $0x608] sm:$0xff]  ;;  %v9827_v8 = vld [vmem:[%s12559_s1 + $0x400] sm:$0xff] }
  0xf7   :  { %12583 = vst [vmem:[#allocation8_spill] sm:$0xff] %v9759_v56  ;;  %v9787_v62 = vcvt.s32.f32 %v2458_v14  ;;  %8470 = vmatpush.xpose.msk.msrb.mxu1 %vm258_vm0, %v228_v25  ;;  %v9819_v25 = vcvt.s32.f32 %v2306_v43  ;;  %v2442_v14 = vunpack.c.1.s8 %v9725_v11  ;;  %v9839_v11 = vcvt.s32.f32 %v2434_v49  ;;  %v9845_v56 = vld [vmem:[%s12559_s1 + $0x500] sm:$0xff] }
  0xf8   :  { %12586 = vst [vmem:[#allocation11_spill] sm:$0xff] %v9789_v30  ;;  %8487 = vmatpush.xpose.msk.msrb.mxu2 %vm258_vm0, %v244_v9  ;;  %v12592_v9 = vpack.c.bf16 %v9491_v42, %v9489_v41  ;;  %v2162_v43 = vunpack.c.2.s8 %v9808_v60  ;;  %v9855_v49 = vcvt.s32.f32 %v2034_v61  ;;  %v2298_v2 = vunpack.c.3.s8 %v9827_v8  ;;  %v1059_v30 = vpop.f32.mrf.mxu3 }
  0xf9   :  { %6595 = vmatpush.bf16.msra.mxu3 %v5682_v57  ;;  %v9800_v57 = vcvt.s32.f32 %v2178_v52  ;;  %12590 = vst [vmem:[#allocation15_spill] sm:$0xff] %v9819_v25  ;;  %v9821_v52 = vcvt.s32.f32 %v2314_v40  ;;  %v9849_v42 = vcvt.s32.f32 %v2442_v14  ;;  %v2170_v40 = vunpack.c.3.s8 %v9808_v60  ;;  %v210_v14 = vld [vmem:[%s12558_s0 + $0x600] sm:$0xff] }
  0xfa   :  { %8454 = vmatpush.xpose.msk.msrb.mxu0 %vm258_vm0, %v211_v36  ;;  %v226_v36 = vld [vmem:[%s12558_s0 + $0x680] sm:$0xff]  ;;  %v9871_v41 = vcvt.s32.f32 %v2162_v43  ;;  %v2418_v25 = vunpack.c.2.s8 %v9845_v56  ;;  %v9884_v59 = vcvt.s32.f32 %v2298_v2  ;;  %v12594_v43 = vpack.c.bf16 %v9571_v23, %v9566_v18 }
  0xfb   :  { %12588 = vst [vmem:[#allocation13_spill] sm:$0xff] %v9800_v57  ;;  %8471 = vmatpush.xpose.msk.msrb.mxu1 %vm258_vm0, %v227_v31  ;;  %v2290_v57 = vunpack.c.2.s8 %v9827_v8  ;;  %v9880_v35 = vcvt.s32.f32 %v2170_v40  ;;  %v2018_v40 = vunpack.c.0.s8 %v9794_v34  ;;  %v1530_v23 = vld [vmem:[%s12559_s1 + $0x7c0] sm:$0xff]  ;;  %v12598_v31 = vmov 0.020408163  }
  0xfc   :  { %12591 = vst [vmem:[#allocation16_spill] sm:$0xff] %v9821_v52  ;;  %8488 = vmatpush.xpose.msk.msrb.mxu2 %vm258_vm0, %v243_v55  ;;  %v12593_v55 = vpack.c.bf16 %v9499_v46, %v9497_v45  ;;  %v242_v52 = vld [vmem:[%s12558_s0 + $0x700] sm:$0xff]  ;;  %v9892_v46 = vcvt.s32.f32 %v2418_v25  ;;  %v12597_v45 = vpack.c.bf16 %v9545_v5, %v9543_v4 }
  0xfd   :  { %6596 = vmatpush.bf16.msra.mxu3 %v12592_v9  ;;  %v2042_v9 = vunpack.c.3.s8 %v9794_v34  ;;  %v9882_v13 = vcvt.s32.f32 %v2290_v57  ;;  %v9900_v57 = vld [vmem:[%s12559_s1 + $0x6c0] sm:$0xff]  ;;  %v9913_v25 = vcvt.s32.f32 %v2018_v40 }
  0xfe   :  { %8455 = vmatpush.xpose.msk.msrb.mxu0 %vm258_vm0, %v210_v14  ;;  %v2146_v14 = vunpack.c.0.s8 %v9808_v60  ;;  %v2642_v18 = vunpack.c.2.s8 %v9900_v57 }
  0xff   :  { %v9869_v61 = vcvt.s32.f32 %v2042_v9  ;;  %v2426_v9 = vunpack.c.3.s8 %v9845_v56  ;;  %8472 = vmatpush.xpose.msk.msrb.mxu1 %vm258_vm0, %v226_v36  ;;  %v2154_v36 = vunpack.c.1.s8 %v9808_v60  ;;  %v2282_v60 = vunpack.c.1.s8 %v9827_v8 }
 0x100   :  { %8489 = vmatpush.xpose.msk.msrb.mxu2 %vm258_vm0, %v242_v52 }
 0x101   :  { %6597 = vmatpush.bf16.msra.mxu3 %v12593_v55  ;;  %v9894_v55 = vpack.c.bf16 %v1059_v30, %v1059_v30  ;;  %v9908_v2 = vcvt.s32.f32 %v2426_v9  ;;  %v2026_v30 = vunpack.c.1.s8 %v9794_v34  ;;  %v12595_v9 = vpack.c.bf16 %v9534_v0, %v9532_v63  ;;  %8456 = vmatmul.msk.f32.vlgmr.msrb.gmra.mxu0 %vm258_vm0, %v12598_v31 }
 0x102   :  { %v12596_v34 = vpack.c.bf16 %v9541_v3, %v9536_v1  ;;  %v9938_v63 = vcvt.s32.f32 %v2146_v14  ;;  %v9940_v0 = vcvt.s32.f32 %v2154_v36  ;;  %v2650_v3 = vunpack.c.3.s8 %v9900_v57  ;;  %8473 = vmatmul.msk.f32.vlgmr.msrb.gmra.mxu1 %vm258_vm0, %v12598_v31  ;;  %v1079_v14 = vpop.f32.mrf.mxu0  ;;  %v1490_v36 = vld [vmem:[%s12559_s1 + $0x680] sm:$0xff]  ;;  %v12624_v4 = vld [vmem:[#allocation13_spill] sm:$0xff] }
 0x103   :  { %6603 = vmatpush.bf16.msra.mxu0 %v12595_v9  ;;  %v9929_v40 = vcvt.s32.f32 %v2026_v30  ;;  %8490 = vmatmul.msk.f32.vlgmr.msrb.gmra.mxu2 %vm258_vm0, %v12598_v31  ;;  %v9951_v5 = vcvt.s32.f32 %v2282_v60  ;;  %v12599_v30 = vpack.c.bf16 %v9627_v16, %v9605_v58  ;;  %v2778_v9 = vunpack.c.3.s8 %v1530_v23  ;;  %v1099_v31 = vpop.f32.mrf.mxu1 }
 0x104   :  { %6598 = vmatmul.bf16.vlgmr.msra.gmra.mxu3 %v9549_v7  ;;  %6616 = vmatpush.bf16.msra.mxu1 %v12596_v34  ;;  %v2402_v34 = vunpack.c.0.s8 %v9845_v56  ;;  %v12600_v60 = vpack.c.bf16 %v9581_v38, %v9573_v32  ;;  %v9969_v58 = vpack.c.bf16 %v1079_v14, %v1079_v14  ;;  %v12602_v32 = vpack.c.bf16 %v9603_v54, %v9601_v53  ;;  %v1522_v53 = vld [vmem:[%s12559_s1 + $0x780] sm:$0xff] }
 0x105   :  { %6642 = vmatpush.bf16.msrb.mxu3 %v12594_v43  ;;  %v2274_v43 = vunpack.c.0.s8 %v9827_v8  ;;  %6629 = vmatpush.bf16.msra.mxu2 %v12597_v45  ;;  %v9953_v8 = vcvt.s32.f32 %v2642_v18  ;;  %v2770_v45 = vunpack.c.2.s8 %v1530_v23  ;;  %v12601_v18 = vpack.c.bf16 %v9585_v47, %v9583_v50 }
 0x106   :  { %v9985_v50 = vcvt.s32.f32 %v2778_v9  ;;  %v2410_v47 = vunpack.c.1.s8 %v9845_v56  ;;  %v9988_v14 = vcvt.s32.f32 %v2402_v34  ;;  %v12603_v54 = vpack.c.bf16 %v9670_v24, %v9664_v15  ;;  %v1594_v9 = vld [vmem:[%s12559_s1 + $0x9c0] sm:$0xff] }
 0x107   :  { %v9942_v1 = vcvt.s32.f32 %v2274_v43  ;;  %v9960_v43 = vcvt.s32.f32 %v2650_v3  ;;  %6604 = vmatpush.bf16.msra.mxu0 %v12600_v60  ;;  %v9975_v3 = vpack.c.bf16 %v1099_v31, %v1099_v31  ;;  %v2634_v31 = vunpack.c.1.s8 %v9900_v57 }
 0x108   :  { %6617 = vmatpush.bf16.msra.mxu1 %v12601_v18  ;;  %v2754_v60 = vunpack.c.0.s8 %v1530_v23  ;;  %v2762_v18 = vunpack.c.1.s8 %v1530_v23  ;;  %v10000_v56 = vcvt.s32.f32 %v2410_v47  ;;  %v2610_v34 = vunpack.c.2.s8 %v1490_v36 }
 0x109   :  { %6643 = vmatpush.bf16.msrb.mxu3 %v12599_v30  ;;  %v9973_v30 = vcvt.s32.f32 %v2770_v45  ;;  %6630 = vmatpush.bf16.msra.mxu2 %v12602_v32  ;;  %v2626_v45 = vunpack.c.0.s8 %v9900_v57  ;;  %v2618_v32 = vunpack.c.3.s8 %v1490_v36  ;;  %v1562_v57 = vld [vmem:[%s12559_s1 + $0x8c0] sm:$0xff]  ;;  %v12604_v23 = vpack.c.bf16 %v9633_v22, %v9631_v19 }
 0x10a   :  { %v12605_v38 = vpack.c.bf16 %v9646_v51, %v9644_v37  ;;  %v10013_v24 = vcvt.s32.f32 %v2634_v31  ;;  %v10015_v47 = vcvt.s32.f32 %v2754_v60  ;;  %v12606_v19 = vpack.c.bf16 %v9659_v10, %v9657_v6 }
 0x10b   :  { %6605 = vmatpush.bf16.msra.mxu0 %v12604_v23  ;;  %v10011_v15 = vcvt.s32.f32 %v2626_v45  ;;  %v10027_v37 = vcvt.s32.f32 %v2610_v34  ;;  %v10029_v51 = vcvt.s32.f32 %v2618_v32  ;;  %v2746_v60 = vunpack.c.3.s8 %v1522_v53 }
 0x10c   :  { %6618 = vmatpush.bf16.msra.mxu1 %v12605_v38  ;;  %v2738_v38 = vunpack.c.2.s8 %v1522_v53  ;;  %v12607_v6 = vpack.c.bf16 %v9736_v27, %v9718_v39  ;;  %v2906_v32 = vunpack.c.3.s8 %v1562_v57  ;;  %v3026_v23 = vunpack.c.2.s8 %v1594_v9 }
 0x10d   :  { %6644 = vmatpush.bf16.msrb.mxu3 %v12603_v54  ;;  %v10017_v54 = vcvt.s32.f32 %v2762_v18  ;;  %6631 = vmatpush.bf16.msra.mxu2 %v12606_v19  ;;  %v2898_v18 = vunpack.c.2.s8 %v1562_v57  ;;  %v12608_v19 = vpack.c.bf16 %v9681_v33, %v9679_v29  ;;  %v12609_v31 = vpack.c.bf16 %v9698_v21, %v9696_v20 }
 0x10e   :  { %v10040_v34 = vcvt.s32.f32 %v2738_v38  ;;  %v10048_v45 = vcvt.s32.f32 %v2746_v60  ;;  %v3034_v39 = vunpack.c.3.s8 %v1594_v9  ;;  %v2594_v27 = vunpack.c.0.s8 %v1490_v36 }
 0x10f   :  { %6606 = vmatpush.bf16.msra.mxu0 %v12608_v19  ;;  %v10050_v16 = vcvt.s32.f32 %v2898_v18  ;;  %v12610_v38 = vpack.c.bf16 %v9708_v44, %v9706_v26  ;;  %v10057_v10 = vcvt.s32.f32 %v3026_v23  ;;  %v2602_v29 = vunpack.c.1.s8 %v1490_v36  ;;  %v1482_v18 = vld [vmem:[%s12559_s1 + $0x640] sm:$0xff] }
 0x110   :  { %6619 = vmatpush.bf16.msra.mxu1 %v12609_v31  ;;  %v2722_v33 = vunpack.c.0.s8 %v1522_v53  ;;  %v10061_v21 = vcvt.s32.f32 %v3034_v39  ;;  %v10063_v31 = vcvt.s32.f32 %v2594_v27  ;;  %v2730_v60 = vunpack.c.1.s8 %v1522_v53  ;;  %v12614_v53 = vld [vmem:[#allocation7_spill] sm:$0xff] }
 0x111   :  { %6645 = vmatpush.bf16.msrb.mxu3 %v12607_v6  ;;  %6632 = vmatpush.bf16.msra.mxu2 %v12610_v38  ;;  %v10055_v6 = vcvt.s32.f32 %v2906_v32  ;;  %v12611_v26 = vpack.c.bf16 %v9787_v62, %v9775_v48  ;;  %v10073_v36 = vcvt.s32.f32 %v2602_v29  ;;  %v2882_v23 = vunpack.c.0.s8 %v1562_v57  ;;  %v1514_v29 = vld [vmem:[%s12559_s1 + $0x740] sm:$0xff] }
 0x112   :  { %v10075_v32 = vcvt.s32.f32 %v2722_v33  ;;  %v12613_v19 = vpack.c.bf16 %v9746_v17, %v9744_v12  ;;  %v12615_v39 = vpack.c.bf16 %v9752_v28, %v12614_v53  ;;  %v10085_v48 = vcvt.s32.f32 %v2730_v60  ;;  %v12616_v33 = vld [vmem:[#allocation9_spill] sm:$0xff]  ;;  %v12620_v60 = vld [vmem:[#allocation12_spill] sm:$0xff] }
 0x113   :  { %v2890_v27 = vunpack.c.1.s8 %v1562_v57  ;;  %v3010_v38 = vunpack.c.0.s8 %v1594_v9  ;;  %v10095_v17 = vcvt.s32.f32 %v2882_v23  ;;  %v3018_v28 = vunpack.c.1.s8 %v1594_v9  ;;  %v1554_v57 = vld [vmem:[%s12559_s1 + $0x880] sm:$0xff] }
 0x114   :  { %12612 = vst [vmem:[#allocation17_spill] sm:$0xff] %v10075_v32  ;;  %6607 = vmatpush.bf16.msra.mxu0 %v12613_v19  ;;  %6620 = vmatpush.bf16.msra.mxu1 %v12615_v39  ;;  %v2578_v19 = vunpack.c.2.s8 %v1482_v18  ;;  %v12619_v9 = vpack.c.bf16 %v9849_v42, %v9839_v11  ;;  %v2706_v12 = vunpack.c.2.s8 %v1514_v29  ;;  %v2714_v44 = vunpack.c.3.s8 %v1514_v29 }
 0x115   :  { %6646 = vmatpush.bf16.msrb.mxu3 %v12611_v26  ;;  %v12617_v26 = vld [vmem:[#allocation8_spill] sm:$0xff]  ;;  %v10102_v53 = vcvt.s32.f32 %v2890_v27  ;;  %v10104_v39 = vcvt.s32.f32 %v3010_v38  ;;  %v10112_v23 = vcvt.s32.f32 %v3018_v28  ;;  %v12621_v27 = vld [vmem:[#allocation11_spill] sm:$0xff]  ;;  %v12623_v38 = vld [vmem:[#allocation14_spill] sm:$0xff]  ;;  %v2866_v11 = vunpack.c.2.s8 %v1554_v57 }
 0x116   :  { %v12618_v20 = vpack.c.bf16 %v12616_v33, %v12617_v26  ;;  %v2586_v33 = vunpack.c.3.s8 %v1482_v18  ;;  %v10114_v26 = vcvt.s32.f32 %v2578_v19  ;;  %v12622_v62 = vpack.c.bf16 %v12620_v60, %v12621_v27  ;;  %v12626_v28 = vld [vmem:[#allocation16_spill] sm:$0xff]  ;;  %v12627_v19 = vld [vmem:[#allocation15_spill] sm:$0xff] }
 0x117   :  { %v12625_v22 = vpack.c.bf16 %v12623_v38, %v12624_v4  ;;  %v2874_v42 = vunpack.c.3.s8 %v1554_v57  ;;  %v6226_v32 = vpack.c.bf16 %v10112_v23, %v10104_v39  ;;  %v10131_v60 = vcvt.s32.f32 %v2706_v12 }
 0x118   :  { %6633 = vmatpush.bf16.msra.mxu2 %v12618_v20  ;;  %v1586_v20 = vld [vmem:[%s12559_s1 + $0x980] sm:$0xff]  ;;  %6608 = vmatpush.bf16.msra.mxu0 %v12622_v62  ;;  %v10124_v7 = vcvt.s32.f32 %v2586_v33  ;;  %v10133_v62 = vcvt.s32.f32 %v2714_v44  ;;  %v10137_v27 = vcvt.s32.f32 %v2866_v11  ;;  %v2562_v44 = vunpack.c.0.s8 %v1482_v18 }
 0x119   :  { %6647 = vmatpush.bf16.msrb.mxu3 %v12619_v9  ;;  %6621 = vmatpush.bf16.msra.mxu1 %v12625_v22  ;;  %v12628_v9 = vpack.c.bf16 %v12626_v28, %v12627_v19  ;;  %v2994_v4 = vunpack.c.2.s8 %v1586_v20  ;;  %v10139_v33 = vcvt.s32.f32 %v2874_v42  ;;  %v3002_v38 = vunpack.c.3.s8 %v1586_v20 }
 0x11a   :  { %v6010_v22 = vpack.c.bf16 %v10124_v7, %v10114_v26  ;;  %v12629_v28 = vpack.c.bf16 %v9908_v2, %v9892_v46  ;;  %v12630_v52 = vpack.c.bf16 %v9869_v61, %v9855_v49  ;;  %v12631_v11 = vpack.c.bf16 %v9880_v35, %v9871_v41  ;;  %v10168_v35 = vld [vmem:[%s12559_s1 + $0x600] sm:$0xff] }
 0x11b   :  { %v10146_v12 = vcvt.s32.f32 %v2994_v4  ;;  %v6154_v42 = vpack.c.bf16 %v10139_v33, %v10137_v27  ;;  %v10156_v46 = vcvt.s32.f32 %v3002_v38  ;;  %v2690_v2 = vunpack.c.0.s8 %v1514_v29 }
 0x11c   :  { %6634 = vmatpush.bf16.msra.mxu2 %v12628_v9  ;;  %v2570_v9 = vunpack.c.1.s8 %v1482_v18  ;;  %6609 = vmatpush.bf16.msra.mxu0 %v12630_v52  ;;  %v12632_v4 = vpack.c.bf16 %v9884_v59, %v9882_v13  ;;  %v10161_v18 = vcvt.s32.f32 %v2562_v44  ;;  %v2850_v49 = vunpack.c.0.s8 %v1554_v57  ;;  %v10179_v13 = vld [vmem:[%s12559_s1 + $0x700] sm:$0xff] }
 0x11d   :  { %6648 = vmatpush.bf16.msrb.mxu3 %v12629_v28  ;;  %6622 = vmatpush.bf16.msra.mxu1 %v12631_v11  ;;  %v2698_v28 = vunpack.c.1.s8 %v1514_v29  ;;  %v2858_v61 = vunpack.c.1.s8 %v1554_v57  ;;  %v6218_v41 = vpack.c.bf16 %v10156_v46, %v10146_v12  ;;  %v10172_v52 = vcvt.s32.f32 %v2690_v2  ;;  %v1546_v2 = vld [vmem:[%s12559_s1 + $0x840] sm:$0xff] }
 0x11e   :  { %v10163_v19 = vcvt.s32.f32 %v2570_v9  ;;  %v2978_v59 = vunpack.c.0.s8 %v1586_v20  ;;  %v12633_v57 = vpack.c.bf16 %v10000_v56, %v9988_v14  ;;  %v10186_v44 = vcvt.s32.f32 %v2850_v49 }
 0x11f   :  { %v10174_v29 = vcvt.s32.f32 %v2698_v28  ;;  %v10188_v9 = vcvt.s32.f32 %v2858_v61  ;;  %v2986_v11 = vunpack.c.1.s8 %v1586_v20  ;;  %v12634_v28 = vpack.c.bf16 %v9929_v40, %v9913_v25  ;;  %v10208_v61 = vld [vmem:[%s12559_s1 + $0x940] sm:$0xff] }
 0x120   :  { %6635 = vmatpush.bf16.msra.mxu2 %v12632_v4  ;;  %v12635_v14 = vpack.c.bf16 %v9940_v0, %v9938_v63  ;;  %v10201_v4 = vcvt.s32.f32 %v2978_v59  ;;  %v2546_v49 = vunpack.c.2.s8 %v10168_v35  ;;  %v2554_v20 = vunpack.c.3.s8 %v10168_v35 }
 0x121   :  { %6649 = vmatpush.bf16.msrb.mxu3 %v12633_v57  ;;  %6610 = vmatpush.bf16.msra.mxu0 %v12634_v28  ;;  %v12636_v25 = vpack.c.bf16 %v9951_v5, %v9942_v1  ;;  %v12637_v40 = vpack.c.bf16 %v9960_v43, %v9953_v8  ;;  %v6146_v63 = vpack.c.bf16 %v10188_v9, %v10186_v44  ;;  %v10218_v0 = vcvt.s32.f32 %v2986_v11 }
 0x122   :  { %6623 = vmatpush.bf16.msra.mxu1 %v12635_v14  ;;  %v2674_v59 = vunpack.c.2.s8 %v10179_v13  ;;  %v2682_v57 = vunpack.c.3.s8 %v10179_v13  ;;  %v12638_v28 = vpack.c.bf16 %v9985_v50, %v9973_v30  ;;  %v10226_v1 = vcvt.s32.f32 %v2546_v49  ;;  %v1119_v14 = vpop.f32.mrf.mxu2 }
 0x123   :  { %v10228_v5 = vcvt.s32.f32 %v2554_v20  ;;  %v2834_v8 = vunpack.c.2.s8 %v1546_v2  ;;  %v2842_v43 = vunpack.c.3.s8 %v1546_v2  ;;  %v6210_v11 = vpack.c.bf16 %v10218_v0, %v10201_v4 }
 0x124   :  { %6636 = vmatpush.bf16.msra.mxu2 %v12636_v25  ;;  %6650 = vmatmul.bf16.vlgmr.msrb.gmra.mxu3 %v9975_v3  ;;  %v12639_v25 = vld [vmem:[#allocation10_spill] sm:$0xff]  ;;  %v10236_v30 = vcvt.s32.f32 %v2682_v57  ;;  %v2962_v50 = vunpack.c.2.s8 %v10208_v61  ;;  %v12640_v49 = vpack.c.bf16 %v10061_v21, %v10057_v10  ;;  %v12641_v57 = vpack.c.bf16 %v10013_v24, %v10011_v15 }
 0x125   :  { %6655 = vmatpush.bf16.msrb.mxu0 %v12637_v40  ;;  %6624 = vmatmul.bf16.vlgmr.msra.gmra.mxu1 %v9894_v55  ;;  %v10234_v40 = vcvt.s32.f32 %v2674_v59  ;;  %v10247_v56 = vcvt.s32.f32 %v2842_v43  ;;  %v2970_v59 = vunpack.c.3.s8 %v10208_v61  ;;  %v12642_v38 = vpack.c.bf16 %v10055_v6, %v10050_v16  ;;  %v1626_v43 = vld [vmem:[%s12559_s1 + $0xac0] sm:$0xff] }
 0x126   :  { %6668 = vmatpush.bf16.msrb.mxu1 %v12638_v28  ;;  %6611 = vmatmul.bf16.vlgmr.msra.gmra.mxu0 %v12639_v25  ;;  %v10245_v28 = vcvt.s32.f32 %v2834_v8  ;;  %v10258_v21 = vcvt.s32.f32 %v2962_v50  ;;  %v2530_v8 = vunpack.c.0.s8 %v10168_v35  ;;  %v12643_v15 = vpack.c.bf16 %v10017_v54, %v10015_v47  ;;  %v1658_v47 = vld [vmem:[%s12559_s1 + $0xbc0] sm:$0xff] }
 0x127   :  { %6637 = vmatmul.bf16.vlgmr.msra.gmra.mxu2 %v9969_v58  ;;  %6694 = vmatpush.bf16.msra.mxu3 %v12640_v49  ;;  %v10260_v49 = vpack.c.bf16 %v1119_v14, %v1119_v14  ;;  %v10271_v24 = vcvt.s32.f32 %v2970_v59  ;;  %v2538_v6 = vunpack.c.1.s8 %v10168_v35  ;;  %v2666_v50 = vunpack.c.1.s8 %v10179_v13 }
 0x128   :  { %6681 = vmatpush.bf16.msrb.mxu2 %v12642_v38  ;;  %v6138_v16 = vpack.c.bf16 %v10247_v56, %v10245_v28  ;;  %v2658_v38 = vunpack.c.0.s8 %v10179_v13  ;;  %v10275_v14 = vcvt.s32.f32 %v2530_v8  ;;  %v2826_v10 = vunpack.c.1.s8 %v1546_v2  ;;  %v1690_v56 = vld [vmem:[%s12559_s1 + $0xcc0] sm:$0xff] }
 0x129   :  { %6656 = vmatpush.bf16.msrb.mxu0 %v12641_v57  ;;  %v2818_v57 = vunpack.c.0.s8 %v1546_v2  ;;  %v6202_v54 = vpack.c.bf16 %v10271_v24, %v10258_v21  ;;  %v10286_v35 = vcvt.s32.f32 %v2538_v6  ;;  %v3154_v8 = vunpack.c.2.s8 %v1626_v43 }
 0x12a   :  { %6669 = vmatpush.bf16.msrb.mxu1 %v12643_v15  ;;  %v10288_v59 = vcvt.s32.f32 %v2658_v38  ;;  %v1139_v15 = vpop.f32.mrf.mxu3  ;;  %v12644_v13 = vpack.c.bf16 %v10029_v51, %v10027_v37  ;;  %v12645_v2 = vpack.c.bf16 %v10102_v53, %v10095_v17  ;;  %v10296_v20 = vcvt.s32.f32 %v2666_v50  ;;  %v1538_v17 = vld [vmem:[%s12559_s1 + $0x800] sm:$0xff] }
 0x12b   :  { %6695 = vmatpush.bf16.msra.mxu3 %v6226_v32  ;;  %v10298_v32 = vcvt.s32.f32 %v2818_v57  ;;  %v10300_v39 = vcvt.s32.f32 %v2826_v10  ;;  %v3162_v23 = vunpack.c.3.s8 %v1626_v43  ;;  %v12646_v6 = vpack.c.bf16 %v10048_v45, %v10040_v34 }
 0x12c   :  { %6682 = vmatpush.bf16.msrb.mxu2 %v12645_v2  ;;  %v5986_v38 = vpack.c.bf16 %v10286_v35, %v10275_v14  ;;  %v10307_v37 = vcvt.s32.f32 %v3154_v8  ;;  %v3282_v51 = vunpack.c.2.s8 %v1658_v47  ;;  %v10318_v45 = vpack.c.bf16 %v1139_v15, %v1139_v15 }
 0x12d   :  { %6657 = vmatpush.bf16.msrb.mxu0 %v12644_v13  ;;  %v3290_v13 = vunpack.c.3.s8 %v1658_v47  ;;  %v6130_v10 = vpack.c.bf16 %v10300_v39, %v10298_v32  ;;  %v10316_v50 = vcvt.s32.f32 %v3162_v23  ;;  %v2946_v8 = vunpack.c.0.s8 %v10208_v61  ;;  %v1570_v23 = vld [vmem:[%s12559_s1 + $0x900] sm:$0xff] }
 0x12e   :  { %6670 = vmatpush.bf16.msrb.mxu1 %v12646_v6  ;;  %v10323_v34 = vcvt.s32.f32 %v3282_v51  ;;  %v2954_v2 = vunpack.c.1.s8 %v10208_v61  ;;  %v12647_v6 = vpack.c.bf16 %v10073_v36, %v10063_v31  ;;  %v2802_v46 = vunpack.c.2.s8 %v1538_v17  ;;  %v12648_v61 = vld [vmem:[#allocation17_spill] sm:$0xff]  ;;  %v1642_v39 = vld [vmem:[%s12559_s1 + $0xb40] sm:$0xff] }
 0x12f   :  { %6696 = vmatpush.bf16.msra.mxu3 %v6218_v41  ;;  %v10325_v57 = vcvt.s32.f32 %v3290_v13  ;;  %v2810_v41 = vunpack.c.3.s8 %v1538_v17  ;;  %v3138_v15 = vunpack.c.0.s8 %v1626_v43  ;;  %v12649_v51 = vpack.c.bf16 %v10085_v48, %v12648_v61 }
 0x130   :  { %6683 = vmatpush.bf16.msrb.mxu2 %v6154_v42  ;;  %v4866_v36 = vcvt.s32.f32 %v2946_v8  ;;  %v4874_v27 = vcvt.s32.f32 %v2954_v2  ;;  %v3146_v33 = vunpack.c.1.s8 %v1626_v43  ;;  %v10345_v42 = vcvt.s32.f32 %v2802_v46  ;;  %v1618_v43 = vld [vmem:[%s12559_s1 + $0xa80] sm:$0xff] }
 0x131   :  { %6658 = vmatpush.bf16.msrb.mxu0 %v12647_v6  ;;  %v6362_v31 = vpack.c.bf16 %v10325_v57, %v10323_v34  ;;  %v10347_v13 = vcvt.s32.f32 %v2810_v41  ;;  %v10349_v6 = vcvt.s32.f32 %v3138_v15  ;;  %v3266_v12 = vunpack.c.0.s8 %v1658_v47  ;;  %v1650_v8 = vld [vmem:[%s12559_s1 + $0xb80] sm:$0xff] }
 0x132   :  { %6671 = vmatpush.bf16.msrb.mxu1 %v12649_v51  ;;  %v6194_v53 = vpack.c.bf16 %v4874_v27, %v4866_v36  ;;  %v10354_v48 = vcvt.s32.f32 %v3146_v33  ;;  %v3274_v61 = vunpack.c.1.s8 %v1658_v47  ;;  %v2930_v51 = vunpack.c.2.s8 %v1570_v23  ;;  %v1682_v34 = vld [vmem:[%s12559_s1 + $0xc80] sm:$0xff] }
 0x133   :  { %6697 = vmatpush.bf16.msra.mxu3 %v6210_v11  ;;  %v6122_v4 = vpack.c.bf16 %v10347_v13, %v10345_v42  ;;  %v10367_v0 = vcvt.s32.f32 %v3266_v12  ;;  %v2938_v11 = vunpack.c.3.s8 %v1570_v23  ;;  %v2786_v47 = vunpack.c.0.s8 %v1538_v17 }
 0x134   :  { %6684 = vmatpush.bf16.msrb.mxu2 %v6146_v63  ;;  %v12650_v2 = vpack.c.bf16 %v10133_v62, %v10131_v60  ;;  %v6290_v7 = vpack.c.bf16 %v10354_v48, %v10349_v6  ;;  %v10377_v26 = vcvt.s32.f32 %v3274_v61  ;;  %v2794_v44 = vunpack.c.1.s8 %v1538_v17 }
 0x135   :  { %6659 = vmatpush.bf16.msrb.mxu0 %v6010_v22  ;;  %v4850_v22 = vcvt.s32.f32 %v2930_v51  ;;  %v4858_v9 = vcvt.s32.f32 %v2938_v11  ;;  %v10379_v63 = vcvt.s32.f32 %v2786_v47  ;;  %v3122_v12 = vunpack.c.2.s8 %v1618_v43 }
 0x136   :  { %6672 = vmatpush.bf16.msrb.mxu1 %v12650_v2  ;;  %v3130_v46 = vunpack.c.3.s8 %v1618_v43  ;;  %v6354_v60 = vpack.c.bf16 %v10377_v26, %v10367_v0  ;;  %v10386_v62 = vcvt.s32.f32 %v2794_v44  ;;  %v3250_v41 = vunpack.c.2.s8 %v1650_v8 }
 0x137   :  { %6698 = vmatpush.bf16.msra.mxu3 %v6202_v54  ;;  %v3258_v15 = vunpack.c.3.s8 %v1650_v8  ;;  %v12651_v36 = vpack.c.bf16 %v10163_v19, %v10161_v18  ;;  %v6186_v17 = vpack.c.bf16 %v4858_v9, %v4850_v22  ;;  %v10394_v27 = vcvt.s32.f32 %v3122_v12 }
 0x138   :  { %6685 = vmatpush.bf16.msrb.mxu2 %v6138_v16  ;;  %v10396_v21 = vcvt.s32.f32 %v3130_v46  ;;  %v2914_v24 = vunpack.c.0.s8 %v1570_v23  ;;  %v12652_v54 = vpack.c.bf16 %v10174_v29, %v10172_v52  ;;  %v6114_v33 = vpack.c.bf16 %v10386_v62, %v10379_v63  ;;  %v1722_v52 = vld [vmem:[%s12559_s1 + $0xdc0] sm:$0xff] }
 0x139   :  { %6660 = vmatpush.bf16.msrb.mxu0 %v12651_v36  ;;  %v10403_v61 = vcvt.s32.f32 %v3250_v41  ;;  %v10405_v19 = vcvt.s32.f32 %v3258_v15  ;;  %v2922_v18 = vunpack.c.1.s8 %v1570_v23  ;;  %v3106_v51 = vunpack.c.0.s8 %v1618_v43  ;;  %v1610_v63 = vld [vmem:[%s12559_s1 + $0xa40] sm:$0xff] }
 0x13a   :  { %6673 = vmatpush.bf16.msrb.mxu1 %v12652_v54  ;;  %v6282_v28 = vpack.c.bf16 %v10396_v21, %v10394_v27  ;;  %v4834_v16 = vcvt.s32.f32 %v2914_v24  ;;  %v3114_v11 = vunpack.c.1.s8 %v1618_v43  ;;  %v3234_v23 = vunpack.c.0.s8 %v1650_v8 }
 0x13b   :  { %6699 = vmatpush.bf16.msra.mxu3 %v6194_v53  ;;  %v6346_v29 = vpack.c.bf16 %v10405_v19, %v10403_v61  ;;  %v4842_v47 = vcvt.s32.f32 %v2922_v18  ;;  %v3242_v2 = vunpack.c.1.s8 %v1650_v8  ;;  %v12653_v22 = vpack.c.bf16 %v10228_v5, %v10226_v1 }
 0x13c   :  { %6686 = vmatpush.bf16.msrb.mxu2 %v6130_v10  ;;  %v10423_v43 = vcvt.s32.f32 %v3106_v51  ;;  %v10425_v44 = vcvt.s32.f32 %v3114_v11  ;;  %v3410_v9 = vunpack.c.2.s8 %v1690_v56  ;;  %v3418_v53 = vunpack.c.3.s8 %v1690_v56 }
 0x13d   :  { %6661 = vmatpush.bf16.msrb.mxu0 %v12653_v22  ;;  %v12654_v8 = vpack.c.bf16 %v10236_v30, %v10234_v40  ;;  %v6178_v1 = vpack.c.bf16 %v4842_v47, %v4834_v16  ;;  %v10433_v5 = vcvt.s32.f32 %v3234_v23  ;;  %v10435_v12 = vcvt.s32.f32 %v3242_v2  ;;  %v10479_v2 = vld [vmem:[%s12559_s1 + $0xd80] sm:$0xff] }
 0x13e   :  { %v3538_v32 = vunpack.c.2.s8 %v1722_v52  ;;  %v6274_v10 = vpack.c.bf16 %v10425_v44, %v10423_v43  ;;  %v5330_v46 = vcvt.s32.f32 %v3410_v9  ;;  %v5338_v62 = vcvt.s32.f32 %v3418_v53  ;;  %v1159_v0 = vpop.f32.mrf.mxu0  ;;  %v1754_v44 = vld [vmem:[%s12559_s1 + $0xec0] sm:$0xff] }
 0x13f   :  { %6674 = vmatpush.bf16.msrb.mxu1 %v12654_v8  ;;  %v3546_v41 = vunpack.c.3.s8 %v1722_v52  ;;  %6700 = vmatpush.bf16.msra.mxu3 %v6186_v17  ;;  %v6338_v40 = vpack.c.bf16 %v10435_v12, %v10433_v5  ;;  %v3090_v15 = vunpack.c.2.s8 %v1610_v63  ;;  %v3098_v36 = vunpack.c.3.s8 %v1610_v63  ;;  %v1179_v26 = vpop.f32.mrf.mxu1  ;;  %v1307_v12 = vld [vmem:[%s12559_s1 + $0xc8] sm:$0xff] }
 0x140   :  { %v5458_v30 = vcvt.s32.f32 %v3538_v32  ;;  %6687 = vmatpush.bf16.msrb.mxu2 %v6122_v4  ;;  %v6426_v24 = vpack.c.bf16 %v5338_v62, %v5330_v46  ;;  %v3218_v18 = vunpack.c.2.s8 %v1642_v39  ;;  %v3226_v16 = vunpack.c.3.s8 %v1642_v39 }
 0x141   :  { %6662 = vmatpush.bf16.msrb.mxu0 %v5986_v38  ;;  %v5466_v54 = vcvt.s32.f32 %v3546_v41  ;;  %v12655_v17 = vpack.c.bf16 %v10296_v20, %v10288_v59  ;;  %v12656_v51 = vpack.c.bf16 %v10316_v50, %v10307_v37  ;;  %v10456_v11 = vcvt.s32.f32 %v3090_v15 }
 0x142   :  { %v10458_v14 = vcvt.s32.f32 %v3098_v36  ;;  %v3394_v35 = vunpack.c.0.s8 %v1690_v56  ;;  %v3402_v38 = vunpack.c.1.s8 %v1690_v56  ;;  %v10463_v13 = vcvt.s32.f32 %v3218_v18 }
 0x143   :  { %6675 = vmatpush.bf16.msrb.mxu1 %v12655_v17  ;;  %v6490_v42 = vpack.c.bf16 %v5466_v54, %v5458_v30  ;;  %v10465_v4 = vcvt.s32.f32 %v3226_v16  ;;  %v3522_v20 = vunpack.c.0.s8 %v1722_v52  ;;  %6701 = vmatpush.bf16.msra.mxu3 %v6178_v1  ;;  %v3530_v47 = vunpack.c.1.s8 %v1722_v52  ;;  %v1634_v30 = vld [vmem:[%s12559_s1 + $0xb00] sm:$0xff] }
 0x144   :  { %6663 = vmatmul.bf16.vlgmr.msrb.gmra.mxu0 %v10260_v49  ;;  %v6266_v59 = vpack.c.bf16 %v10458_v14, %v10456_v11  ;;  %v5314_v37 = vcvt.s32.f32 %v3394_v35  ;;  %v5322_v50 = vcvt.s32.f32 %v3402_v38  ;;  %6688 = vmatpush.bf16.msrb.mxu2 %v6114_v33  ;;  %v3074_v56 = vunpack.c.0.s8 %v1610_v63  ;;  %v1706_v11 = vld [vmem:[%s12559_s1 + $0xd40] sm:$0xff] }
 0x145   :  { %6707 = vmatpush.bf16.msra.mxu0 %v12656_v51  ;;  %v6330_v57 = vpack.c.bf16 %v10465_v4, %v10463_v13  ;;  %v3082_v23 = vunpack.c.1.s8 %v1610_v63  ;;  %v5450_v22 = vcvt.s32.f32 %v3530_v47  ;;  %v3202_v9 = vunpack.c.0.s8 %v1642_v39 }
 0x146   :  { %6676 = vmatmul.bf16.vlgmr.msrb.gmra.mxu1 %v10318_v45  ;;  %v6418_v52 = vpack.c.bf16 %v5322_v50, %v5314_v37  ;;  %v3210_v33 = vunpack.c.1.s8 %v1642_v39  ;;  %v10487_v53 = vcvt.s32.f32 %v3074_v56  ;;  %v3378_v8 = vunpack.c.2.s8 %v1682_v34 }
 0x147   :  { %6720 = vmatpush.bf16.msra.mxu1 %v6362_v31  ;;  %v5442_v31 = vcvt.s32.f32 %v3522_v20  ;;  %6746 = vmatpush.bf16.msrb.mxu3 %v6490_v42  ;;  %v10489_v63 = vcvt.s32.f32 %v3082_v23  ;;  %v3386_v1 = vunpack.c.3.s8 %v1682_v34  ;;  %v10491_v46 = vcvt.s32.f32 %v3202_v9  ;;  %v1199_v23 = vpop.f32.mrf.mxu2 }
 0x148   :  { %6733 = vmatpush.bf16.msra.mxu2 %v6426_v24  ;;  %v10493_v6 = vcvt.s32.f32 %v3210_v33  ;;  %v3506_v48 = vunpack.c.2.s8 %v10479_v2  ;;  %v5298_v39 = vcvt.s32.f32 %v3378_v8  ;;  %v3514_v41 = vunpack.c.3.s8 %v10479_v2  ;;  %v1219_v33 = vpop.f32.mrf.mxu3 }
 0x149   :  { %6708 = vmatpush.bf16.msra.mxu0 %v6290_v7  ;;  %v6482_v32 = vpack.c.bf16 %v5450_v22, %v5442_v31  ;;  %v1602_v7 = vld [vmem:[%s12559_s1 + $0xa00] sm:$0xff]  ;;  %v5306_v62 = vcvt.s32.f32 %v3386_v1  ;;  %v10505_v15 = vpack.c.bf16 %v1159_v0, %v1159_v0  ;;  %v10510_v36 = vpack.c.bf16 %v1179_v26, %v1179_v26 }
 0x14a   :  { %v6322_v24 = vpack.c.bf16 %v10493_v6, %v10491_v46  ;;  %v5426_v54 = vcvt.s32.f32 %v3506_v48  ;;  %v5434_v16 = vcvt.s32.f32 %v3514_v41  ;;  %v3058_v17 = vunpack.c.2.s8 %v1602_v7 }
 0x14b   :  { %6721 = vmatpush.bf16.msra.mxu1 %v6354_v60  ;;  %v6258_v60 = vpack.c.bf16 %v10489_v63, %v10487_v53  ;;  %6747 = vmatpush.bf16.msrb.mxu3 %v6482_v32  ;;  %v6410_v18 = vpack.c.bf16 %v5306_v62, %v5298_v39  ;;  %v3066_v51 = vunpack.c.3.s8 %v1602_v7  ;;  %v3186_v27 = vunpack.c.2.s8 %v1634_v30 }
 0x14c   :  { %6734 = vmatpush.bf16.msra.mxu2 %v6418_v52  ;;  %6702 = vmatmul.bf16.vlgmr.msra.gmra.mxu3 %v10510_v36  ;;  %v3194_v21 = vunpack.c.3.s8 %v1634_v30  ;;  %v3370_v35 = vunpack.c.1.s8 %v1682_v34  ;;  %v6474_v38 = vpack.c.bf16 %v5434_v16, %v5426_v54  ;;  %v10519_v42 = vcvt.s32.f32 %v3058_v17 }
 0x14d   :  { %6709 = vmatpush.bf16.msra.mxu0 %v6282_v28  ;;  %6689 = vmatmul.bf16.vlgmr.msrb.gmra.mxu2 %v10505_v15  ;;  %v3362_v28 = vunpack.c.0.s8 %v1682_v34  ;;  %v10521_v20 = vcvt.s32.f32 %v3066_v51  ;;  %v3490_v61 = vunpack.c.0.s8 %v10479_v2  ;;  %v10527_v19 = vcvt.s32.f32 %v3186_v27 }
 0x14e   :  { %v5290_v50 = vcvt.s32.f32 %v3370_v35  ;;  %v3498_v34 = vunpack.c.1.s8 %v10479_v2  ;;  %v3042_v43 = vunpack.c.0.s8 %v1602_v7  ;;  %v3050_v52 = vunpack.c.1.s8 %v1602_v7  ;;  %v1674_v7 = vld [vmem:[%s12559_s1 + $0xc40] sm:$0xff] }
 0x14f   :  { %6722 = vmatpush.bf16.msra.mxu1 %v6346_v29  ;;  %v10529_v29 = vcvt.s32.f32 %v3194_v21  ;;  %v5282_v37 = vcvt.s32.f32 %v3362_v28  ;;  %6748 = vmatpush.bf16.msrb.mxu3 %v6474_v38  ;;  %v6250_v47 = vpack.c.bf16 %v10521_v20, %v10519_v42  ;;  %v5410_v31 = vcvt.s32.f32 %v3490_v61 }
 0x150   :  { %6735 = vmatpush.bf16.msra.mxu2 %v6410_v18  ;;  %v3170_v5 = vunpack.c.0.s8 %v1634_v30  ;;  %v10545_v22 = vpack.c.bf16 %v1199_v23, %v1199_v23  ;;  %v10547_v2 = vcvt.s32.f32 %v3042_v43  ;;  %v3178_v9 = vunpack.c.1.s8 %v1634_v30 }
 0x151   :  { %6710 = vmatpush.bf16.msra.mxu0 %v6274_v10  ;;  %v6314_v10 = vpack.c.bf16 %v10529_v29, %v10527_v19  ;;  %v6402_v56 = vpack.c.bf16 %v5290_v50, %v5282_v37  ;;  %v4970_v8 = vcvt.s32.f32 %v3050_v52  ;;  %v3666_v32 = vunpack.c.2.s8 %v1754_v44  ;;  %v1299_v50 = vld [vmem:[%s12559_s1 + $0x88] sm:$0xff] }
 0x152   :  { %v10552_v1 = vcvt.s32.f32 %v3170_v5  ;;  %v3674_v48 = vunpack.c.3.s8 %v1754_v44  ;;  %v5098_v26 = vcvt.s32.f32 %v3178_v9  ;;  %v1875_v39 = vunpack.c.2.s8 %v1307_v12 }
 0x153   :  { %6723 = vmatpush.bf16.msra.mxu1 %v6338_v40  ;;  %v5418_v40 = vcvt.s32.f32 %v3498_v34  ;;  %v1883_v62 = vunpack.c.3.s8 %v1307_v12  ;;  %v6242_v14 = vpack.c.bf16 %v4970_v8, %v10547_v2  ;;  %v10564_v30 = vpack.c.bf16 %v1219_v33, %v1219_v33 }
 0x154   :  { %6736 = vmatpush.bf16.msra.mxu2 %v6402_v56  ;;  %v5594_v41 = vcvt.s32.f32 %v3674_v48  ;;  %v6306_v54 = vpack.c.bf16 %v5098_v26, %v10552_v1  ;;  %v3795_v18 = vcvt.s32.f32 %v1875_v39  ;;  %v3346_v4 = vunpack.c.2.s8 %v1674_v7 }
 0x155   :  { %6711 = vmatpush.bf16.msra.mxu0 %v6266_v59  ;;  %v6466_v0 = vpack.c.bf16 %v5418_v40, %v5410_v31  ;;  %v5586_v59 = vcvt.s32.f32 %v3666_v32  ;;  %v3803_v13 = vcvt.s32.f32 %v1883_v62  ;;  %v3354_v16 = vunpack.c.3.s8 %v1674_v7 }
 0x156   :  { %v3474_v17 = vunpack.c.2.s8 %v1706_v11  ;;  %v3482_v51 = vunpack.c.3.s8 %v1706_v11  ;;  %v5266_v21 = vcvt.s32.f32 %v3346_v4  ;;  %v3650_v28 = vunpack.c.0.s8 %v1754_v44 }
 0x157   :  { %6724 = vmatpush.bf16.msra.mxu1 %v6330_v57  ;;  %6749 = vmatpush.bf16.msrb.mxu3 %v6466_v0  ;;  %v6554_v57 = vpack.c.bf16 %v5594_v41, %v5586_v59  ;;  %v5659_v27 = vpack.c.bf16 %v3803_v13, %v3795_v18  ;;  %v3658_v35 = vunpack.c.1.s8 %v1754_v44  ;;  %v5274_v38 = vcvt.s32.f32 %v3354_v16 }
 0x158   :  { %v5394_v42 = vcvt.s32.f32 %v3474_v17  ;;  %v5402_v20 = vcvt.s32.f32 %v3482_v51  ;;  %v1859_v61 = vunpack.c.0.s8 %v1307_v12  ;;  %v5570_v19 = vcvt.s32.f32 %v3650_v28  ;;  %v1339_v28 = vld [vmem:[%s12559_s1 + $0x1c8] sm:$0xff] }
 0x159   :  { %6712 = vmatpush.bf16.msra.mxu0 %v6258_v60  ;;  %v5578_v29 = vcvt.s32.f32 %v3658_v35  ;;  %v1867_v53 = vunpack.c.1.s8 %v1307_v12  ;;  %v3330_v63 = vunpack.c.0.s8 %v1674_v7  ;;  %v1746_v60 = vld [vmem:[%s12559_s1 + $0xe80] sm:$0xff]  ;;  %v6394_v37 = vpack.c.bf16 %v5274_v38, %v5266_v21 }
 0x15a   :  { %v6458_v46 = vpack.c.bf16 %v5402_v20, %v5394_v42  ;;  %v3779_v6 = vcvt.s32.f32 %v1859_v61  ;;  %v3458_v44 = vunpack.c.0.s8 %v1706_v11  ;;  %v3466_v23 = vunpack.c.1.s8 %v1706_v11  ;;  %v1371_v61 = vld [vmem:[%s12559_s1 + $0x2c8] sm:$0xff] }
 0x15b   :  { %6725 = vmatpush.bf16.msra.mxu1 %v6322_v24  ;;  %v3338_v24 = vunpack.c.1.s8 %v1674_v7  ;;  %v6546_v34 = vpack.c.bf16 %v5578_v29, %v5570_v19  ;;  %v3787_v31 = vcvt.s32.f32 %v1867_v53  ;;  %v5250_v43 = vcvt.s32.f32 %v3330_v63  ;;  %6737 = vmatpush.bf16.msra.mxu2 %v6394_v37 }
 0x15c   :  { %6750 = vmatpush.bf16.msrb.mxu3 %v6458_v46  ;;  %v3634_v52 = vunpack.c.2.s8 %v1746_v60  ;;  %v3642_v5 = vunpack.c.3.s8 %v1746_v60  ;;  %v5378_v40 = vcvt.s32.f32 %v3458_v44  ;;  %v1843_v2 = vunpack.c.2.s8 %v1299_v50  ;;  %v1291_v44 = vld [vmem:[%s12559_s1 + $0x48] sm:$0xff] }
 0x15d   :  { %6713 = vmatpush.bf16.msra.mxu0 %v6250_v47  ;;  %v5258_v56 = vcvt.s32.f32 %v3338_v24  ;;  %v1666_v47 = vld [vmem:[%s12559_s1 + $0xc00] sm:$0xff]  ;;  %v5651_v12 = vpack.c.bf16 %v3787_v31, %v3779_v6  ;;  %v1851_v9 = vunpack.c.3.s8 %v1299_v50  ;;  %v5386_v8 = vcvt.s32.f32 %v3466_v23 }
 0x15e   :  { %v5554_v1 = vcvt.s32.f32 %v3634_v52  ;;  %v5562_v32 = vcvt.s32.f32 %v3642_v5  ;;  %v3763_v48 = vcvt.s32.f32 %v1843_v2  ;;  %v3314_v0 = vunpack.c.2.s8 %v1666_v47  ;;  %v1738_v24 = vld [vmem:[%s12559_s1 + $0xe40] sm:$0xff] }
 0x15f   :  { %6726 = vmatpush.bf16.msra.mxu1 %v6314_v10  ;;  %v1698_v10 = vld [vmem:[%s12559_s1 + $0xd00] sm:$0xff]  ;;  %v6386_v33 = vpack.c.bf16 %v5258_v56, %v5250_v43  ;;  %v3771_v7 = vcvt.s32.f32 %v1851_v9  ;;  %v3322_v26 = vunpack.c.3.s8 %v1666_v47  ;;  %v6450_v39 = vpack.c.bf16 %v5386_v8, %v5378_v40 }
 0x160   :  { %v6538_v62 = vpack.c.bf16 %v5562_v32, %v5554_v1  ;;  %v3442_v11 = vunpack.c.2.s8 %v1698_v10  ;;  %v3450_v59 = vunpack.c.3.s8 %v1698_v10  ;;  %v3618_v13 = vunpack.c.0.s8 %v1746_v60 }
 0x161   :  { %6714 = vmatpush.bf16.msra.mxu0 %v6242_v14  ;;  %6738 = vmatpush.bf16.msra.mxu2 %v6386_v33  ;;  %v5643_v41 = vpack.c.bf16 %v3771_v7, %v3763_v48  ;;  %v5234_v14 = vcvt.s32.f32 %v3314_v0  ;;  %v5242_v18 = vcvt.s32.f32 %v3322_v26  ;;  %v1827_v16 = vunpack.c.0.s8 %v1299_v50 }
 0x162   :  { %6751 = vmatpush.bf16.msrb.mxu3 %v6450_v39  ;;  %v5370_v4 = vcvt.s32.f32 %v3450_v59  ;;  %v5538_v51 = vcvt.s32.f32 %v3618_v13  ;;  %v3298_v21 = vunpack.c.0.s8 %v1666_v47  ;;  %v3306_v20 = vunpack.c.1.s8 %v1666_v47 }
 0x163   :  { %6727 = vmatpush.bf16.msra.mxu1 %v6306_v54  ;;  %v5362_v54 = vcvt.s32.f32 %v3442_v11  ;;  %v6378_v17 = vpack.c.bf16 %v5242_v18, %v5234_v14  ;;  %v3747_v42 = vcvt.s32.f32 %v1827_v16  ;;  %v3426_v53 = vunpack.c.0.s8 %v1698_v10  ;;  %v1331_v18 = vld [vmem:[%s12559_s1 + $0x188] sm:$0xff] }
 0x164   :  { %6715 = vmatmul.bf16.vlgmr.msra.gmra.mxu0 %v10545_v22  ;;  %v5218_v29 = vcvt.s32.f32 %v3298_v21  ;;  %v3434_v63 = vunpack.c.1.s8 %v1698_v10  ;;  %v5226_v37 = vcvt.s32.f32 %v3306_v20  ;;  %v2003_v46 = vunpack.c.2.s8 %v1339_v28  ;;  %v1363_v16 = vld [vmem:[%s12559_s1 + $0x288] sm:$0xff] }
 0x165   :  { %6759 = vmatpush.bf16.msrb.mxu0 %v6554_v57  ;;  %v3626_v57 = vunpack.c.1.s8 %v1746_v60  ;;  %v6442_v35 = vpack.c.bf16 %v5370_v4, %v5362_v54  ;;  %6739 = vmatpush.bf16.msra.mxu2 %v6378_v17  ;;  %v2011_v6 = vunpack.c.3.s8 %v1339_v28  ;;  %v2131_v43 = vunpack.c.2.s8 %v1371_v61 }
 0x166   :  { %6728 = vmatmul.bf16.vlgmr.msra.gmra.mxu1 %v10564_v30  ;;  %v5354_v31 = vcvt.s32.f32 %v3434_v63  ;;  %v6370_v56 = vpack.c.bf16 %v5226_v37, %v5218_v29  ;;  %v3923_v23 = vcvt.s32.f32 %v2003_v46  ;;  %v2139_v5 = vunpack.c.3.s8 %v1371_v61 }
 0x167   :  { %6772 = vmatpush.bf16.msrb.mxu1 %v5659_v27  ;;  %v1835_v27 = vunpack.c.1.s8 %v1299_v50  ;;  %v5546_v38 = vcvt.s32.f32 %v3626_v57  ;;  %6752 = vmatpush.bf16.msrb.mxu3 %v6442_v35  ;;  %v3931_v52 = vcvt.s32.f32 %v2011_v6  ;;  %v3602_v40 = vunpack.c.2.s8 %v1738_v24  ;;  %v10605_v17 = vpop.f32.mrf.mxu3 }
 0x168   :  { %v3610_v2 = vunpack.c.3.s8 %v1738_v24  ;;  %v4059_v10 = vcvt.s32.f32 %v2139_v5  ;;  %v1811_v33 = vunpack.c.2.s8 %v1291_v44  ;;  %v1819_v8 = vunpack.c.3.s8 %v1291_v44 }
 0x169   :  { %6760 = vmatpush.bf16.msrb.mxu0 %v6546_v34  ;;  %v3755_v19 = vcvt.s32.f32 %v1835_v27  ;;  %v6530_v60 = vpack.c.bf16 %v5546_v38, %v5538_v51  ;;  %v5346_v34 = vcvt.s32.f32 %v3426_v53  ;;  %6740 = vmatpush.bf16.msra.mxu2 %v6370_v56  ;;  %v5723_v9 = vpack.c.bf16 %v3931_v52, %v3923_v23 }
 0x16a   :  { %v5522_v1 = vcvt.s32.f32 %v3602_v40  ;;  %v5530_v32 = vcvt.s32.f32 %v3610_v2  ;;  %v1987_v48 = vunpack.c.0.s8 %v1339_v28  ;;  %v1995_v7 = vunpack.c.1.s8 %v1339_v28 }
 0x16b   :  { %6773 = vmatpush.bf16.msrb.mxu1 %v5651_v12  ;;  %v5635_v50 = vpack.c.bf16 %v3755_v19, %v3747_v42  ;;  %v6434_v47 = vpack.c.bf16 %v5354_v31, %v5346_v34  ;;  %v4051_v12 = vcvt.s32.f32 %v2131_v43  ;;  %v3731_v26 = vcvt.s32.f32 %v1811_v33 }
 0x16c   :  { %v3739_v39 = vcvt.s32.f32 %v1819_v8  ;;  %v6522_v11 = vpack.c.bf16 %v5530_v32, %v5522_v1  ;;  %v3907_v59 = vcvt.s32.f32 %v1987_v48  ;;  %v2123_v14 = vunpack.c.1.s8 %v1371_v61 }
 0x16d   :  { %6761 = vmatpush.bf16.msrb.mxu0 %v6538_v62  ;;  %6753 = vmatpush.bf16.msrb.mxu3 %v6434_v47  ;;  %v5787_v0 = vpack.c.bf16 %v4059_v10, %v4051_v12  ;;  %v2115_v62 = vunpack.c.0.s8 %v1371_v61  ;;  %v3586_v4 = vunpack.c.0.s8 %v1738_v24  ;;  %v3594_v57 = vunpack.c.1.s8 %v1738_v24  ;;  %v1730_v61 = vld [vmem:[%s12559_s1 + $0xe00] sm:$0xff] }
 0x16e   :  { %6785 = vmatpush.bf16.msrb.mxu2 %v5723_v9  ;;  %v5627_v13 = vpack.c.bf16 %v3739_v39, %v3731_v26  ;;  %v4043_v27 = vcvt.s32.f32 %v2123_v14  ;;  %v1795_v21 = vunpack.c.0.s8 %v1291_v44  ;;  %v1803_v28 = vunpack.c.1.s8 %v1291_v44 }
 0x16f   :  { %6774 = vmatpush.bf16.msrb.mxu1 %v5643_v41  ;;  %v3915_v41 = vcvt.s32.f32 %v1995_v7  ;;  %v4035_v54 = vcvt.s32.f32 %v2115_v62  ;;  %v5506_v35 = vcvt.s32.f32 %v3586_v4  ;;  %v5514_v38 = vcvt.s32.f32 %v3594_v57  ;;  %v6588_v8 = vpop.f32.mrf.mxu3 }
 0x170   :  { %v1971_v42 = vunpack.c.2.s8 %v1331_v18  ;;  %v1979_v20 = vunpack.c.3.s8 %v1331_v18  ;;  %v3715_v29 = vcvt.s32.f32 %v1795_v21  ;;  %v3723_v53 = vcvt.s32.f32 %v1803_v28 }
 0x171   :  { %6762 = vmatpush.bf16.msrb.mxu0 %v6530_v60  ;;  %6798 = vmatpush.bf16.msra.mxu3 %v5787_v0  ;;  %v5715_v51 = vpack.c.bf16 %v3915_v41, %v3907_v59  ;;  %v5779_v19 = vpack.c.bf16 %v4043_v27, %v4035_v54  ;;  %v2099_v63 = vunpack.c.2.s8 %v1363_v16  ;;  %v1283_v60 = vld [vmem:[%s12559_s1 + $0x8] sm:$0xff]  ;;  %v6514_v37 = vpack.c.bf16 %v5514_v38, %v5506_v35 }
 0x172   :  { %v3891_v46 = vcvt.s32.f32 %v1971_v42  ;;  %v3899_v6 = vcvt.s32.f32 %v1979_v20  ;;  %v2107_v24 = vunpack.c.3.s8 %v1363_v16  ;;  %v3570_v31 = vunpack.c.2.s8 %v1730_v61  ;;  %v1403_v0 = vld [vmem:[%s12559_s1 + $0x3c8] sm:$0xff] }
 0x173   :  { %6775 = vmatpush.bf16.msrb.mxu1 %v5635_v50  ;;  %6786 = vmatpush.bf16.msrb.mxu2 %v5715_v51  ;;  %v5619_v50 = vpack.c.bf16 %v3723_v53, %v3715_v29  ;;  %v4019_v34 = vcvt.s32.f32 %v2099_v63  ;;  %v3578_v43 = vunpack.c.3.s8 %v1730_v61  ;;  %v1779_v23 = vunpack.c.2.s8 %v1283_v60  ;;  %v1435_v59 = vld [vmem:[%s12559_s1 + $0x4c8] sm:$0xff] }
 0x174   :  { %v5707_v44 = vpack.c.bf16 %v3899_v6, %v3891_v46  ;;  %v4027_v56 = vcvt.s32.f32 %v2107_v24  ;;  %v1787_v52 = vunpack.c.3.s8 %v1283_v60  ;;  %v5490_v5 = vcvt.s32.f32 %v3570_v31  ;;  %v1323_v51 = vld [vmem:[%s12559_s1 + $0x148] sm:$0xff] }
 0x175   :  { %6763 = vmatpush.bf16.msrb.mxu0 %v6522_v11  ;;  %6799 = vmatpush.bf16.msra.mxu3 %v5779_v19  ;;  %v5498_v47 = vcvt.s32.f32 %v3578_v43  ;;  %v1955_v12 = vunpack.c.0.s8 %v1331_v18  ;;  %v1963_v40 = vunpack.c.1.s8 %v1331_v18  ;;  %v3699_v9 = vcvt.s32.f32 %v1779_v23  ;;  %v1355_v38 = vld [vmem:[%s12559_s1 + $0x248] sm:$0xff] }
 0x176   :  { %v5771_v2 = vpack.c.bf16 %v4027_v56, %v4019_v34  ;;  %v3707_v10 = vcvt.s32.f32 %v1787_v52  ;;  %v2083_v33 = vunpack.c.0.s8 %v1363_v16  ;;  %v2091_v7 = vunpack.c.1.s8 %v1363_v16 }
 0x177   :  { %6776 = vmatpush.bf16.msrb.mxu1 %v5627_v13  ;;  %6787 = vmatpush.bf16.msrb.mxu2 %v5707_v44  ;;  %v6506_v1 = vpack.c.bf16 %v5498_v47, %v5490_v5  ;;  %v3875_v32 = vcvt.s32.f32 %v1955_v12  ;;  %v3883_v48 = vcvt.s32.f32 %v1963_v40  ;;  %v3554_v62 = vunpack.c.0.s8 %v1730_v61 }
 0x178   :  { %v5611_v26 = vpack.c.bf16 %v3707_v10, %v3699_v9  ;;  %v4003_v39 = vcvt.s32.f32 %v2083_v33  ;;  %v3562_v11 = vunpack.c.1.s8 %v1730_v61  ;;  %v4011_v14 = vcvt.s32.f32 %v2091_v7 }
 0x179   :  { %6764 = vmatpush.bf16.msrb.mxu0 %v6514_v37  ;;  %6800 = vmatpush.bf16.msra.mxu3 %v5771_v2  ;;  %v5699_v41 = vpack.c.bf16 %v3883_v48, %v3875_v32  ;;  %v1763_v18 = vunpack.c.0.s8 %v1283_v60  ;;  %v1771_v13 = vunpack.c.1.s8 %v1283_v60  ;;  %v5474_v54 = vcvt.s32.f32 %v3554_v62  ;;  %v10628_v2 = vld [vmem:[%s12559_s1 + $0x388] sm:$0xff] }
 0x17a   :  { %v5482_v4 = vcvt.s32.f32 %v3562_v11  ;;  %v2259_v57 = vunpack.c.2.s8 %v1403_v0  ;;  %v2267_v16 = vunpack.c.3.s8 %v1403_v0  ;;  %v5763_v27 = vpack.c.bf16 %v4011_v14, %v4003_v39  ;;  %v12657_v32 = vld [vmem:[#allocation5_spill] sm:$0xff] }
 0x17b   :  { %6777 = vmatpush.bf16.msrb.mxu1 %v5619_v50  ;;  %6788 = vmatpush.bf16.msrb.mxu2 %v5699_v41  ;;  %v3683_v21 = vcvt.s32.f32 %v1763_v18  ;;  %v3691_v28 = vcvt.s32.f32 %v1771_v13  ;;  %v2387_v35 = vunpack.c.2.s8 %v1435_v59  ;;  %v2395_v19 = vunpack.c.3.s8 %v1435_v59  ;;  %v1315_v41 = vld [vmem:[%s12559_s1 + $0x108] sm:$0xff] }
 0x17c   :  { %v6498_v42 = vpack.c.bf16 %v5482_v4, %v5474_v54  ;;  %v4179_v20 = vcvt.s32.f32 %v2259_v57  ;;  %v4187_v61 = vcvt.s32.f32 %v2267_v16  ;;  %v1939_v63 = vunpack.c.2.s8 %v1323_v51  ;;  %v1347_v4 = vld [vmem:[%s12559_s1 + $0x208] sm:$0xff] }
 0x17d   :  { %6765 = vmatpush.bf16.msrb.mxu0 %v6506_v1  ;;  %6801 = vmatpush.bf16.msra.mxu3 %v5763_v27  ;;  %v5603_v29 = vpack.c.bf16 %v3691_v28, %v3683_v21  ;;  %v4307_v53 = vcvt.s32.f32 %v2387_v35  ;;  %v1947_v60 = vunpack.c.3.s8 %v1323_v51  ;;  %v4315_v46 = vcvt.s32.f32 %v2395_v19  ;;  %v1427_v1 = vld [vmem:[%s12559_s1 + $0x488] sm:$0xff] }
 0x17e   :  { %v5851_v37 = vpack.c.bf16 %v4187_v61, %v4179_v20  ;;  %v2067_v6 = vunpack.c.2.s8 %v1355_v38  ;;  %v2075_v24 = vunpack.c.3.s8 %v1355_v38  ;;  %v3859_v50 = vcvt.s32.f32 %v1939_v63  ;;  %v1239_v21 = vpop.f32.mrf.mxu0 }
 0x17f   :  { %6778 = vmatpush.bf16.msrb.mxu1 %v5611_v26  ;;  %v3867_v34 = vcvt.s32.f32 %v1947_v60  ;;  %v2243_v31 = vunpack.c.0.s8 %v1403_v0  ;;  %v2251_v43 = vunpack.c.1.s8 %v1403_v0  ;;  %v5915_v44 = vpack.c.bf16 %v4315_v46, %v4307_v53  ;;  %v1259_v20 = vpop.f32.mrf.mxu1 }
 0x180   :  { %v3987_v56 = vcvt.s32.f32 %v2067_v6  ;;  %v3995_v23 = vcvt.s32.f32 %v2075_v24  ;;  %v2371_v52 = vunpack.c.0.s8 %v1435_v59  ;;  %v2379_v40 = vunpack.c.1.s8 %v1435_v59 }
 0x181   :  { %6766 = vmatpush.bf16.msrb.mxu0 %v6498_v42  ;;  %v5691_v5 = vpack.c.bf16 %v3867_v34, %v3859_v50  ;;  %v4163_v47 = vcvt.s32.f32 %v2243_v31  ;;  %v4171_v12 = vcvt.s32.f32 %v2251_v43  ;;  %v1923_v33 = vunpack.c.0.s8 %v1323_v51 }
 0x182   :  { %v5755_v9 = vpack.c.bf16 %v3995_v23, %v3987_v56  ;;  %v4291_v10 = vcvt.s32.f32 %v2371_v52  ;;  %v1931_v8 = vunpack.c.1.s8 %v1323_v51  ;;  %v4299_v7 = vcvt.s32.f32 %v2379_v40  ;;  %v1467_v52 = vld [vmem:[%s12559_s1 + $0x5c8] sm:$0xff] }
 0x183   :  { %6779 = vmatpush.bf16.msrb.mxu1 %v5603_v29  ;;  %6789 = vmatpush.bf16.msrb.mxu2 %v5691_v5  ;;  %v5843_v48 = vpack.c.bf16 %v4171_v12, %v4163_v47  ;;  %v2051_v0 = vunpack.c.0.s8 %v1355_v38  ;;  %v2059_v26 = vunpack.c.1.s8 %v1355_v38  ;;  %v3843_v39 = vcvt.s32.f32 %v1923_v33 }
 0x184   :  { %6802 = vmatpush.bf16.msra.mxu3 %v5755_v9  ;;  %v3851_v62 = vcvt.s32.f32 %v1931_v8  ;;  %v2227_v11 = vunpack.c.2.s8 %v10628_v2  ;;  %v2235_v59 = vunpack.c.3.s8 %v10628_v2  ;;  %v5907_v14 = vpack.c.bf16 %v4299_v7, %v4291_v10  ;;  %v1499_v8 = vld [vmem:[%s12559_s1 + $0x6c8] sm:$0xff] }
 0x185   :  { %6811 = vmatpush.bf16.msra.mxu0 %v5851_v37  ;;  %v3971_v18 = vcvt.s32.f32 %v2051_v0  ;;  %v3979_v13 = vcvt.s32.f32 %v2059_v26  ;;  %v2355_v54 = vunpack.c.2.s8 %v1427_v1  ;;  %v2363_v27 = vunpack.c.3.s8 %v1427_v1  ;;  %v1387_v26 = vld [vmem:[%s12559_s1 + $0x348] sm:$0xff] }
 0x186   :  { %6780 = vmatmul.bf16.vlgmr.msrb.gmra.mxu1 %v12657_v32  ;;  %v5683_v57 = vpack.c.bf16 %v3851_v62, %v3843_v39  ;;  %v4147_v16 = vcvt.s32.f32 %v2227_v11  ;;  %v4155_v51 = vcvt.s32.f32 %v2235_v59  ;;  %v1907_v38 = vunpack.c.2.s8 %v1315_v41 }
 0x187   :  { %6824 = vmatpush.bf16.msra.mxu1 %v5915_v44  ;;  %v5747_v28 = vpack.c.bf16 %v3979_v13, %v3971_v18  ;;  %v4275_v35 = vcvt.s32.f32 %v2355_v54  ;;  %v1915_v42 = vunpack.c.3.s8 %v1315_v41  ;;  %v4283_v19 = vcvt.s32.f32 %v2363_v27  ;;  %v6599_v31 = vpop.f32.mrf.mxu3  ;;  %v1279_v27 = vpop.f32.mrf.mxu2 }
 0x188   :  { %6790 = vmatpush.bf16.msrb.mxu2 %v5683_v57  ;;  %v5835_v61 = vpack.c.bf16 %v4155_v51, %v4147_v16  ;;  %v2035_v29 = vunpack.c.2.s8 %v1347_v4  ;;  %v2043_v53 = vunpack.c.3.s8 %v1347_v4  ;;  %v3827_v63 = vcvt.s32.f32 %v1907_v38 }
 0x189   :  { %6812 = vmatpush.bf16.msra.mxu0 %v5843_v48  ;;  %6803 = vmatpush.bf16.msra.mxu3 %v5747_v28  ;;  %v3835_v60 = vcvt.s32.f32 %v1915_v42  ;;  %v10642_v37 = vpack.c.bf16 %v1239_v21, %v1239_v21  ;;  %v10644_v46 = vpack.c.bf16 %v1259_v20, %v1259_v20  ;;  %v5899_v6 = vpack.c.bf16 %v4283_v19, %v4275_v35 }
 0x18a   :  { %v3955_v24 = vcvt.s32.f32 %v2035_v29  ;;  %v3963_v50 = vcvt.s32.f32 %v2043_v53  ;;  %v2211_v34 = vunpack.c.0.s8 %v10628_v2  ;;  %v2219_v44 = vunpack.c.1.s8 %v10628_v2 }
 0x18b   :  { %6825 = vmatpush.bf16.msra.mxu1 %v5907_v14  ;;  %v5675_v43 = vpack.c.bf16 %v3835_v60, %v3827_v63  ;;  %v2339_v56 = vunpack.c.0.s8 %v1427_v1  ;;  %v2347_v23 = vunpack.c.1.s8 %v1427_v1  ;;  %6741 = vmatmul.bf16.vlgmr.msra.gmra.mxu2 %v10642_v37  ;;  %v1891_v12 = vunpack.c.0.s8 %v1315_v41 }
 0x18c   :  { %6754 = vmatmul.bf16.vlgmr.msrb.gmra.mxu3 %v10644_v46  ;;  %v5739_v5 = vpack.c.bf16 %v3963_v50, %v3955_v24  ;;  %v4131_v47 = vcvt.s32.f32 %v2211_v34  ;;  %v1899_v40 = vunpack.c.1.s8 %v1315_v41  ;;  %v4139_v9 = vcvt.s32.f32 %v2219_v44  ;;  %v1419_v41 = vld [vmem:[%s12559_s1 + $0x448] sm:$0xff] }
 0x18d   :  { %6813 = vmatpush.bf16.msra.mxu0 %v5835_v61  ;;  %6791 = vmatpush.bf16.msrb.mxu2 %v5675_v43  ;;  %v4259_v10 = vcvt.s32.f32 %v2339_v56  ;;  %v4267_v33 = vcvt.s32.f32 %v2347_v23  ;;  %v2019_v2 = vunpack.c.0.s8 %v1347_v4  ;;  %v3811_v1 = vcvt.s32.f32 %v1891_v12  ;;  %v1459_v23 = vld [vmem:[%s12559_s1 + $0x588] sm:$0xff] }
 0x18e   :  { %6804 = vmatpush.bf16.msra.mxu3 %v5739_v5  ;;  %v3819_v48 = vcvt.s32.f32 %v1899_v40  ;;  %v2027_v7 = vunpack.c.1.s8 %v1347_v4  ;;  %v2515_v0 = vunpack.c.2.s8 %v1467_v52  ;;  %v5827_v39 = vpack.c.bf16 %v4139_v9, %v4131_v47 }
 0x18f   :  { %6826 = vmatpush.bf16.msra.mxu1 %v5899_v6  ;;  %v5891_v62 = vpack.c.bf16 %v4267_v33, %v4259_v10  ;;  %v3939_v11 = vcvt.s32.f32 %v2019_v2  ;;  %v2523_v59 = vunpack.c.3.s8 %v1467_v52  ;;  %v2643_v54 = vunpack.c.2.s8 %v1499_v8  ;;  %v6601_v42 = vpop.f32.mrf.mxu3 }
 0x190   :  { %v5667_v14 = vpack.c.bf16 %v3819_v48, %v3811_v1  ;;  %v3947_v18 = vcvt.s32.f32 %v2027_v7  ;;  %v4435_v13 = vcvt.s32.f32 %v2515_v0  ;;  %v2651_v57 = vunpack.c.3.s8 %v1499_v8  ;;  %v1379_v0 = vld [vmem:[%s12559_s1 + $0x308] sm:$0xff] }
 0x191   :  { %6814 = vmatpush.bf16.msra.mxu0 %v5827_v39  ;;  %v4443_v4 = vcvt.s32.f32 %v2523_v59  ;;  %v10663_v16 = vadd.f32 %v6599_v31, %v10605_v17  ;;  %v2195_v51 = vunpack.c.2.s8 %v1387_v26  ;;  %v4563_v28 = vcvt.s32.f32 %v2643_v54  ;;  %v1411_v59 = vld [vmem:[%s12559_s1 + $0x408] sm:$0xff] }
 0x192   :  { %6792 = vmatpush.bf16.msrb.mxu2 %v5667_v14  ;;  %v5731_v21 = vpack.c.bf16 %v3947_v18, %v3939_v11  ;;  %v2203_v35 = vunpack.c.3.s8 %v1387_v26  ;;  %v2323_v38 = vunpack.c.2.s8 %v1419_v41  ;;  %v4571_v61 = vcvt.s32.f32 %v2651_v57 }
 0x193   :  { %6827 = vmatpush.bf16.msra.mxu1 %v5891_v62  ;;  %v5979_v20 = vpack.c.bf16 %v4443_v4, %v4435_v13  ;;  %v4115_v19 = vcvt.s32.f32 %v2195_v51  ;;  %v2331_v29 = vunpack.c.3.s8 %v1419_v41  ;;  %v10665_v60 = vpack.c.bf16 %v1279_v27, %v1279_v27  ;;  %v12658_v27 = vld [vmem:[#allocation6_spill] sm:$0xff] }
 0x194   :  { %6805 = vmatpush.bf16.msra.mxu3 %v5731_v21  ;;  %v4123_v53 = vcvt.s32.f32 %v2203_v35  ;;  %v4243_v63 = vcvt.s32.f32 %v2323_v38  ;;  %v2499_v6 = vunpack.c.0.s8 %v1467_v52  ;;  %v6043_v17 = vpack.c.bf16 %v4571_v61, %v4563_v28 }
 0x195   :  { %v4251_v24 = vcvt.s32.f32 %v2331_v29  ;;  %v2507_v50 = vunpack.c.1.s8 %v1467_v52  ;;  %v2627_v34 = vunpack.c.0.s8 %v1499_v8  ;;  %v2635_v44 = vunpack.c.1.s8 %v1499_v8  ;;  %6767 = vmatmul.bf16.vlgmr.msrb.gmra.mxu0 %v10665_v60  ;;  %v1491_v52 = vld [vmem:[%s12559_s1 + $0x688] sm:$0xff] }
 0x196   :  { %6837 = vmatpush.bf16.msra.mxu2 %v5979_v20  ;;  %v5819_v31 = vpack.c.bf16 %v4123_v53, %v4115_v19  ;;  %v4419_v43 = vcvt.s32.f32 %v2499_v6  ;;  %v2179_v56 = vunpack.c.0.s8 %v1387_v26  ;;  %v2187_v40 = vunpack.c.1.s8 %v1387_v26 }
 0x197   :  { %v5883_v5 = vpack.c.bf16 %v4251_v24, %v4243_v63  ;;  %v4427_v47 = vcvt.s32.f32 %v2507_v50  ;;  %v4547_v12 = vcvt.s32.f32 %v2627_v34  ;;  %v4555_v9 = vcvt.s32.f32 %v2635_v44 }
 0x198   :  { %6850 = vmatpush.bf16.msrb.mxu3 %v6043_v17  ;;  %6815 = vmatpush.bf16.msra.mxu0 %v5819_v31  ;;  %v4099_v10 = vcvt.s32.f32 %v2179_v56  ;;  %v2307_v33 = vunpack.c.0.s8 %v1419_v41  ;;  %v2315_v2 = vunpack.c.1.s8 %v1419_v41  ;;  %v4107_v1 = vcvt.s32.f32 %v2187_v40  ;;  %v1531_v31 = vld [vmem:[%s12559_s1 + $0x7c8] sm:$0xff] }
 0x199   :  { %6828 = vmatpush.bf16.msra.mxu1 %v5883_v5  ;;  %v5971_v8 = vpack.c.bf16 %v4427_v47, %v4419_v43  ;;  %v2483_v48 = vunpack.c.2.s8 %v1459_v23  ;;  %v2491_v7 = vunpack.c.3.s8 %v1459_v23  ;;  %v6035_v39 = vpack.c.bf16 %v4555_v9, %v4547_v12 }
 0x19a   :  { %v4227_v26 = vcvt.s32.f32 %v2307_v33  ;;  %v4235_v62 = vcvt.s32.f32 %v2315_v2  ;;  %v2611_v11 = vunpack.c.2.s8 %v1491_v52  ;;  %v5811_v14 = vpack.c.bf16 %v4107_v1, %v4099_v10 }
 0x19b   :  { %6838 = vmatpush.bf16.msra.mxu2 %v5971_v8  ;;  %v4403_v41 = vcvt.s32.f32 %v2483_v48  ;;  %v4411_v18 = vcvt.s32.f32 %v2491_v7  ;;  %v2619_v13 = vunpack.c.3.s8 %v1491_v52  ;;  %v2163_v57 = vunpack.c.2.s8 %v1379_v0  ;;  %v1451_v8 = vld [vmem:[%s12559_s1 + $0x548] sm:$0xff] }
 0x19c   :  { %6806 = vmatmul.bf16.vlgmr.msra.gmra.mxu3 %v12639_v25  ;;  %v5875_v54 = vpack.c.bf16 %v4235_v62, %v4227_v26  ;;  %v4531_v4 = vcvt.s32.f32 %v2611_v11  ;;  %v2171_v51 = vunpack.c.3.s8 %v1379_v0  ;;  %6793 = vmatmul.bf16.vlgmr.msrb.gmra.mxu2 %v12658_v27  ;;  %v2291_v35 = vunpack.c.2.s8 %v1411_v59 }
 0x19d   :  { %6851 = vmatpush.bf16.msrb.mxu3 %v6035_v39  ;;  %6816 = vmatpush.bf16.msra.mxu0 %v5811_v14  ;;  %v5963_v21 = vpack.c.bf16 %v4411_v18, %v4403_v41  ;;  %v4539_v28 = vcvt.s32.f32 %v2619_v13  ;;  %v2299_v38 = vunpack.c.3.s8 %v1411_v59  ;;  %v4083_v42 = vcvt.s32.f32 %v2163_v57  ;;  %v1483_v39 = vld [vmem:[%s12559_s1 + $0x648] sm:$0xff] }
 0x19e   :  { %6829 = vmatpush.bf16.msra.mxu1 %v5875_v54  ;;  %v4091_v20 = vcvt.s32.f32 %v2171_v51  ;;  %v2467_v61 = vunpack.c.0.s8 %v1459_v23  ;;  %v2475_v19 = vunpack.c.1.s8 %v1459_v23  ;;  %v4211_v53 = vcvt.s32.f32 %v2291_v35  ;;  %v1563_v23 = vld [vmem:[%s12559_s1 + $0x8c8] sm:$0xff] }
 0x19f   :  { %6839 = vmatpush.bf16.msra.mxu2 %v5963_v21  ;;  %v6027_v29 = vpack.c.bf16 %v4539_v28, %v4531_v4  ;;  %v4219_v63 = vcvt.s32.f32 %v2299_v38  ;;  %v2595_v6 = vunpack.c.0.s8 %v1491_v52  ;;  %v2603_v34 = vunpack.c.1.s8 %v1491_v52 }
 0x1a0   :  { %v5803_v17 = vpack.c.bf16 %v4091_v20, %v4083_v42  ;;  %v4387_v24 = vcvt.s32.f32 %v2467_v61  ;;  %v4395_v50 = vcvt.s32.f32 %v2475_v19  ;;  %v2147_v56 = vunpack.c.0.s8 %v1379_v0 }
 0x1a1   :  { %6852 = vmatpush.bf16.msrb.mxu3 %v6027_v29  ;;  %v5867_v43 = vpack.c.bf16 %v4219_v63, %v4211_v53  ;;  %v4515_v44 = vcvt.s32.f32 %v2595_v6  ;;  %v2155_v5 = vunpack.c.1.s8 %v1379_v0  ;;  %v4523_v12 = vcvt.s32.f32 %v2603_v34  ;;  %v1523_v34 = vld [vmem:[%s12559_s1 + $0x788] sm:$0xff] }
 0x1a2   :  { %6817 = vmatpush.bf16.msra.mxu0 %v5803_v17  ;;  %v5955_v47 = vpack.c.bf16 %v4395_v50, %v4387_v24  ;;  %v2275_v40 = vunpack.c.0.s8 %v1411_v59  ;;  %v2283_v9 = vunpack.c.1.s8 %v1411_v59  ;;  %v4067_v52 = vcvt.s32.f32 %v2147_v56  ;;  %v10696_v62 = vpop.f32.mrf.mxu1 }
 0x1a3   :  { %6830 = vmatpush.bf16.msra.mxu1 %v5867_v43  ;;  %v4075_v10 = vcvt.s32.f32 %v2155_v5  ;;  %v2771_v33 = vunpack.c.2.s8 %v1531_v31  ;;  %v2779_v2 = vunpack.c.3.s8 %v1531_v31  ;;  %v6019_v1 = vpack.c.bf16 %v4523_v12, %v4515_v44  ;;  %v10694_v26 = vpop.f32.mrf.mxu0  ;;  %v10707_v5 = vld [vmem:[%s12559_s1 + $0x888] sm:$0xff] }
 0x1a4   :  { %6840 = vmatpush.bf16.msra.mxu2 %v5955_v47  ;;  %v4195_v48 = vcvt.s32.f32 %v2275_v40  ;;  %v4203_v7 = vcvt.s32.f32 %v2283_v9  ;;  %v2899_v0 = vunpack.c.2.s8 %v1563_v23  ;;  %v2907_v41 = vunpack.c.3.s8 %v1563_v23 }
 0x1a5   :  { %v5795_v11 = vpack.c.bf16 %v4075_v10, %v4067_v52  ;;  %v4691_v59 = vcvt.s32.f32 %v2771_v33  ;;  %v4699_v14 = vcvt.s32.f32 %v2779_v2  ;;  %6853 = vmatpush.bf16.msrb.mxu3 %v6019_v1  ;;  %v2451_v54 = vunpack.c.2.s8 %v1451_v8 }
 0x1a6   :  { %v5859_v18 = vpack.c.bf16 %v4203_v7, %v4195_v48  ;;  %v4819_v13 = vcvt.s32.f32 %v2899_v0  ;;  %v2459_v4 = vunpack.c.3.s8 %v1451_v8  ;;  %v4827_v51 = vcvt.s32.f32 %v2907_v41  ;;  %v1443_v48 = vld [vmem:[%s12559_s1 + $0x508] sm:$0xff] }
 0x1a7   :  { %6818 = vmatpush.bf16.msra.mxu0 %v5795_v11  ;;  %v6107_v57 = vpack.c.bf16 %v4699_v14, %v4691_v59  ;;  %v2579_v21 = vunpack.c.2.s8 %v1483_v39  ;;  %v2587_v28 = vunpack.c.3.s8 %v1483_v39  ;;  %v4371_v35 = vcvt.s32.f32 %v2451_v54  ;;  %v10698_v63 = vpop.f32.mrf.mxu3 }
 0x1a8   :  { %6831 = vmatpush.bf16.msra.mxu1 %v5859_v18  ;;  %v4379_v38 = vcvt.s32.f32 %v2459_v4  ;;  %v2755_v42 = vunpack.c.0.s8 %v1531_v31  ;;  %v2763_v20 = vunpack.c.1.s8 %v1531_v31  ;;  %v6171_v61 = vpack.c.bf16 %v4827_v51, %v4819_v13 }
 0x1a9   :  { %v4499_v19 = vcvt.s32.f32 %v2579_v21  ;;  %v4507_v29 = vcvt.s32.f32 %v2587_v28  ;;  %v2883_v53 = vunpack.c.0.s8 %v1563_v23  ;;  %v2891_v50 = vunpack.c.1.s8 %v1563_v23 }
 0x1aa   :  { %v5947_v6 = vpack.c.bf16 %v4379_v38, %v4371_v35  ;;  %v4675_v17 = vcvt.s32.f32 %v2755_v42  ;;  %v4683_v24 = vcvt.s32.f32 %v2763_v20  ;;  %6819 = vmatmul.bf16.vlgmr.msra.gmra.mxu0 %v9894_v55  ;;  %v2435_v44 = vunpack.c.0.s8 %v1451_v8  ;;  %v10709_v47 = vpop.f32.mrf.mxu2  ;;  %v6627_v10 = vpop.f32.mrf.mxu1 }
 0x1ab   :  { %6863 = vmatpush.bf16.msrb.mxu0 %v6107_v57  ;;  %v6011_v43 = vpack.c.bf16 %v4507_v29, %v4499_v19  ;;  %v4803_v31 = vcvt.s32.f32 %v2883_v53  ;;  %v2443_v56 = vunpack.c.1.s8 %v1451_v8  ;;  %6832 = vmatmul.bf16.vlgmr.msra.gmra.mxu1 %v9969_v58  ;;  %v4811_v12 = vcvt.s32.f32 %v2891_v50  ;;  %v6614_v52 = vpop.f32.mrf.mxu0 }
 0x1ac   :  { %6876 = vmatpush.bf16.msrb.mxu1 %v6171_v61  ;;  %6841 = vmatpush.bf16.msra.mxu2 %v5947_v6  ;;  %v6099_v23 = vpack.c.bf16 %v4683_v24, %v4675_v17  ;;  %v2563_v40 = vunpack.c.0.s8 %v1483_v39  ;;  %v2571_v9 = vunpack.c.1.s8 %v1483_v39  ;;  %v4355_v33 = vcvt.s32.f32 %v2435_v44  ;;  %v1475_v39 = vld [vmem:[%s12559_s1 + $0x608] sm:$0xff] }
 0x1ad   :  { %6854 = vmatpush.bf16.msrb.mxu3 %v6011_v43  ;;  %v4363_v2 = vcvt.s32.f32 %v2443_v56  ;;  %v2739_v8 = vunpack.c.2.s8 %v1523_v34  ;;  %v2747_v1 = vunpack.c.3.s8 %v1523_v34  ;;  %v6163_v7 = vpack.c.bf16 %v4811_v12, %v4803_v31 }
 0x1ae   :  { %v4483_v0 = vcvt.s32.f32 %v2563_v40  ;;  %v4491_v11 = vcvt.s32.f32 %v2571_v9  ;;  %v2867_v59 = vunpack.c.2.s8 %v10707_v5  ;;  %v2875_v13 = vunpack.c.3.s8 %v10707_v5 }
 0x1af   :  { %6864 = vmatpush.bf16.msrb.mxu0 %v6099_v23  ;;  %v5939_v14 = vpack.c.bf16 %v4363_v2, %v4355_v33  ;;  %v4659_v41 = vcvt.s32.f32 %v2739_v8  ;;  %v4667_v18 = vcvt.s32.f32 %v2747_v1  ;;  %v2419_v57 = vunpack.c.2.s8 %v1443_v48  ;;  %v6653_v42 = vpop.f32.mrf.mxu3  ;;  %v1595_v23 = vld [vmem:[%s12559_s1 + $0x9c8] sm:$0xff] }
 0x1b0   :  { %6877 = vmatpush.bf16.msrb.mxu1 %v6163_v7  ;;  %v6003_v54 = vpack.c.bf16 %v4491_v11, %v4483_v0  ;;  %v4787_v4 = vcvt.s32.f32 %v2867_v59  ;;  %v2427_v51 = vunpack.c.3.s8 %v1443_v48  ;;  %v4795_v28 = vcvt.s32.f32 %v2875_v13  ;;  %v1515_v7 = vld [vmem:[%s12559_s1 + $0x748] sm:$0xff] }
 0x1b1   :  { %6842 = vmatpush.bf16.msra.mxu2 %v5939_v14  ;;  %v6091_v21 = vpack.c.bf16 %v4667_v18, %v4659_v41  ;;  %v2547_v35 = vunpack.c.2.s8 %v1475_v39  ;;  %v2555_v38 = vunpack.c.3.s8 %v1475_v39  ;;  %v4339_v20 = vcvt.s32.f32 %v2419_v57 }
 0x1b2   :  { %6855 = vmatpush.bf16.msrb.mxu3 %v6003_v54  ;;  %v4347_v61 = vcvt.s32.f32 %v2427_v51  ;;  %v6613_v19 = vadd.f32 %v10694_v26, %v10663_v16  ;;  %v2723_v29 = vunpack.c.0.s8 %v1523_v34  ;;  %v6155_v53 = vpack.c.bf16 %v4795_v28, %v4787_v4  ;;  %v6640_v50 = vpop.f32.mrf.mxu2 }
 0x1b3   :  { %6865 = vmatpush.bf16.msrb.mxu0 %v6091_v21  ;;  %v4467_v6 = vcvt.s32.f32 %v2547_v35  ;;  %v4475_v17 = vcvt.s32.f32 %v2555_v38  ;;  %v2731_v24 = vunpack.c.1.s8 %v1523_v34  ;;  %v2851_v56 = vunpack.c.0.s8 %v10707_v5 }
 0x1b4   :  { %v5931_v43 = vpack.c.bf16 %v4347_v61, %v4339_v20  ;;  %v6626_v31 = vadd.f32 %v10696_v62, %v6613_v19  ;;  %v4643_v44 = vcvt.s32.f32 %v2723_v29  ;;  %6878 = vmatpush.bf16.msrb.mxu1 %v6155_v53  ;;  %v2859_v26 = vunpack.c.1.s8 %v10707_v5  ;;  %v1627_v62 = vld [vmem:[%s12559_s1 + $0xac8] sm:$0xff] }
 0x1b5   :  { %v5995_v12 = vpack.c.bf16 %v4475_v17, %v4467_v6  ;;  %v4651_v16 = vcvt.s32.f32 %v2731_v24  ;;  %v2403_v40 = vunpack.c.0.s8 %v1443_v48  ;;  %v4771_v9 = vcvt.s32.f32 %v2851_v56 }
 0x1b6   :  { %6843 = vmatpush.bf16.msra.mxu2 %v5931_v43  ;;  %v2411_v34 = vunpack.c.1.s8 %v1443_v48  ;;  %v2531_v52 = vunpack.c.0.s8 %v1475_v39  ;;  %v2539_v10 = vunpack.c.1.s8 %v1475_v39  ;;  %v4779_v2 = vcvt.s32.f32 %v2859_v26  ;;  %v1547_v48 = vld [vmem:[%s12559_s1 + $0x848] sm:$0xff] }
 0x1b7   :  { %6856 = vmatpush.bf16.msrb.mxu3 %v5995_v12  ;;  %v6083_v33 = vpack.c.bf16 %v4651_v16, %v4643_v44  ;;  %v4323_v8 = vcvt.s32.f32 %v2403_v40  ;;  %v3027_v1 = vunpack.c.2.s8 %v1595_v23  ;;  %v3035_v59 = vunpack.c.3.s8 %v1595_v23 }
 0x1b8   :  { %v4331_v5 = vcvt.s32.f32 %v2411_v34  ;;  %v4451_v0 = vcvt.s32.f32 %v2531_v52  ;;  %v4459_v11 = vcvt.s32.f32 %v2539_v10  ;;  %v6147_v39 = vpack.c.bf16 %v4779_v2, %v4771_v9  ;;  %v1619_v9 = vld [vmem:[%s12559_s1 + $0xa88] sm:$0xff] }
 0x1b9   :  { %6866 = vmatpush.bf16.msrb.mxu0 %v6083_v33  ;;  %v4947_v14 = vcvt.s32.f32 %v3027_v1  ;;  %v3155_v41 = vunpack.c.2.s8 %v1627_v62  ;;  %v3163_v18 = vunpack.c.3.s8 %v1627_v62  ;;  %v4955_v4 = vcvt.s32.f32 %v3035_v59 }
 0x1ba   :  { %v5923_v13 = vpack.c.bf16 %v4331_v5, %v4323_v8  ;;  %v5987_v54 = vpack.c.bf16 %v4459_v11, %v4451_v0  ;;  %v2707_v57 = vunpack.c.2.s8 %v1515_v7  ;;  %6879 = vmatpush.bf16.msrb.mxu1 %v6147_v39  ;;  %v2715_v28 = vunpack.c.3.s8 %v1515_v7 }
 0x1bb   :  { %v5075_v51 = vcvt.s32.f32 %v3155_v41  ;;  %v5083_v21 = vcvt.s32.f32 %v3163_v18  ;;  %v2835_v35 = vunpack.c.2.s8 %v1547_v48  ;;  %v6235_v38 = vpack.c.bf16 %v4955_v4, %v4947_v14 }
 0x1bc   :  { %6844 = vmatpush.bf16.msra.mxu2 %v5923_v13  ;;  %6857 = vmatpush.bf16.msrb.mxu3 %v5987_v54  ;;  %v4627_v42 = vcvt.s32.f32 %v2707_v57  ;;  %v2843_v20 = vunpack.c.3.s8 %v1547_v48  ;;  %v6639_v61 = vadd.f32 %v10709_v47, %v6626_v31  ;;  %v4635_v29 = vcvt.s32.f32 %v2715_v28  ;;  %v1587_v47 = vld [vmem:[%s12559_s1 + $0x988] sm:$0xff] }
 0x1bd   :  { %v6299_v19 = vpack.c.bf16 %v5083_v21, %v5075_v51  ;;  %v4755_v53 = vcvt.s32.f32 %v2835_v35  ;;  %v3011_v6 = vunpack.c.0.s8 %v1595_v23  ;;  %v3019_v24 = vunpack.c.1.s8 %v1595_v23 }
 0x1be   :  { %v4763_v17 = vcvt.s32.f32 %v2843_v20  ;;  %v3139_v50 = vunpack.c.0.s8 %v1627_v62  ;;  %v3147_v43 = vunpack.c.1.s8 %v1627_v62  ;;  %v6075_v44 = vpack.c.bf16 %v4635_v29, %v4627_v42  ;;  %v1507_v62 = vld [vmem:[%s12559_s1 + $0x708] sm:$0xff] }
 0x1bf   :  { %6845 = vmatmul.bf16.vlgmr.msra.gmra.mxu2 %v9975_v3  ;;  %v4931_v56 = vcvt.s32.f32 %v3011_v6  ;;  %v10740_v12 = vadd.f32 %v10698_v63, %v6639_v61  ;;  %v2691_v16 = vunpack.c.0.s8 %v1515_v7  ;;  %6858 = vmatmul.bf16.vlgmr.msrb.gmra.mxu3 %v10260_v49  ;;  %v4939_v26 = vcvt.s32.f32 %v3019_v24 }
 0x1c0   :  { %6889 = vmatpush.bf16.msrb.mxu2 %v6235_v38  ;;  %6902 = vmatpush.bf16.msra.mxu3 %v6299_v19  ;;  %v6139_v31 = vpack.c.bf16 %v4763_v17, %v4755_v53  ;;  %v5059_v23 = vcvt.s32.f32 %v3139_v50  ;;  %v5067_v40 = vcvt.s32.f32 %v3147_v43  ;;  %v2699_v34 = vunpack.c.1.s8 %v1515_v7  ;;  %v1539_v7 = vld [vmem:[%s12559_s1 + $0x808] sm:$0xff] }
 0x1c1   :  { %6867 = vmatpush.bf16.msrb.mxu0 %v6075_v44  ;;  %v4611_v52 = vcvt.s32.f32 %v2691_v16  ;;  %v2819_v63 = vunpack.c.0.s8 %v1547_v48  ;;  %v2827_v10 = vunpack.c.1.s8 %v1547_v48  ;;  %v10752_v33 = vpop.f32.mrf.mxu0  ;;  %v6227_v2 = vpack.c.bf16 %v4939_v26, %v4931_v56  ;;  %v1659_v56 = vld [vmem:[%s12559_s1 + $0xbc8] sm:$0xff] }
 0x1c2   :  { %6880 = vmatpush.bf16.msrb.mxu1 %v6139_v31  ;;  %v6291_v8 = vpack.c.bf16 %v5067_v40, %v5059_v23  ;;  %v2995_v1 = vunpack.c.2.s8 %v1587_v47  ;;  %v3003_v5 = vunpack.c.3.s8 %v1587_v47  ;;  %v4619_v0 = vcvt.s32.f32 %v2699_v34 }
 0x1c3   :  { %v4739_v11 = vcvt.s32.f32 %v2819_v63  ;;  %v4747_v59 = vcvt.s32.f32 %v2827_v10  ;;  %v3123_v39 = vunpack.c.2.s8 %v1619_v9  ;;  %v10757_v48 = vpop.f32.mrf.mxu1  ;;  %v3131_v18 = vunpack.c.3.s8 %v1619_v9  ;;  %v1579_v10 = vld [vmem:[%s12559_s1 + $0x948] sm:$0xff] }
 0x1c4   :  { %6890 = vmatpush.bf16.msrb.mxu2 %v6227_v2  ;;  %6903 = vmatpush.bf16.msra.mxu3 %v6291_v8  ;;  %v4915_v14 = vcvt.s32.f32 %v2995_v1  ;;  %v4923_v41 = vcvt.s32.f32 %v3003_v5  ;;  %v2675_v13 = vunpack.c.2.s8 %v1507_v62  ;;  %v6067_v54 = vpack.c.bf16 %v4619_v0, %v4611_v52 }
 0x1c5   :  { %v6131_v4 = vpack.c.bf16 %v4747_v59, %v4739_v11  ;;  %v5043_v57 = vcvt.s32.f32 %v3123_v39  ;;  %v2683_v51 = vunpack.c.3.s8 %v1507_v62  ;;  %v5051_v28 = vcvt.s32.f32 %v3131_v18 }
 0x1c6   :  { %v6219_v21 = vpack.c.bf16 %v4923_v41, %v4915_v14  ;;  %v4595_v35 = vcvt.s32.f32 %v2675_v13  ;;  %v2803_v38 = vunpack.c.2.s8 %v1539_v7  ;;  %6868 = vmatpush.bf16.msrb.mxu0 %v6067_v54  ;;  %v2811_v20 = vunpack.c.3.s8 %v1539_v7  ;;  %v1611_v14 = vld [vmem:[%s12559_s1 + $0xa48] sm:$0xff] }
 0x1c7   :  { %6881 = vmatpush.bf16.msrb.mxu1 %v6131_v4  ;;  %v4603_v42 = vcvt.s32.f32 %v2683_v51  ;;  %v2979_v61 = vunpack.c.0.s8 %v1587_v47  ;;  %v2987_v19 = vunpack.c.1.s8 %v1587_v47  ;;  %v6283_v29 = vpack.c.bf16 %v5051_v28, %v5043_v57  ;;  %v1691_v47 = vld [vmem:[%s12559_s1 + $0xcc8] sm:$0xff] }
 0x1c8   :  { %6891 = vmatpush.bf16.msrb.mxu2 %v6219_v21  ;;  %v4723_v53 = vcvt.s32.f32 %v2803_v38  ;;  %v3107_v6 = vunpack.c.0.s8 %v1619_v9  ;;  %v3115_v17 = vunpack.c.1.s8 %v1619_v9  ;;  %v4731_v50 = vcvt.s32.f32 %v2811_v20 }
 0x1c9   :  { %v6059_v24 = vpack.c.bf16 %v4603_v42, %v4595_v35  ;;  %v4899_v43 = vcvt.s32.f32 %v2979_v61  ;;  %v4907_v44 = vcvt.s32.f32 %v2987_v19  ;;  %v6666_v16 = vpop.f32.mrf.mxu0  ;;  %6904 = vmatpush.bf16.msra.mxu3 %v6283_v29  ;;  %v2659_v23 = vunpack.c.0.s8 %v1507_v62 }
 0x1ca   :  { %v5027_v31 = vcvt.s32.f32 %v3107_v6  ;;  %v5035_v26 = vcvt.s32.f32 %v3115_v17  ;;  %v2667_v40 = vunpack.c.1.s8 %v1507_v62  ;;  %v6123_v9 = vpack.c.bf16 %v4731_v50, %v4723_v53  ;;  %v1651_v16 = vld [vmem:[%s12559_s1 + $0xb88] sm:$0xff] }
 0x1cb   :  { %6869 = vmatpush.bf16.msrb.mxu0 %v6059_v24  ;;  %v6211_v34 = vpack.c.bf16 %v4907_v44, %v4899_v43  ;;  %v2787_v52 = vunpack.c.0.s8 %v1539_v7  ;;  %v2795_v63 = vunpack.c.1.s8 %v1539_v7  ;;  %v6679_v2 = vpop.f32.mrf.mxu1  ;;  %v4579_v1 = vcvt.s32.f32 %v2659_v23 }
 0x1cc   :  { %v6275_v8 = vpack.c.bf16 %v5035_v26, %v5027_v31  ;;  %v4587_v5 = vcvt.s32.f32 %v2667_v40  ;;  %v3283_v0 = vunpack.c.2.s8 %v1659_v56  ;;  %6882 = vmatpush.bf16.msrb.mxu1 %v6123_v9  ;;  %v3291_v59 = vunpack.c.3.s8 %v1659_v56  ;;  %v1683_v40 = vld [vmem:[%s12559_s1 + $0xc88] sm:$0xff] }
 0x1cd   :  { %6892 = vmatpush.bf16.msrb.mxu2 %v6211_v34  ;;  %v4707_v62 = vcvt.s32.f32 %v2787_v52  ;;  %v4715_v11 = vcvt.s32.f32 %v2795_v63  ;;  %v3411_v39 = vunpack.c.2.s8 %v1691_v47  ;;  %v3419_v18 = vunpack.c.3.s8 %v1691_v47 }
 0x1ce   :  { %6905 = vmatpush.bf16.msra.mxu3 %v6275_v8  ;;  %v6051_v7 = vpack.c.bf16 %v4587_v5, %v4579_v1  ;;  %v5203_v41 = vcvt.s32.f32 %v3283_v0  ;;  %v2963_v13 = vunpack.c.2.s8 %v1579_v10  ;;  %v5211_v4 = vcvt.s32.f32 %v3291_v59 }
 0x1cf   :  { %v6115_v54 = vpack.c.bf16 %v4715_v11, %v4707_v62  ;;  %v5331_v57 = vcvt.s32.f32 %v3411_v39  ;;  %v2971_v51 = vunpack.c.3.s8 %v1579_v10  ;;  %v5339_v21 = vcvt.s32.f32 %v3419_v18  ;;  %v1603_v39 = vld [vmem:[%s12559_s1 + $0xa08] sm:$0xff] }
 0x1d0   :  { %6870 = vmatpush.bf16.msrb.mxu0 %v6051_v7  ;;  %v4883_v28 = vcvt.s32.f32 %v2963_v13  ;;  %v3091_v35 = vunpack.c.2.s8 %v1611_v14  ;;  %v3099_v38 = vunpack.c.3.s8 %v1611_v14  ;;  %v6363_v42 = vpack.c.bf16 %v5211_v4, %v5203_v41  ;;  %v10779_v63 = vpop.f32.mrf.mxu2  ;;  %v10787_v13 = vpop.f32.mrf.mxu3 }
 0x1d1   :  { %6883 = vmatpush.bf16.msrb.mxu1 %v6115_v54  ;;  %v4891_v20 = vcvt.s32.f32 %v2971_v51  ;;  %v3267_v61 = vunpack.c.0.s8 %v1659_v56  ;;  %v3275_v19 = vunpack.c.1.s8 %v1659_v56  ;;  %v6427_v29 = vpack.c.bf16 %v5339_v21, %v5331_v57 }
 0x1d2   :  { %v5011_v53 = vcvt.s32.f32 %v3091_v35  ;;  %v5019_v6 = vcvt.s32.f32 %v3099_v38  ;;  %v3395_v17 = vunpack.c.0.s8 %v1691_v47  ;;  %v3403_v44 = vunpack.c.1.s8 %v1691_v47 }
 0x1d3   :  { %v6203_v24 = vpack.c.bf16 %v4891_v20, %v4883_v28  ;;  %v5187_v50 = vcvt.s32.f32 %v3267_v61  ;;  %v5195_v43 = vcvt.s32.f32 %v3275_v19  ;;  %6871 = vmatmul.bf16.vlgmr.msrb.gmra.mxu0 %v10318_v45  ;;  %v2947_v23 = vunpack.c.0.s8 %v1579_v10 }
 0x1d4   :  { %6915 = vmatpush.bf16.msra.mxu0 %v6363_v42  ;;  %v6267_v31 = vpack.c.bf16 %v5019_v6, %v5011_v53  ;;  %v5315_v26 = vcvt.s32.f32 %v3395_v17  ;;  %v2955_v56 = vunpack.c.1.s8 %v1579_v10  ;;  %6884 = vmatmul.bf16.vlgmr.msrb.gmra.mxu1 %v10505_v15  ;;  %v5323_v47 = vcvt.s32.f32 %v3403_v44  ;;  %v1571_v10 = vld [vmem:[%s12559_s1 + $0x908] sm:$0xff] }
 0x1d5   :  { %6928 = vmatpush.bf16.msra.mxu1 %v6427_v29  ;;  %6893 = vmatpush.bf16.msrb.mxu2 %v6203_v24  ;;  %v6355_v9 = vpack.c.bf16 %v5195_v43, %v5187_v50  ;;  %v3075_v34 = vunpack.c.0.s8 %v1611_v14  ;;  %v3083_v52 = vunpack.c.1.s8 %v1611_v14  ;;  %v4867_v2 = vcvt.s32.f32 %v2947_v23 }
 0x1d6   :  { %6906 = vmatpush.bf16.msra.mxu3 %v6267_v31  ;;  %v4875_v8 = vcvt.s32.f32 %v2955_v56  ;;  %v3251_v1 = vunpack.c.2.s8 %v1651_v16  ;;  %v3259_v5 = vunpack.c.3.s8 %v1651_v16  ;;  %v6419_v0 = vpack.c.bf16 %v5323_v47, %v5315_v26  ;;  %v1723_v31 = vld [vmem:[%s12559_s1 + $0xdc8] sm:$0xff] }
 0x1d7   :  { %v4995_v62 = vcvt.s32.f32 %v3075_v34  ;;  %v5003_v11 = vcvt.s32.f32 %v3083_v52  ;;  %v3379_v59 = vunpack.c.2.s8 %v1683_v40  ;;  %v3387_v18 = vunpack.c.3.s8 %v1683_v40 }
 0x1d8   :  { %6916 = vmatpush.bf16.msra.mxu0 %v6355_v9  ;;  %v6195_v14 = vpack.c.bf16 %v4875_v8, %v4867_v2  ;;  %v5171_v7 = vcvt.s32.f32 %v3251_v1  ;;  %v5179_v41 = vcvt.s32.f32 %v3259_v5  ;;  %v2931_v57 = vunpack.c.2.s8 %v1571_v10  ;;  %v6692_v26 = vpop.f32.mrf.mxu2  ;;  %v6705_v5 = vpop.f32.mrf.mxu3 }
 0x1d9   :  { %6929 = vmatpush.bf16.msra.mxu1 %v6419_v0  ;;  %v6259_v54 = vpack.c.bf16 %v5003_v11, %v4995_v62  ;;  %v5299_v4 = vcvt.s32.f32 %v3379_v59  ;;  %v2939_v51 = vunpack.c.3.s8 %v1571_v10  ;;  %v5307_v28 = vcvt.s32.f32 %v3387_v18 }
 0x1da   :  { %6894 = vmatpush.bf16.msrb.mxu2 %v6195_v14  ;;  %v6347_v21 = vpack.c.bf16 %v5179_v41, %v5171_v7  ;;  %v3059_v35 = vunpack.c.2.s8 %v1603_v39  ;;  %v3067_v38 = vunpack.c.3.s8 %v1603_v39  ;;  %v4851_v42 = vcvt.s32.f32 %v2931_v57 }
 0x1db   :  { %6907 = vmatpush.bf16.msra.mxu3 %v6259_v54  ;;  %v4859_v20 = vcvt.s32.f32 %v2939_v51  ;;  %v6665_v61 = vadd.f32 %v10752_v33, %v10740_v12  ;;  %v3235_v19 = vunpack.c.0.s8 %v1651_v16  ;;  %v6411_v29 = vpack.c.bf16 %v5307_v28, %v5299_v4 }
 0x1dc   :  { %6917 = vmatpush.bf16.msra.mxu0 %v6347_v21  ;;  %v4979_v53 = vcvt.s32.f32 %v3059_v35  ;;  %v4987_v6 = vcvt.s32.f32 %v3067_v38  ;;  %v3243_v17 = vunpack.c.1.s8 %v1651_v16  ;;  %v3363_v43 = vunpack.c.0.s8 %v1683_v40 }
 0x1dd   :  { %v6187_v24 = vpack.c.bf16 %v4859_v20, %v4851_v42  ;;  %v5155_v50 = vcvt.s32.f32 %v3235_v19  ;;  %v3371_v44 = vunpack.c.1.s8 %v1683_v40  ;;  %6930 = vmatpush.bf16.msra.mxu1 %v6411_v29  ;;  %v10795_v12 = vadd.f32 %v10757_v48, %v6665_v61  ;;  %v1755_v40 = vld [vmem:[%s12559_s1 + $0xec8] sm:$0xff] }
 0x1de   :  { %v6251_v23 = vpack.c.bf16 %v4987_v6, %v4979_v53  ;;  %v5163_v56 = vcvt.s32.f32 %v3243_v17  ;;  %v2915_v33 = vunpack.c.0.s8 %v1571_v10  ;;  %v5283_v9 = vcvt.s32.f32 %v3363_v43  ;;  %v1643_v48 = vld [vmem:[%s12559_s1 + $0xb48] sm:$0xff] }
 0x1df   :  { %6895 = vmatpush.bf16.msrb.mxu2 %v6187_v24  ;;  %v5291_v47 = vcvt.s32.f32 %v3371_v44  ;;  %v2923_v16 = vunpack.c.1.s8 %v1571_v10  ;;  %v3043_v34 = vunpack.c.0.s8 %v1603_v39  ;;  %v3051_v8 = vunpack.c.1.s8 %v1603_v39  ;;  %v1675_v10 = vld [vmem:[%s12559_s1 + $0xc48] sm:$0xff] }
 0x1e0   :  { %6908 = vmatpush.bf16.msra.mxu3 %v6251_v23  ;;  %v6339_v52 = vpack.c.bf16 %v5163_v56, %v5155_v50  ;;  %v4835_v2 = vcvt.s32.f32 %v2915_v33  ;;  %v3539_v1 = vunpack.c.2.s8 %v1723_v31  ;;  %v3547_v59 = vunpack.c.3.s8 %v1723_v31  ;;  %v1715_v33 = vld [vmem:[%s12559_s1 + $0xd88] sm:$0xff] }
 0x1e1   :  { %v6403_v0 = vpack.c.bf16 %v5291_v47, %v5283_v9  ;;  %v4843_v62 = vcvt.s32.f32 %v2923_v16  ;;  %v4963_v11 = vcvt.s32.f32 %v3043_v34  ;;  %v4971_v14 = vcvt.s32.f32 %v3051_v8  ;;  %v1747_v34 = vld [vmem:[%s12559_s1 + $0xe88] sm:$0xff] }
 0x1e2   :  { %6918 = vmatpush.bf16.msra.mxu0 %v6339_v52  ;;  %v5459_v7 = vcvt.s32.f32 %v3539_v1  ;;  %v3667_v41 = vunpack.c.2.s8 %v1755_v40  ;;  %v3675_v18 = vunpack.c.3.s8 %v1755_v40  ;;  %v5467_v54 = vcvt.s32.f32 %v3547_v59  ;;  %v1667_v59 = vld [vmem:[%s12559_s1 + $0xc08] sm:$0xff] }
 0x1e3   :  { %6931 = vmatpush.bf16.msra.mxu1 %v6403_v0  ;;  %v6179_v39 = vpack.c.bf16 %v4843_v62, %v4835_v2  ;;  %v3219_v4 = vunpack.c.2.s8 %v1643_v48  ;;  %v3227_v57 = vunpack.c.3.s8 %v1643_v48  ;;  %v6243_v51 = vpack.c.bf16 %v4971_v14, %v4963_v11 }
 0x1e4   :  { %v5587_v21 = vcvt.s32.f32 %v3667_v41  ;;  %v5595_v28 = vcvt.s32.f32 %v3675_v18  ;;  %v3347_v35 = vunpack.c.2.s8 %v1675_v10  ;;  %v6491_v38 = vpack.c.bf16 %v5467_v54, %v5459_v7 }
 0x1e5   :  { %6896 = vmatpush.bf16.msrb.mxu2 %v6179_v39  ;;  %v5139_v42 = vcvt.s32.f32 %v3219_v4  ;;  %v5147_v20 = vcvt.s32.f32 %v3227_v57  ;;  %v3355_v61 = vunpack.c.3.s8 %v1675_v10  ;;  %6909 = vmatpush.bf16.msra.mxu3 %v6243_v51  ;;  %v3523_v53 = vunpack.c.0.s8 %v1723_v31  ;;  %v10822_v39 = vpop.f32.mrf.mxu1 }
 0x1e6   :  { %v6555_v19 = vpack.c.bf16 %v5595_v28, %v5587_v21  ;;  %v5267_v29 = vcvt.s32.f32 %v3347_v35  ;;  %v3531_v6 = vunpack.c.1.s8 %v1723_v31  ;;  %v3651_v50 = vunpack.c.0.s8 %v1755_v40 }
 0x1e7   :  { %v6331_v17 = vpack.c.bf16 %v5147_v20, %v5139_v42  ;;  %v5275_v24 = vcvt.s32.f32 %v3355_v61  ;;  %v3659_v43 = vunpack.c.1.s8 %v1755_v40  ;;  %v5443_v44 = vcvt.s32.f32 %v3523_v53  ;;  %v10814_v40 = vpop.f32.mrf.mxu0 }
 0x1e8   :  { %6897 = vmatmul.bf16.vlgmr.msrb.gmra.mxu2 %v10510_v36  ;;  %v5451_v26 = vcvt.s32.f32 %v3531_v6  ;;  %v3203_v23 = vunpack.c.0.s8 %v1643_v48  ;;  %v3211_v56 = vunpack.c.1.s8 %v1643_v48  ;;  %6910 = vmatmul.bf16.vlgmr.msra.gmra.mxu3 %v10545_v22  ;;  %v5571_v9 = vcvt.s32.f32 %v3651_v50  ;;  %v1635_v48 = vld [vmem:[%s12559_s1 + $0xb08] sm:$0xff] }
 0x1e9   :  { %6941 = vmatpush.bf16.msra.mxu2 %v6491_v38  ;;  %6954 = vmatpush.bf16.msrb.mxu3 %v6555_v19  ;;  %v6395_v31 = vpack.c.bf16 %v5275_v24, %v5267_v29  ;;  %v5579_v47 = vcvt.s32.f32 %v3659_v43  ;;  %v3331_v16 = vunpack.c.0.s8 %v1675_v10  ;;  %v3339_v1 = vunpack.c.1.s8 %v1675_v10 }
 0x1ea   :  { %6919 = vmatpush.bf16.msra.mxu0 %v6331_v17  ;;  %v6483_v52 = vpack.c.bf16 %v5451_v26, %v5443_v44  ;;  %v5123_v2 = vcvt.s32.f32 %v3203_v23  ;;  %v5131_v8 = vcvt.s32.f32 %v3211_v56  ;;  %v3507_v62 = vunpack.c.2.s8 %v1715_v33 }
 0x1eb   :  { %6932 = vmatpush.bf16.msra.mxu1 %v6395_v31  ;;  %v6547_v5 = vpack.c.bf16 %v5579_v47, %v5571_v9  ;;  %v5251_v0 = vcvt.s32.f32 %v3331_v16  ;;  %v3515_v11 = vunpack.c.3.s8 %v1715_v33  ;;  %v5259_v7 = vcvt.s32.f32 %v3339_v1  ;;  %v1308_v9 = vld [vmem:[%s12559_s1 + $0xd0] sm:$0xff] }
 0x1ec   :  { %v6323_v14 = vpack.c.bf16 %v5131_v8, %v5123_v2  ;;  %v3635_v41 = vunpack.c.2.s8 %v1747_v34  ;;  %v3643_v18 = vunpack.c.3.s8 %v1747_v34  ;;  %v5427_v10 = vcvt.s32.f32 %v3507_v62 }
 0x1ed   :  { %6942 = vmatpush.bf16.msra.mxu2 %v6483_v52  ;;  %6955 = vmatpush.bf16.msrb.mxu3 %v6547_v5  ;;  %v5435_v54 = vcvt.s32.f32 %v3515_v11  ;;  %v3187_v4 = vunpack.c.2.s8 %v1635_v48  ;;  %v3195_v57 = vunpack.c.3.s8 %v1635_v48  ;;  %v6387_v51 = vpack.c.bf16 %v5259_v7, %v5251_v0  ;;  %v1707_v11 = vld [vmem:[%s12559_s1 + $0xd48] sm:$0xff] }
 0x1ee   :  { %6920 = vmatpush.bf16.msra.mxu0 %v6323_v14  ;;  %v5555_v21 = vcvt.s32.f32 %v3635_v41  ;;  %v5563_v28 = vcvt.s32.f32 %v3643_v18  ;;  %v3315_v35 = vunpack.c.2.s8 %v1667_v59  ;;  %v3323_v61 = vunpack.c.3.s8 %v1667_v59  ;;  %v1739_v18 = vld [vmem:[%s12559_s1 + $0xe48] sm:$0xff] }
 0x1ef   :  { %v6475_v38 = vpack.c.bf16 %v5435_v54, %v5427_v10  ;;  %v5107_v42 = vcvt.s32.f32 %v3187_v4  ;;  %v5115_v20 = vcvt.s32.f32 %v3195_v57  ;;  %6933 = vmatpush.bf16.msra.mxu1 %v6387_v51  ;;  %v6691_v53 = vadd.f32 %v10779_v63, %v10795_v12  ;;  %v6718_v44 = vpop.f32.mrf.mxu0 }
 0x1f0   :  { %v6539_v19 = vpack.c.bf16 %v5563_v28, %v5555_v21  ;;  %v5235_v29 = vcvt.s32.f32 %v3315_v35  ;;  %v3491_v6 = vunpack.c.0.s8 %v1715_v33  ;;  %v5243_v24 = vcvt.s32.f32 %v3323_v61 }
 0x1f1   :  { %6943 = vmatpush.bf16.msra.mxu2 %v6475_v38  ;;  %v6315_v17 = vpack.c.bf16 %v5115_v20, %v5107_v42  ;;  %v3499_v50 = vunpack.c.1.s8 %v1715_v33  ;;  %v3619_v43 = vunpack.c.0.s8 %v1747_v34  ;;  %v3627_v23 = vunpack.c.1.s8 %v1747_v34  ;;  %v1340_v33 = vld [vmem:[%s12559_s1 + $0x1d0] sm:$0xff] }
 0x1f2   :  { %6956 = vmatpush.bf16.msrb.mxu3 %v6539_v19  ;;  %v5411_v26 = vcvt.s32.f32 %v3491_v6  ;;  %v10827_v56 = vadd.f32 %v10787_v13, %v6691_v53  ;;  %v3171_v31 = vunpack.c.0.s8 %v1635_v48  ;;  %v6379_v63 = vpack.c.bf16 %v5243_v24, %v5235_v29  ;;  %v6731_v13 = vpop.f32.mrf.mxu1 }
 0x1f3   :  { %6921 = vmatpush.bf16.msra.mxu0 %v6315_v17  ;;  %v5419_v12 = vcvt.s32.f32 %v3499_v50  ;;  %v5539_v47 = vcvt.s32.f32 %v3619_v43  ;;  %v3179_v16 = vunpack.c.1.s8 %v1635_v48  ;;  %v5547_v52 = vcvt.s32.f32 %v3627_v23 }
 0x1f4   :  { %v5091_v2 = vcvt.s32.f32 %v3171_v31  ;;  %v3299_v34 = vunpack.c.0.s8 %v1667_v59  ;;  %v3307_v8 = vunpack.c.1.s8 %v1667_v59  ;;  %6934 = vmatpush.bf16.msra.mxu1 %v6379_v63  ;;  %v1876_v0 = vunpack.c.2.s8 %v1308_v9  ;;  %v1300_v31 = vld [vmem:[%s12559_s1 + $0x90] sm:$0xff] }
 0x1f5   :  { %v6467_v1 = vpack.c.bf16 %v5419_v12, %v5411_v26  ;;  %v5099_v5 = vcvt.s32.f32 %v3179_v16  ;;  %v1884_v62 = vunpack.c.3.s8 %v1308_v9  ;;  %v6531_v14 = vpack.c.bf16 %v5547_v52, %v5539_v47  ;;  %v1332_v16 = vld [vmem:[%s12559_s1 + $0x190] sm:$0xff] }
 0x1f6   :  { %v5219_v48 = vcvt.s32.f32 %v3299_v34  ;;  %v5227_v7 = vcvt.s32.f32 %v3307_v8  ;;  %v2004_v41 = vunpack.c.2.s8 %v1340_v33  ;;  %v3796_v10 = vcvt.s32.f32 %v1876_v0  ;;  %v1699_v0 = vld [vmem:[%s12559_s1 + $0xd08] sm:$0xff] }
 0x1f7   :  { %6944 = vmatpush.bf16.msra.mxu2 %v6467_v1  ;;  %v6307_v59 = vpack.c.bf16 %v5099_v5, %v5091_v2  ;;  %v3804_v54 = vcvt.s32.f32 %v1884_v62  ;;  %v2012_v4 = vunpack.c.3.s8 %v1340_v33  ;;  %6957 = vmatpush.bf16.msrb.mxu3 %v6531_v14  ;;  %v3475_v21 = vunpack.c.2.s8 %v1707_v11 }
 0x1f8   :  { %v6371_v57 = vpack.c.bf16 %v5227_v7, %v5219_v48  ;;  %v3924_v51 = vcvt.s32.f32 %v2004_v41  ;;  %v3483_v28 = vunpack.c.3.s8 %v1707_v11  ;;  %v3603_v42 = vunpack.c.2.s8 %v1739_v18  ;;  %v1731_v7 = vld [vmem:[%s12559_s1 + $0xe08] sm:$0xff] }
 0x1f9   :  { %6922 = vmatpush.bf16.msra.mxu0 %v6307_v59  ;;  %v5660_v35 = vpack.c.bf16 %v3804_v54, %v3796_v10  ;;  %v3932_v38 = vcvt.s32.f32 %v2012_v4  ;;  %v3611_v20 = vunpack.c.3.s8 %v1739_v18  ;;  %v5395_v61 = vcvt.s32.f32 %v3475_v21 }
 0x1fa   :  { %6935 = vmatpush.bf16.msra.mxu1 %v6371_v57  ;;  %v5403_v19 = vcvt.s32.f32 %v3483_v28  ;;  %v1860_v29 = vunpack.c.0.s8 %v1308_v9  ;;  %v1868_v53 = vunpack.c.1.s8 %v1308_v9  ;;  %v5523_v17 = vcvt.s32.f32 %v3603_v42 }
 0x1fb   :  { %v5724_v6 = vpack.c.bf16 %v3932_v38, %v3924_v51  ;;  %v5531_v24 = vcvt.s32.f32 %v3611_v20  ;;  %v1988_v50 = vunpack.c.0.s8 %v1340_v33  ;;  %v1996_v23 = vunpack.c.1.s8 %v1340_v33 }
 0x1fc   :  { %v6459_v43 = vpack.c.bf16 %v5403_v19, %v5395_v61  ;;  %6923 = vmatmul.bf16.vlgmr.msra.gmra.mxu0 %v10564_v30  ;;  %v3780_v44 = vcvt.s32.f32 %v1860_v29  ;;  %v3788_v26 = vcvt.s32.f32 %v1868_v53  ;;  %v3459_v47 = vunpack.c.0.s8 %v1707_v11 }
 0x1fd   :  { %6967 = vmatpush.bf16.msrb.mxu0 %v5660_v35  ;;  %v6523_v63 = vpack.c.bf16 %v5531_v24, %v5523_v17  ;;  %v3908_v12 = vcvt.s32.f32 %v1988_v50  ;;  %v3467_v9 = vunpack.c.1.s8 %v1707_v11  ;;  %6936 = vmatmul.bf16.vlgmr.msra.gmra.mxu1 %v10642_v37  ;;  %v3916_v2 = vcvt.s32.f32 %v1996_v23 }
 0x1fe   :  { %6980 = vmatpush.bf16.msrb.mxu1 %v5724_v6  ;;  %6945 = vmatpush.bf16.msra.mxu2 %v6459_v43  ;;  %v5652_v52 = vpack.c.bf16 %v3788_v26, %v3780_v44  ;;  %v3587_v34 = vunpack.c.0.s8 %v1739_v18  ;;  %v3595_v33 = vunpack.c.1.s8 %v1739_v18  ;;  %v5379_v8 = vcvt.s32.f32 %v3459_v47  ;;  %v1372_v26 = vld [vmem:[%s12559_s1 + $0x2d0] sm:$0xff] }
 0x1ff   :  { %6958 = vmatpush.bf16.msrb.mxu3 %v6523_v63  ;;  %v5387_v13 = vcvt.s32.f32 %v3467_v9  ;;  %v1844_v1 = vunpack.c.2.s8 %v1300_v31  ;;  %v1852_v5 = vunpack.c.3.s8 %v1300_v31  ;;  %v5716_v62 = vpack.c.bf16 %v3916_v2, %v3908_v12 }
 0x200   :  { %v5507_v11 = vcvt.s32.f32 %v3587_v34  ;;  %v5515_v14 = vcvt.s32.f32 %v3595_v33  ;;  %v1972_v48 = vunpack.c.2.s8 %v1332_v16  ;;  %v1980_v10 = vunpack.c.3.s8 %v1332_v16 }
 0x201   :  { %6968 = vmatpush.bf16.msrb.mxu0 %v5652_v52  ;;  %v6451_v41 = vpack.c.bf16 %v5387_v13, %v5379_v8  ;;  %v3764_v18 = vcvt.s32.f32 %v1844_v1  ;;  %v3772_v59 = vcvt.s32.f32 %v1852_v5  ;;  %v3443_v57 = vunpack.c.2.s8 %v1699_v0 }
 0x202   :  { %6981 = vmatpush.bf16.msrb.mxu1 %v5716_v62  ;;  %v6515_v54 = vpack.c.bf16 %v5515_v14, %v5507_v11  ;;  %v3892_v4 = vcvt.s32.f32 %v1972_v48  ;;  %v3451_v51 = vunpack.c.3.s8 %v1699_v0  ;;  %v3900_v28 = vcvt.s32.f32 %v1980_v10 }
 0x203   :  { %6946 = vmatpush.bf16.msra.mxu2 %v6451_v41  ;;  %v5644_v21 = vpack.c.bf16 %v3772_v59, %v3764_v18  ;;  %v3571_v35 = vunpack.c.2.s8 %v1731_v7  ;;  %v3579_v38 = vunpack.c.3.s8 %v1731_v7  ;;  %v5363_v42 = vcvt.s32.f32 %v3443_v57 }
 0x204   :  { %6959 = vmatpush.bf16.msrb.mxu3 %v6515_v54  ;;  %v5371_v20 = vcvt.s32.f32 %v3451_v51  ;;  %v6717_v61 = vadd.f32 %v10814_v40, %v10827_v56  ;;  %v1828_v19 = vunpack.c.0.s8 %v1300_v31  ;;  %v5708_v29 = vpack.c.bf16 %v3900_v28, %v3892_v4 }
 0x205   :  { %6969 = vmatpush.bf16.msrb.mxu0 %v5644_v21  ;;  %v5491_v53 = vcvt.s32.f32 %v3571_v35  ;;  %v5499_v6 = vcvt.s32.f32 %v3579_v38  ;;  %v1836_v17 = vunpack.c.1.s8 %v1300_v31  ;;  %v1956_v43 = vunpack.c.0.s8 %v1332_v16 }
 0x206   :  { %v6443_v24 = vpack.c.bf16 %v5371_v20, %v5363_v42  ;;  %v3748_v50 = vcvt.s32.f32 %v1828_v19  ;;  %v1964_v44 = vunpack.c.1.s8 %v1332_v16  ;;  %6982 = vmatpush.bf16.msrb.mxu1 %v5708_v29  ;;  %v10861_v12 = vadd.f32 %v10822_v39, %v6717_v61  ;;  %v1404_v16 = vld [vmem:[%s12559_s1 + $0x3d0] sm:$0xff] }
 0x207   :  { %v6507_v23 = vpack.c.bf16 %v5499_v6, %v5491_v53  ;;  %v3756_v63 = vcvt.s32.f32 %v1836_v17  ;;  %v3427_v40 = vunpack.c.0.s8 %v1699_v0  ;;  %v3876_v56 = vcvt.s32.f32 %v1956_v43  ;;  %v1292_v39 = vld [vmem:[%s12559_s1 + $0x50] sm:$0xff] }
 0x208   :  { %6947 = vmatpush.bf16.msra.mxu2 %v6443_v24  ;;  %v3884_v47 = vcvt.s32.f32 %v1964_v44  ;;  %v3435_v9 = vunpack.c.1.s8 %v1699_v0  ;;  %v3555_v31 = vunpack.c.0.s8 %v1731_v7  ;;  %v3563_v34 = vunpack.c.1.s8 %v1731_v7  ;;  %v1324_v0 = vld [vmem:[%s12559_s1 + $0x150] sm:$0xff] }
 0x209   :  { %6960 = vmatpush.bf16.msrb.mxu3 %v6507_v23  ;;  %v5636_v52 = vpack.c.bf16 %v3756_v63, %v3748_v50  ;;  %v5347_v2 = vcvt.s32.f32 %v3427_v40  ;;  %v2132_v33 = vunpack.c.2.s8 %v1372_v26  ;;  %v2140_v5 = vunpack.c.3.s8 %v1372_v26  ;;  %v1364_v44 = vld [vmem:[%s12559_s1 + $0x290] sm:$0xff] }
 0x20a   :  { %v5700_v8 = vpack.c.bf16 %v3884_v47, %v3876_v56  ;;  %v5355_v13 = vcvt.s32.f32 %v3435_v9  ;;  %v5475_v1 = vcvt.s32.f32 %v3555_v31  ;;  %v5483_v62 = vcvt.s32.f32 %v3563_v34  ;;  %v1396_v56 = vld [vmem:[%s12559_s1 + $0x390] sm:$0xff]  ;;  %v10880_v47 = vpop.f32.mrf.mxu1 }
 0x20b   :  { %6970 = vmatpush.bf16.msrb.mxu0 %v5636_v52  ;;  %v4052_v11 = vcvt.s32.f32 %v2132_v33  ;;  %v2260_v14 = vunpack.c.2.s8 %v1404_v16  ;;  %v2268_v48 = vunpack.c.3.s8 %v1404_v16  ;;  %v4060_v41 = vcvt.s32.f32 %v2140_v5 }
 0x20c   :  { %6983 = vmatpush.bf16.msrb.mxu1 %v5700_v8  ;;  %v6435_v7 = vpack.c.bf16 %v5355_v13, %v5347_v2  ;;  %v1812_v18 = vunpack.c.2.s8 %v1292_v39  ;;  %v1820_v59 = vunpack.c.3.s8 %v1292_v39  ;;  %v6499_v10 = vpack.c.bf16 %v5483_v62, %v5475_v1  ;;  %v1284_v2 = vld [vmem:[%s12559_s1 + $0x10] sm:$0xff] }
 0x20d   :  { %v4180_v54 = vcvt.s32.f32 %v2260_v14  ;;  %v4188_v4 = vcvt.s32.f32 %v2268_v48  ;;  %v1940_v57 = vunpack.c.2.s8 %v1324_v0  ;;  %v5788_v51 = vpack.c.bf16 %v4060_v41, %v4052_v11  ;;  %v1316_v13 = vld [vmem:[%s12559_s1 + $0x110] sm:$0xff] }
 0x20e   :  { %6948 = vmatpush.bf16.msra.mxu2 %v6435_v7  ;;  %v3732_v21 = vcvt.s32.f32 %v1812_v18  ;;  %v3740_v28 = vcvt.s32.f32 %v1820_v59  ;;  %v1948_v35 = vunpack.c.3.s8 %v1324_v0  ;;  %6961 = vmatpush.bf16.msrb.mxu3 %v6499_v10  ;;  %v2116_v20 = vunpack.c.0.s8 %v1372_v26 }
 0x20f   :  { %v5852_v38 = vpack.c.bf16 %v4188_v4, %v4180_v54  ;;  %v3860_v42 = vcvt.s32.f32 %v1940_v57  ;;  %v2124_v61 = vunpack.c.1.s8 %v1372_v26  ;;  %v2244_v53 = vunpack.c.0.s8 %v1404_v16 }
 0x210   :  { %v5628_v19 = vpack.c.bf16 %v3740_v28, %v3732_v21  ;;  %v3868_v29 = vcvt.s32.f32 %v1948_v35  ;;  %v2252_v6 = vunpack.c.1.s8 %v1404_v16  ;;  %v4036_v17 = vcvt.s32.f32 %v2116_v20 }
 0x211   :  { %6949 = vmatmul.bf16.vlgmr.msra.gmra.mxu2 %v10644_v46  ;;  %v4044_v24 = vcvt.s32.f32 %v2124_v61  ;;  %v1796_v50 = vunpack.c.0.s8 %v1292_v39  ;;  %v1804_v43 = vunpack.c.1.s8 %v1292_v39  ;;  %6962 = vmatmul.bf16.vlgmr.msrb.gmra.mxu3 %v10665_v60  ;;  %v4164_v23 = vcvt.s32.f32 %v2244_v53 }
 0x212   :  { %6993 = vmatpush.bf16.msrb.mxu2 %v5788_v51  ;;  %7006 = vmatpush.bf16.msra.mxu3 %v5852_v38  ;;  %v5692_v26 = vpack.c.bf16 %v3868_v29, %v3860_v42  ;;  %v4172_v63 = vcvt.s32.f32 %v2252_v6  ;;  %v1924_v40 = vunpack.c.0.s8 %v1324_v0  ;;  %v1932_v52 = vunpack.c.1.s8 %v1324_v0  ;;  %v6783_v29 = vpop.f32.mrf.mxu1 }
 0x213   :  { %6971 = vmatpush.bf16.msrb.mxu0 %v5628_v19  ;;  %v5780_v9 = vpack.c.bf16 %v4044_v24, %v4036_v17  ;;  %v3716_v31 = vcvt.s32.f32 %v1796_v50  ;;  %v3724_v16 = vcvt.s32.f32 %v1804_v43  ;;  %v2100_v39 = vunpack.c.2.s8 %v1364_v44  ;;  %v1436_v50 = vld [vmem:[%s12559_s1 + $0x4d0] sm:$0xff] }
 0x214   :  { %6984 = vmatpush.bf16.msrb.mxu1 %v5692_v26  ;;  %v5844_v34 = vpack.c.bf16 %v4172_v63, %v4164_v23  ;;  %v3844_v33 = vcvt.s32.f32 %v1924_v40  ;;  %v2108_v8 = vunpack.c.3.s8 %v1364_v44  ;;  %v3852_v5 = vcvt.s32.f32 %v1932_v52  ;;  %v1468_v63 = vld [vmem:[%s12559_s1 + $0x5d0] sm:$0xff] }
 0x215   :  { %v5620_v1 = vpack.c.bf16 %v3724_v16, %v3716_v31  ;;  %v2228_v62 = vunpack.c.2.s8 %v1396_v56  ;;  %v2236_v11 = vunpack.c.3.s8 %v1396_v56  ;;  %v4020_v0 = vcvt.s32.f32 %v2100_v39  ;;  %v1356_v16 = vld [vmem:[%s12559_s1 + $0x250] sm:$0xff] }
 0x216   :  { %6994 = vmatpush.bf16.msrb.mxu2 %v5780_v9  ;;  %7007 = vmatpush.bf16.msra.mxu3 %v5844_v34  ;;  %v4028_v14 = vcvt.s32.f32 %v2108_v8  ;;  %v1780_v48 = vunpack.c.2.s8 %v1284_v2  ;;  %v1788_v7 = vunpack.c.3.s8 %v1284_v2  ;;  %v5684_v41 = vpack.c.bf16 %v3852_v5, %v3844_v33  ;;  %v1388_v39 = vld [vmem:[%s12559_s1 + $0x350] sm:$0xff] }
 0x217   :  { %6972 = vmatpush.bf16.msrb.mxu0 %v5620_v1  ;;  %v4148_v18 = vcvt.s32.f32 %v2228_v62  ;;  %v4156_v59 = vcvt.s32.f32 %v2236_v11  ;;  %v1908_v10 = vunpack.c.2.s8 %v1316_v13  ;;  %v1916_v51 = vunpack.c.3.s8 %v1316_v13 }
 0x218   :  { %v5772_v54 = vpack.c.bf16 %v4028_v14, %v4020_v0  ;;  %v3700_v4 = vcvt.s32.f32 %v1780_v48  ;;  %v3708_v57 = vcvt.s32.f32 %v1788_v7  ;;  %6985 = vmatpush.bf16.msrb.mxu1 %v5684_v41  ;;  %v2084_v35 = vunpack.c.0.s8 %v1364_v44 }
 0x219   :  { %v5836_v21 = vpack.c.bf16 %v4156_v59, %v4148_v18  ;;  %v3828_v28 = vcvt.s32.f32 %v1908_v10  ;;  %v2092_v38 = vunpack.c.1.s8 %v1364_v44  ;;  %v3836_v20 = vcvt.s32.f32 %v1916_v51 }
 0x21a   :  { %6995 = vmatpush.bf16.msrb.mxu2 %v5772_v54  ;;  %v5612_v42 = vpack.c.bf16 %v3708_v57, %v3700_v4  ;;  %v2212_v61 = vunpack.c.0.s8 %v1396_v56  ;;  %v2220_v19 = vunpack.c.1.s8 %v1396_v56  ;;  %v4004_v53 = vcvt.s32.f32 %v2084_v35 }
 0x21b   :  { %7008 = vmatpush.bf16.msra.mxu3 %v5836_v21  ;;  %v4012_v6 = vcvt.s32.f32 %v2092_v38  ;;  %v1764_v17 = vunpack.c.0.s8 %v1284_v2  ;;  %v1772_v24 = vunpack.c.1.s8 %v1284_v2  ;;  %v5676_v43 = vpack.c.bf16 %v3836_v20, %v3828_v28 }
 0x21c   :  { %6973 = vmatpush.bf16.msrb.mxu0 %v5612_v42  ;;  %v4132_v26 = vcvt.s32.f32 %v2212_v61  ;;  %v4140_v23 = vcvt.s32.f32 %v2220_v19  ;;  %v1892_v44 = vunpack.c.0.s8 %v1316_v13  ;;  %v1900_v31 = vunpack.c.1.s8 %v1316_v13 }
 0x21d   :  { %v5764_v40 = vpack.c.bf16 %v4012_v6, %v4004_v53  ;;  %v3684_v56 = vcvt.s32.f32 %v1764_v17  ;;  %v3692_v9 = vcvt.s32.f32 %v1772_v24  ;;  %6986 = vmatpush.bf16.msrb.mxu1 %v5676_v43  ;;  %v2388_v34 = vunpack.c.2.s8 %v1436_v50  ;;  %v1428_v6 = vld [vmem:[%s12559_s1 + $0x490] sm:$0xff] }
 0x21e   :  { %v5828_v52 = vpack.c.bf16 %v4140_v23, %v4132_v26  ;;  %v3812_v2 = vcvt.s32.f32 %v1892_v44  ;;  %v2396_v33 = vunpack.c.3.s8 %v1436_v50  ;;  %v3820_v1 = vcvt.s32.f32 %v1900_v31  ;;  %v1460_v26 = vld [vmem:[%s12559_s1 + $0x590] sm:$0xff] }
 0x21f   :  { %6996 = vmatpush.bf16.msrb.mxu2 %v5764_v40  ;;  %v5604_v8 = vpack.c.bf16 %v3692_v9, %v3684_v56  ;;  %v2516_v5 = vunpack.c.2.s8 %v1468_v63  ;;  %v2524_v62 = vunpack.c.3.s8 %v1468_v63  ;;  %v4308_v13 = vcvt.s32.f32 %v2388_v34  ;;  %v1348_v56 = vld [vmem:[%s12559_s1 + $0x210] sm:$0xff] }
 0x220   :  { %7009 = vmatpush.bf16.msra.mxu3 %v5828_v52  ;;  %v4316_v11 = vcvt.s32.f32 %v2396_v33  ;;  %v2068_v0 = vunpack.c.2.s8 %v1356_v16  ;;  %v2076_v14 = vunpack.c.3.s8 %v1356_v16  ;;  %v5668_v48 = vpack.c.bf16 %v3820_v1, %v3812_v2  ;;  %v1380_v2 = vld [vmem:[%s12559_s1 + $0x310] sm:$0xff] }
 0x221   :  { %6974 = vmatpush.bf16.msrb.mxu0 %v5604_v8  ;;  %v4436_v7 = vcvt.s32.f32 %v2516_v5  ;;  %v4444_v41 = vcvt.s32.f32 %v2524_v62  ;;  %v2196_v18 = vunpack.c.2.s8 %v1388_v39  ;;  %v2204_v4 = vunpack.c.3.s8 %v1388_v39 }
 0x222   :  { %v5916_v59 = vpack.c.bf16 %v4316_v11, %v4308_v13  ;;  %v3988_v10 = vcvt.s32.f32 %v2068_v0  ;;  %v3996_v54 = vcvt.s32.f32 %v2076_v14  ;;  %6987 = vmatpush.bf16.msrb.mxu1 %v5668_v48  ;;  %v2372_v21 = vunpack.c.0.s8 %v1436_v50 }
 0x223   :  { %v5980_v57 = vpack.c.bf16 %v4444_v41, %v4436_v7  ;;  %v4116_v51 = vcvt.s32.f32 %v2196_v18  ;;  %v2380_v28 = vunpack.c.1.s8 %v1436_v50  ;;  %v4124_v38 = vcvt.s32.f32 %v2204_v4  ;;  %v10914_v7 = vpop.f32.mrf.mxu2  ;;  %v10916_v41 = vpop.f32.mrf.mxu3 }
 0x224   :  { %v5756_v35 = vpack.c.bf16 %v3996_v54, %v3988_v10  ;;  %v2500_v42 = vunpack.c.0.s8 %v1468_v63  ;;  %v2508_v20 = vunpack.c.1.s8 %v1468_v63  ;;  %6975 = vmatmul.bf16.vlgmr.msrb.gmra.mxu0 %v12657_v32  ;;  %v4292_v61 = vcvt.s32.f32 %v2372_v21  ;;  %v10918_v4 = vpop.f32.mrf.mxu0 }
 0x225   :  { %7019 = vmatpush.bf16.msra.mxu0 %v5916_v59  ;;  %v4300_v19 = vcvt.s32.f32 %v2380_v28  ;;  %v2052_v29 = vunpack.c.0.s8 %v1356_v16  ;;  %v2060_v53 = vunpack.c.1.s8 %v1356_v16  ;;  %v5820_v17 = vpack.c.bf16 %v4124_v38, %v4116_v51  ;;  %6988 = vmatmul.bf16.vlgmr.msrb.gmra.mxu1 %v12658_v27 }
 0x226   :  { %7032 = vmatpush.bf16.msra.mxu1 %v5980_v57  ;;  %6997 = vmatpush.bf16.msrb.mxu2 %v5756_v35  ;;  %v4420_v24 = vcvt.s32.f32 %v2500_v42  ;;  %v4428_v50 = vcvt.s32.f32 %v2508_v20  ;;  %v2180_v43 = vunpack.c.0.s8 %v1388_v39  ;;  %v2188_v40 = vunpack.c.1.s8 %v1388_v39 }
 0x227   :  { %v5908_v23 = vpack.c.bf16 %v4300_v19, %v4292_v61  ;;  %v3972_v44 = vcvt.s32.f32 %v2052_v29  ;;  %v3980_v63 = vcvt.s32.f32 %v2060_v53  ;;  %7010 = vmatpush.bf16.msra.mxu3 %v5820_v17  ;;  %v2356_v16 = vunpack.c.2.s8 %v1428_v6  ;;  %v1500_v17 = vld [vmem:[%s12559_s1 + $0x6d0] sm:$0xff] }
 0x228   :  { %v5972_v9 = vpack.c.bf16 %v4428_v50, %v4420_v24  ;;  %v4100_v31 = vcvt.s32.f32 %v2180_v43  ;;  %v2364_v52 = vunpack.c.3.s8 %v1428_v6  ;;  %v4108_v33 = vcvt.s32.f32 %v2188_v40 }
 0x229   :  { %7020 = vmatpush.bf16.msra.mxu0 %v5908_v23  ;;  %v5748_v34 = vpack.c.bf16 %v3980_v63, %v3972_v44  ;;  %v2484_v8 = vunpack.c.2.s8 %v1460_v26  ;;  %v2492_v1 = vunpack.c.3.s8 %v1460_v26  ;;  %v4276_v39 = vcvt.s32.f32 %v2356_v16 }
 0x22a   :  { %7033 = vmatpush.bf16.msra.mxu1 %v5972_v9  ;;  %v4284_v5 = vcvt.s32.f32 %v2364_v52  ;;  %v2036_v62 = vunpack.c.2.s8 %v1348_v56  ;;  %v2044_v13 = vunpack.c.3.s8 %v1348_v56  ;;  %v5812_v11 = vpack.c.bf16 %v4108_v33, %v4100_v31 }
 0x22b   :  { %6998 = vmatpush.bf16.msrb.mxu2 %v5748_v34  ;;  %v4404_v0 = vcvt.s32.f32 %v2484_v8  ;;  %v4412_v14 = vcvt.s32.f32 %v2492_v1  ;;  %v2164_v48 = vunpack.c.2.s8 %v1380_v2  ;;  %v2172_v54 = vunpack.c.3.s8 %v1380_v2  ;;  %v1452_v34 = vld [vmem:[%s12559_s1 + $0x550] sm:$0xff] }
 0x22c   :  { %v5900_v18 = vpack.c.bf16 %v4284_v5, %v4276_v39  ;;  %v3956_v59 = vcvt.s32.f32 %v2036_v62  ;;  %v3964_v10 = vcvt.s32.f32 %v2044_v13  ;;  %7011 = vmatpush.bf16.msra.mxu3 %v5812_v11  ;;  %v2340_v21 = vunpack.c.0.s8 %v1428_v6  ;;  %v6744_v5 = vpop.f32.mrf.mxu2 }
 0x22d   :  { %v5964_v57 = vpack.c.bf16 %v4412_v14, %v4404_v0  ;;  %v4084_v51 = vcvt.s32.f32 %v2164_v48  ;;  %v2348_v28 = vunpack.c.1.s8 %v1428_v6  ;;  %v4092_v38 = vcvt.s32.f32 %v2172_v54  ;;  %v1532_v6 = vld [vmem:[%s12559_s1 + $0x7d0] sm:$0xff]  ;;  %v6770_v14 = vpop.f32.mrf.mxu0 }
 0x22e   :  { %7021 = vmatpush.bf16.msra.mxu0 %v5900_v18  ;;  %v5740_v35 = vpack.c.bf16 %v3964_v10, %v3956_v59  ;;  %v2468_v42 = vunpack.c.0.s8 %v1460_v26  ;;  %v2476_v20 = vunpack.c.1.s8 %v1460_v26  ;;  %v4260_v61 = vcvt.s32.f32 %v2340_v21  ;;  %v1444_v5 = vld [vmem:[%s12559_s1 + $0x510] sm:$0xff] }
 0x22f   :  { %7034 = vmatpush.bf16.msra.mxu1 %v5964_v57  ;;  %v4268_v19 = vcvt.s32.f32 %v2348_v28  ;;  %v2020_v29 = vunpack.c.0.s8 %v1348_v56  ;;  %v2028_v53 = vunpack.c.1.s8 %v1348_v56  ;;  %v5804_v24 = vpack.c.bf16 %v4092_v38, %v4084_v51  ;;  %v1420_v56 = vld [vmem:[%s12559_s1 + $0x450] sm:$0xff] }
 0x230   :  { %6999 = vmatpush.bf16.msrb.mxu2 %v5740_v35  ;;  %v4388_v50 = vcvt.s32.f32 %v2468_v42  ;;  %v4396_v43 = vcvt.s32.f32 %v2476_v20  ;;  %v2148_v23 = vunpack.c.0.s8 %v1380_v2  ;;  %v2156_v40 = vunpack.c.1.s8 %v1380_v2  ;;  %v6757_v2 = vpop.f32.mrf.mxu3 }
 0x231   :  { %v5892_v44 = vpack.c.bf16 %v4268_v19, %v4260_v61  ;;  %v3940_v26 = vcvt.s32.f32 %v2020_v29  ;;  %v3948_v63 = vcvt.s32.f32 %v2028_v53  ;;  %7012 = vmatpush.bf16.msra.mxu3 %v5804_v24  ;;  %v2644_v16 = vunpack.c.2.s8 %v1500_v17 }
 0x232   :  { %v5956_v9 = vpack.c.bf16 %v4396_v43, %v4388_v50  ;;  %v4068_v31 = vcvt.s32.f32 %v2148_v23  ;;  %v2652_v52 = vunpack.c.3.s8 %v1500_v17  ;;  %v4076_v8 = vcvt.s32.f32 %v2156_v40  ;;  %v1492_v23 = vld [vmem:[%s12559_s1 + $0x690] sm:$0xff] }
 0x233   :  { %7022 = vmatpush.bf16.msra.mxu0 %v5892_v44  ;;  %v5732_v33 = vpack.c.bf16 %v3948_v63, %v3940_v26  ;;  %v2772_v1 = vunpack.c.2.s8 %v1532_v6  ;;  %v2780_v39 = vunpack.c.3.s8 %v1532_v6  ;;  %v4564_v62 = vcvt.s32.f32 %v2644_v16 }
 0x234   :  { %7035 = vmatpush.bf16.msra.mxu1 %v5956_v9  ;;  %v4572_v13 = vcvt.s32.f32 %v2652_v52  ;;  %v2324_v11 = vunpack.c.2.s8 %v1420_v56  ;;  %v2332_v0 = vunpack.c.3.s8 %v1420_v56  ;;  %v5796_v48 = vpack.c.bf16 %v4076_v8, %v4068_v31  ;;  %v10943_v52 = vpop.f32.mrf.mxu1 }
 0x235   :  { %7000 = vmatpush.bf16.msrb.mxu2 %v5732_v33  ;;  %v4692_v18 = vcvt.s32.f32 %v2772_v1  ;;  %v4700_v59 = vcvt.s32.f32 %v2780_v39  ;;  %v2452_v10 = vunpack.c.2.s8 %v1452_v34  ;;  %v2460_v21 = vunpack.c.3.s8 %v1452_v34 }
 0x236   :  { %v6044_v54 = vpack.c.bf16 %v4572_v13, %v4564_v62  ;;  %v4244_v57 = vcvt.s32.f32 %v2324_v11  ;;  %v4252_v51 = vcvt.s32.f32 %v2332_v0  ;;  %7013 = vmatpush.bf16.msra.mxu3 %v5796_v48  ;;  %v2628_v38 = vunpack.c.0.s8 %v1500_v17 }
 0x237   :  { %v6108_v28 = vpack.c.bf16 %v4700_v59, %v4692_v18  ;;  %v4372_v35 = vcvt.s32.f32 %v2452_v10  ;;  %v2636_v42 = vunpack.c.1.s8 %v1500_v17  ;;  %v4380_v61 = vcvt.s32.f32 %v2460_v21 }
 0x238   :  { %v5884_v20 = vpack.c.bf16 %v4252_v51, %v4244_v57  ;;  %v2756_v19 = vunpack.c.0.s8 %v1532_v6  ;;  %v2764_v29 = vunpack.c.1.s8 %v1532_v6  ;;  %7001 = vmatmul.bf16.vlgmr.msrb.gmra.mxu2 %v12639_v25  ;;  %v4548_v53 = vcvt.s32.f32 %v2628_v38  ;;  %v1524_v6 = vld [vmem:[%s12559_s1 + $0x790] sm:$0xff] }
 0x239   :  { %7045 = vmatpush.bf16.msra.mxu2 %v6044_v54  ;;  %v4556_v24 = vcvt.s32.f32 %v2636_v42  ;;  %v2308_v50 = vunpack.c.0.s8 %v1420_v56  ;;  %v2316_v43 = vunpack.c.1.s8 %v1420_v56  ;;  %7014 = vmatmul.bf16.vlgmr.msra.gmra.mxu3 %v9894_v55  ;;  %v5948_v17 = vpack.c.bf16 %v4380_v61, %v4372_v35  ;;  %v1412_v56 = vld [vmem:[%s12559_s1 + $0x410] sm:$0xff] }
 0x23a   :  { %7058 = vmatpush.bf16.msrb.mxu3 %v6108_v28  ;;  %7023 = vmatpush.bf16.msra.mxu0 %v5884_v20  ;;  %v4676_v44 = vcvt.s32.f32 %v2756_v19  ;;  %v4684_v26 = vcvt.s32.f32 %v2764_v29  ;;  %v2436_v63 = vunpack.c.0.s8 %v1452_v34  ;;  %v2444_v16 = vunpack.c.1.s8 %v1452_v34 }
 0x23b   :  { %v6036_v40 = vpack.c.bf16 %v4556_v24, %v4548_v53  ;;  %v4228_v9 = vcvt.s32.f32 %v2308_v50  ;;  %v4236_v31 = vcvt.s32.f32 %v2316_v43  ;;  %7036 = vmatpush.bf16.msra.mxu1 %v5948_v17  ;;  %v2612_v1 = vunpack.c.2.s8 %v1492_v23 }
 0x23c   :  { %v6100_v33 = vpack.c.bf16 %v4684_v26, %v4676_v44  ;;  %v4356_v8 = vcvt.s32.f32 %v2436_v63  ;;  %v2620_v39 = vunpack.c.3.s8 %v1492_v23  ;;  %v4364_v62 = vcvt.s32.f32 %v2444_v16  ;;  %v10948_v44 = vpop.f32.mrf.mxu2  ;;  %v10950_v26 = vpop.f32.mrf.mxu3 }
 0x23d   :  { %7046 = vmatpush.bf16.msra.mxu2 %v6036_v40  ;;  %v5876_v2 = vpack.c.bf16 %v4236_v31, %v4228_v9  ;;  %v2740_v13 = vunpack.c.2.s8 %v1524_v6  ;;  %v2748_v34 = vunpack.c.3.s8 %v1524_v6  ;;  %v4532_v11 = vcvt.s32.f32 %v2612_v1  ;;  %v10955_v16 = vpop.f32.mrf.mxu0 }
 0x23e   :  { %7059 = vmatpush.bf16.msrb.mxu3 %v6100_v33  ;;  %v4540_v0 = vcvt.s32.f32 %v2620_v39  ;;  %v2292_v14 = vunpack.c.2.s8 %v1412_v56  ;;  %v2300_v48 = vunpack.c.3.s8 %v1412_v56  ;;  %v5940_v18 = vpack.c.bf16 %v4364_v62, %v4356_v8  ;;  %v1596_v39 = vld [vmem:[%s12559_s1 + $0x9d0] sm:$0xff] }
 0x23f   :  { %7024 = vmatpush.bf16.msra.mxu0 %v5876_v2  ;;  %v4660_v59 = vcvt.s32.f32 %v2740_v13  ;;  %v4668_v10 = vcvt.s32.f32 %v2748_v34  ;;  %v2420_v54 = vunpack.c.2.s8 %v1444_v5  ;;  %v2428_v28 = vunpack.c.3.s8 %v1444_v5  ;;  %v1484_v34 = vld [vmem:[%s12559_s1 + $0x650] sm:$0xff] }
 0x240   :  { %v6028_v57 = vpack.c.bf16 %v4540_v0, %v4532_v11  ;;  %v4212_v51 = vcvt.s32.f32 %v2292_v14  ;;  %v4220_v21 = vcvt.s32.f32 %v2300_v48  ;;  %7037 = vmatpush.bf16.msra.mxu1 %v5940_v18  ;;  %v2596_v42 = vunpack.c.0.s8 %v1492_v23 }
 0x241   :  { %v6092_v35 = vpack.c.bf16 %v4668_v10, %v4660_v59  ;;  %v4340_v38 = vcvt.s32.f32 %v2420_v54  ;;  %v2604_v20 = vunpack.c.1.s8 %v1492_v23  ;;  %v4348_v19 = vcvt.s32.f32 %v2428_v28  ;;  %v1564_v23 = vld [vmem:[%s12559_s1 + $0x8d0] sm:$0xff] }
 0x242   :  { %7047 = vmatpush.bf16.msra.mxu2 %v6028_v57  ;;  %v5868_v61 = vpack.c.bf16 %v4220_v21, %v4212_v51  ;;  %v2724_v29 = vunpack.c.0.s8 %v1524_v6  ;;  %v2732_v53 = vunpack.c.1.s8 %v1524_v6  ;;  %v4516_v24 = vcvt.s32.f32 %v2596_v42  ;;  %v6835_v6 = vpop.f32.mrf.mxu1  ;;  %v1516_v10 = vld [vmem:[%s12559_s1 + $0x750] sm:$0xff] }
 0x243   :  { %7060 = vmatpush.bf16.msrb.mxu3 %v6092_v35  ;;  %v4524_v50 = vcvt.s32.f32 %v2604_v20  ;;  %v2276_v43 = vunpack.c.0.s8 %v1412_v56  ;;  %v2284_v17 = vunpack.c.1.s8 %v1412_v56  ;;  %v5932_v63 = vpack.c.bf16 %v4348_v19, %v4340_v38  ;;  %v1556_v6 = vld [vmem:[%s12559_s1 + $0x890] sm:$0xff] }
 0x244   :  { %7025 = vmatpush.bf16.msra.mxu0 %v5868_v61  ;;  %v4644_v40 = vcvt.s32.f32 %v2724_v29  ;;  %v4652_v9 = vcvt.s32.f32 %v2732_v53  ;;  %v2404_v31 = vunpack.c.0.s8 %v1444_v5  ;;  %v2412_v56 = vunpack.c.1.s8 %v1444_v5  ;;  %v6796_v61 = vpop.f32.mrf.mxu2  ;;  %v6809_v19 = vpop.f32.mrf.mxu3 }
 0x245   :  { %v6020_v33 = vpack.c.bf16 %v4524_v50, %v4516_v24  ;;  %v4196_v8 = vcvt.s32.f32 %v2276_v43  ;;  %v4204_v1 = vcvt.s32.f32 %v2284_v17  ;;  %7038 = vmatpush.bf16.msra.mxu1 %v5932_v63  ;;  %v6743_v13 = vadd.f32 %v10914_v7, %v10861_v12  ;;  %v6822_v50 = vpop.f32.mrf.mxu0 }
 0x246   :  { %v6084_v2 = vpack.c.bf16 %v4652_v9, %v4644_v40  ;;  %v4324_v62 = vcvt.s32.f32 %v2404_v31  ;;  %v4332_v0 = vcvt.s32.f32 %v2412_v56  ;;  %v2900_v14 = vunpack.c.2.s8 %v1564_v23 }
 0x247   :  { %7048 = vmatpush.bf16.msra.mxu2 %v6020_v33  ;;  %v5860_v11 = vpack.c.bf16 %v4204_v1, %v4196_v8  ;;  %v6756_v5 = vadd.f32 %v10916_v41, %v6743_v13  ;;  %v2908_v48 = vunpack.c.3.s8 %v1564_v23  ;;  %v3028_v18 = vunpack.c.2.s8 %v1596_v39 }
 0x248   :  { %7061 = vmatpush.bf16.msrb.mxu3 %v6084_v2  ;;  %v3036_v59 = vunpack.c.3.s8 %v1596_v39  ;;  %v5924_v12 = vpack.c.bf16 %v4332_v0, %v4324_v62  ;;  %v4820_v7 = vcvt.s32.f32 %v2900_v14  ;;  %v2580_v54 = vunpack.c.2.s8 %v1484_v34 }
 0x249   :  { %7026 = vmatpush.bf16.msra.mxu0 %v5860_v11  ;;  %v2588_v57 = vunpack.c.3.s8 %v1484_v34  ;;  %v10970_v51 = vadd.f32 %v10918_v4, %v6756_v5  ;;  %v4828_v21 = vcvt.s32.f32 %v2908_v48  ;;  %v4948_v28 = vcvt.s32.f32 %v3028_v18  ;;  %v1588_v11 = vld [vmem:[%s12559_s1 + $0x990] sm:$0xff] }
 0x24a   :  { %v4956_v35 = vcvt.s32.f32 %v3036_v59  ;;  %7039 = vmatpush.bf16.msra.mxu1 %v5924_v12  ;;  %v4500_v41 = vcvt.s32.f32 %v2580_v54  ;;  %v2708_v42 = vunpack.c.2.s8 %v1516_v10  ;;  %v2716_v20 = vunpack.c.3.s8 %v1516_v10  ;;  %v1476_v48 = vld [vmem:[%s12559_s1 + $0x610] sm:$0xff] }
 0x24b   :  { %v4508_v38 = vcvt.s32.f32 %v2588_v57  ;;  %v6172_v29 = vpack.c.bf16 %v4828_v21, %v4820_v7  ;;  %v2884_v24 = vunpack.c.0.s8 %v1564_v23  ;;  %v2892_v63 = vunpack.c.1.s8 %v1564_v23 }
 0x24c   :  { %v6236_v53 = vpack.c.bf16 %v4956_v35, %v4948_v28  ;;  %7027 = vmatmul.bf16.vlgmr.msra.gmra.mxu0 %v9969_v58  ;;  %v4628_v17 = vcvt.s32.f32 %v2708_v42  ;;  %v4636_v4 = vcvt.s32.f32 %v2716_v20  ;;  %v3012_v9 = vunpack.c.0.s8 %v1596_v39 }
 0x24d   :  { %v6012_v43 = vpack.c.bf16 %v4508_v38, %v4500_v41  ;;  %7071 = vmatpush.bf16.msrb.mxu0 %v6172_v29  ;;  %v4804_v40 = vcvt.s32.f32 %v2884_v24  ;;  %v3020_v31 = vunpack.c.1.s8 %v1596_v39  ;;  %7040 = vmatmul.bf16.vlgmr.msra.gmra.mxu1 %v9975_v3  ;;  %v4812_v8 = vcvt.s32.f32 %v2892_v63 }
 0x24e   :  { %7084 = vmatpush.bf16.msrb.mxu1 %v6236_v53  ;;  %v6076_v33 = vpack.c.bf16 %v4636_v4, %v4628_v17  ;;  %v2564_v1 = vunpack.c.0.s8 %v1484_v34  ;;  %v2572_v56 = vunpack.c.1.s8 %v1484_v34  ;;  %v4932_v2 = vcvt.s32.f32 %v3012_v9 }
 0x24f   :  { %7049 = vmatpush.bf16.msra.mxu2 %v6012_v43  ;;  %v4940_v62 = vcvt.s32.f32 %v3020_v31  ;;  %v2692_v13 = vunpack.c.0.s8 %v1516_v10  ;;  %v2700_v23 = vunpack.c.1.s8 %v1516_v10  ;;  %v6164_v39 = vpack.c.bf16 %v4812_v8, %v4804_v40  ;;  %v1508_v10 = vld [vmem:[%s12559_s1 + $0x710] sm:$0xff] }
 0x250   :  { %7062 = vmatpush.bf16.msrb.mxu3 %v6076_v33  ;;  %v4484_v0 = vcvt.s32.f32 %v2564_v1  ;;  %v4492_v14 = vcvt.s32.f32 %v2572_v56  ;;  %v2868_v5 = vunpack.c.2.s8 %v1556_v6  ;;  %v2876_v12 = vunpack.c.3.s8 %v1556_v6  ;;  %v10989_v8 = vld [vmem:[%s12559_s1 + $0xad0] sm:$0xff] }
 0x251   :  { %v6228_v18 = vpack.c.bf16 %v4940_v62, %v4932_v2  ;;  %v4612_v59 = vcvt.s32.f32 %v2692_v13  ;;  %v4620_v34 = vcvt.s32.f32 %v2700_v23  ;;  %7072 = vmatpush.bf16.msrb.mxu0 %v6164_v39  ;;  %v2996_v57 = vunpack.c.2.s8 %v1588_v11 }
 0x252   :  { %v6004_v7 = vpack.c.bf16 %v4492_v14, %v4484_v0  ;;  %v4788_v54 = vcvt.s32.f32 %v2868_v5  ;;  %v3004_v21 = vunpack.c.3.s8 %v1588_v11  ;;  %v4796_v35 = vcvt.s32.f32 %v2876_v12  ;;  %v1660_v0 = vld [vmem:[%s12559_s1 + $0xbd0] sm:$0xff]  ;;  %v10996_v14 = vpop.f32.mrf.mxu3 }
 0x253   :  { %7085 = vmatpush.bf16.msrb.mxu1 %v6228_v18  ;;  %v6068_v28 = vpack.c.bf16 %v4620_v34, %v4612_v59  ;;  %v2548_v41 = vunpack.c.2.s8 %v1476_v48  ;;  %v2556_v38 = vunpack.c.3.s8 %v1476_v48  ;;  %v4916_v42 = vcvt.s32.f32 %v2996_v57  ;;  %v1580_v57 = vld [vmem:[%s12559_s1 + $0x950] sm:$0xff] }
 0x254   :  { %7050 = vmatpush.bf16.msra.mxu2 %v6004_v7  ;;  %v4924_v20 = vcvt.s32.f32 %v3004_v21  ;;  %v2676_v61 = vunpack.c.2.s8 %v1508_v10  ;;  %v2684_v19 = vunpack.c.3.s8 %v1508_v10  ;;  %v6156_v29 = vpack.c.bf16 %v4796_v35, %v4788_v54 }
 0x255   :  { %7063 = vmatpush.bf16.msrb.mxu3 %v6068_v28  ;;  %v4468_v53 = vcvt.s32.f32 %v2548_v41  ;;  %v4476_v24 = vcvt.s32.f32 %v2556_v38  ;;  %v2852_v50 = vunpack.c.0.s8 %v1556_v6  ;;  %v2860_v63 = vunpack.c.1.s8 %v1556_v6 }
 0x256   :  { %v6220_v43 = vpack.c.bf16 %v4924_v20, %v4916_v42  ;;  %v4596_v17 = vcvt.s32.f32 %v2676_v61  ;;  %v4604_v4 = vcvt.s32.f32 %v2684_v19  ;;  %7073 = vmatpush.bf16.msrb.mxu0 %v6156_v29  ;;  %v2980_v31 = vunpack.c.0.s8 %v1588_v11 }
 0x257   :  { %v5996_v40 = vpack.c.bf16 %v4476_v24, %v4468_v53  ;;  %v4772_v9 = vcvt.s32.f32 %v2852_v50  ;;  %v2988_v33 = vunpack.c.1.s8 %v1588_v11  ;;  %v4780_v56 = vcvt.s32.f32 %v2860_v63  ;;  %v10994_v11 = vpop.f32.mrf.mxu2 }
 0x258   :  { %7086 = vmatpush.bf16.msrb.mxu1 %v6220_v43  ;;  %v6060_v1 = vpack.c.bf16 %v4604_v4, %v4596_v17  ;;  %v2532_v2 = vunpack.c.0.s8 %v1476_v48  ;;  %v2540_v62 = vunpack.c.1.s8 %v1476_v48  ;;  %v4900_v13 = vcvt.s32.f32 %v2980_v31  ;;  %v1548_v48 = vld [vmem:[%s12559_s1 + $0x850] sm:$0xff] }
 0x259   :  { %7051 = vmatpush.bf16.msra.mxu2 %v5996_v40  ;;  %v4908_v23 = vcvt.s32.f32 %v2988_v33  ;;  %v2660_v39 = vunpack.c.0.s8 %v1508_v10  ;;  %v2668_v6 = vunpack.c.1.s8 %v1508_v10  ;;  %v6148_v5 = vpack.c.bf16 %v4780_v56, %v4772_v9 }
 0x25a   :  { %7064 = vmatpush.bf16.msrb.mxu3 %v6060_v1  ;;  %v4452_v18 = vcvt.s32.f32 %v2532_v2  ;;  %v4460_v59 = vcvt.s32.f32 %v2540_v62  ;;  %v3156_v34 = vunpack.c.2.s8 %v10989_v8  ;;  %v3164_v54 = vunpack.c.3.s8 %v10989_v8  ;;  %v6861_v2 = vpop.f32.mrf.mxu3 }
 0x25b   :  { %v6212_v12 = vpack.c.bf16 %v4908_v23, %v4900_v13  ;;  %v4580_v10 = vcvt.s32.f32 %v2660_v39  ;;  %v4588_v7 = vcvt.s32.f32 %v2668_v6  ;;  %7074 = vmatpush.bf16.msrb.mxu0 %v6148_v5  ;;  %v3284_v35 = vunpack.c.2.s8 %v1660_v0  ;;  %v1620_v39 = vld [vmem:[%s12559_s1 + $0xa90] sm:$0xff] }
 0x25c   :  { %v5988_v21 = vpack.c.bf16 %v4460_v59, %v4452_v18  ;;  %v5076_v28 = vcvt.s32.f32 %v3156_v34  ;;  %v3292_v41 = vunpack.c.3.s8 %v1660_v0  ;;  %v5084_v42 = vcvt.s32.f32 %v3164_v54  ;;  %v1652_v18 = vld [vmem:[%s12559_s1 + $0xb90] sm:$0xff] }
 0x25d   :  { %7087 = vmatpush.bf16.msrb.mxu1 %v6212_v12  ;;  %v6052_v38 = vpack.c.bf16 %v4588_v7, %v4580_v10  ;;  %v6795_v20 = vadd.f32 %v10948_v44, %v10880_v47  ;;  %v2836_v61 = vunpack.c.2.s8 %v1548_v48  ;;  %v5204_v19 = vcvt.s32.f32 %v3284_v35  ;;  %v11022_v10 = vpop.f32.mrf.mxu0  ;;  %v11024_v7 = vpop.f32.mrf.mxu1 }
 0x25e   :  { %7052 = vmatpush.bf16.msra.mxu2 %v5988_v21  ;;  %v5212_v29 = vcvt.s32.f32 %v3292_v41  ;;  %v2844_v53 = vunpack.c.3.s8 %v1548_v48  ;;  %v2964_v24 = vunpack.c.2.s8 %v1580_v57  ;;  %v6300_v50 = vpack.c.bf16 %v5084_v42, %v5076_v28 }
 0x25f   :  { %7065 = vmatpush.bf16.msrb.mxu3 %v6052_v38  ;;  %v6808_v43 = vadd.f32 %v10950_v26, %v6795_v20  ;;  %v4756_v17 = vcvt.s32.f32 %v2836_v61  ;;  %v2972_v4 = vunpack.c.3.s8 %v1580_v57  ;;  %v3140_v31 = vunpack.c.0.s8 %v10989_v8  ;;  %v6848_v56 = vpop.f32.mrf.mxu2 }
 0x260   :  { %v6364_v63 = vpack.c.bf16 %v5212_v29, %v5204_v19  ;;  %v4764_v40 = vcvt.s32.f32 %v2844_v53  ;;  %v4884_v9 = vcvt.s32.f32 %v2964_v24  ;;  %v3148_v33 = vunpack.c.1.s8 %v10989_v8 }
 0x261   :  { %v11011_v47 = vadd.f32 %v10955_v16, %v6808_v43  ;;  %v4892_v44 = vcvt.s32.f32 %v2972_v4  ;;  %v3268_v1 = vunpack.c.0.s8 %v1660_v0  ;;  %7053 = vmatmul.bf16.vlgmr.msra.gmra.mxu2 %v10260_v49  ;;  %v5060_v62 = vcvt.s32.f32 %v3140_v31 }
 0x262   :  { %7097 = vmatpush.bf16.msrb.mxu2 %v6300_v50  ;;  %v6140_v26 = vpack.c.bf16 %v4764_v40, %v4756_v17  ;;  %v3276_v13 = vunpack.c.1.s8 %v1660_v0  ;;  %v2820_v23 = vunpack.c.0.s8 %v1548_v48  ;;  %7066 = vmatmul.bf16.vlgmr.msrb.gmra.mxu3 %v10318_v45  ;;  %v5068_v6 = vcvt.s32.f32 %v3148_v33 }
 0x263   :  { %7110 = vmatpush.bf16.msra.mxu3 %v6364_v63  ;;  %v6204_v16 = vpack.c.bf16 %v4892_v44, %v4884_v9  ;;  %v5188_v5 = vcvt.s32.f32 %v3268_v1  ;;  %v2828_v8 = vunpack.c.1.s8 %v1548_v48  ;;  %v2948_v12 = vunpack.c.0.s8 %v1580_v57  ;;  %v1540_v48 = vld [vmem:[%s12559_s1 + $0x810] sm:$0xff] }
 0x264   :  { %7075 = vmatpush.bf16.msrb.mxu0 %v6140_v26  ;;  %v5196_v59 = vcvt.s32.f32 %v3276_v13  ;;  %v4740_v34 = vcvt.s32.f32 %v2820_v23  ;;  %v2956_v0 = vunpack.c.1.s8 %v1580_v57  ;;  %v6292_v54 = vpack.c.bf16 %v5068_v6, %v5060_v62  ;;  %v1572_v57 = vld [vmem:[%s12559_s1 + $0x910] sm:$0xff] }
 0x265   :  { %7088 = vmatpush.bf16.msrb.mxu1 %v6204_v16  ;;  %v4748_v21 = vcvt.s32.f32 %v2828_v8  ;;  %v3124_v28 = vunpack.c.2.s8 %v1620_v39  ;;  %v3132_v35 = vunpack.c.3.s8 %v1620_v39  ;;  %v4868_v38 = vcvt.s32.f32 %v2948_v12  ;;  %v6874_v8 = vpop.f32.mrf.mxu0 }
 0x266   :  { %v6356_v41 = vpack.c.bf16 %v5196_v59, %v5188_v5  ;;  %v4876_v42 = vcvt.s32.f32 %v2956_v0  ;;  %v3252_v20 = vunpack.c.2.s8 %v1652_v18  ;;  %7098 = vmatpush.bf16.msrb.mxu2 %v6292_v54  ;;  %v3260_v53 = vunpack.c.3.s8 %v1652_v18  ;;  %v1692_v5 = vld [vmem:[%s12559_s1 + $0xcd0] sm:$0xff]  ;;  %v6887_v59 = vpop.f32.mrf.mxu1 }
 0x267   :  { %v6132_v61 = vpack.c.bf16 %v4748_v21, %v4740_v34  ;;  %v5044_v19 = vcvt.s32.f32 %v3124_v28  ;;  %v5052_v29 = vcvt.s32.f32 %v3132_v35  ;;  %v2804_v43 = vunpack.c.2.s8 %v1540_v48  ;;  %v1724_v54 = vld [vmem:[%s12559_s1 + $0xdd0] sm:$0xff] }
 0x268   :  { %7111 = vmatpush.bf16.msra.mxu3 %v6356_v41  ;;  %v6196_v24 = vpack.c.bf16 %v4876_v42, %v4868_v38  ;;  %v5172_v50 = vcvt.s32.f32 %v3252_v20  ;;  %v2812_v17 = vunpack.c.3.s8 %v1540_v48  ;;  %v5180_v63 = vcvt.s32.f32 %v3260_v53 }
 0x269   :  { %7076 = vmatpush.bf16.msrb.mxu0 %v6132_v61  ;;  %v6284_v4 = vpack.c.bf16 %v5052_v29, %v5044_v19  ;;  %v2932_v40 = vunpack.c.2.s8 %v1572_v57  ;;  %v2940_v9 = vunpack.c.3.s8 %v1572_v57  ;;  %v4724_v31 = vcvt.s32.f32 %v2804_v43  ;;  %v1612_v61 = vld [vmem:[%s12559_s1 + $0xa50] sm:$0xff] }
 0x26a   :  { %7089 = vmatpush.bf16.msrb.mxu1 %v6196_v24  ;;  %v4732_v44 = vcvt.s32.f32 %v2812_v17  ;;  %v3108_v33 = vunpack.c.0.s8 %v1620_v39  ;;  %v3116_v1 = vunpack.c.1.s8 %v1620_v39  ;;  %v6348_v56 = vpack.c.bf16 %v5180_v63, %v5172_v50  ;;  %v1644_v24 = vld [vmem:[%s12559_s1 + $0xb50] sm:$0xff] }
 0x26b   :  { %7099 = vmatpush.bf16.msrb.mxu2 %v6284_v4  ;;  %v4852_v2 = vcvt.s32.f32 %v2932_v40  ;;  %v4860_v26 = vcvt.s32.f32 %v2940_v9  ;;  %v3236_v62 = vunpack.c.0.s8 %v1652_v18  ;;  %v3244_v6 = vunpack.c.1.s8 %v1652_v18 }
 0x26c   :  { %v6124_v13 = vpack.c.bf16 %v4732_v44, %v4724_v31  ;;  %v5028_v23 = vcvt.s32.f32 %v3108_v33  ;;  %v5036_v16 = vcvt.s32.f32 %v3116_v1  ;;  %7112 = vmatpush.bf16.msra.mxu3 %v6348_v56  ;;  %v2788_v0 = vunpack.c.0.s8 %v1540_v48 }
 0x26d   :  { %v6188_v34 = vpack.c.bf16 %v4860_v26, %v4852_v2  ;;  %v5156_v12 = vcvt.s32.f32 %v3236_v62  ;;  %v2796_v39 = vunpack.c.1.s8 %v1540_v48  ;;  %v5164_v28 = vcvt.s32.f32 %v3244_v6 }
 0x26e   :  { %7077 = vmatpush.bf16.msrb.mxu0 %v6124_v13  ;;  %v6276_v21 = vpack.c.bf16 %v5036_v16, %v5028_v23  ;;  %v2916_v35 = vunpack.c.0.s8 %v1572_v57  ;;  %v2924_v18 = vunpack.c.1.s8 %v1572_v57  ;;  %v4708_v41 = vcvt.s32.f32 %v2788_v0 }
 0x26f   :  { %7090 = vmatpush.bf16.msrb.mxu1 %v6188_v34  ;;  %v4716_v38 = vcvt.s32.f32 %v2796_v39  ;;  %v3412_v42 = vunpack.c.2.s8 %v1692_v5  ;;  %v3420_v20 = vunpack.c.3.s8 %v1692_v5  ;;  %v6340_v48 = vpack.c.bf16 %v5164_v28, %v5156_v12 }
 0x270   :  { %7100 = vmatpush.bf16.msrb.mxu2 %v6276_v21  ;;  %v4836_v19 = vcvt.s32.f32 %v2916_v35  ;;  %v4844_v29 = vcvt.s32.f32 %v2924_v18  ;;  %v3540_v53 = vunpack.c.2.s8 %v1724_v54  ;;  %v3548_v17 = vunpack.c.3.s8 %v1724_v54 }
 0x271   :  { %v6116_v50 = vpack.c.bf16 %v4716_v38, %v4708_v41  ;;  %v5332_v57 = vcvt.s32.f32 %v3412_v42  ;;  %v5340_v43 = vcvt.s32.f32 %v3420_v20  ;;  %7113 = vmatpush.bf16.msra.mxu3 %v6340_v48  ;;  %v3092_v40 = vunpack.c.2.s8 %v1612_v61  ;;  %v1604_v20 = vld [vmem:[%s12559_s1 + $0xa10] sm:$0xff] }
 0x272   :  { %v6180_v4 = vpack.c.bf16 %v4844_v29, %v4836_v19  ;;  %v5460_v63 = vcvt.s32.f32 %v3540_v53  ;;  %v3100_v9 = vunpack.c.3.s8 %v1612_v61  ;;  %v5468_v44 = vcvt.s32.f32 %v3548_v17 }
 0x273   :  { %7078 = vmatpush.bf16.msrb.mxu0 %v6116_v50  ;;  %v6428_v31 = vpack.c.bf16 %v5340_v43, %v5332_v57  ;;  %v3220_v33 = vunpack.c.2.s8 %v1644_v24  ;;  %v3228_v1 = vunpack.c.3.s8 %v1644_v24  ;;  %v5012_v56 = vcvt.s32.f32 %v3092_v40  ;;  %v1636_v43 = vld [vmem:[%s12559_s1 + $0xb10] sm:$0xff] }
 0x274   :  { %7091 = vmatpush.bf16.msrb.mxu1 %v6180_v4  ;;  %v5020_v2 = vcvt.s32.f32 %v3100_v9  ;;  %v6834_v26 = vadd.f32 %v10943_v52, %v11011_v47  ;;  %v3396_v62 = vunpack.c.0.s8 %v1692_v5  ;;  %v6492_v13 = vpack.c.bf16 %v5468_v44, %v5460_v63  ;;  %v1684_v52 = vld [vmem:[%s12559_s1 + $0xc90] sm:$0xff] }
 0x275   :  { %v5140_v23 = vcvt.s32.f32 %v3220_v33  ;;  %v5148_v16 = vcvt.s32.f32 %v3228_v1  ;;  %v3404_v6 = vunpack.c.1.s8 %v1692_v5  ;;  %v3524_v12 = vunpack.c.0.s8 %v1724_v54 }
 0x276   :  { %v6268_v8 = vpack.c.bf16 %v5020_v2, %v5012_v56  ;;  %7079 = vmatmul.bf16.vlgmr.msrb.gmra.mxu0 %v10505_v15  ;;  %v6847_v59 = vadd.f32 %v10994_v11, %v6834_v26  ;;  %v5316_v34 = vcvt.s32.f32 %v3396_v62  ;;  %v3532_v21 = vunpack.c.1.s8 %v1724_v54  ;;  %v1716_v11 = vld [vmem:[%s12559_s1 + $0xd90] sm:$0xff] }
 0x277   :  { %7123 = vmatpush.bf16.msra.mxu0 %v6428_v31  ;;  %v6332_v0 = vpack.c.bf16 %v5148_v16, %v5140_v23  ;;  %v5324_v39 = vcvt.s32.f32 %v3404_v6  ;;  %v3076_v28 = vunpack.c.0.s8 %v1612_v61  ;;  %7092 = vmatmul.bf16.vlgmr.msrb.gmra.mxu1 %v10510_v36  ;;  %v5444_v5 = vcvt.s32.f32 %v3524_v12 }
 0x278   :  { %7136 = vmatpush.bf16.msra.mxu1 %v6492_v13  ;;  %7101 = vmatpush.bf16.msrb.mxu2 %v6268_v8  ;;  %v6860_v47 = vadd.f32 %v10996_v14, %v6847_v59  ;;  %v3084_v35 = vunpack.c.1.s8 %v1612_v61  ;;  %v3204_v18 = vunpack.c.0.s8 %v1644_v24  ;;  %v5452_v54 = vcvt.s32.f32 %v3532_v21  ;;  %v1756_v21 = vld [vmem:[%s12559_s1 + $0xed0] sm:$0xff] }
 0x279   :  { %7114 = vmatpush.bf16.msra.mxu3 %v6332_v0  ;;  %v6420_v41 = vpack.c.bf16 %v5324_v39, %v5316_v34  ;;  %v4996_v38 = vcvt.s32.f32 %v3076_v28  ;;  %v3212_v42 = vunpack.c.1.s8 %v1644_v24  ;;  %v3380_v29 = vunpack.c.2.s8 %v1684_v52 }
 0x27a   :  { %v5004_v48 = vcvt.s32.f32 %v3084_v35  ;;  %v5124_v19 = vcvt.s32.f32 %v3204_v18  ;;  %v3388_v14 = vunpack.c.3.s8 %v1684_v52  ;;  %v6484_v61 = vpack.c.bf16 %v5452_v54, %v5444_v5  ;;  %v11069_v35 = vpop.f32.mrf.mxu2  ;;  %v11071_v18 = vpop.f32.mrf.mxu3 }
 0x27b   :  { %7124 = vmatpush.bf16.msra.mxu0 %v6420_v41  ;;  %v5132_v53 = vcvt.s32.f32 %v3212_v42  ;;  %v3508_v50 = vunpack.c.2.s8 %v1716_v11  ;;  %v3516_v57 = vunpack.c.3.s8 %v1716_v11  ;;  %v5300_v4 = vcvt.s32.f32 %v3380_v29  ;;  %v1676_v29 = vld [vmem:[%s12559_s1 + $0xc50] sm:$0xff] }
 0x27c   :  { %v6260_v17 = vpack.c.bf16 %v5004_v48, %v4996_v38  ;;  %v5308_v24 = vcvt.s32.f32 %v3388_v14  ;;  %v3060_v63 = vunpack.c.2.s8 %v1604_v20  ;;  %7137 = vmatpush.bf16.msra.mxu1 %v6484_v61  ;;  %v3068_v44 = vunpack.c.3.s8 %v1604_v20 }
 0x27d   :  { %v6324_v40 = vpack.c.bf16 %v5132_v53, %v5124_v19  ;;  %v5428_v9 = vcvt.s32.f32 %v3508_v50  ;;  %v5436_v31 = vcvt.s32.f32 %v3516_v57  ;;  %v3188_v56 = vunpack.c.2.s8 %v1636_v43 }
 0x27e   :  { %7102 = vmatpush.bf16.msrb.mxu2 %v6260_v17  ;;  %v6412_v33 = vpack.c.bf16 %v5308_v24, %v5300_v4  ;;  %v4980_v1 = vcvt.s32.f32 %v3060_v63  ;;  %v3196_v2 = vunpack.c.3.s8 %v1636_v43  ;;  %v4988_v62 = vcvt.s32.f32 %v3068_v44 }
 0x27f   :  { %7115 = vmatpush.bf16.msra.mxu3 %v6324_v40  ;;  %v6476_v26 = vpack.c.bf16 %v5436_v31, %v5428_v9  ;;  %v6873_v13 = vadd.f32 %v11022_v10, %v6860_v47  ;;  %v3364_v23 = vunpack.c.0.s8 %v1684_v52  ;;  %v5108_v16 = vcvt.s32.f32 %v3188_v56 }
 0x280   :  { %7125 = vmatpush.bf16.msra.mxu0 %v6412_v33  ;;  %v5116_v6 = vcvt.s32.f32 %v3196_v2  ;;  %v3372_v8 = vunpack.c.1.s8 %v1684_v52  ;;  %v3492_v59 = vunpack.c.0.s8 %v1716_v11  ;;  %v6252_v34 = vpack.c.bf16 %v4988_v62, %v4980_v1 }
 0x281   :  { %7138 = vmatpush.bf16.msra.mxu1 %v6476_v26  ;;  %v11064_v12 = vadd.f32 %v11024_v7, %v6873_v13  ;;  %v5284_v0 = vcvt.s32.f32 %v3364_v23  ;;  %v3500_v39 = vunpack.c.1.s8 %v1716_v11  ;;  %v3044_v47 = vunpack.c.0.s8 %v1604_v20  ;;  %v1309_v11 = vld [vmem:[%s12559_s1 + $0xd8] sm:$0xff] }
 0x282   :  { %v6316_v28 = vpack.c.bf16 %v5116_v6, %v5108_v16  ;;  %v5292_v5 = vcvt.s32.f32 %v3372_v8  ;;  %v5412_v10 = vcvt.s32.f32 %v3492_v59  ;;  %7103 = vmatpush.bf16.msrb.mxu2 %v6252_v34  ;;  %v3052_v41 = vunpack.c.1.s8 %v1604_v20  ;;  %v1708_v20 = vld [vmem:[%s12559_s1 + $0xd50] sm:$0xff]  ;;  %v6900_v8 = vpop.f32.mrf.mxu2  ;;  %v6913_v59 = vpop.f32.mrf.mxu3 }
 0x283   :  { %v5420_v52 = vcvt.s32.f32 %v3500_v39  ;;  %v3172_v54 = vunpack.c.0.s8 %v1636_v43  ;;  %v3180_v7 = vunpack.c.1.s8 %v1636_v43  ;;  %v4964_v42 = vcvt.s32.f32 %v3044_v47 }
 0x284   :  { %7116 = vmatpush.bf16.msra.mxu3 %v6316_v28  ;;  %v6404_v38 = vpack.c.bf16 %v5292_v5, %v5284_v0  ;;  %v3668_v48 = vunpack.c.2.s8 %v1756_v21  ;;  %v3676_v19 = vunpack.c.3.s8 %v1756_v21  ;;  %v4972_v61 = vcvt.s32.f32 %v3052_v41  ;;  %v1748_v5 = vld [vmem:[%s12559_s1 + $0xe90] sm:$0xff] }
 0x285   :  { %v6468_v14 = vpack.c.bf16 %v5420_v52, %v5412_v10  ;;  %v5092_v53 = vcvt.s32.f32 %v3172_v54  ;;  %v5100_v50 = vcvt.s32.f32 %v3180_v7  ;;  %v1877_v17 = vunpack.c.2.s8 %v1309_v11 }
 0x286   :  { %7126 = vmatpush.bf16.msra.mxu0 %v6404_v38  ;;  %v5588_v57 = vcvt.s32.f32 %v3668_v48  ;;  %v5596_v43 = vcvt.s32.f32 %v3676_v19  ;;  %v1885_v4 = vunpack.c.3.s8 %v1309_v11  ;;  %v6244_v24 = vpack.c.bf16 %v4972_v61, %v4964_v42  ;;  %v11090_v42 = vpop.f32.mrf.mxu0  ;;  %v11092_v48 = vpop.f32.mrf.mxu1 }
 0x287   :  { %7139 = vmatpush.bf16.msra.mxu1 %v6468_v14  ;;  %v6308_v63 = vpack.c.bf16 %v5100_v50, %v5092_v53  ;;  %v3348_v40 = vunpack.c.2.s8 %v1676_v29  ;;  %v3356_v9 = vunpack.c.3.s8 %v1676_v29  ;;  %v3797_v44 = vcvt.s32.f32 %v1877_v17  ;;  %v1700_v17 = vld [vmem:[%s12559_s1 + $0xd10] sm:$0xff] }
 0x288   :  { %v6556_v31 = vpack.c.bf16 %v5596_v43, %v5588_v57  ;;  %v3805_v33 = vcvt.s32.f32 %v1885_v4  ;;  %v3476_v1 = vunpack.c.2.s8 %v1708_v20  ;;  %7104 = vmatpush.bf16.msrb.mxu2 %v6244_v24  ;;  %v3484_v26 = vunpack.c.3.s8 %v1708_v20 }
 0x289   :  { %7117 = vmatpush.bf16.msra.mxu3 %v6308_v63  ;;  %v5268_v56 = vcvt.s32.f32 %v3348_v40  ;;  %v5276_v2 = vcvt.s32.f32 %v3356_v9  ;;  %v3652_v62 = vunpack.c.0.s8 %v1756_v21  ;;  %v3660_v16 = vunpack.c.1.s8 %v1756_v21 }
 0x28a   :  { %v5661_v13 = vpack.c.bf16 %v3805_v33, %v3797_v44  ;;  %v5396_v23 = vcvt.s32.f32 %v3476_v1  ;;  %v1861_v6 = vunpack.c.0.s8 %v1309_v11  ;;  %v5404_v0 = vcvt.s32.f32 %v3484_v26 }
 0x28b   :  { %v6396_v34 = vpack.c.bf16 %v5276_v2, %v5268_v56  ;;  %v5572_v39 = vcvt.s32.f32 %v3652_v62  ;;  %v1869_v28 = vunpack.c.1.s8 %v1309_v11  ;;  %7105 = vmatmul.bf16.vlgmr.msrb.gmra.mxu2 %v10545_v22  ;;  %v5580_v10 = vcvt.s32.f32 %v3660_v16  ;;  %v1301_v11 = vld [vmem:[%s12559_s1 + $0x98] sm:$0xff] }
 0x28c   :  { %7149 = vmatpush.bf16.msra.mxu2 %v6556_v31  ;;  %v3781_v47 = vcvt.s32.f32 %v1861_v6  ;;  %v3332_v52 = vunpack.c.0.s8 %v1676_v29  ;;  %v3340_v41 = vunpack.c.1.s8 %v1676_v29  ;;  %7118 = vmatmul.bf16.vlgmr.msra.gmra.mxu3 %v10564_v30  ;;  %v6460_v21 = vpack.c.bf16 %v5404_v0, %v5396_v23  ;;  %v1668_v29 = vld [vmem:[%s12559_s1 + $0xc10] sm:$0xff] }
 0x28d   :  { %7162 = vmatpush.bf16.msrb.mxu3 %v5661_v13  ;;  %7127 = vmatpush.bf16.msra.mxu0 %v6396_v34  ;;  %v3789_v54 = vcvt.s32.f32 %v1869_v28  ;;  %v3460_v7 = vunpack.c.0.s8 %v1708_v20  ;;  %v3468_v38 = vunpack.c.1.s8 %v1708_v20  ;;  %v6548_v19 = vpack.c.bf16 %v5580_v10, %v5572_v39 }
 0x28e   :  { %v5252_v14 = vcvt.s32.f32 %v3332_v52  ;;  %v5260_v61 = vcvt.s32.f32 %v3340_v41  ;;  %v3636_v53 = vunpack.c.2.s8 %v1748_v5  ;;  %7140 = vmatpush.bf16.msra.mxu1 %v6460_v21  ;;  %v3644_v43 = vunpack.c.3.s8 %v1748_v5  ;;  %v6926_v52 = vpop.f32.mrf.mxu0  ;;  %v6939_v41 = vpop.f32.mrf.mxu1 }
 0x28f   :  { %v5653_v50 = vpack.c.bf16 %v3789_v54, %v3781_v47  ;;  %v5380_v57 = vcvt.s32.f32 %v3460_v7  ;;  %v5388_v20 = vcvt.s32.f32 %v3468_v38  ;;  %v1845_v63 = vunpack.c.2.s8 %v1301_v11  ;;  %v11103_v47 = vld [vmem:[%s12559_s1 + $0x1d8] sm:$0xff] }
 0x290   :  { %7150 = vmatpush.bf16.msra.mxu2 %v6548_v19  ;;  %v6388_v4 = vpack.c.bf16 %v5260_v61, %v5252_v14  ;;  %v5556_v24 = vcvt.s32.f32 %v3636_v53  ;;  %v1853_v40 = vunpack.c.3.s8 %v1301_v11  ;;  %v5564_v31 = vcvt.s32.f32 %v3644_v43  ;;  %v1740_v43 = vld [vmem:[%s12559_s1 + $0xe50] sm:$0xff] }
 0x291   :  { %7163 = vmatpush.bf16.msrb.mxu3 %v5653_v50  ;;  %v6452_v9 = vpack.c.bf16 %v5388_v20, %v5380_v57  ;;  %v3316_v44 = vunpack.c.2.s8 %v1668_v29  ;;  %v3324_v33 = vunpack.c.3.s8 %v1668_v29  ;;  %v3765_v1 = vcvt.s32.f32 %v1845_v63 }
 0x292   :  { %7128 = vmatpush.bf16.msra.mxu0 %v6388_v4  ;;  %v3773_v56 = vcvt.s32.f32 %v1853_v40  ;;  %v3444_v2 = vunpack.c.2.s8 %v1700_v17  ;;  %v3452_v26 = vunpack.c.3.s8 %v1700_v17  ;;  %v6540_v62 = vpack.c.bf16 %v5564_v31, %v5556_v24 }
 0x293   :  { %7141 = vmatpush.bf16.msra.mxu1 %v6452_v9  ;;  %v5236_v13 = vcvt.s32.f32 %v3316_v44  ;;  %v5244_v23 = vcvt.s32.f32 %v3324_v33  ;;  %v3620_v16 = vunpack.c.0.s8 %v1748_v5  ;;  %v3628_v34 = vunpack.c.1.s8 %v1748_v5 }
 0x294   :  { %v5645_v6 = vpack.c.bf16 %v3773_v56, %v3765_v1  ;;  %v5364_v8 = vcvt.s32.f32 %v3444_v2  ;;  %v5372_v59 = vcvt.s32.f32 %v3452_v26  ;;  %7151 = vmatpush.bf16.msra.mxu2 %v6540_v62  ;;  %v1829_v28 = vunpack.c.0.s8 %v1301_v11 }
 0x295   :  { %v6380_v0 = vpack.c.bf16 %v5244_v23, %v5236_v13  ;;  %v5540_v39 = vcvt.s32.f32 %v3620_v16  ;;  %v1837_v10 = vunpack.c.1.s8 %v1301_v11  ;;  %v5548_v54 = vcvt.s32.f32 %v3628_v34  ;;  %v1373_v11 = vld [vmem:[%s12559_s1 + $0x2d8] sm:$0xff] }
 0x296   :  { %7164 = vmatpush.bf16.msrb.mxu3 %v5645_v6  ;;  %v6444_v21 = vpack.c.bf16 %v5372_v59, %v5364_v8  ;;  %v3300_v7 = vunpack.c.0.s8 %v1668_v29  ;;  %v3308_v38 = vunpack.c.1.s8 %v1668_v29  ;;  %v3749_v19 = vcvt.s32.f32 %v1829_v28 }
 0x297   :  { %7129 = vmatpush.bf16.msra.mxu0 %v6380_v0  ;;  %v3757_v5 = vcvt.s32.f32 %v1837_v10  ;;  %v3428_v14 = vunpack.c.0.s8 %v1700_v17  ;;  %v3436_v61 = vunpack.c.1.s8 %v1700_v17  ;;  %v6532_v53 = vpack.c.bf16 %v5548_v54, %v5540_v39  ;;  %v1293_v17 = vld [vmem:[%s12559_s1 + $0x58] sm:$0xff] }
 0x298   :  { %7142 = vmatpush.bf16.msra.mxu1 %v6444_v21  ;;  %v5220_v50 = vcvt.s32.f32 %v3300_v7  ;;  %v5228_v57 = vcvt.s32.f32 %v3308_v38  ;;  %v2005_v20 = vunpack.c.2.s8 %v11103_v47  ;;  %v2013_v63 = vunpack.c.3.s8 %v11103_v47  ;;  %v1333_v54 = vld [vmem:[%s12559_s1 + $0x198] sm:$0xff] }
 0x299   :  { %v5637_v29 = vpack.c.bf16 %v3757_v5, %v3749_v19  ;;  %v5348_v4 = vcvt.s32.f32 %v3428_v14  ;;  %v5356_v24 = vcvt.s32.f32 %v3436_v61  ;;  %7152 = vmatpush.bf16.msra.mxu2 %v6532_v53  ;;  %v2133_v31 = vunpack.c.2.s8 %v1373_v11 }
 0x29a   :  { %v6372_v40 = vpack.c.bf16 %v5228_v57, %v5220_v50  ;;  %v3925_v9 = vcvt.s32.f32 %v2005_v20  ;;  %v2141_v44 = vunpack.c.3.s8 %v1373_v11  ;;  %v3933_v1 = vcvt.s32.f32 %v2013_v63 }
 0x29b   :  { %7165 = vmatpush.bf16.msrb.mxu3 %v5637_v29  ;;  %v6436_v33 = vpack.c.bf16 %v5356_v24, %v5348_v4  ;;  %v3604_v56 = vunpack.c.2.s8 %v1740_v43  ;;  %v3612_v2 = vunpack.c.3.s8 %v1740_v43  ;;  %v4053_v26 = vcvt.s32.f32 %v2133_v31 }
 0x29c   :  { %7130 = vmatpush.bf16.msra.mxu0 %v6372_v40  ;;  %v4061_v62 = vcvt.s32.f32 %v2141_v44  ;;  %v1813_v13 = vunpack.c.2.s8 %v1293_v17  ;;  %v1821_v23 = vunpack.c.3.s8 %v1293_v17  ;;  %v5725_v16 = vpack.c.bf16 %v3933_v1, %v3925_v9 }
 0x29d   :  { %7143 = vmatpush.bf16.msra.mxu1 %v6436_v33  ;;  %v5524_v6 = vcvt.s32.f32 %v3604_v56  ;;  %v5532_v8 = vcvt.s32.f32 %v3612_v2  ;;  %v6899_v59 = vadd.f32 %v11069_v35, %v11064_v12  ;;  %v1989_v28 = vunpack.c.0.s8 %v11103_v47 }
 0x29e   :  { %v5789_v34 = vpack.c.bf16 %v4061_v62, %v4053_v26  ;;  %v3733_v0 = vcvt.s32.f32 %v1813_v13  ;;  %v3741_v39 = vcvt.s32.f32 %v1821_v23  ;;  %v1997_v41 = vunpack.c.1.s8 %v11103_v47  ;;  %v1365_v47 = vld [vmem:[%s12559_s1 + $0x298] sm:$0xff] }
 0x29f   :  { %v6524_v10 = vpack.c.bf16 %v5532_v8, %v5524_v6  ;;  %v6912_v52 = vadd.f32 %v11071_v18, %v6899_v59  ;;  %v2117_v21 = vunpack.c.0.s8 %v1373_v11  ;;  %7131 = vmatmul.bf16.vlgmr.msra.gmra.mxu0 %v10642_v37  ;;  %v3909_v12 = vcvt.s32.f32 %v1989_v28 }
 0x2a0   :  { %7175 = vmatpush.bf16.msrb.mxu0 %v5725_v16  ;;  %v5629_v7 = vpack.c.bf16 %v3741_v39, %v3733_v0  ;;  %v2125_v35 = vunpack.c.1.s8 %v1373_v11  ;;  %v3588_v38 = vunpack.c.0.s8 %v1740_v43  ;;  %7144 = vmatmul.bf16.vlgmr.msra.gmra.mxu1 %v10644_v46  ;;  %v3917_v19 = vcvt.s32.f32 %v1997_v41  ;;  %v1732_v11 = vld [vmem:[%s12559_s1 + $0xe10] sm:$0xff] }
 0x2a1   :  { %7188 = vmatpush.bf16.msrb.mxu1 %v5789_v34  ;;  %7153 = vmatpush.bf16.msra.mxu2 %v6524_v10  ;;  %v4037_v5 = vcvt.s32.f32 %v2117_v21  ;;  %v3596_v18 = vunpack.c.1.s8 %v1740_v43  ;;  %v1797_v14 = vunpack.c.0.s8 %v1293_v17  ;;  %v1805_v50 = vunpack.c.1.s8 %v1293_v17  ;;  %v1285_v43 = vld [vmem:[%s12559_s1 + $0x18] sm:$0xff] }
 0x2a2   :  { %7166 = vmatpush.bf16.msrb.mxu3 %v5629_v7  ;;  %v4045_v61 = vcvt.s32.f32 %v2125_v35  ;;  %v5508_v53 = vcvt.s32.f32 %v3588_v38  ;;  %v1973_v57 = vunpack.c.2.s8 %v1333_v54  ;;  %v5717_v20 = vpack.c.bf16 %v3917_v19, %v3909_v12  ;;  %v1405_v38 = vld [vmem:[%s12559_s1 + $0x3d8] sm:$0xff] }
 0x2a3   :  { %v5516_v29 = vcvt.s32.f32 %v3596_v18  ;;  %v3717_v4 = vcvt.s32.f32 %v1797_v14  ;;  %v1981_v24 = vunpack.c.3.s8 %v1333_v54  ;;  %v3725_v40 = vcvt.s32.f32 %v1805_v50  ;;  %v11142_v18 = vpop.f32.mrf.mxu2  ;;  %v11144_v14 = vpop.f32.mrf.mxu3 }
 0x2a4   :  { %v5781_v63 = vpack.c.bf16 %v4045_v61, %v4037_v5  ;;  %v3893_v9 = vcvt.s32.f32 %v1973_v57  ;;  %v2101_v31 = vunpack.c.2.s8 %v1365_v47  ;;  %7176 = vmatpush.bf16.msrb.mxu0 %v5717_v20  ;;  %v2109_v33 = vunpack.c.3.s8 %v1365_v47 }
 0x2a5   :  { %v6516_v44 = vpack.c.bf16 %v5516_v29, %v5508_v53  ;;  %v3901_v17 = vcvt.s32.f32 %v1981_v24  ;;  %v3572_v1 = vunpack.c.2.s8 %v1732_v11  ;;  %v5621_v56 = vpack.c.bf16 %v3725_v40, %v3717_v4  ;;  %v1325_v4 = vld [vmem:[%s12559_s1 + $0x158] sm:$0xff] }
 0x2a6   :  { %7189 = vmatpush.bf16.msrb.mxu1 %v5781_v63  ;;  %v4021_v2 = vcvt.s32.f32 %v2101_v31  ;;  %v3580_v26 = vunpack.c.3.s8 %v1732_v11  ;;  %v1781_v62 = vunpack.c.2.s8 %v1285_v43  ;;  %v4029_v23 = vcvt.s32.f32 %v2109_v33 }
 0x2a7   :  { %7154 = vmatpush.bf16.msra.mxu2 %v6516_v44  ;;  %v5709_v13 = vpack.c.bf16 %v3901_v17, %v3893_v9  ;;  %v5492_v16 = vcvt.s32.f32 %v3572_v1  ;;  %v1789_v6 = vunpack.c.3.s8 %v1285_v43  ;;  %7167 = vmatpush.bf16.msrb.mxu3 %v5621_v56  ;;  %v6925_v34 = vadd.f32 %v11090_v42, %v6912_v52 }
 0x2a8   :  { %v5500_v8 = vcvt.s32.f32 %v3580_v26  ;;  %v3701_v59 = vcvt.s32.f32 %v1781_v62  ;;  %v1957_v0 = vunpack.c.0.s8 %v1333_v54  ;;  %v5773_v39 = vpack.c.bf16 %v4029_v23, %v4021_v2 }
 0x2a9   :  { %7177 = vmatpush.bf16.msrb.mxu0 %v5709_v13  ;;  %v3709_v28 = vcvt.s32.f32 %v1789_v6  ;;  %v1965_v10 = vunpack.c.1.s8 %v1333_v54  ;;  %v2085_v41 = vunpack.c.0.s8 %v1365_v47  ;;  %v11137_v7 = vadd.f32 %v11092_v48, %v6925_v34 }
 0x2aa   :  { %v6508_v21 = vpack.c.bf16 %v5500_v8, %v5492_v16  ;;  %v3877_v12 = vcvt.s32.f32 %v1957_v0  ;;  %v2093_v35 = vunpack.c.1.s8 %v1365_v47  ;;  %7190 = vmatpush.bf16.msrb.mxu1 %v5773_v39  ;;  %v3556_v52 = vunpack.c.0.s8 %v1732_v11  ;;  %v1437_v47 = vld [vmem:[%s12559_s1 + $0x4d8] sm:$0xff] }
 0x2ab   :  { %v5613_v19 = vpack.c.bf16 %v3709_v28, %v3701_v59  ;;  %v3885_v5 = vcvt.s32.f32 %v1965_v10  ;;  %v4005_v42 = vcvt.s32.f32 %v2085_v41  ;;  %v3564_v61 = vunpack.c.1.s8 %v1732_v11  ;;  %v1357_v11 = vld [vmem:[%s12559_s1 + $0x258] sm:$0xff]  ;;  %v6952_v10 = vpop.f32.mrf.mxu2  ;;  %v6965_v41 = vpop.f32.mrf.mxu3 }
 0x2ac   :  { %7155 = vmatpush.bf16.msra.mxu2 %v6508_v21  ;;  %v4013_v54 = vcvt.s32.f32 %v2093_v35  ;;  %v1765_v48 = vunpack.c.0.s8 %v1285_v43  ;;  %v1773_v53 = vunpack.c.1.s8 %v1285_v43  ;;  %v5476_v57 = vcvt.s32.f32 %v3556_v52 }
 0x2ad   :  { %7168 = vmatpush.bf16.msrb.mxu3 %v5613_v19  ;;  %v5701_v50 = vpack.c.bf16 %v3885_v5, %v3877_v12  ;;  %v2261_v20 = vunpack.c.2.s8 %v1405_v38  ;;  %v2269_v29 = vunpack.c.3.s8 %v1405_v38  ;;  %v5484_v63 = vcvt.s32.f32 %v3564_v61  ;;  %v1397_v5 = vld [vmem:[%s12559_s1 + $0x398] sm:$0xff] }
 0x2ae   :  { %v5765_v24 = vpack.c.bf16 %v4013_v54, %v4005_v42  ;;  %v3685_v40 = vcvt.s32.f32 %v1765_v48  ;;  %v3693_v9 = vcvt.s32.f32 %v1773_v53  ;;  %v2389_v44 = vunpack.c.2.s8 %v1437_v47 }
 0x2af   :  { %7178 = vmatpush.bf16.msrb.mxu0 %v5701_v50  ;;  %v4181_v43 = vcvt.s32.f32 %v2261_v20  ;;  %v4189_v31 = vcvt.s32.f32 %v2269_v29  ;;  %v2397_v17 = vunpack.c.3.s8 %v1437_v47  ;;  %v6500_v33 = vpack.c.bf16 %v5484_v63, %v5476_v57  ;;  %v1317_v63 = vld [vmem:[%s12559_s1 + $0x118] sm:$0xff] }
 0x2b0   :  { %7191 = vmatpush.bf16.msrb.mxu1 %v5765_v24  ;;  %v5605_v1 = vpack.c.bf16 %v3693_v9, %v3685_v40  ;;  %v1941_v56 = vunpack.c.2.s8 %v1325_v4  ;;  %v1949_v2 = vunpack.c.3.s8 %v1325_v4  ;;  %v4309_v62 = vcvt.s32.f32 %v2389_v44  ;;  %v11168_v40 = vpop.f32.mrf.mxu1  ;;  %v1349_v44 = vld [vmem:[%s12559_s1 + $0x218] sm:$0xff] }
 0x2b1   :  { %v5853_v26 = vpack.c.bf16 %v4189_v31, %v4181_v43  ;;  %v4317_v13 = vcvt.s32.f32 %v2397_v17  ;;  %v2069_v23 = vunpack.c.2.s8 %v1357_v11  ;;  %7156 = vmatpush.bf16.msra.mxu2 %v6500_v33  ;;  %v2077_v8 = vunpack.c.3.s8 %v1357_v11 }
 0x2b2   :  { %7169 = vmatpush.bf16.msrb.mxu3 %v5605_v1  ;;  %v3861_v16 = vcvt.s32.f32 %v1941_v56  ;;  %v3869_v6 = vcvt.s32.f32 %v1949_v2  ;;  %v2245_v59 = vunpack.c.0.s8 %v1405_v38  ;;  %v2253_v39 = vunpack.c.1.s8 %v1405_v38 }
 0x2b3   :  { %v5917_v34 = vpack.c.bf16 %v4317_v13, %v4309_v62  ;;  %v3989_v0 = vcvt.s32.f32 %v2069_v23  ;;  %v2373_v28 = vunpack.c.0.s8 %v1437_v47  ;;  %v3997_v12 = vcvt.s32.f32 %v2077_v8 }
 0x2b4   :  { %v5693_v21 = vpack.c.bf16 %v3869_v6, %v3861_v16  ;;  %v4165_v35 = vcvt.s32.f32 %v2245_v59  ;;  %v2381_v19 = vunpack.c.1.s8 %v1437_v47  ;;  %7157 = vmatmul.bf16.vlgmr.msra.gmra.mxu2 %v10665_v60  ;;  %v4173_v42 = vcvt.s32.f32 %v2253_v39  ;;  %v1429_v47 = vld [vmem:[%s12559_s1 + $0x498] sm:$0xff] }
 0x2b5   :  { %7201 = vmatpush.bf16.msrb.mxu2 %v5853_v26  ;;  %v4293_v52 = vcvt.s32.f32 %v2373_v28  ;;  %v1925_v54 = vunpack.c.0.s8 %v1325_v4  ;;  %v1933_v61 = vunpack.c.1.s8 %v1325_v4  ;;  %7170 = vmatmul.bf16.vlgmr.msrb.gmra.mxu3 %v12657_v32  ;;  %v5757_v38 = vpack.c.bf16 %v3997_v12, %v3989_v0  ;;  %v11166_v4 = vpop.f32.mrf.mxu0 }
 0x2b6   :  { %7214 = vmatpush.bf16.msra.mxu3 %v5917_v34  ;;  %7179 = vmatpush.bf16.msrb.mxu0 %v5693_v21  ;;  %v4301_v48 = vcvt.s32.f32 %v2381_v19  ;;  %v2053_v53 = vunpack.c.0.s8 %v1357_v11  ;;  %v2061_v50 = vunpack.c.1.s8 %v1357_v11  ;;  %v5845_v57 = vpack.c.bf16 %v4173_v42, %v4165_v35 }
 0x2b7   :  { %v3845_v20 = vcvt.s32.f32 %v1925_v54  ;;  %v3853_v29 = vcvt.s32.f32 %v1933_v61  ;;  %v2229_v24 = vunpack.c.2.s8 %v1397_v5  ;;  %7192 = vmatpush.bf16.msrb.mxu1 %v5757_v38  ;;  %v2237_v31 = vunpack.c.3.s8 %v1397_v5 }
 0x2b8   :  { %v5909_v9 = vpack.c.bf16 %v4301_v48, %v4293_v52  ;;  %v3973_v43 = vcvt.s32.f32 %v2053_v53  ;;  %v3981_v11 = vcvt.s32.f32 %v2061_v50  ;;  %v2357_v1 = vunpack.c.2.s8 %v1429_v47  ;;  %v11176_v52 = vld [vmem:[%s12559_s1 + $0x5d8] sm:$0xff]  ;;  %v6991_v50 = vpop.f32.mrf.mxu1 }
 0x2b9   :  { %7202 = vmatpush.bf16.msrb.mxu2 %v5845_v57  ;;  %v5685_v17 = vpack.c.bf16 %v3853_v29, %v3845_v20  ;;  %v4149_v33 = vcvt.s32.f32 %v2229_v24  ;;  %v2365_v56 = vunpack.c.3.s8 %v1429_v47  ;;  %v4157_v26 = vcvt.s32.f32 %v2237_v31 }
 0x2ba   :  { %7215 = vmatpush.bf16.msra.mxu3 %v5909_v9  ;;  %v5749_v2 = vpack.c.bf16 %v3981_v11, %v3973_v43  ;;  %v1909_v62 = vunpack.c.2.s8 %v1317_v63  ;;  %v1917_v13 = vunpack.c.3.s8 %v1317_v63  ;;  %v4277_v23 = vcvt.s32.f32 %v2357_v1 }
 0x2bb   :  { %7180 = vmatpush.bf16.msrb.mxu0 %v5685_v17  ;;  %v4285_v16 = vcvt.s32.f32 %v2365_v56  ;;  %v2037_v6 = vunpack.c.2.s8 %v1349_v44  ;;  %v2045_v8 = vunpack.c.3.s8 %v1349_v44  ;;  %v5837_v59 = vpack.c.bf16 %v4157_v26, %v4149_v33 }
 0x2bc   :  { %7193 = vmatpush.bf16.msrb.mxu1 %v5749_v2  ;;  %v3829_v34 = vcvt.s32.f32 %v1909_v62  ;;  %v3837_v0 = vcvt.s32.f32 %v1917_v13  ;;  %v2213_v39 = vunpack.c.0.s8 %v1397_v5  ;;  %v2221_v21 = vunpack.c.1.s8 %v1397_v5 }
 0x2bd   :  { %v5901_v28 = vpack.c.bf16 %v4285_v16, %v4277_v23  ;;  %v3957_v10 = vcvt.s32.f32 %v2037_v6  ;;  %v3965_v41 = vcvt.s32.f32 %v2045_v8  ;;  %7203 = vmatpush.bf16.msrb.mxu2 %v5837_v59  ;;  %v2341_v19 = vunpack.c.0.s8 %v1429_v47  ;;  %v6978_v53 = vpop.f32.mrf.mxu0 }
 0x2be   :  { %v5677_v12 = vpack.c.bf16 %v3837_v0, %v3829_v34  ;;  %v4133_v35 = vcvt.s32.f32 %v2213_v39  ;;  %v2349_v42 = vunpack.c.1.s8 %v1429_v47  ;;  %v4141_v61 = vcvt.s32.f32 %v2221_v21  ;;  %v1501_v47 = vld [vmem:[%s12559_s1 + $0x6d8] sm:$0xff] }
 0x2bf   :  { %7216 = vmatpush.bf16.msra.mxu3 %v5901_v28  ;;  %v5741_v54 = vpack.c.bf16 %v3965_v41, %v3957_v10  ;;  %v1893_v38 = vunpack.c.0.s8 %v1317_v63  ;;  %v1901_v48 = vunpack.c.1.s8 %v1317_v63  ;;  %v4261_v57 = vcvt.s32.f32 %v2341_v19  ;;  %v1389_v63 = vld [vmem:[%s12559_s1 + $0x358] sm:$0xff] }
 0x2c0   :  { %7181 = vmatpush.bf16.msrb.mxu0 %v5677_v12  ;;  %v4269_v5 = vcvt.s32.f32 %v2349_v42  ;;  %v2021_v20 = vunpack.c.0.s8 %v1349_v44  ;;  %v2029_v29 = vunpack.c.1.s8 %v1349_v44  ;;  %v5829_v24 = vpack.c.bf16 %v4141_v61, %v4133_v35  ;;  %v1421_v44 = vld [vmem:[%s12559_s1 + $0x458] sm:$0xff] }
 0x2c1   :  { %7194 = vmatpush.bf16.msrb.mxu1 %v5741_v54  ;;  %v3813_v9 = vcvt.s32.f32 %v1893_v38  ;;  %v3821_v43 = vcvt.s32.f32 %v1901_v48  ;;  %v2517_v11 = vunpack.c.2.s8 %v11176_v52  ;;  %v2525_v1 = vunpack.c.3.s8 %v11176_v52 }
 0x2c2   :  { %v5893_v31 = vpack.c.bf16 %v4269_v5, %v4261_v57  ;;  %v3941_v17 = vcvt.s32.f32 %v2021_v20  ;;  %v3949_v33 = vcvt.s32.f32 %v2029_v29  ;;  %7204 = vmatpush.bf16.msrb.mxu2 %v5829_v24  ;;  %v2645_v26 = vunpack.c.2.s8 %v1501_v47 }
 0x2c3   :  { %v5669_v56 = vpack.c.bf16 %v3821_v43, %v3813_v9  ;;  %v4437_v2 = vcvt.s32.f32 %v2517_v11  ;;  %v2653_v62 = vunpack.c.3.s8 %v1501_v47  ;;  %v4445_v23 = vcvt.s32.f32 %v2525_v1  ;;  %v1381_v43 = vld [vmem:[%s12559_s1 + $0x318] sm:$0xff] }
 0x2c4   :  { %7217 = vmatpush.bf16.msra.mxu3 %v5893_v31  ;;  %v5733_v13 = vpack.c.bf16 %v3949_v33, %v3941_v17  ;;  %v2197_v16 = vunpack.c.2.s8 %v1389_v63  ;;  %v2205_v6 = vunpack.c.3.s8 %v1389_v63  ;;  %v4565_v8 = vcvt.s32.f32 %v2645_v26  ;;  %v1413_v33 = vld [vmem:[%s12559_s1 + $0x418] sm:$0xff] }
 0x2c5   :  { %7182 = vmatpush.bf16.msrb.mxu0 %v5669_v56  ;;  %v4573_v59 = vcvt.s32.f32 %v2653_v62  ;;  %v2325_v34 = vunpack.c.2.s8 %v1421_v44  ;;  %v2333_v0 = vunpack.c.3.s8 %v1421_v44  ;;  %v5981_v39 = vpack.c.bf16 %v4445_v23, %v4437_v2 }
 0x2c6   :  { %7195 = vmatpush.bf16.msrb.mxu1 %v5733_v13  ;;  %v4117_v28 = vcvt.s32.f32 %v2197_v16  ;;  %v4125_v10 = vcvt.s32.f32 %v2205_v6  ;;  %v6951_v41 = vadd.f32 %v11142_v18, %v11137_v7  ;;  %v2501_v54 = vunpack.c.0.s8 %v11176_v52 }
 0x2c7   :  { %v6045_v21 = vpack.c.bf16 %v4573_v59, %v4565_v8  ;;  %v4245_v12 = vcvt.s32.f32 %v2325_v34  ;;  %v4253_v35 = vcvt.s32.f32 %v2333_v0  ;;  %v2509_v38 = vunpack.c.1.s8 %v11176_v52 }
 0x2c8   :  { %v5821_v19 = vpack.c.bf16 %v4125_v10, %v4117_v28  ;;  %v11192_v42 = vadd.f32 %v11144_v14, %v6951_v41  ;;  %7183 = vmatmul.bf16.vlgmr.msrb.gmra.mxu0 %v12658_v27  ;;  %v2629_v48 = vunpack.c.0.s8 %v1501_v47  ;;  %v2637_v53 = vunpack.c.1.s8 %v1501_v47  ;;  %v1461_v14 = vld [vmem:[%s12559_s1 + $0x598] sm:$0xff] }
 0x2c9   :  { %7227 = vmatpush.bf16.msra.mxu0 %v5981_v39  ;;  %v5885_v61 = vpack.c.bf16 %v4253_v35, %v4245_v12  ;;  %7196 = vmatmul.bf16.vlgmr.msrb.gmra.mxu1 %v12639_v25  ;;  %v4421_v7 = vcvt.s32.f32 %v2501_v54  ;;  %v2181_v18 = vunpack.c.0.s8 %v1389_v63  ;;  %v2189_v50 = vunpack.c.1.s8 %v1389_v63  ;;  %v1493_v47 = vld [vmem:[%s12559_s1 + $0x698] sm:$0xff] }
 0x2ca   :  { %7240 = vmatpush.bf16.msra.mxu1 %v6045_v21  ;;  %7205 = vmatpush.bf16.msrb.mxu2 %v5821_v19  ;;  %v4429_v57 = vcvt.s32.f32 %v2509_v38  ;;  %v4549_v5 = vcvt.s32.f32 %v2629_v48  ;;  %v4557_v20 = vcvt.s32.f32 %v2637_v53  ;;  %v2309_v29 = vunpack.c.0.s8 %v1421_v44 }
 0x2cb   :  { %7218 = vmatpush.bf16.msra.mxu3 %v5885_v61  ;;  %v4101_v24 = vcvt.s32.f32 %v2181_v18  ;;  %v4109_v9 = vcvt.s32.f32 %v2189_v50  ;;  %v2317_v52 = vunpack.c.1.s8 %v1421_v44  ;;  %v2485_v17 = vunpack.c.2.s8 %v1461_v14 }
 0x2cc   :  { %v5973_v11 = vpack.c.bf16 %v4429_v57, %v4421_v7  ;;  %v6037_v63 = vpack.c.bf16 %v4557_v20, %v4549_v5  ;;  %v4229_v31 = vcvt.s32.f32 %v2309_v29  ;;  %v2493_v2 = vunpack.c.3.s8 %v1461_v14  ;;  %v1533_v7 = vld [vmem:[%s12559_s1 + $0x7d8] sm:$0xff] }
 0x2cd   :  { %v5813_v1 = vpack.c.bf16 %v4109_v9, %v4101_v24  ;;  %v4237_v56 = vcvt.s32.f32 %v2317_v52  ;;  %v4405_v44 = vcvt.s32.f32 %v2485_v17  ;;  %v2613_v26 = vunpack.c.2.s8 %v1493_v47 }
 0x2ce   :  { %7228 = vmatpush.bf16.msra.mxu0 %v5973_v11  ;;  %7241 = vmatpush.bf16.msra.mxu1 %v6037_v63  ;;  %v2621_v62 = vunpack.c.3.s8 %v1493_v47  ;;  %v2165_v13 = vunpack.c.2.s8 %v1381_v43  ;;  %v4413_v16 = vcvt.s32.f32 %v2493_v2  ;;  %v2173_v6 = vunpack.c.3.s8 %v1381_v43  ;;  %v1485_v2 = vld [vmem:[%s12559_s1 + $0x658] sm:$0xff] }
 0x2cf   :  { %7206 = vmatpush.bf16.msrb.mxu2 %v5813_v1  ;;  %v5877_v23 = vpack.c.bf16 %v4237_v56, %v4229_v31  ;;  %v2293_v8 = vunpack.c.2.s8 %v1413_v33  ;;  %v4533_v59 = vcvt.s32.f32 %v2613_v26  ;;  %v2301_v39 = vunpack.c.3.s8 %v1413_v33 }
 0x2d0   :  { %v4541_v34 = vcvt.s32.f32 %v2621_v62  ;;  %v4085_v0 = vcvt.s32.f32 %v2165_v13  ;;  %v5965_v28 = vpack.c.bf16 %v4413_v16, %v4405_v44  ;;  %v4093_v10 = vcvt.s32.f32 %v2173_v6 }
 0x2d1   :  { %7219 = vmatpush.bf16.msra.mxu3 %v5877_v23  ;;  %v4213_v41 = vcvt.s32.f32 %v2293_v8  ;;  %v11212_v21 = vadd.f32 %v11168_v40, %v11166_v4  ;;  %v4221_v35 = vcvt.s32.f32 %v2301_v39  ;;  %v2469_v19 = vunpack.c.0.s8 %v1461_v14  ;;  %v1565_v4 = vld [vmem:[%s12559_s1 + $0x8d8] sm:$0xff]  ;;  %v11220_v40 = vpop.f32.mrf.mxu2 }
 0x2d2   :  { %v6029_v12 = vpack.c.bf16 %v4541_v34, %v4533_v59  ;;  %v2477_v54 = vunpack.c.1.s8 %v1461_v14  ;;  %7229 = vmatpush.bf16.msra.mxu0 %v5965_v28  ;;  %v5805_v61 = vpack.c.bf16 %v4093_v10, %v4085_v0  ;;  %v2597_v38 = vunpack.c.0.s8 %v1493_v47  ;;  %v11222_v14 = vpop.f32.mrf.mxu3 }
 0x2d3   :  { %v2605_v48 = vunpack.c.1.s8 %v1493_v47  ;;  %v2149_v53 = vunpack.c.0.s8 %v1381_v43  ;;  %v5869_v18 = vpack.c.bf16 %v4221_v35, %v4213_v41  ;;  %v4389_v50 = vcvt.s32.f32 %v2469_v19 }
 0x2d4   :  { %7242 = vmatpush.bf16.msra.mxu1 %v6029_v12  ;;  %v4397_v57 = vcvt.s32.f32 %v2477_v54  ;;  %v2157_v5 = vunpack.c.1.s8 %v1381_v43  ;;  %7207 = vmatpush.bf16.msrb.mxu2 %v5805_v61  ;;  %v4517_v20 = vcvt.s32.f32 %v2597_v38  ;;  %v2277_v9 = vunpack.c.0.s8 %v1413_v33  ;;  %v1453_v43 = vld [vmem:[%s12559_s1 + $0x558] sm:$0xff] }
 0x2d5   :  { %v4525_v29 = vcvt.s32.f32 %v2605_v48  ;;  %v4069_v24 = vcvt.s32.f32 %v2149_v53  ;;  %7220 = vmatpush.bf16.msra.mxu3 %v5869_v18  ;;  %v2285_v11 = vunpack.c.1.s8 %v1413_v33  ;;  %v2773_v63 = vunpack.c.2.s8 %v1533_v7 }
 0x2d6   :  { %v5957_v52 = vpack.c.bf16 %v4397_v57, %v4389_v50  ;;  %v4077_v47 = vcvt.s32.f32 %v2157_v5  ;;  %v4197_v17 = vcvt.s32.f32 %v2277_v9  ;;  %v2781_v1 = vunpack.c.3.s8 %v1533_v7  ;;  %v1525_v57 = vld [vmem:[%s12559_s1 + $0x798] sm:$0xff] }
 0x2d7   :  { %v6021_v31 = vpack.c.bf16 %v4525_v29, %v4517_v20  ;;  %v2901_v56 = vunpack.c.2.s8 %v1565_v4  ;;  %v4205_v26 = vcvt.s32.f32 %v2285_v11  ;;  %v4693_v62 = vcvt.s32.f32 %v2773_v63  ;;  %v11238_v11 = vpop.f32.mrf.mxu0  ;;  %v11240_v63 = vpop.f32.mrf.mxu1 }
 0x2d8   :  { %7230 = vmatpush.bf16.msra.mxu0 %v5957_v52  ;;  %v5797_v44 = vpack.c.bf16 %v4077_v47, %v4069_v24  ;;  %v2909_v13 = vunpack.c.3.s8 %v1565_v4  ;;  %v4701_v33 = vcvt.s32.f32 %v2781_v1  ;;  %v2453_v16 = vunpack.c.2.s8 %v1453_v43 }
 0x2d9   :  { %7243 = vmatpush.bf16.msra.mxu1 %v6021_v31  ;;  %v4821_v23 = vcvt.s32.f32 %v2901_v56  ;;  %v2461_v6 = vunpack.c.3.s8 %v1453_v43  ;;  %v5861_v8 = vpack.c.bf16 %v4205_v26, %v4197_v17  ;;  %v2581_v34 = vunpack.c.2.s8 %v1485_v2  ;;  %v7004_v61 = vpop.f32.mrf.mxu2  ;;  %v1445_v56 = vld [vmem:[%s12559_s1 + $0x518] sm:$0xff] }
 0x2da   :  { %7208 = vmatpush.bf16.msrb.mxu2 %v5797_v44  ;;  %v4829_v59 = vcvt.s32.f32 %v2909_v13  ;;  %v2589_v0 = vunpack.c.3.s8 %v1485_v2  ;;  %v6109_v39 = vpack.c.bf16 %v4701_v33, %v4693_v62  ;;  %v4373_v28 = vcvt.s32.f32 %v2453_v16  ;;  %v7017_v38 = vpop.f32.mrf.mxu3  ;;  %v1477_v13 = vld [vmem:[%s12559_s1 + $0x618] sm:$0xff] }
 0x2db   :  { %v4381_v10 = vcvt.s32.f32 %v2461_v6  ;;  %v2757_v41 = vunpack.c.0.s8 %v1533_v7  ;;  %7221 = vmatpush.bf16.msra.mxu3 %v5861_v8  ;;  %v4501_v35 = vcvt.s32.f32 %v2581_v34  ;;  %v2765_v54 = vunpack.c.1.s8 %v1533_v7 }
 0x2dc   :  { %v6173_v12 = vpack.c.bf16 %v4829_v59, %v4821_v23  ;;  %v4509_v19 = vcvt.s32.f32 %v2589_v0  ;;  %v2885_v18 = vunpack.c.0.s8 %v1565_v4  ;;  %v2893_v50 = vunpack.c.1.s8 %v1565_v4  ;;  %v1557_v4 = vld [vmem:[%s12559_s1 + $0x898] sm:$0xff] }
 0x2dd   :  { %v5949_v48 = vpack.c.bf16 %v4381_v10, %v4373_v28  ;;  %v4677_v53 = vcvt.s32.f32 %v2757_v41  ;;  %7209 = vmatmul.bf16.vlgmr.msrb.gmra.mxu2 %v9894_v55  ;;  %v4685_v20 = vcvt.s32.f32 %v2765_v54  ;;  %v2437_v29 = vunpack.c.0.s8 %v1453_v43 }
 0x2de   :  { %7253 = vmatpush.bf16.msra.mxu2 %v6109_v39  ;;  %v6013_v5 = vpack.c.bf16 %v4509_v19, %v4501_v35  ;;  %v2445_v24 = vunpack.c.1.s8 %v1453_v43  ;;  %7222 = vmatmul.bf16.vlgmr.msra.gmra.mxu3 %v9969_v58  ;;  %v4805_v7 = vcvt.s32.f32 %v2885_v18  ;;  %v4813_v9 = vcvt.s32.f32 %v2893_v50 }
 0x2df   :  { %7266 = vmatpush.bf16.msrb.mxu3 %v6173_v12  ;;  %7231 = vmatpush.bf16.msra.mxu0 %v5949_v48  ;;  %v2565_v52 = vunpack.c.0.s8 %v1485_v2  ;;  %v2573_v47 = vunpack.c.1.s8 %v1485_v2  ;;  %v6101_v31 = vpack.c.bf16 %v4685_v20, %v4677_v53  ;;  %v4357_v17 = vcvt.s32.f32 %v2437_v29  ;;  %v11251_v29 = vld [vmem:[%s12559_s1 + $0x9d8] sm:$0xff] }
 0x2e0   :  { %7244 = vmatpush.bf16.msra.mxu1 %v6013_v5  ;;  %v4365_v1 = vcvt.s32.f32 %v2445_v24  ;;  %v2741_v43 = vunpack.c.2.s8 %v1525_v57  ;;  %v6165_v44 = vpack.c.bf16 %v4813_v9, %v4805_v7  ;;  %v2749_v62 = vunpack.c.3.s8 %v1525_v57  ;;  %v7030_v24 = vpop.f32.mrf.mxu0  ;;  %v7043_v7 = vpop.f32.mrf.mxu1 }
 0x2e1   :  { %v4485_v26 = vcvt.s32.f32 %v2565_v52  ;;  %v4493_v2 = vcvt.s32.f32 %v2573_v47  ;;  %v2869_v16 = vunpack.c.2.s8 %v1557_v4  ;;  %v2877_v6 = vunpack.c.3.s8 %v1557_v4 }
 0x2e2   :  { %7254 = vmatpush.bf16.msra.mxu2 %v6101_v31  ;;  %v5941_v33 = vpack.c.bf16 %v4365_v1, %v4357_v17  ;;  %v4661_v23 = vcvt.s32.f32 %v2741_v43  ;;  %v4669_v59 = vcvt.s32.f32 %v2749_v62  ;;  %v2421_v34 = vunpack.c.2.s8 %v1445_v56 }
 0x2e3   :  { %7267 = vmatpush.bf16.msrb.mxu3 %v6165_v44  ;;  %v6005_v8 = vpack.c.bf16 %v4493_v2, %v4485_v26  ;;  %v2429_v0 = vunpack.c.3.s8 %v1445_v56  ;;  %v4789_v39 = vcvt.s32.f32 %v2869_v16  ;;  %v4797_v28 = vcvt.s32.f32 %v2877_v6 }
 0x2e4   :  { %7232 = vmatpush.bf16.msra.mxu0 %v5941_v33  ;;  %v2549_v10 = vunpack.c.2.s8 %v1477_v13  ;;  %v2557_v41 = vunpack.c.3.s8 %v1477_v13  ;;  %v6093_v12 = vpack.c.bf16 %v4669_v59, %v4661_v23  ;;  %v4341_v35 = vcvt.s32.f32 %v2421_v34  ;;  %v1517_v33 = vld [vmem:[%s12559_s1 + $0x758] sm:$0xff] }
 0x2e5   :  { %7245 = vmatpush.bf16.msra.mxu1 %v6005_v8  ;;  %v4349_v19 = vcvt.s32.f32 %v2429_v0  ;;  %v2725_v54 = vunpack.c.0.s8 %v1525_v57  ;;  %v6157_v61 = vpack.c.bf16 %v4797_v28, %v4789_v39  ;;  %v2733_v53 = vunpack.c.1.s8 %v1525_v57 }
 0x2e6   :  { %v4469_v38 = vcvt.s32.f32 %v2549_v10  ;;  %v4477_v48 = vcvt.s32.f32 %v2557_v41  ;;  %7255 = vmatpush.bf16.msra.mxu2 %v6093_v12  ;;  %v2853_v5 = vunpack.c.0.s8 %v1557_v4  ;;  %v2861_v20 = vunpack.c.1.s8 %v1557_v4  ;;  %v1629_v4 = vld [vmem:[%s12559_s1 + $0xad8] sm:$0xff] }
 0x2e7   :  { %v5933_v18 = vpack.c.bf16 %v4349_v19, %v4341_v35  ;;  %v4645_v50 = vcvt.s32.f32 %v2725_v54  ;;  %7268 = vmatpush.bf16.msrb.mxu3 %v6157_v61  ;;  %v4653_v52 = vcvt.s32.f32 %v2733_v53  ;;  %v2405_v47 = vunpack.c.0.s8 %v1445_v56 }
 0x2e8   :  { %v5997_v9 = vpack.c.bf16 %v4477_v48, %v4469_v38  ;;  %v2413_v31 = vunpack.c.1.s8 %v1445_v56  ;;  %v4773_v17 = vcvt.s32.f32 %v2853_v5  ;;  %v4781_v57 = vcvt.s32.f32 %v2861_v20 }
 0x2e9   :  { %7233 = vmatpush.bf16.msra.mxu0 %v5933_v18  ;;  %v2533_v1 = vunpack.c.0.s8 %v1477_v13  ;;  %v2541_v43 = vunpack.c.1.s8 %v1477_v13  ;;  %v6085_v44 = vpack.c.bf16 %v4653_v52, %v4645_v50  ;;  %v4325_v26 = vcvt.s32.f32 %v2405_v47  ;;  %v1549_v13 = vld [vmem:[%s12559_s1 + $0x858] sm:$0xff] }
 0x2ea   :  { %7246 = vmatpush.bf16.msra.mxu1 %v5997_v9  ;;  %v4333_v2 = vcvt.s32.f32 %v2413_v31  ;;  %v3029_v62 = vunpack.c.2.s8 %v11251_v29  ;;  %v6149_v56 = vpack.c.bf16 %v4781_v57, %v4773_v17  ;;  %v3037_v6 = vunpack.c.3.s8 %v11251_v29  ;;  %v1589_v47 = vld [vmem:[%s12559_s1 + $0x998] sm:$0xff] }
 0x2eb   :  { %v4453_v23 = vcvt.s32.f32 %v2533_v1  ;;  %v4461_v16 = vcvt.s32.f32 %v2541_v43  ;;  %7256 = vmatpush.bf16.msra.mxu2 %v6085_v44  ;;  %v3157_v34 = vunpack.c.2.s8 %v1629_v4  ;;  %v3165_v0 = vunpack.c.3.s8 %v1629_v4 }
 0x2ec   :  { %v5925_v8 = vpack.c.bf16 %v4333_v2, %v4325_v26  ;;  %v4949_v59 = vcvt.s32.f32 %v3029_v62  ;;  %7269 = vmatpush.bf16.msrb.mxu3 %v6149_v56  ;;  %v4957_v28 = vcvt.s32.f32 %v3037_v6  ;;  %v2709_v10 = vunpack.c.2.s8 %v1517_v33 }
 0x2ed   :  { %v5989_v39 = vpack.c.bf16 %v4461_v16, %v4453_v23  ;;  %v2717_v41 = vunpack.c.3.s8 %v1517_v33  ;;  %v5077_v12 = vcvt.s32.f32 %v3157_v34  ;;  %v5085_v35 = vcvt.s32.f32 %v3165_v0 }
 0x2ee   :  { %7234 = vmatpush.bf16.msra.mxu0 %v5925_v8  ;;  %v2837_v19 = vunpack.c.2.s8 %v1549_v13  ;;  %v2845_v54 = vunpack.c.3.s8 %v1549_v13  ;;  %v6237_v61 = vpack.c.bf16 %v4957_v28, %v4949_v59  ;;  %v4629_v38 = vcvt.s32.f32 %v2709_v10 }
 0x2ef   :  { %7247 = vmatpush.bf16.msra.mxu1 %v5989_v39  ;;  %v4637_v48 = vcvt.s32.f32 %v2717_v41  ;;  %v7003_v53 = vadd.f32 %v11220_v40, %v11212_v21  ;;  %v6301_v18 = vpack.c.bf16 %v5085_v35, %v5077_v12  ;;  %v3013_v20 = vunpack.c.0.s8 %v11251_v29 }
 0x2f0   :  { %v4757_v50 = vcvt.s32.f32 %v2837_v19  ;;  %v4765_v5 = vcvt.s32.f32 %v2845_v54  ;;  %v3021_v9 = vunpack.c.1.s8 %v11251_v29  ;;  %v3141_v52 = vunpack.c.0.s8 %v1629_v4  ;;  %v1621_v29 = vld [vmem:[%s12559_s1 + $0xa98] sm:$0xff] }
 0x2f1   :  { %v6077_v24 = vpack.c.bf16 %v4637_v48, %v4629_v38  ;;  %v7016_v7 = vadd.f32 %v11222_v14, %v7003_v53  ;;  %7235 = vmatmul.bf16.vlgmr.msra.gmra.mxu0 %v9975_v3  ;;  %v4933_v21 = vcvt.s32.f32 %v3013_v20  ;;  %v3149_v40 = vunpack.c.1.s8 %v1629_v4  ;;  %v1509_v4 = vld [vmem:[%s12559_s1 + $0x718] sm:$0xff] }
 0x2f2   :  { %7279 = vmatpush.bf16.msrb.mxu0 %v6237_v61  ;;  %v6141_v31 = vpack.c.bf16 %v4765_v5, %v4757_v50  ;;  %v2693_v17 = vunpack.c.0.s8 %v1517_v33  ;;  %7248 = vmatmul.bf16.vlgmr.msra.gmra.mxu1 %v10260_v49  ;;  %v4941_v57 = vcvt.s32.f32 %v3021_v9  ;;  %v5061_v1 = vcvt.s32.f32 %v3141_v52 }
 0x2f3   :  { %7292 = vmatpush.bf16.msrb.mxu1 %v6301_v18  ;;  %7257 = vmatpush.bf16.msra.mxu2 %v6077_v24  ;;  %v2701_v14 = vunpack.c.1.s8 %v1517_v33  ;;  %v2821_v43 = vunpack.c.0.s8 %v1549_v13  ;;  %v5069_v44 = vcvt.s32.f32 %v3149_v40  ;;  %v2829_v2 = vunpack.c.1.s8 %v1549_v13  ;;  %v1541_v33 = vld [vmem:[%s12559_s1 + $0x818] sm:$0xff] }
 0x2f4   :  { %7270 = vmatpush.bf16.msrb.mxu3 %v6141_v31  ;;  %v4613_v26 = vcvt.s32.f32 %v2693_v17  ;;  %v2997_v62 = vunpack.c.2.s8 %v1589_v47  ;;  %v6229_v56 = vpack.c.bf16 %v4941_v57, %v4933_v21  ;;  %v3005_v6 = vunpack.c.3.s8 %v1589_v47  ;;  %v1661_v57 = vld [vmem:[%s12559_s1 + $0xbd8] sm:$0xff] }
 0x2f5   :  { %v4621_v23 = vcvt.s32.f32 %v2701_v14  ;;  %v4741_v16 = vcvt.s32.f32 %v2821_v43  ;;  %v6293_v8 = vpack.c.bf16 %v5069_v44, %v5061_v1  ;;  %v4749_v59 = vcvt.s32.f32 %v2829_v2  ;;  %v11290_v43 = vpop.f32.mrf.mxu2  ;;  %v11292_v44 = vpop.f32.mrf.mxu3 }
 0x2f6   :  { %v4917_v34 = vcvt.s32.f32 %v2997_v62  ;;  %v3125_v0 = vunpack.c.2.s8 %v1621_v29  ;;  %7280 = vmatpush.bf16.msrb.mxu0 %v6229_v56  ;;  %v4925_v13 = vcvt.s32.f32 %v3005_v6  ;;  %v3133_v28 = vunpack.c.3.s8 %v1621_v29  ;;  %v1581_v6 = vld [vmem:[%s12559_s1 + $0x958] sm:$0xff] }
 0x2f7   :  { %v6069_v39 = vpack.c.bf16 %v4621_v23, %v4613_v26  ;;  %v2677_v10 = vunpack.c.2.s8 %v1509_v4  ;;  %7293 = vmatpush.bf16.msrb.mxu1 %v6293_v8  ;;  %v6133_v41 = vpack.c.bf16 %v4749_v59, %v4741_v16  ;;  %v2685_v35 = vunpack.c.3.s8 %v1509_v4 }
 0x2f8   :  { %v5045_v12 = vcvt.s32.f32 %v3125_v0  ;;  %v2805_v19 = vunpack.c.2.s8 %v1541_v33  ;;  %v6221_v54 = vpack.c.bf16 %v4925_v13, %v4917_v34  ;;  %v5053_v61 = vcvt.s32.f32 %v3133_v28 }
 0x2f9   :  { %7258 = vmatpush.bf16.msra.mxu2 %v6069_v39  ;;  %v4597_v38 = vcvt.s32.f32 %v2677_v10  ;;  %v2813_v48 = vunpack.c.3.s8 %v1541_v33  ;;  %7271 = vmatpush.bf16.msrb.mxu3 %v6133_v41  ;;  %v4605_v53 = vcvt.s32.f32 %v2685_v35  ;;  %v7029_v50 = vadd.f32 %v11238_v11, %v7016_v7 }
 0x2fa   :  { %v4725_v18 = vcvt.s32.f32 %v2805_v19  ;;  %v2981_v5 = vunpack.c.0.s8 %v1589_v47  ;;  %7281 = vmatpush.bf16.msrb.mxu0 %v6221_v54  ;;  %v6285_v20 = vpack.c.bf16 %v5053_v61, %v5045_v12  ;;  %v2989_v9 = vunpack.c.1.s8 %v1589_v47 }
 0x2fb   :  { %v4733_v24 = vcvt.s32.f32 %v2813_v48  ;;  %v3109_v52 = vunpack.c.0.s8 %v1621_v29  ;;  %v6061_v31 = vpack.c.bf16 %v4605_v53, %v4597_v38  ;;  %v11285_v21 = vadd.f32 %v11240_v63, %v7029_v50 }
 0x2fc   :  { %v4901_v40 = vcvt.s32.f32 %v2981_v5  ;;  %v3117_v17 = vunpack.c.1.s8 %v1621_v29  ;;  %7294 = vmatpush.bf16.msrb.mxu1 %v6285_v20  ;;  %v4909_v14 = vcvt.s32.f32 %v2989_v9  ;;  %v2661_v7 = vunpack.c.0.s8 %v1509_v4  ;;  %v1693_v29 = vld [vmem:[%s12559_s1 + $0xcd8] sm:$0xff] }
 0x2fd   :  { %v6125_v1 = vpack.c.bf16 %v4733_v24, %v4725_v18  ;;  %v5029_v11 = vcvt.s32.f32 %v3109_v52  ;;  %7259 = vmatpush.bf16.msra.mxu2 %v6061_v31  ;;  %v2669_v26 = vunpack.c.1.s8 %v1509_v4  ;;  %v2789_v63 = vunpack.c.0.s8 %v1541_v33  ;;  %v1613_v4 = vld [vmem:[%s12559_s1 + $0xa58] sm:$0xff]  ;;  %v7056_v52 = vpop.f32.mrf.mxu2  ;;  %v7069_v31 = vpop.f32.mrf.mxu3 }
 0x2fe   :  { %v5037_v47 = vcvt.s32.f32 %v3117_v17  ;;  %v2797_v2 = vunpack.c.1.s8 %v1541_v33  ;;  %v6213_v62 = vpack.c.bf16 %v4909_v14, %v4901_v40  ;;  %v4581_v56 = vcvt.s32.f32 %v2661_v7 }
 0x2ff   :  { %7272 = vmatpush.bf16.msrb.mxu3 %v6125_v1  ;;  %v3285_v23 = vunpack.c.2.s8 %v1661_v57  ;;  %v3293_v16 = vunpack.c.3.s8 %v1661_v57  ;;  %v4589_v59 = vcvt.s32.f32 %v2669_v26  ;;  %v4709_v34 = vcvt.s32.f32 %v2789_v63 }
 0x300   :  { %v6277_v8 = vpack.c.bf16 %v5037_v47, %v5029_v11  ;;  %v4717_v0 = vcvt.s32.f32 %v2797_v2  ;;  %7282 = vmatpush.bf16.msrb.mxu0 %v6213_v62  ;;  %v3413_v13 = vunpack.c.2.s8 %v1693_v29  ;;  %v3421_v28 = vunpack.c.3.s8 %v1693_v29  ;;  %v1653_v11 = vld [vmem:[%s12559_s1 + $0xb98] sm:$0xff] }
 0x301   :  { %v5205_v33 = vcvt.s32.f32 %v3285_v23  ;;  %v5213_v39 = vcvt.s32.f32 %v3293_v16  ;;  %v6053_v10 = vpack.c.bf16 %v4589_v59, %v4581_v56  ;;  %v2965_v12 = vunpack.c.2.s8 %v1581_v6  ;;  %v11311_v23 = vpop.f32.mrf.mxu0  ;;  %v11313_v16 = vpop.f32.mrf.mxu1 }
 0x302   :  { %7295 = vmatpush.bf16.msrb.mxu1 %v6277_v8  ;;  %v6117_v41 = vpack.c.bf16 %v4717_v0, %v4709_v34  ;;  %v2973_v35 = vunpack.c.3.s8 %v1581_v6  ;;  %v5333_v54 = vcvt.s32.f32 %v3413_v13  ;;  %v5341_v61 = vcvt.s32.f32 %v3421_v28  ;;  %v1605_v28 = vld [vmem:[%s12559_s1 + $0xa18] sm:$0xff] }
 0x303   :  { %v6365_v19 = vpack.c.bf16 %v5213_v39, %v5205_v33  ;;  %v3093_v38 = vunpack.c.2.s8 %v1613_v4  ;;  %7260 = vmatpush.bf16.msra.mxu2 %v6053_v10  ;;  %v4885_v48 = vcvt.s32.f32 %v2965_v12  ;;  %v3101_v18 = vunpack.c.3.s8 %v1613_v4 }
 0x304   :  { %7273 = vmatpush.bf16.msrb.mxu3 %v6117_v41  ;;  %v4893_v53 = vcvt.s32.f32 %v2973_v35  ;;  %v3269_v50 = vunpack.c.0.s8 %v1661_v57  ;;  %v6429_v5 = vpack.c.bf16 %v5341_v61, %v5333_v54  ;;  %v3277_v24 = vunpack.c.1.s8 %v1661_v57 }
 0x305   :  { %v5013_v20 = vcvt.s32.f32 %v3093_v38  ;;  %v3397_v9 = vunpack.c.0.s8 %v1693_v29  ;;  %v5021_v17 = vcvt.s32.f32 %v3101_v18  ;;  %v3405_v14 = vunpack.c.1.s8 %v1693_v29  ;;  %v1685_v29 = vld [vmem:[%s12559_s1 + $0xc98] sm:$0xff] }
 0x306   :  { %v6205_v40 = vpack.c.bf16 %v4893_v53, %v4885_v48  ;;  %v5189_v1 = vcvt.s32.f32 %v3269_v50  ;;  %7261 = vmatmul.bf16.vlgmr.msra.gmra.mxu2 %v10318_v45  ;;  %v5197_v7 = vcvt.s32.f32 %v3277_v24  ;;  %v2949_v26 = vunpack.c.0.s8 %v1581_v6 }
 0x307   :  { %7305 = vmatpush.bf16.msrb.mxu2 %v6365_v19  ;;  %v5317_v47 = vcvt.s32.f32 %v3397_v9  ;;  %v2957_v63 = vunpack.c.1.s8 %v1581_v6  ;;  %7274 = vmatmul.bf16.vlgmr.msrb.gmra.mxu3 %v10505_v15  ;;  %v6269_v57 = vpack.c.bf16 %v5021_v17, %v5013_v20  ;;  %v5325_v2 = vcvt.s32.f32 %v3405_v14  ;;  %v1573_v6 = vld [vmem:[%s12559_s1 + $0x918] sm:$0xff] }
 0x308   :  { %7318 = vmatpush.bf16.msra.mxu3 %v6429_v5  ;;  %7283 = vmatpush.bf16.msrb.mxu0 %v6205_v40  ;;  %v3077_v62 = vunpack.c.0.s8 %v1613_v4  ;;  %v3085_v56 = vunpack.c.1.s8 %v1613_v4  ;;  %v6357_v8 = vpack.c.bf16 %v5197_v7, %v5189_v1  ;;  %v4869_v59 = vcvt.s32.f32 %v2949_v26  ;;  %v11324_v26 = vld [vmem:[%s12559_s1 + $0xdd8] sm:$0xff] }
 0x309   :  { %v4877_v34 = vcvt.s32.f32 %v2957_v63  ;;  %v3253_v0 = vunpack.c.2.s8 %v1653_v11  ;;  %7296 = vmatpush.bf16.msrb.mxu1 %v6269_v57  ;;  %v6421_v33 = vpack.c.bf16 %v5325_v2, %v5317_v47  ;;  %v3261_v13 = vunpack.c.3.s8 %v1653_v11  ;;  %v7082_v63 = vpop.f32.mrf.mxu0  ;;  %v7095_v57 = vpop.f32.mrf.mxu1 }
 0x30a   :  { %v4997_v39 = vcvt.s32.f32 %v3077_v62  ;;  %v5005_v4 = vcvt.s32.f32 %v3085_v56  ;;  %v3381_v12 = vunpack.c.2.s8 %v1685_v29  ;;  %v3389_v35 = vunpack.c.3.s8 %v1685_v29 }
 0x30b   :  { %7306 = vmatpush.bf16.msrb.mxu2 %v6357_v8  ;;  %v6197_v10 = vpack.c.bf16 %v4877_v34, %v4869_v59  ;;  %v5173_v41 = vcvt.s32.f32 %v3253_v0  ;;  %v5181_v54 = vcvt.s32.f32 %v3261_v13  ;;  %v2933_v61 = vunpack.c.2.s8 %v1573_v6 }
 0x30c   :  { %7319 = vmatpush.bf16.msra.mxu3 %v6421_v33  ;;  %v6261_v19 = vpack.c.bf16 %v5005_v4, %v4997_v39  ;;  %v2941_v38 = vunpack.c.3.s8 %v1573_v6  ;;  %v5301_v48 = vcvt.s32.f32 %v3381_v12  ;;  %v5309_v53 = vcvt.s32.f32 %v3389_v35 }
 0x30d   :  { %7284 = vmatpush.bf16.msrb.mxu0 %v6197_v10  ;;  %v3061_v18 = vunpack.c.2.s8 %v1605_v28  ;;  %v3069_v50 = vunpack.c.3.s8 %v1605_v28  ;;  %v6349_v5 = vpack.c.bf16 %v5181_v54, %v5173_v41  ;;  %v4853_v20 = vcvt.s32.f32 %v2933_v61  ;;  %v1645_v10 = vld [vmem:[%s12559_s1 + $0xb58] sm:$0xff] }
 0x30e   :  { %7297 = vmatpush.bf16.msrb.mxu1 %v6261_v19  ;;  %v4861_v24 = vcvt.s32.f32 %v2941_v38  ;;  %v3237_v9 = vunpack.c.0.s8 %v1653_v11  ;;  %v6413_v52 = vpack.c.bf16 %v5309_v53, %v5301_v48  ;;  %v3245_v17 = vunpack.c.1.s8 %v1653_v11 }
 0x30f   :  { %v4981_v31 = vcvt.s32.f32 %v3061_v18  ;;  %v4989_v40 = vcvt.s32.f32 %v3069_v50  ;;  %7307 = vmatpush.bf16.msrb.mxu2 %v6349_v5  ;;  %v3365_v7 = vunpack.c.0.s8 %v1685_v29  ;;  %v3373_v47 = vunpack.c.1.s8 %v1685_v29  ;;  %v1757_v29 = vld [vmem:[%s12559_s1 + $0xed8] sm:$0xff] }
 0x310   :  { %v6189_v1 = vpack.c.bf16 %v4861_v24, %v4853_v20  ;;  %v5157_v14 = vcvt.s32.f32 %v3237_v9  ;;  %7320 = vmatpush.bf16.msra.mxu3 %v6413_v52  ;;  %v5165_v62 = vcvt.s32.f32 %v3245_v17  ;;  %v2917_v56 = vunpack.c.0.s8 %v1573_v6 }
 0x311   :  { %v6253_v2 = vpack.c.bf16 %v4989_v40, %v4981_v31  ;;  %v2925_v8 = vunpack.c.1.s8 %v1573_v6  ;;  %v5285_v59 = vcvt.s32.f32 %v3365_v7  ;;  %v5293_v11 = vcvt.s32.f32 %v3373_v47 }
 0x312   :  { %7285 = vmatpush.bf16.msrb.mxu0 %v6189_v1  ;;  %v3045_v34 = vunpack.c.0.s8 %v1605_v28  ;;  %v3053_v0 = vunpack.c.1.s8 %v1605_v28  ;;  %v6341_v33 = vpack.c.bf16 %v5165_v62, %v5157_v14  ;;  %v4837_v39 = vcvt.s32.f32 %v2917_v56  ;;  %v1677_v28 = vld [vmem:[%s12559_s1 + $0xc58] sm:$0xff] }
 0x313   :  { %7298 = vmatpush.bf16.msrb.mxu1 %v6253_v2  ;;  %v4845_v4 = vcvt.s32.f32 %v2925_v8  ;;  %v3541_v13 = vunpack.c.2.s8 %v11324_v26  ;;  %v6405_v6 = vpack.c.bf16 %v5293_v11, %v5285_v59  ;;  %v3549_v35 = vunpack.c.3.s8 %v11324_v26  ;;  %v1717_v56 = vld [vmem:[%s12559_s1 + $0xd98] sm:$0xff] }
 0x314   :  { %v4965_v41 = vcvt.s32.f32 %v3045_v34  ;;  %v4973_v12 = vcvt.s32.f32 %v3053_v0  ;;  %7308 = vmatpush.bf16.msrb.mxu2 %v6341_v33  ;;  %v3669_v61 = vunpack.c.2.s8 %v1757_v29  ;;  %v3677_v38 = vunpack.c.3.s8 %v1757_v29 }
 0x315   :  { %v6181_v19 = vpack.c.bf16 %v4845_v4, %v4837_v39  ;;  %v5461_v54 = vcvt.s32.f32 %v3541_v13  ;;  %7321 = vmatpush.bf16.msra.mxu3 %v6405_v6  ;;  %v5469_v53 = vcvt.s32.f32 %v3549_v35  ;;  %v3221_v18 = vunpack.c.2.s8 %v1645_v10 }
 0x316   :  { %v6245_v48 = vpack.c.bf16 %v4973_v12, %v4965_v41  ;;  %v3229_v50 = vunpack.c.3.s8 %v1645_v10  ;;  %v5589_v5 = vcvt.s32.f32 %v3669_v61  ;;  %v5597_v20 = vcvt.s32.f32 %v3677_v38 }
 0x317   :  { %7286 = vmatpush.bf16.msrb.mxu0 %v6181_v19  ;;  %v3349_v24 = vunpack.c.2.s8 %v1677_v28  ;;  %v3357_v9 = vunpack.c.3.s8 %v1677_v28  ;;  %v6493_v52 = vpack.c.bf16 %v5469_v53, %v5461_v54  ;;  %v5141_v31 = vcvt.s32.f32 %v3221_v18 }
 0x318   :  { %7299 = vmatpush.bf16.msrb.mxu1 %v6245_v48  ;;  %v5149_v40 = vcvt.s32.f32 %v3229_v50  ;;  %v7055_v17 = vadd.f32 %v11290_v43, %v11285_v21  ;;  %v6557_v1 = vpack.c.bf16 %v5597_v20, %v5589_v5  ;;  %v3525_v47 = vunpack.c.0.s8 %v11324_v26 }
 0x319   :  { %v5269_v14 = vcvt.s32.f32 %v3349_v24  ;;  %v5277_v7 = vcvt.s32.f32 %v3357_v9  ;;  %v3533_v2 = vunpack.c.1.s8 %v11324_v26  ;;  %v3653_v62 = vunpack.c.0.s8 %v1757_v29  ;;  %v1749_v26 = vld [vmem:[%s12559_s1 + $0xe98] sm:$0xff] }
 0x31a   :  { %v6333_v63 = vpack.c.bf16 %v5149_v40, %v5141_v31  ;;  %v7068_v57 = vadd.f32 %v11292_v44, %v7055_v17  ;;  %7287 = vmatmul.bf16.vlgmr.msrb.gmra.mxu0 %v10510_v36  ;;  %v5445_v21 = vcvt.s32.f32 %v3525_v47  ;;  %v3661_v43 = vunpack.c.1.s8 %v1757_v29  ;;  %v1637_v29 = vld [vmem:[%s12559_s1 + $0xb18] sm:$0xff] }
 0x31b   :  { %7331 = vmatpush.bf16.msra.mxu0 %v6493_v52  ;;  %v6397_v8 = vpack.c.bf16 %v5277_v7, %v5269_v14  ;;  %v3205_v59 = vunpack.c.0.s8 %v1645_v10  ;;  %7300 = vmatmul.bf16.vlgmr.msrb.gmra.mxu1 %v10545_v22  ;;  %v5453_v11 = vcvt.s32.f32 %v3533_v2  ;;  %v5573_v34 = vcvt.s32.f32 %v3653_v62 }
 0x31c   :  { %7344 = vmatpush.bf16.msra.mxu1 %v6557_v1  ;;  %7309 = vmatpush.bf16.msrb.mxu2 %v6333_v63  ;;  %v3213_v44 = vunpack.c.1.s8 %v1645_v10  ;;  %v3333_v0 = vunpack.c.0.s8 %v1677_v28  ;;  %v5581_v33 = vcvt.s32.f32 %v3661_v43  ;;  %v3341_v4 = vunpack.c.1.s8 %v1677_v28  ;;  %v1669_v10 = vld [vmem:[%s12559_s1 + $0xc18] sm:$0xff] }
 0x31d   :  { %7322 = vmatpush.bf16.msra.mxu3 %v6397_v8  ;;  %v5125_v39 = vcvt.s32.f32 %v3205_v59  ;;  %v3509_v13 = vunpack.c.2.s8 %v1717_v56  ;;  %v6485_v6 = vpack.c.bf16 %v5453_v11, %v5445_v21  ;;  %v3517_v35 = vunpack.c.3.s8 %v1717_v56  ;;  %v1310_v11 = vld [vmem:[%s12559_s1 + $0xe0] sm:$0xff] }
 0x31e   :  { %v5133_v41 = vcvt.s32.f32 %v3213_v44  ;;  %v5253_v12 = vcvt.s32.f32 %v3333_v0  ;;  %v6549_v19 = vpack.c.bf16 %v5581_v33, %v5573_v34  ;;  %v5261_v54 = vcvt.s32.f32 %v3341_v4  ;;  %v11363_v0 = vpop.f32.mrf.mxu2  ;;  %v11365_v33 = vpop.f32.mrf.mxu3 }
 0x31f   :  { %v5429_v61 = vcvt.s32.f32 %v3509_v13  ;;  %v3637_v38 = vunpack.c.2.s8 %v1749_v26  ;;  %7332 = vmatpush.bf16.msra.mxu0 %v6485_v6  ;;  %v5437_v28 = vcvt.s32.f32 %v3517_v35  ;;  %v3645_v53 = vunpack.c.3.s8 %v1749_v26  ;;  %v1709_v35 = vld [vmem:[%s12559_s1 + $0xd58] sm:$0xff] }
 0x320   :  { %v6325_v48 = vpack.c.bf16 %v5133_v41, %v5125_v39  ;;  %v3189_v18 = vunpack.c.2.s8 %v1637_v29  ;;  %7345 = vmatpush.bf16.msra.mxu1 %v6549_v19  ;;  %v6389_v50 = vpack.c.bf16 %v5261_v54, %v5253_v12  ;;  %v3197_v20 = vunpack.c.3.s8 %v1637_v29 }
 0x321   :  { %v5557_v5 = vcvt.s32.f32 %v3637_v38  ;;  %v3317_v24 = vunpack.c.2.s8 %v1669_v10  ;;  %v6477_v9 = vpack.c.bf16 %v5437_v28, %v5429_v61  ;;  %v5565_v52 = vcvt.s32.f32 %v3645_v53 }
 0x322   :  { %7310 = vmatpush.bf16.msrb.mxu2 %v6325_v48  ;;  %v5109_v31 = vcvt.s32.f32 %v3189_v18  ;;  %v3325_v40 = vunpack.c.3.s8 %v1669_v10  ;;  %7323 = vmatpush.bf16.msra.mxu3 %v6389_v50  ;;  %v5117_v17 = vcvt.s32.f32 %v3197_v20  ;;  %v7081_v14 = vadd.f32 %v11311_v23, %v7068_v57 }
 0x323   :  { %v5237_v1 = vcvt.s32.f32 %v3317_v24  ;;  %v3493_v7 = vunpack.c.0.s8 %v1717_v56  ;;  %7333 = vmatpush.bf16.msra.mxu0 %v6477_v9  ;;  %v6541_v47 = vpack.c.bf16 %v5565_v52, %v5557_v5  ;;  %v3501_v2 = vunpack.c.1.s8 %v1717_v56 }
 0x324   :  { %v5245_v63 = vcvt.s32.f32 %v3325_v40  ;;  %v3621_v62 = vunpack.c.0.s8 %v1749_v26  ;;  %v6317_v8 = vpack.c.bf16 %v5117_v17, %v5109_v31  ;;  %v11358_v21 = vadd.f32 %v11313_v16, %v7081_v14 }
 0x325   :  { %v5413_v43 = vcvt.s32.f32 %v3493_v7  ;;  %v3629_v59 = vunpack.c.1.s8 %v1749_v26  ;;  %7346 = vmatpush.bf16.msra.mxu1 %v6541_v47  ;;  %v5421_v44 = vcvt.s32.f32 %v3501_v2  ;;  %v3173_v57 = vunpack.c.0.s8 %v1637_v29  ;;  %v1342_v26 = vld [vmem:[%s12559_s1 + $0x1e0] sm:$0xff] }
 0x326   :  { %v6381_v34 = vpack.c.bf16 %v5245_v63, %v5237_v1  ;;  %v5541_v23 = vcvt.s32.f32 %v3621_v62  ;;  %7311 = vmatpush.bf16.msrb.mxu2 %v6317_v8  ;;  %v3181_v39 = vunpack.c.1.s8 %v1637_v29  ;;  %v3301_v16 = vunpack.c.0.s8 %v1669_v10  ;;  %v1741_v29 = vld [vmem:[%s12559_s1 + $0xe58] sm:$0xff]  ;;  %v7108_v62 = vpop.f32.mrf.mxu2  ;;  %v7121_v8 = vpop.f32.mrf.mxu3 }
 0x327   :  { %v5549_v56 = vcvt.s32.f32 %v3629_v59  ;;  %v3309_v4 = vunpack.c.1.s8 %v1669_v10  ;;  %v6469_v13 = vpack.c.bf16 %v5421_v44, %v5413_v43  ;;  %v5093_v6 = vcvt.s32.f32 %v3173_v57 }
 0x328   :  { %7324 = vmatpush.bf16.msra.mxu3 %v6381_v34  ;;  %v1878_v41 = vunpack.c.2.s8 %v1310_v11  ;;  %v1886_v12 = vunpack.c.3.s8 %v1310_v11  ;;  %v5101_v54 = vcvt.s32.f32 %v3181_v39  ;;  %v5221_v61 = vcvt.s32.f32 %v3301_v16 }
 0x329   :  { %v6533_v19 = vpack.c.bf16 %v5549_v56, %v5541_v23  ;;  %v5229_v38 = vcvt.s32.f32 %v3309_v4  ;;  %7334 = vmatpush.bf16.msra.mxu0 %v6469_v13  ;;  %v2006_v28 = vunpack.c.2.s8 %v1342_v26  ;;  %v2014_v53 = vunpack.c.3.s8 %v1342_v26  ;;  %v1302_v23 = vld [vmem:[%s12559_s1 + $0xa0] sm:$0xff] }
 0x32a   :  { %v3798_v10 = vcvt.s32.f32 %v1878_v41  ;;  %v3806_v48 = vcvt.s32.f32 %v1886_v12  ;;  %v6309_v18 = vpack.c.bf16 %v5101_v54, %v5093_v6  ;;  %v3477_v5 = vunpack.c.2.s8 %v1709_v35  ;;  %v11384_v41 = vpop.f32.mrf.mxu0  ;;  %v11386_v12 = vpop.f32.mrf.mxu1 }
 0x32b   :  { %7347 = vmatpush.bf16.msra.mxu1 %v6533_v19  ;;  %v6373_v50 = vpack.c.bf16 %v5229_v38, %v5221_v61  ;;  %v3485_v20 = vunpack.c.3.s8 %v1709_v35  ;;  %v3926_v9 = vcvt.s32.f32 %v2006_v28  ;;  %v3934_v52 = vcvt.s32.f32 %v2014_v53  ;;  %v1733_v53 = vld [vmem:[%s12559_s1 + $0xe18] sm:$0xff] }
 0x32c   :  { %v5662_v24 = vpack.c.bf16 %v3806_v48, %v3798_v10  ;;  %v3605_v31 = vunpack.c.2.s8 %v1741_v29  ;;  %7312 = vmatpush.bf16.msrb.mxu2 %v6309_v18  ;;  %v5397_v40 = vcvt.s32.f32 %v3477_v5  ;;  %v3613_v1 = vunpack.c.3.s8 %v1741_v29 }
 0x32d   :  { %7325 = vmatpush.bf16.msra.mxu3 %v6373_v50  ;;  %v5405_v17 = vcvt.s32.f32 %v3485_v20  ;;  %v1862_v14 = vunpack.c.0.s8 %v1310_v11  ;;  %v5726_v7 = vpack.c.bf16 %v3934_v52, %v3926_v9  ;;  %v1870_v63 = vunpack.c.1.s8 %v1310_v11 }
 0x32e   :  { %v5525_v47 = vcvt.s32.f32 %v3605_v31  ;;  %v1990_v2 = vunpack.c.0.s8 %v1342_v26  ;;  %v5533_v59 = vcvt.s32.f32 %v3613_v1  ;;  %v1998_v44 = vunpack.c.1.s8 %v1342_v26  ;;  %v1334_v26 = vld [vmem:[%s12559_s1 + $0x1a0] sm:$0xff] }
 0x32f   :  { %v6461_v43 = vpack.c.bf16 %v5405_v17, %v5397_v40  ;;  %v3782_v34 = vcvt.s32.f32 %v1862_v14  ;;  %7313 = vmatmul.bf16.vlgmr.msrb.gmra.mxu2 %v10564_v30  ;;  %v3790_v57 = vcvt.s32.f32 %v1870_v63  ;;  %v3461_v39 = vunpack.c.0.s8 %v1709_v35 }
 0x330   :  { %7357 = vmatpush.bf16.msra.mxu2 %v5662_v24  ;;  %v3910_v56 = vcvt.s32.f32 %v1990_v2  ;;  %v3469_v16 = vunpack.c.1.s8 %v1709_v35  ;;  %7326 = vmatmul.bf16.vlgmr.msra.gmra.mxu3 %v10642_v37  ;;  %v6525_v11 = vpack.c.bf16 %v5533_v59, %v5525_v47  ;;  %v3918_v4 = vcvt.s32.f32 %v1998_v44  ;;  %v1701_v35 = vld [vmem:[%s12559_s1 + $0xd18] sm:$0xff] }
 0x331   :  { %7370 = vmatpush.bf16.msrb.mxu3 %v5726_v7  ;;  %7335 = vmatpush.bf16.msra.mxu0 %v6461_v43  ;;  %v3589_v13 = vunpack.c.0.s8 %v1741_v29  ;;  %v3597_v6 = vunpack.c.1.s8 %v1741_v29  ;;  %v5654_v19 = vpack.c.bf16 %v3790_v57, %v3782_v34  ;;  %v5381_v54 = vcvt.s32.f32 %v3461_v39  ;;  %v11397_v39 = vld [vmem:[%s12559_s1 + $0x2e0] sm:$0xff] }
 0x332   :  { %v5389_v61 = vcvt.s32.f32 %v3469_v16  ;;  %v1846_v38 = vunpack.c.2.s8 %v1302_v23  ;;  %7348 = vmatpush.bf16.msra.mxu1 %v6525_v11  ;;  %v5718_v10 = vpack.c.bf16 %v3918_v4, %v3910_v56  ;;  %v1854_v28 = vunpack.c.3.s8 %v1302_v23  ;;  %v7134_v16 = vpop.f32.mrf.mxu0  ;;  %v7147_v11 = vpop.f32.mrf.mxu1 }
 0x333   :  { %v5509_v48 = vcvt.s32.f32 %v3589_v13  ;;  %v5517_v29 = vcvt.s32.f32 %v3597_v6  ;;  %v1974_v5 = vunpack.c.2.s8 %v1334_v26  ;;  %v1982_v20 = vunpack.c.3.s8 %v1334_v26 }
 0x334   :  { %7358 = vmatpush.bf16.msra.mxu2 %v5654_v19  ;;  %v6453_v18 = vpack.c.bf16 %v5389_v61, %v5381_v54  ;;  %v3766_v50 = vcvt.s32.f32 %v1846_v38  ;;  %v3774_v9 = vcvt.s32.f32 %v1854_v28  ;;  %v3445_v52 = vunpack.c.2.s8 %v1701_v35 }
 0x335   :  { %7371 = vmatpush.bf16.msrb.mxu3 %v5718_v10  ;;  %v6517_v24 = vpack.c.bf16 %v5517_v29, %v5509_v48  ;;  %v3453_v31 = vunpack.c.3.s8 %v1701_v35  ;;  %v3894_v40 = vcvt.s32.f32 %v1974_v5  ;;  %v3902_v17 = vcvt.s32.f32 %v1982_v20 }
 0x336   :  { %7336 = vmatpush.bf16.msra.mxu0 %v6453_v18  ;;  %v3573_v1 = vunpack.c.2.s8 %v1733_v53  ;;  %v3581_v14 = vunpack.c.3.s8 %v1733_v53  ;;  %v5646_v7 = vpack.c.bf16 %v3774_v9, %v3766_v50  ;;  %v5365_v47 = vcvt.s32.f32 %v3445_v52  ;;  %v1294_v18 = vld [vmem:[%s12559_s1 + $0x60] sm:$0xff] }
 0x337   :  { %7349 = vmatpush.bf16.msra.mxu1 %v6517_v24  ;;  %v5373_v63 = vcvt.s32.f32 %v3453_v31  ;;  %v1830_v2 = vunpack.c.0.s8 %v1302_v23  ;;  %v5710_v62 = vpack.c.bf16 %v3902_v17, %v3894_v40  ;;  %v1838_v59 = vunpack.c.1.s8 %v1302_v23 }
 0x338   :  { %v5493_v8 = vcvt.s32.f32 %v3573_v1  ;;  %v5501_v43 = vcvt.s32.f32 %v3581_v14  ;;  %7359 = vmatpush.bf16.msra.mxu2 %v5646_v7  ;;  %v1958_v57 = vunpack.c.0.s8 %v1334_v26  ;;  %v1966_v56 = vunpack.c.1.s8 %v1334_v26  ;;  %v1406_v26 = vld [vmem:[%s12559_s1 + $0x3e0] sm:$0xff] }
 0x339   :  { %v6445_v34 = vpack.c.bf16 %v5373_v63, %v5365_v47  ;;  %v3750_v44 = vcvt.s32.f32 %v1830_v2  ;;  %7372 = vmatpush.bf16.msrb.mxu3 %v5710_v62  ;;  %v3758_v13 = vcvt.s32.f32 %v1838_v59  ;;  %v3429_v6 = vunpack.c.0.s8 %v1701_v35 }
 0x33a   :  { %v6509_v4 = vpack.c.bf16 %v5501_v43, %v5493_v8  ;;  %v3437_v19 = vunpack.c.1.s8 %v1701_v35  ;;  %v3878_v54 = vcvt.s32.f32 %v1958_v57  ;;  %v3886_v23 = vcvt.s32.f32 %v1966_v56 }
 0x33b   :  { %7337 = vmatpush.bf16.msra.mxu0 %v6445_v34  ;;  %v3557_v61 = vunpack.c.0.s8 %v1733_v53  ;;  %v3565_v38 = vunpack.c.1.s8 %v1733_v53  ;;  %v5638_v10 = vpack.c.bf16 %v3758_v13, %v3750_v44  ;;  %v5349_v48 = vcvt.s32.f32 %v3429_v6  ;;  %v1326_v53 = vld [vmem:[%s12559_s1 + $0x160] sm:$0xff] }
 0x33c   :  { %7350 = vmatpush.bf16.msra.mxu1 %v6509_v4  ;;  %v5357_v29 = vcvt.s32.f32 %v3437_v19  ;;  %v2134_v28 = vunpack.c.2.s8 %v11397_v39  ;;  %v5702_v35 = vpack.c.bf16 %v3886_v23, %v3878_v54  ;;  %v2142_v20 = vunpack.c.3.s8 %v11397_v39  ;;  %v1366_v6 = vld [vmem:[%s12559_s1 + $0x2a0] sm:$0xff] }
 0x33d   :  { %v5477_v50 = vcvt.s32.f32 %v3557_v61  ;;  %v5485_v5 = vcvt.s32.f32 %v3565_v38  ;;  %7360 = vmatpush.bf16.msra.mxu2 %v5638_v10  ;;  %v2262_v52 = vunpack.c.2.s8 %v1406_v26  ;;  %v2270_v31 = vunpack.c.3.s8 %v1406_v26 }
 0x33e   :  { %v6437_v24 = vpack.c.bf16 %v5357_v29, %v5349_v48  ;;  %v4054_v9 = vcvt.s32.f32 %v2134_v28  ;;  %7373 = vmatpush.bf16.msrb.mxu3 %v5702_v35  ;;  %v4062_v17 = vcvt.s32.f32 %v2142_v20  ;;  %v1814_v1 = vunpack.c.2.s8 %v1294_v18 }
 0x33f   :  { %v6501_v40 = vpack.c.bf16 %v5485_v5, %v5477_v50  ;;  %v1822_v14 = vunpack.c.3.s8 %v1294_v18  ;;  %v4182_v7 = vcvt.s32.f32 %v2262_v52  ;;  %v4190_v47 = vcvt.s32.f32 %v2270_v31 }
 0x340   :  { %7338 = vmatpush.bf16.msra.mxu0 %v6437_v24  ;;  %v1942_v63 = vunpack.c.2.s8 %v1326_v53  ;;  %v1950_v2 = vunpack.c.3.s8 %v1326_v53  ;;  %v5790_v62 = vpack.c.bf16 %v4062_v17, %v4054_v9  ;;  %v3734_v8 = vcvt.s32.f32 %v1814_v1 }
 0x341   :  { %7351 = vmatpush.bf16.msra.mxu1 %v6501_v40  ;;  %v3742_v43 = vcvt.s32.f32 %v1822_v14  ;;  %v7107_v59 = vadd.f32 %v11363_v0, %v11358_v21  ;;  %v5854_v34 = vpack.c.bf16 %v4190_v47, %v4182_v7  ;;  %v2118_v56 = vunpack.c.0.s8 %v11397_v39 }
 0x342   :  { %v3862_v44 = vcvt.s32.f32 %v1942_v63  ;;  %v3870_v57 = vcvt.s32.f32 %v1950_v2  ;;  %v2126_v4 = vunpack.c.1.s8 %v11397_v39  ;;  %v2246_v13 = vunpack.c.0.s8 %v1406_v26  ;;  %v1398_v39 = vld [vmem:[%s12559_s1 + $0x3a0] sm:$0xff] }
 0x343   :  { %v5630_v16 = vpack.c.bf16 %v3742_v43, %v3734_v8  ;;  %v7120_v11 = vadd.f32 %v11365_v33, %v7107_v59  ;;  %7339 = vmatmul.bf16.vlgmr.msra.gmra.mxu0 %v10644_v46  ;;  %v4038_v21 = vcvt.s32.f32 %v2118_v56  ;;  %v2254_v0 = vunpack.c.1.s8 %v1406_v26  ;;  %v1286_v26 = vld [vmem:[%s12559_s1 + $0x20] sm:$0xff] }
 0x344   :  { %7383 = vmatpush.bf16.msrb.mxu0 %v5790_v62  ;;  %v5694_v19 = vpack.c.bf16 %v3870_v57, %v3862_v44  ;;  %v1798_v54 = vunpack.c.0.s8 %v1294_v18  ;;  %7352 = vmatmul.bf16.vlgmr.msra.gmra.mxu1 %v10665_v60  ;;  %v4046_v23 = vcvt.s32.f32 %v2126_v4  ;;  %v4166_v61 = vcvt.s32.f32 %v2246_v13 }
 0x345   :  { %7396 = vmatpush.bf16.msrb.mxu1 %v5854_v34  ;;  %7361 = vmatpush.bf16.msra.mxu2 %v5630_v16  ;;  %v1806_v33 = vunpack.c.1.s8 %v1294_v18  ;;  %v1926_v38 = vunpack.c.0.s8 %v1326_v53  ;;  %v4174_v10 = vcvt.s32.f32 %v2254_v0  ;;  %v1934_v29 = vunpack.c.1.s8 %v1326_v53  ;;  %v1318_v18 = vld [vmem:[%s12559_s1 + $0x120] sm:$0xff] }
 0x346   :  { %7374 = vmatpush.bf16.msrb.mxu3 %v5694_v19  ;;  %v3718_v48 = vcvt.s32.f32 %v1798_v54  ;;  %v2102_v28 = vunpack.c.2.s8 %v1366_v6  ;;  %v5782_v35 = vpack.c.bf16 %v4046_v23, %v4038_v21  ;;  %v2110_v20 = vunpack.c.3.s8 %v1366_v6  ;;  %v1438_v23 = vld [vmem:[%s12559_s1 + $0x4e0] sm:$0xff] }
 0x347   :  { %v3726_v50 = vcvt.s32.f32 %v1806_v33  ;;  %v3846_v5 = vcvt.s32.f32 %v1926_v38  ;;  %v5846_v24 = vpack.c.bf16 %v4174_v10, %v4166_v61  ;;  %v3854_v9 = vcvt.s32.f32 %v1934_v29  ;;  %v11436_v38 = vpop.f32.mrf.mxu2 }
 0x348   :  { %v4022_v52 = vcvt.s32.f32 %v2102_v28  ;;  %v2230_v31 = vunpack.c.2.s8 %v1398_v39  ;;  %7384 = vmatpush.bf16.msrb.mxu0 %v5782_v35  ;;  %v4030_v53 = vcvt.s32.f32 %v2110_v20  ;;  %v2238_v17 = vunpack.c.3.s8 %v1398_v39  ;;  %v1358_v20 = vld [vmem:[%s12559_s1 + $0x260] sm:$0xff] }
 0x349   :  { %v5622_v40 = vpack.c.bf16 %v3726_v50, %v3718_v48  ;;  %v1782_v1 = vunpack.c.2.s8 %v1286_v26  ;;  %7397 = vmatpush.bf16.msrb.mxu1 %v5846_v24  ;;  %v5686_v14 = vpack.c.bf16 %v3854_v9, %v3846_v5  ;;  %v1790_v47 = vunpack.c.3.s8 %v1286_v26 }
 0x34a   :  { %v4150_v7 = vcvt.s32.f32 %v2230_v31  ;;  %v1910_v63 = vunpack.c.2.s8 %v1318_v18  ;;  %v5774_v2 = vpack.c.bf16 %v4030_v53, %v4022_v52  ;;  %v4158_v62 = vcvt.s32.f32 %v2238_v17 }
 0x34b   :  { %7362 = vmatpush.bf16.msra.mxu2 %v5622_v40  ;;  %v3702_v8 = vcvt.s32.f32 %v1782_v1  ;;  %v1918_v43 = vunpack.c.3.s8 %v1318_v18  ;;  %7375 = vmatpush.bf16.msrb.mxu3 %v5686_v14  ;;  %v3710_v59 = vcvt.s32.f32 %v1790_v47  ;;  %v7133_v44 = vadd.f32 %v11384_v41, %v7120_v11 }
 0x34c   :  { %v3830_v34 = vcvt.s32.f32 %v1910_v63  ;;  %v2086_v57 = vunpack.c.0.s8 %v1366_v6  ;;  %7385 = vmatpush.bf16.msrb.mxu0 %v5774_v2  ;;  %v5838_v56 = vpack.c.bf16 %v4158_v62, %v4150_v7  ;;  %v2094_v4 = vunpack.c.1.s8 %v1366_v6 }
 0x34d   :  { %v3838_v16 = vcvt.s32.f32 %v1918_v43  ;;  %v2214_v13 = vunpack.c.0.s8 %v1398_v39  ;;  %v5614_v19 = vpack.c.bf16 %v3710_v59, %v3702_v8  ;;  %v11431_v21 = vadd.f32 %v11386_v12, %v7133_v44  ;;  %v1470_v12 = vld [vmem:[%s12559_s1 + $0x5e0] sm:$0xff] }
 0x34e   :  { %v4006_v0 = vcvt.s32.f32 %v2086_v57  ;;  %v2222_v54 = vunpack.c.1.s8 %v1398_v39  ;;  %7398 = vmatpush.bf16.msrb.mxu1 %v5838_v56  ;;  %v4014_v33 = vcvt.s32.f32 %v2094_v4  ;;  %v1766_v11 = vunpack.c.0.s8 %v1286_v26  ;;  %v11441_v39 = vpop.f32.mrf.mxu3 }
 0x34f   :  { %v5678_v61 = vpack.c.bf16 %v3838_v16, %v3830_v34  ;;  %v4134_v41 = vcvt.s32.f32 %v2214_v13  ;;  %7363 = vmatpush.bf16.msra.mxu2 %v5614_v19  ;;  %v1774_v10 = vunpack.c.1.s8 %v1286_v26  ;;  %v1894_v48 = vunpack.c.0.s8 %v1318_v18  ;;  %v7160_v13 = vpop.f32.mrf.mxu2 }
 0x350   :  { %v4142_v6 = vcvt.s32.f32 %v2222_v54  ;;  %v1902_v29 = vunpack.c.1.s8 %v1318_v18  ;;  %v5766_v28 = vpack.c.bf16 %v4014_v33, %v4006_v0  ;;  %v3686_v35 = vcvt.s32.f32 %v1766_v11  ;;  %v1390_v18 = vld [vmem:[%s12559_s1 + $0x360] sm:$0xff] }
 0x351   :  { %7376 = vmatpush.bf16.msrb.mxu3 %v5678_v61  ;;  %v2390_v50 = vunpack.c.2.s8 %v1438_v23  ;;  %v2398_v5 = vunpack.c.3.s8 %v1438_v23  ;;  %v3694_v9 = vcvt.s32.f32 %v1774_v10  ;;  %v3814_v26 = vcvt.s32.f32 %v1894_v48  ;;  %v1430_v33 = vld [vmem:[%s12559_s1 + $0x4a0] sm:$0xff] }
 0x352   :  { %v5830_v24 = vpack.c.bf16 %v4142_v6, %v4134_v41  ;;  %v3822_v52 = vcvt.s32.f32 %v1902_v29  ;;  %7386 = vmatpush.bf16.msrb.mxu0 %v5766_v28  ;;  %v2518_v53 = vunpack.c.2.s8 %v1470_v12  ;;  %v2526_v17 = vunpack.c.3.s8 %v1470_v12 }
 0x353   :  { %v4310_v31 = vcvt.s32.f32 %v2390_v50  ;;  %v4318_v40 = vcvt.s32.f32 %v2398_v5  ;;  %v5606_v1 = vpack.c.bf16 %v3694_v9, %v3686_v35  ;;  %v2070_v7 = vunpack.c.2.s8 %v1358_v20 }
 0x354   :  { %7399 = vmatpush.bf16.msrb.mxu1 %v5830_v24  ;;  %v5670_v14 = vpack.c.bf16 %v3822_v52, %v3814_v26  ;;  %v2078_v47 = vunpack.c.3.s8 %v1358_v20  ;;  %v4438_v2 = vcvt.s32.f32 %v2518_v53  ;;  %v4446_v62 = vcvt.s32.f32 %v2526_v17  ;;  %v1350_v26 = vld [vmem:[%s12559_s1 + $0x220] sm:$0xff]  ;;  %v11462_v52 = vpop.f32.mrf.mxu1 }
 0x355   :  { %v5918_v63 = vpack.c.bf16 %v4318_v40, %v4310_v31  ;;  %v2198_v8 = vunpack.c.2.s8 %v1390_v18  ;;  %7364 = vmatpush.bf16.msra.mxu2 %v5606_v1  ;;  %v3990_v43 = vcvt.s32.f32 %v2070_v7  ;;  %v2206_v34 = vunpack.c.3.s8 %v1390_v18  ;;  %v1382_v17 = vld [vmem:[%s12559_s1 + $0x320] sm:$0xff] }
 0x356   :  { %7377 = vmatpush.bf16.msrb.mxu3 %v5670_v14  ;;  %v3998_v59 = vcvt.s32.f32 %v2078_v47  ;;  %v2374_v44 = vunpack.c.0.s8 %v1438_v23  ;;  %v5982_v57 = vpack.c.bf16 %v4446_v62, %v4438_v2  ;;  %v2382_v16 = vunpack.c.1.s8 %v1438_v23  ;;  %v7173_v41 = vpop.f32.mrf.mxu3 }
 0x357   :  { %v4118_v56 = vcvt.s32.f32 %v2198_v8  ;;  %v2502_v4 = vunpack.c.0.s8 %v1470_v12  ;;  %v4126_v0 = vcvt.s32.f32 %v2206_v34  ;;  %v2510_v61 = vunpack.c.1.s8 %v1470_v12  ;;  %v1462_v12 = vld [vmem:[%s12559_s1 + $0x5a0] sm:$0xff] }
 0x358   :  { %v5758_v19 = vpack.c.bf16 %v3998_v59, %v3990_v43  ;;  %v4294_v54 = vcvt.s32.f32 %v2374_v44  ;;  %7365 = vmatmul.bf16.vlgmr.msra.gmra.mxu2 %v12657_v32  ;;  %v4302_v11 = vcvt.s32.f32 %v2382_v16  ;;  %v2054_v10 = vunpack.c.0.s8 %v1358_v20 }
 0x359   :  { %7409 = vmatpush.bf16.msrb.mxu2 %v5918_v63  ;;  %v4422_v6 = vcvt.s32.f32 %v2502_v4  ;;  %v2062_v48 = vunpack.c.1.s8 %v1358_v20  ;;  %7378 = vmatmul.bf16.vlgmr.msrb.gmra.mxu3 %v12658_v27  ;;  %v5822_v23 = vpack.c.bf16 %v4126_v0, %v4118_v56  ;;  %v4430_v29 = vcvt.s32.f32 %v2510_v61  ;;  %v11460_v20 = vpop.f32.mrf.mxu0 }
 0x35a   :  { %7422 = vmatpush.bf16.msra.mxu3 %v5982_v57  ;;  %7387 = vmatpush.bf16.msrb.mxu0 %v5758_v19  ;;  %v2182_v28 = vunpack.c.0.s8 %v1390_v18  ;;  %v2190_v35 = vunpack.c.1.s8 %v1390_v18  ;;  %v5910_v50 = vpack.c.bf16 %v4302_v11, %v4294_v54  ;;  %v3974_v5 = vcvt.s32.f32 %v2054_v10  ;;  %v1502_v10 = vld [vmem:[%s12559_s1 + $0x6e0] sm:$0xff] }
 0x35b   :  { %v3982_v24 = vcvt.s32.f32 %v2062_v48  ;;  %v2358_v9 = vunpack.c.2.s8 %v1430_v33  ;;  %7400 = vmatpush.bf16.msrb.mxu1 %v5822_v23  ;;  %v5974_v31 = vpack.c.bf16 %v4430_v29, %v4422_v6  ;;  %v2366_v53 = vunpack.c.3.s8 %v1430_v33 }
 0x35c   :  { %v4102_v40 = vcvt.s32.f32 %v2182_v28  ;;  %v4110_v18 = vcvt.s32.f32 %v2190_v35  ;;  %v2486_v7 = vunpack.c.2.s8 %v1462_v12  ;;  %v2494_v47 = vunpack.c.3.s8 %v1462_v12 }
 0x35d   :  { %7410 = vmatpush.bf16.msrb.mxu2 %v5910_v50  ;;  %v5750_v1 = vpack.c.bf16 %v3982_v24, %v3974_v5  ;;  %v4278_v14 = vcvt.s32.f32 %v2358_v9  ;;  %v4286_v2 = vcvt.s32.f32 %v2366_v53  ;;  %v2038_v62 = vunpack.c.2.s8 %v1350_v26  ;;  %v7199_v50 = vpop.f32.mrf.mxu1 }
 0x35e   :  { %7423 = vmatpush.bf16.msra.mxu3 %v5974_v31  ;;  %v5814_v63 = vpack.c.bf16 %v4110_v18, %v4102_v40  ;;  %v2046_v8 = vunpack.c.3.s8 %v1350_v26  ;;  %v4406_v43 = vcvt.s32.f32 %v2486_v7  ;;  %v4414_v59 = vcvt.s32.f32 %v2494_v47 }
 0x35f   :  { %7388 = vmatpush.bf16.msrb.mxu0 %v5750_v1  ;;  %v2166_v34 = vunpack.c.2.s8 %v1382_v17  ;;  %v2174_v44 = vunpack.c.3.s8 %v1382_v17  ;;  %v5902_v57 = vpack.c.bf16 %v4286_v2, %v4278_v14  ;;  %v3958_v56 = vcvt.s32.f32 %v2038_v62 }
 0x360   :  { %7401 = vmatpush.bf16.msrb.mxu1 %v5814_v63  ;;  %v3966_v16 = vcvt.s32.f32 %v2046_v8  ;;  %v2342_v4 = vunpack.c.0.s8 %v1430_v33  ;;  %v5966_v13 = vpack.c.bf16 %v4414_v59, %v4406_v43  ;;  %v2350_v54 = vunpack.c.1.s8 %v1430_v33 }
 0x361   :  { %v4086_v19 = vcvt.s32.f32 %v2166_v34  ;;  %v4094_v0 = vcvt.s32.f32 %v2174_v44  ;;  %7411 = vmatpush.bf16.msrb.mxu2 %v5902_v57  ;;  %v2470_v11 = vunpack.c.0.s8 %v1462_v12  ;;  %v2478_v6 = vunpack.c.1.s8 %v1462_v12  ;;  %v7186_v35 = vpop.f32.mrf.mxu0  ;;  %v1534_v12 = vld [vmem:[%s12559_s1 + $0x7e0] sm:$0xff] }
 0x362   :  { %v5742_v61 = vpack.c.bf16 %v3966_v16, %v3958_v56  ;;  %v4262_v41 = vcvt.s32.f32 %v2342_v4  ;;  %7424 = vmatpush.bf16.msra.mxu3 %v5966_v13  ;;  %v4270_v23 = vcvt.s32.f32 %v2350_v54  ;;  %v2022_v29 = vunpack.c.0.s8 %v1350_v26 }
 0x363   :  { %v5806_v48 = vpack.c.bf16 %v4094_v0, %v4086_v19  ;;  %v2030_v28 = vunpack.c.1.s8 %v1350_v26  ;;  %v4390_v5 = vcvt.s32.f32 %v2470_v11  ;;  %v4398_v24 = vcvt.s32.f32 %v2478_v6  ;;  %v1422_v26 = vld [vmem:[%s12559_s1 + $0x460] sm:$0xff] }
 0x364   :  { %7389 = vmatpush.bf16.msrb.mxu0 %v5742_v61  ;;  %v2150_v33 = vunpack.c.0.s8 %v1382_v17  ;;  %v2158_v9 = vunpack.c.1.s8 %v1382_v17  ;;  %v5894_v31 = vpack.c.bf16 %v4270_v23, %v4262_v41  ;;  %v3942_v40 = vcvt.s32.f32 %v2022_v29  ;;  %v1454_v17 = vld [vmem:[%s12559_s1 + $0x560] sm:$0xff] }
 0x365   :  { %7402 = vmatpush.bf16.msrb.mxu1 %v5806_v48  ;;  %v3950_v18 = vcvt.s32.f32 %v2030_v28  ;;  %v2646_v53 = vunpack.c.2.s8 %v1502_v10  ;;  %v5958_v1 = vpack.c.bf16 %v4398_v24, %v4390_v5  ;;  %v2654_v47 = vunpack.c.3.s8 %v1502_v10  ;;  %v1494_v24 = vld [vmem:[%s12559_s1 + $0x6a0] sm:$0xff] }
 0x366   :  { %v4070_v14 = vcvt.s32.f32 %v2150_v33  ;;  %v4078_v7 = vcvt.s32.f32 %v2158_v9  ;;  %7412 = vmatpush.bf16.msrb.mxu2 %v5894_v31  ;;  %v2774_v62 = vunpack.c.2.s8 %v1534_v12  ;;  %v2782_v8 = vunpack.c.3.s8 %v1534_v12  ;;  %v1526_v31 = vld [vmem:[%s12559_s1 + $0x7a0] sm:$0xff] }
 0x367   :  { %v5734_v63 = vpack.c.bf16 %v3950_v18, %v3942_v40  ;;  %v4566_v2 = vcvt.s32.f32 %v2646_v53  ;;  %7425 = vmatpush.bf16.msra.mxu3 %v5958_v1  ;;  %v4574_v59 = vcvt.s32.f32 %v2654_v47  ;;  %v2326_v34 = vunpack.c.2.s8 %v1422_v26  ;;  %v1446_v47 = vld [vmem:[%s12559_s1 + $0x520] sm:$0xff] }
 0x368   :  { %v5798_v43 = vpack.c.bf16 %v4078_v7, %v4070_v14  ;;  %v2334_v44 = vunpack.c.3.s8 %v1422_v26  ;;  %v4694_v57 = vcvt.s32.f32 %v2774_v62  ;;  %v4702_v56 = vcvt.s32.f32 %v2782_v8 }
 0x369   :  { %7390 = vmatpush.bf16.msrb.mxu0 %v5734_v63  ;;  %v2454_v16 = vunpack.c.2.s8 %v1454_v17  ;;  %v2462_v4 = vunpack.c.3.s8 %v1454_v17  ;;  %v6046_v13 = vpack.c.bf16 %v4574_v59, %v4566_v2  ;;  %v4246_v19 = vcvt.s32.f32 %v2326_v34 }
 0x36a   :  { %7403 = vmatpush.bf16.msrb.mxu1 %v5798_v43  ;;  %v4254_v0 = vcvt.s32.f32 %v2334_v44  ;;  %v11481_v54 = vadd.f32 %v11436_v38, %v11431_v21  ;;  %v6110_v61 = vpack.c.bf16 %v4702_v56, %v4694_v57  ;;  %v2630_v48 = vunpack.c.0.s8 %v1502_v10 }
 0x36b   :  { %v4374_v41 = vcvt.s32.f32 %v2454_v16  ;;  %v4382_v11 = vcvt.s32.f32 %v2462_v4  ;;  %v2638_v23 = vunpack.c.1.s8 %v1502_v10  ;;  %v2758_v28 = vunpack.c.0.s8 %v1534_v12 }
 0x36c   :  { %v5886_v6 = vpack.c.bf16 %v4254_v0, %v4246_v19  ;;  %7391 = vmatmul.bf16.vlgmr.msrb.gmra.mxu0 %v12639_v25  ;;  %v2766_v35 = vunpack.c.1.s8 %v1534_v12  ;;  %v4550_v50 = vcvt.s32.f32 %v2630_v48  ;;  %v2310_v21 = vunpack.c.0.s8 %v1422_v26 }
 0x36d   :  { %7435 = vmatpush.bf16.msra.mxu0 %v6046_v13  ;;  %v5950_v29 = vpack.c.bf16 %v4382_v11, %v4374_v41  ;;  %7404 = vmatmul.bf16.vlgmr.msrb.gmra.mxu1 %v9894_v55  ;;  %v4558_v5 = vcvt.s32.f32 %v2638_v23  ;;  %v2318_v38 = vunpack.c.1.s8 %v1422_v26  ;;  %v4678_v33 = vcvt.s32.f32 %v2758_v28  ;;  %v1414_v26 = vld [vmem:[%s12559_s1 + $0x420] sm:$0xff] }
 0x36e   :  { %7448 = vmatpush.bf16.msra.mxu1 %v6110_v61  ;;  %7413 = vmatpush.bf16.msrb.mxu2 %v5886_v6  ;;  %v4686_v10 = vcvt.s32.f32 %v2766_v35  ;;  %v2438_v9 = vunpack.c.0.s8 %v1454_v17  ;;  %v4230_v40 = vcvt.s32.f32 %v2310_v21  ;;  %v2446_v53 = vunpack.c.1.s8 %v1454_v17 }
 0x36f   :  { %7426 = vmatpush.bf16.msra.mxu3 %v5950_v29  ;;  %v6038_v12 = vpack.c.bf16 %v4558_v5, %v4550_v50  ;;  %v4238_v18 = vcvt.s32.f32 %v2318_v38  ;;  %v2614_v7 = vunpack.c.2.s8 %v1494_v24  ;;  %v2622_v62 = vunpack.c.3.s8 %v1494_v24  ;;  %v1566_v38 = vld [vmem:[%s12559_s1 + $0x8e0] sm:$0xff] }
 0x370   :  { %v6102_v1 = vpack.c.bf16 %v4686_v10, %v4678_v33  ;;  %v4358_v14 = vcvt.s32.f32 %v2438_v9  ;;  %v4366_v2 = vcvt.s32.f32 %v2446_v53  ;;  %v2742_v8 = vunpack.c.2.s8 %v1526_v31  ;;  %v11505_v9 = vpop.f32.mrf.mxu2 }
 0x371   :  { %7436 = vmatpush.bf16.msra.mxu0 %v6038_v12  ;;  %v5878_v63 = vpack.c.bf16 %v4238_v18, %v4230_v40  ;;  %v4534_v43 = vcvt.s32.f32 %v2614_v7  ;;  %v2750_v59 = vunpack.c.3.s8 %v1526_v31  ;;  %v2294_v17 = vunpack.c.2.s8 %v1414_v26 }
 0x372   :  { %7449 = vmatpush.bf16.msra.mxu1 %v6102_v1  ;;  %v2302_v34 = vunpack.c.3.s8 %v1414_v26  ;;  %v5942_v44 = vpack.c.bf16 %v4366_v2, %v4358_v14  ;;  %v4542_v57 = vcvt.s32.f32 %v2622_v62  ;;  %v4662_v56 = vcvt.s32.f32 %v2742_v8 }
 0x373   :  { %7414 = vmatpush.bf16.msrb.mxu2 %v5878_v63  ;;  %v2422_v16 = vunpack.c.2.s8 %v1446_v47  ;;  %v4670_v4 = vcvt.s32.f32 %v2750_v59  ;;  %v4214_v13 = vcvt.s32.f32 %v2294_v17  ;;  %v2430_v0 = vunpack.c.3.s8 %v1446_v47 }
 0x374   :  { %v4222_v19 = vcvt.s32.f32 %v2302_v34  ;;  %7427 = vmatpush.bf16.msra.mxu3 %v5942_v44  ;;  %v6030_v61 = vpack.c.bf16 %v4542_v57, %v4534_v43  ;;  %v7185_v11 = vadd.f32 %v11460_v20, %v11441_v39  ;;  %v2598_v6 = vunpack.c.0.s8 %v1494_v24 }
 0x375   :  { %v4342_v41 = vcvt.s32.f32 %v2422_v16  ;;  %v6094_v48 = vpack.c.bf16 %v4670_v4, %v4662_v56  ;;  %v4350_v29 = vcvt.s32.f32 %v2430_v0  ;;  %v2606_v28 = vunpack.c.1.s8 %v1494_v24  ;;  %v11507_v24 = vpop.f32.mrf.mxu3 }
 0x376   :  { %v5870_v23 = vpack.c.bf16 %v4222_v19, %v4214_v13  ;;  %7437 = vmatpush.bf16.msra.mxu0 %v6030_v61  ;;  %v11500_v35 = vadd.f32 %v11462_v52, %v7185_v11  ;;  %v4518_v50 = vcvt.s32.f32 %v2598_v6  ;;  %v2726_v5 = vunpack.c.0.s8 %v1526_v31 }
 0x377   :  { %v2734_v21 = vunpack.c.1.s8 %v1526_v31  ;;  %7450 = vmatpush.bf16.msra.mxu1 %v6094_v48  ;;  %v5934_v33 = vpack.c.bf16 %v4350_v29, %v4342_v41  ;;  %v4526_v39 = vcvt.s32.f32 %v2606_v28  ;;  %v2278_v20 = vunpack.c.0.s8 %v1414_v26  ;;  %v1598_v31 = vld [vmem:[%s12559_s1 + $0x9e0] sm:$0xff] }
 0x378   :  { %7415 = vmatpush.bf16.msrb.mxu2 %v5870_v23  ;;  %v2286_v10 = vunpack.c.1.s8 %v1414_v26  ;;  %v4646_v12 = vcvt.s32.f32 %v2726_v5  ;;  %v2406_v40 = vunpack.c.0.s8 %v1446_v47  ;;  %v2414_v18 = vunpack.c.1.s8 %v1446_v47  ;;  %v1486_v26 = vld [vmem:[%s12559_s1 + $0x660] sm:$0xff] }
 0x379   :  { %v4654_v52 = vcvt.s32.f32 %v2734_v21  ;;  %7428 = vmatpush.bf16.msra.mxu3 %v5934_v33  ;;  %v6022_v53 = vpack.c.bf16 %v4526_v39, %v4518_v50  ;;  %v4198_v1 = vcvt.s32.f32 %v2278_v20  ;;  %v2902_v7 = vunpack.c.2.s8 %v1566_v38  ;;  %v1518_v47 = vld [vmem:[%s12559_s1 + $0x760] sm:$0xff]  ;;  %v7212_v50 = vpop.f32.mrf.mxu2 }
 0x37a   :  { %v4206_v14 = vcvt.s32.f32 %v2286_v10  ;;  %v4326_v2 = vcvt.s32.f32 %v2406_v40  ;;  %v4334_v62 = vcvt.s32.f32 %v2414_v18  ;;  %v2910_v8 = vunpack.c.3.s8 %v1566_v38  ;;  %v1558_v10 = vld [vmem:[%s12559_s1 + $0x8a0] sm:$0xff] }
 0x37b   :  { %v6086_v63 = vpack.c.bf16 %v4654_v52, %v4646_v12  ;;  %7438 = vmatpush.bf16.msra.mxu0 %v6022_v53  ;;  %v4822_v59 = vcvt.s32.f32 %v2902_v7  ;;  %v3030_v17 = vunpack.c.2.s8 %v1598_v31  ;;  %v3038_v34 = vunpack.c.3.s8 %v1598_v31  ;;  %v11526_v7 = vpop.f32.mrf.mxu0 }
 0x37c   :  { %v5862_v43 = vpack.c.bf16 %v4206_v14, %v4198_v1  ;;  %v5926_v44 = vpack.c.bf16 %v4334_v62, %v4326_v2  ;;  %v4830_v57 = vcvt.s32.f32 %v2910_v8  ;;  %v2582_v56 = vunpack.c.2.s8 %v1486_v26 }
 0x37d   :  { %7451 = vmatpush.bf16.msra.mxu1 %v6086_v63  ;;  %v2590_v16 = vunpack.c.3.s8 %v1486_v26  ;;  %v4950_v4 = vcvt.s32.f32 %v3030_v17  ;;  %v4958_v13 = vcvt.s32.f32 %v3038_v34  ;;  %v2710_v19 = vunpack.c.2.s8 %v1518_v47  ;;  %v7225_v5 = vpop.f32.mrf.mxu3  ;;  %v11528_v63 = vpop.f32.mrf.mxu1 }
 0x37e   :  { %7416 = vmatpush.bf16.msrb.mxu2 %v5862_v43  ;;  %v2718_v0 = vunpack.c.3.s8 %v1518_v47  ;;  %7429 = vmatpush.bf16.msra.mxu3 %v5926_v44  ;;  %v6174_v61 = vpack.c.bf16 %v4830_v57, %v4822_v59  ;;  %v4502_v41 = vcvt.s32.f32 %v2582_v56  ;;  %v2886_v6 = vunpack.c.0.s8 %v1566_v38  ;;  %v1478_v43 = vld [vmem:[%s12559_s1 + $0x620] sm:$0xff] }
 0x37f   :  { %v4510_v11 = vcvt.s32.f32 %v2590_v16  ;;  %v6238_v48 = vpack.c.bf16 %v4958_v13, %v4950_v4  ;;  %v4630_v23 = vcvt.s32.f32 %v2710_v19  ;;  %v2894_v28 = vunpack.c.1.s8 %v1566_v38  ;;  %v1510_v44 = vld [vmem:[%s12559_s1 + $0x720] sm:$0xff] }
 0x380   :  { %v4638_v29 = vcvt.s32.f32 %v2718_v0  ;;  %v4806_v33 = vcvt.s32.f32 %v2886_v6  ;;  %v3014_v39 = vunpack.c.0.s8 %v1598_v31  ;;  %v3022_v20 = vunpack.c.1.s8 %v1598_v31  ;;  %v1590_v31 = vld [vmem:[%s12559_s1 + $0x9a0] sm:$0xff] }
 0x381   :  { %v6014_v21 = vpack.c.bf16 %v4510_v11, %v4502_v41  ;;  %7417 = vmatmul.bf16.vlgmr.msrb.gmra.mxu2 %v9969_v58  ;;  %v4814_v52 = vcvt.s32.f32 %v2894_v28  ;;  %v2566_v40 = vunpack.c.0.s8 %v1486_v26  ;;  %v2574_v18 = vunpack.c.1.s8 %v1486_v26  ;;  %7430 = vmatmul.bf16.vlgmr.msra.gmra.mxu3 %v9975_v3 }
 0x382   :  { %7461 = vmatpush.bf16.msra.mxu2 %v6174_v61  ;;  %7474 = vmatpush.bf16.msrb.mxu3 %v6238_v48  ;;  %v6078_v12 = vpack.c.bf16 %v4638_v29, %v4630_v23  ;;  %v4934_v38 = vcvt.s32.f32 %v3014_v39  ;;  %v4942_v53 = vcvt.s32.f32 %v3022_v20  ;;  %v2694_v1 = vunpack.c.0.s8 %v1518_v47 }
 0x383   :  { %7439 = vmatpush.bf16.msra.mxu0 %v6014_v21  ;;  %v2702_v14 = vunpack.c.1.s8 %v1518_v47  ;;  %v6166_v2 = vpack.c.bf16 %v4814_v52, %v4806_v33  ;;  %v4486_v62 = vcvt.s32.f32 %v2566_v40  ;;  %v4494_v8 = vcvt.s32.f32 %v2574_v18  ;;  %v11539_v18 = vld [vmem:[%s12559_s1 + $0xae0] sm:$0xff] }
 0x384   :  { %7452 = vmatpush.bf16.msra.mxu1 %v6078_v12  ;;  %v2870_v26 = vunpack.c.2.s8 %v1558_v10  ;;  %v6230_v59 = vpack.c.bf16 %v4942_v53, %v4934_v38  ;;  %v4614_v17 = vcvt.s32.f32 %v2694_v1  ;;  %v2878_v34 = vunpack.c.3.s8 %v1558_v10  ;;  %v7238_v38 = vpop.f32.mrf.mxu0 }
 0x385   :  { %v4622_v47 = vcvt.s32.f32 %v2702_v14  ;;  %v6006_v57 = vpack.c.bf16 %v4494_v8, %v4486_v62  ;;  %v2998_v16 = vunpack.c.2.s8 %v1590_v31  ;;  %v3006_v4 = vunpack.c.3.s8 %v1590_v31  ;;  %v7251_v53 = vpop.f32.mrf.mxu1 }
 0x386   :  { %7462 = vmatpush.bf16.msra.mxu2 %v6166_v2  ;;  %v4790_v56 = vcvt.s32.f32 %v2870_v26  ;;  %7475 = vmatpush.bf16.msrb.mxu3 %v6230_v59  ;;  %v4798_v19 = vcvt.s32.f32 %v2878_v34  ;;  %v2550_v0 = vunpack.c.2.s8 %v1478_v43  ;;  %v2558_v61 = vunpack.c.3.s8 %v1478_v43 }
 0x387   :  { %v6070_v13 = vpack.c.bf16 %v4622_v47, %v4614_v17  ;;  %7440 = vmatpush.bf16.msra.mxu0 %v6006_v57  ;;  %v4918_v41 = vcvt.s32.f32 %v2998_v16  ;;  %v4926_v11 = vcvt.s32.f32 %v3006_v4  ;;  %v2678_v6 = vunpack.c.2.s8 %v1510_v44 }
 0x388   :  { %v2686_v48 = vunpack.c.3.s8 %v1510_v44  ;;  %v6158_v23 = vpack.c.bf16 %v4798_v19, %v4790_v56  ;;  %v4470_v29 = vcvt.s32.f32 %v2550_v0  ;;  %v4478_v28 = vcvt.s32.f32 %v2558_v61  ;;  %v1550_v56 = vld [vmem:[%s12559_s1 + $0x860] sm:$0xff] }
 0x389   :  { %7453 = vmatpush.bf16.msra.mxu1 %v6070_v13  ;;  %v2854_v50 = vunpack.c.0.s8 %v1558_v10  ;;  %v6222_v5 = vpack.c.bf16 %v4926_v11, %v4918_v41  ;;  %v4598_v21 = vcvt.s32.f32 %v2678_v6  ;;  %v2862_v39 = vunpack.c.1.s8 %v1558_v10 }
 0x38a   :  { %v4606_v33 = vcvt.s32.f32 %v2686_v48  ;;  %7463 = vmatpush.bf16.msra.mxu2 %v6158_v23  ;;  %v5998_v20 = vpack.c.bf16 %v4478_v28, %v4470_v29  ;;  %v2982_v52 = vunpack.c.0.s8 %v1590_v31  ;;  %v2990_v40 = vunpack.c.1.s8 %v1590_v31  ;;  %v1662_v31 = vld [vmem:[%s12559_s1 + $0xbe0] sm:$0xff] }
 0x38b   :  { %v4774_v12 = vcvt.s32.f32 %v2854_v50  ;;  %7476 = vmatpush.bf16.msrb.mxu3 %v6222_v5  ;;  %v4782_v14 = vcvt.s32.f32 %v2862_v39  ;;  %v2534_v2 = vunpack.c.0.s8 %v1478_v43  ;;  %v2542_v62 = vunpack.c.1.s8 %v1478_v43 }
 0x38c   :  { %v6062_v1 = vpack.c.bf16 %v4606_v33, %v4598_v21  ;;  %7441 = vmatpush.bf16.msra.mxu0 %v5998_v20  ;;  %v4902_v8 = vcvt.s32.f32 %v2982_v52  ;;  %v4910_v10 = vcvt.s32.f32 %v2990_v40  ;;  %v2662_v26 = vunpack.c.0.s8 %v1510_v44 }
 0x38d   :  { %v2670_v59 = vunpack.c.1.s8 %v1510_v44  ;;  %v6150_v17 = vpack.c.bf16 %v4782_v14, %v4774_v12  ;;  %v4454_v47 = vcvt.s32.f32 %v2534_v2  ;;  %v4462_v34 = vcvt.s32.f32 %v2542_v62  ;;  %v1582_v44 = vld [vmem:[%s12559_s1 + $0x960] sm:$0xff] }
 0x38e   :  { %7454 = vmatpush.bf16.msra.mxu1 %v6062_v1  ;;  %v3158_v57 = vunpack.c.2.s8 %v11539_v18  ;;  %v6214_v43 = vpack.c.bf16 %v4910_v10, %v4902_v8  ;;  %v4582_v16 = vcvt.s32.f32 %v2662_v26  ;;  %v3166_v13 = vunpack.c.3.s8 %v11539_v18  ;;  %v1622_v62 = vld [vmem:[%s12559_s1 + $0xaa0] sm:$0xff] }
 0x38f   :  { %v4590_v4 = vcvt.s32.f32 %v2670_v59  ;;  %7464 = vmatpush.bf16.msra.mxu2 %v6150_v17  ;;  %v5990_v19 = vpack.c.bf16 %v4462_v34, %v4454_v47  ;;  %v3286_v61 = vunpack.c.2.s8 %v1662_v31  ;;  %v3294_v41 = vunpack.c.3.s8 %v1662_v31 }
 0x390   :  { %v5078_v0 = vcvt.s32.f32 %v3158_v57  ;;  %7477 = vmatpush.bf16.msrb.mxu3 %v6214_v43  ;;  %v5086_v6 = vcvt.s32.f32 %v3166_v13  ;;  %v2838_v48 = vunpack.c.2.s8 %v1550_v56  ;;  %v2846_v23 = vunpack.c.3.s8 %v1550_v56 }
 0x391   :  { %v6054_v11 = vpack.c.bf16 %v4590_v4, %v4582_v16  ;;  %7442 = vmatpush.bf16.msra.mxu0 %v5990_v19  ;;  %v5206_v29 = vcvt.s32.f32 %v3286_v61  ;;  %v5214_v28 = vcvt.s32.f32 %v3294_v41  ;;  %v2966_v50 = vunpack.c.2.s8 %v1582_v44 }
 0x392   :  { %v2974_v5 = vunpack.c.3.s8 %v1582_v44  ;;  %v6302_v21 = vpack.c.bf16 %v5086_v6, %v5078_v0  ;;  %v4758_v33 = vcvt.s32.f32 %v2838_v48  ;;  %v4766_v39 = vcvt.s32.f32 %v2846_v23 }
 0x393   :  { %7455 = vmatpush.bf16.msra.mxu1 %v6054_v11  ;;  %v7211_v20 = vadd.f32 %v11505_v9, %v11500_v35  ;;  %v6366_v12 = vpack.c.bf16 %v5214_v28, %v5206_v29  ;;  %v4886_v52 = vcvt.s32.f32 %v2966_v50  ;;  %v3142_v38 = vunpack.c.0.s8 %v11539_v18 }
 0x394   :  { %v4894_v40 = vcvt.s32.f32 %v2974_v5  ;;  %v6142_v53 = vpack.c.bf16 %v4766_v39, %v4758_v33  ;;  %v3150_v14 = vunpack.c.1.s8 %v11539_v18  ;;  %v3270_v2 = vunpack.c.0.s8 %v1662_v31  ;;  %7443 = vmatmul.bf16.vlgmr.msra.gmra.mxu0 %v10260_v49  ;;  %v1654_v18 = vld [vmem:[%s12559_s1 + $0xba0] sm:$0xff] }
 0x395   :  { %7487 = vmatpush.bf16.msrb.mxu0 %v6302_v21  ;;  %v7224_v1 = vadd.f32 %v11507_v24, %v7211_v20  ;;  %v5062_v35 = vcvt.s32.f32 %v3142_v38  ;;  %v3278_v9 = vunpack.c.1.s8 %v1662_v31  ;;  %v2822_v10 = vunpack.c.0.s8 %v1550_v56  ;;  %v1542_v31 = vld [vmem:[%s12559_s1 + $0x820] sm:$0xff] }
 0x396   :  { %v6206_v8 = vpack.c.bf16 %v4894_v40, %v4886_v52  ;;  %7465 = vmatpush.bf16.msra.mxu2 %v6142_v53  ;;  %7456 = vmatmul.bf16.vlgmr.msra.gmra.mxu1 %v10318_v45  ;;  %v5070_v26 = vcvt.s32.f32 %v3150_v14  ;;  %v5190_v59 = vcvt.s32.f32 %v3270_v2  ;;  %v2830_v24 = vunpack.c.1.s8 %v1550_v56  ;;  %v1574_v56 = vld [vmem:[%s12559_s1 + $0x920] sm:$0xff] }
 0x397   :  { %7500 = vmatpush.bf16.msrb.mxu1 %v6366_v12  ;;  %v2950_v17 = vunpack.c.0.s8 %v1582_v44  ;;  %v5198_v47 = vcvt.s32.f32 %v3278_v9  ;;  %v4742_v34 = vcvt.s32.f32 %v2822_v10  ;;  %v2958_v57 = vunpack.c.1.s8 %v1582_v44 }
 0x398   :  { %7478 = vmatpush.bf16.msrb.mxu3 %v6206_v8  ;;  %v3126_v43 = vunpack.c.2.s8 %v1622_v62  ;;  %v6294_v16 = vpack.c.bf16 %v5070_v26, %v5062_v35  ;;  %v4750_v4 = vcvt.s32.f32 %v2830_v24  ;;  %v3134_v19 = vunpack.c.3.s8 %v1622_v62 }
 0x399   :  { %v4870_v13 = vcvt.s32.f32 %v2950_v17  ;;  %v6358_v0 = vpack.c.bf16 %v5198_v47, %v5190_v59  ;;  %v4878_v61 = vcvt.s32.f32 %v2958_v57  ;;  %v3254_v11 = vunpack.c.2.s8 %v1654_v18  ;;  %v1694_v59 = vld [vmem:[%s12559_s1 + $0xce0] sm:$0xff]  ;;  %v11578_v47 = vpop.f32.mrf.mxu2 }
 0x39a   :  { %v5046_v41 = vcvt.s32.f32 %v3126_v43  ;;  %7488 = vmatpush.bf16.msrb.mxu0 %v6294_v16  ;;  %v6134_v6 = vpack.c.bf16 %v4750_v4, %v4742_v34  ;;  %v5054_v44 = vcvt.s32.f32 %v3134_v19  ;;  %v3262_v48 = vunpack.c.3.s8 %v1654_v18  ;;  %v11580_v34 = vpop.f32.mrf.mxu3 }
 0x39b   :  { %v2806_v23 = vunpack.c.2.s8 %v1542_v31  ;;  %7501 = vmatpush.bf16.msrb.mxu1 %v6358_v0  ;;  %v6198_v29 = vpack.c.bf16 %v4878_v61, %v4870_v13  ;;  %v5174_v28 = vcvt.s32.f32 %v3254_v11  ;;  %v2814_v50 = vunpack.c.3.s8 %v1542_v31  ;;  %v1614_v0 = vld [vmem:[%s12559_s1 + $0xa60] sm:$0xff] }
 0x39c   :  { %v2934_v5 = vunpack.c.2.s8 %v1574_v56  ;;  %7466 = vmatpush.bf16.msra.mxu2 %v6134_v6  ;;  %v6286_v21 = vpack.c.bf16 %v5054_v44, %v5046_v41  ;;  %v5182_v33 = vcvt.s32.f32 %v3262_v48  ;;  %v2942_v20 = vunpack.c.3.s8 %v1574_v56 }
 0x39d   :  { %v4726_v39 = vcvt.s32.f32 %v2806_v23  ;;  %7479 = vmatpush.bf16.msrb.mxu3 %v6198_v29  ;;  %v4734_v12 = vcvt.s32.f32 %v2814_v50  ;;  %v7237_v40 = vadd.f32 %v11526_v7, %v7224_v1  ;;  %v3110_v38 = vunpack.c.0.s8 %v1622_v62 }
 0x39e   :  { %v4854_v52 = vcvt.s32.f32 %v2934_v5  ;;  %7489 = vmatpush.bf16.msrb.mxu0 %v6286_v21  ;;  %v6350_v53 = vpack.c.bf16 %v5182_v33, %v5174_v28  ;;  %v4862_v14 = vcvt.s32.f32 %v2942_v20  ;;  %v3118_v2 = vunpack.c.1.s8 %v1622_v62 }
 0x39f   :  { %v3238_v8 = vunpack.c.0.s8 %v1654_v18  ;;  %v6126_v35 = vpack.c.bf16 %v4734_v12, %v4726_v39  ;;  %v11573_v9 = vadd.f32 %v11528_v63, %v7237_v40  ;;  %v5030_v10 = vcvt.s32.f32 %v3110_v38 }
 0x3a0   :  { %v3246_v26 = vunpack.c.1.s8 %v1654_v18  ;;  %7502 = vmatpush.bf16.msrb.mxu1 %v6350_v53  ;;  %v6190_v24 = vpack.c.bf16 %v4862_v14, %v4854_v52  ;;  %v5038_v17 = vcvt.s32.f32 %v3118_v2  ;;  %v2790_v1 = vunpack.c.0.s8 %v1542_v31  ;;  %v1726_v18 = vld [vmem:[%s12559_s1 + $0xde0] sm:$0xff] }
 0x3a1   :  { %v5158_v7 = vcvt.s32.f32 %v3238_v8  ;;  %7467 = vmatpush.bf16.msra.mxu2 %v6126_v35  ;;  %v2798_v57 = vunpack.c.1.s8 %v1542_v31  ;;  %v2918_v63 = vunpack.c.0.s8 %v1574_v56  ;;  %v2926_v43 = vunpack.c.1.s8 %v1574_v56  ;;  %v1646_v31 = vld [vmem:[%s12559_s1 + $0xb60] sm:$0xff]  ;;  %v7264_v35 = vpop.f32.mrf.mxu2 }
 0x3a2   :  { %v5166_v62 = vcvt.s32.f32 %v3246_v26  ;;  %7480 = vmatpush.bf16.msrb.mxu3 %v6190_v24  ;;  %v6278_v16 = vpack.c.bf16 %v5038_v17, %v5030_v10  ;;  %v4710_v4 = vcvt.s32.f32 %v2790_v1  ;;  %v3414_v13 = vunpack.c.2.s8 %v1694_v59  ;;  %v7277_v10 = vpop.f32.mrf.mxu3  ;;  %v1686_v1 = vld [vmem:[%s12559_s1 + $0xca0] sm:$0xff] }
 0x3a3   :  { %v3422_v19 = vunpack.c.3.s8 %v1694_v59  ;;  %v4718_v41 = vcvt.s32.f32 %v2798_v57  ;;  %v4838_v11 = vcvt.s32.f32 %v2918_v63  ;;  %v4846_v6 = vcvt.s32.f32 %v2926_v43 }
 0x3a4   :  { %v6342_v61 = vpack.c.bf16 %v5166_v62, %v5158_v7  ;;  %7490 = vmatpush.bf16.msrb.mxu0 %v6278_v16  ;;  %v5334_v56 = vcvt.s32.f32 %v3414_v13  ;;  %v3542_v48 = vunpack.c.2.s8 %v1726_v18  ;;  %v3550_v23 = vunpack.c.3.s8 %v1726_v18 }
 0x3a5   :  { %v5342_v44 = vcvt.s32.f32 %v3422_v19  ;;  %v6118_v29 = vpack.c.bf16 %v4718_v41, %v4710_v4  ;;  %v6182_v28 = vpack.c.bf16 %v4846_v6, %v4838_v11  ;;  %v3094_v50 = vunpack.c.2.s8 %v1614_v0  ;;  %v11599_v19 = vpop.f32.mrf.mxu0 }
 0x3a6   :  { %7503 = vmatpush.bf16.msrb.mxu1 %v6342_v61  ;;  %v3102_v5 = vunpack.c.3.s8 %v1614_v0  ;;  %v5462_v33 = vcvt.s32.f32 %v3542_v48  ;;  %v5470_v39 = vcvt.s32.f32 %v3550_v23  ;;  %v3222_v20 = vunpack.c.2.s8 %v1646_v31  ;;  %v11601_v61 = vpop.f32.mrf.mxu1 }
 0x3a7   :  { %v6430_v21 = vpack.c.bf16 %v5342_v44, %v5334_v56  ;;  %7468 = vmatpush.bf16.msra.mxu2 %v6118_v29  ;;  %7481 = vmatpush.bf16.msrb.mxu3 %v6182_v28  ;;  %v5014_v12 = vcvt.s32.f32 %v3094_v50  ;;  %v3230_v40 = vunpack.c.3.s8 %v1646_v31  ;;  %v3398_v38 = vunpack.c.0.s8 %v1694_v59  ;;  %v1638_v29 = vld [vmem:[%s12559_s1 + $0xb20] sm:$0xff] }
 0x3a8   :  { %v5022_v52 = vcvt.s32.f32 %v3102_v5  ;;  %v6494_v53 = vpack.c.bf16 %v5470_v39, %v5462_v33  ;;  %v5142_v14 = vcvt.s32.f32 %v3222_v20  ;;  %v3406_v2 = vunpack.c.1.s8 %v1694_v59 }
 0x3a9   :  { %v3526_v8 = vunpack.c.0.s8 %v1726_v18  ;;  %v5150_v24 = vcvt.s32.f32 %v3230_v40  ;;  %v5318_v17 = vcvt.s32.f32 %v3398_v38  ;;  %v3534_v7 = vunpack.c.1.s8 %v1726_v18  ;;  %v1718_v18 = vld [vmem:[%s12559_s1 + $0xda0] sm:$0xff] }
 0x3aa   :  { %v6270_v26 = vpack.c.bf16 %v5022_v52, %v5014_v12  ;;  %7469 = vmatmul.bf16.vlgmr.msra.gmra.mxu2 %v10505_v15  ;;  %v5326_v62 = vcvt.s32.f32 %v3406_v2  ;;  %v3078_v63 = vunpack.c.0.s8 %v1614_v0  ;;  %v3086_v43 = vunpack.c.1.s8 %v1614_v0  ;;  %7482 = vmatmul.bf16.vlgmr.msrb.gmra.mxu3 %v10510_v36  ;;  %v1606_v0 = vld [vmem:[%s12559_s1 + $0xa20] sm:$0xff] }
 0x3ab   :  { %7513 = vmatpush.bf16.msrb.mxu2 %v6430_v21  ;;  %7526 = vmatpush.bf16.msra.mxu3 %v6494_v53  ;;  %v5446_v57 = vcvt.s32.f32 %v3526_v8  ;;  %v6334_v59 = vpack.c.bf16 %v5150_v24, %v5142_v14  ;;  %v5454_v16 = vcvt.s32.f32 %v3534_v7  ;;  %v3206_v4 = vunpack.c.0.s8 %v1646_v31 }
 0x3ac   :  { %7491 = vmatpush.bf16.msrb.mxu0 %v6270_v26  ;;  %v3214_v13 = vunpack.c.1.s8 %v1646_v31  ;;  %v6422_v41 = vpack.c.bf16 %v5326_v62, %v5318_v17  ;;  %v4998_v11 = vcvt.s32.f32 %v3078_v63  ;;  %v5006_v6 = vcvt.s32.f32 %v3086_v43  ;;  %v11612_v43 = vld [vmem:[%s12559_s1 + $0xee0] sm:$0xff] }
 0x3ad   :  { %v3382_v56 = vunpack.c.2.s8 %v1686_v1  ;;  %7504 = vmatpush.bf16.msrb.mxu1 %v6334_v59  ;;  %v6486_v44 = vpack.c.bf16 %v5454_v16, %v5446_v57  ;;  %v5126_v48 = vcvt.s32.f32 %v3206_v4  ;;  %v3390_v23 = vunpack.c.3.s8 %v1686_v1  ;;  %v7290_v59 = vpop.f32.mrf.mxu0 }
 0x3ae   :  { %v5134_v31 = vcvt.s32.f32 %v3214_v13  ;;  %v6262_v28 = vpack.c.bf16 %v5006_v6, %v4998_v11  ;;  %v3510_v5 = vunpack.c.2.s8 %v1718_v18  ;;  %v3518_v21 = vunpack.c.3.s8 %v1718_v18  ;;  %v7303_v16 = vpop.f32.mrf.mxu1 }
 0x3af   :  { %7514 = vmatpush.bf16.msrb.mxu2 %v6422_v41  ;;  %v5302_v50 = vcvt.s32.f32 %v3382_v56  ;;  %7527 = vmatpush.bf16.msra.mxu3 %v6486_v44  ;;  %v5310_v39 = vcvt.s32.f32 %v3390_v23  ;;  %v3062_v20 = vunpack.c.2.s8 %v1606_v0  ;;  %v3070_v12 = vunpack.c.3.s8 %v1606_v0 }
 0x3b0   :  { %v6326_v33 = vpack.c.bf16 %v5134_v31, %v5126_v48  ;;  %7492 = vmatpush.bf16.msrb.mxu0 %v6262_v28  ;;  %v5430_v52 = vcvt.s32.f32 %v3510_v5  ;;  %v5438_v40 = vcvt.s32.f32 %v3518_v21  ;;  %v3190_v38 = vunpack.c.2.s8 %v1638_v29 }
 0x3b1   :  { %v3198_v53 = vunpack.c.3.s8 %v1638_v29  ;;  %v6414_v14 = vpack.c.bf16 %v5310_v39, %v5302_v50  ;;  %v4982_v2 = vcvt.s32.f32 %v3062_v20  ;;  %v4990_v8 = vcvt.s32.f32 %v3070_v12  ;;  %v1678_v50 = vld [vmem:[%s12559_s1 + $0xc60] sm:$0xff] }
 0x3b2   :  { %7505 = vmatpush.bf16.msrb.mxu1 %v6326_v33  ;;  %v3366_v35 = vunpack.c.0.s8 %v1686_v1  ;;  %v6478_v10 = vpack.c.bf16 %v5438_v40, %v5430_v52  ;;  %v5110_v26 = vcvt.s32.f32 %v3190_v38  ;;  %v3374_v17 = vunpack.c.1.s8 %v1686_v1 }
 0x3b3   :  { %v5118_v24 = vcvt.s32.f32 %v3198_v53  ;;  %7515 = vmatpush.bf16.msrb.mxu2 %v6414_v14  ;;  %v6254_v7 = vpack.c.bf16 %v4990_v8, %v4982_v2  ;;  %v3494_v57 = vunpack.c.0.s8 %v1718_v18  ;;  %v3502_v63 = vunpack.c.1.s8 %v1718_v18  ;;  %v1311_v18 = vld [vmem:[%s12559_s1 + $0xe8] sm:$0xff] }
 0x3b4   :  { %v5286_v62 = vcvt.s32.f32 %v3366_v35  ;;  %7528 = vmatpush.bf16.msra.mxu3 %v6478_v10  ;;  %v5294_v13 = vcvt.s32.f32 %v3374_v17  ;;  %v3046_v41 = vunpack.c.0.s8 %v1606_v0  ;;  %v3054_v11 = vunpack.c.1.s8 %v1606_v0 }
 0x3b5   :  { %v6318_v4 = vpack.c.bf16 %v5118_v24, %v5110_v26  ;;  %7493 = vmatpush.bf16.msrb.mxu0 %v6254_v7  ;;  %v5414_v6 = vcvt.s32.f32 %v3494_v57  ;;  %v5422_v1 = vcvt.s32.f32 %v3502_v63  ;;  %v3174_v56 = vunpack.c.0.s8 %v1638_v29 }
 0x3b6   :  { %v3182_v44 = vunpack.c.1.s8 %v1638_v29  ;;  %v6406_v48 = vpack.c.bf16 %v5294_v13, %v5286_v62  ;;  %v4966_v31 = vcvt.s32.f32 %v3046_v41  ;;  %v4974_v23 = vcvt.s32.f32 %v3054_v11  ;;  %v1710_v29 = vld [vmem:[%s12559_s1 + $0xd60] sm:$0xff] }
 0x3b7   :  { %7506 = vmatpush.bf16.msrb.mxu1 %v6318_v4  ;;  %v3670_v28 = vunpack.c.2.s8 %v11612_v43  ;;  %v6470_v0 = vpack.c.bf16 %v5422_v1, %v5414_v6  ;;  %v5094_v5 = vcvt.s32.f32 %v3174_v56  ;;  %v3678_v33 = vunpack.c.3.s8 %v11612_v43  ;;  %v1750_v11 = vld [vmem:[%s12559_s1 + $0xea0] sm:$0xff] }
 0x3b8   :  { %v5102_v21 = vcvt.s32.f32 %v3182_v44  ;;  %7516 = vmatpush.bf16.msrb.mxu2 %v6406_v48  ;;  %v6246_v39 = vpack.c.bf16 %v4974_v23, %v4966_v31  ;;  %v1879_v12 = vunpack.c.2.s8 %v1311_v18  ;;  %v1887_v52 = vunpack.c.3.s8 %v1311_v18 }
 0x3b9   :  { %v5590_v20 = vcvt.s32.f32 %v3670_v28  ;;  %7529 = vmatpush.bf16.msra.mxu3 %v6470_v0  ;;  %v5598_v38 = vcvt.s32.f32 %v3678_v33  ;;  %v3350_v53 = vunpack.c.2.s8 %v1678_v50  ;;  %v3358_v14 = vunpack.c.3.s8 %v1678_v50 }
 0x3ba   :  { %v6310_v40 = vpack.c.bf16 %v5102_v21, %v5094_v5  ;;  %7494 = vmatpush.bf16.msrb.mxu0 %v6246_v39  ;;  %v3799_v2 = vcvt.s32.f32 %v1879_v12  ;;  %v3807_v8 = vcvt.s32.f32 %v1887_v52  ;;  %v3478_v35 = vunpack.c.2.s8 %v1710_v29 }
 0x3bb   :  { %v3486_v10 = vunpack.c.3.s8 %v1710_v29  ;;  %v6558_v26 = vpack.c.bf16 %v5598_v38, %v5590_v20  ;;  %v5270_v24 = vcvt.s32.f32 %v3350_v53  ;;  %v5278_v17 = vcvt.s32.f32 %v3358_v14 }
 0x3bc   :  { %7507 = vmatpush.bf16.msrb.mxu1 %v6310_v40  ;;  %v7263_v7 = vadd.f32 %v11578_v47, %v11573_v9  ;;  %v5663_v62 = vpack.c.bf16 %v3807_v8, %v3799_v2  ;;  %v5398_v57 = vcvt.s32.f32 %v3478_v35  ;;  %v3654_v59 = vunpack.c.0.s8 %v11612_v43 }
 0x3bd   :  { %v5406_v63 = vcvt.s32.f32 %v3486_v10  ;;  %v6398_v16 = vpack.c.bf16 %v5278_v17, %v5270_v24  ;;  %v3662_v13 = vunpack.c.1.s8 %v11612_v43  ;;  %v1863_v41 = vunpack.c.0.s8 %v1311_v18  ;;  %7495 = vmatmul.bf16.vlgmr.msrb.gmra.mxu0 %v10545_v22  ;;  %v1303_v43 = vld [vmem:[%s12559_s1 + $0xa8] sm:$0xff] }
 0x3be   :  { %7539 = vmatpush.bf16.msra.mxu0 %v6558_v26  ;;  %v7276_v4 = vadd.f32 %v11580_v34, %v7263_v7  ;;  %v5574_v9 = vcvt.s32.f32 %v3654_v59  ;;  %v1871_v47 = vunpack.c.1.s8 %v1311_v18  ;;  %v3334_v1 = vunpack.c.0.s8 %v1678_v50  ;;  %v1670_v18 = vld [vmem:[%s12559_s1 + $0xc20] sm:$0xff] }
 0x3bf   :  { %v6462_v6 = vpack.c.bf16 %v5406_v63, %v5398_v57  ;;  %7517 = vmatpush.bf16.msrb.mxu2 %v6398_v16  ;;  %7508 = vmatmul.bf16.vlgmr.msrb.gmra.mxu1 %v10564_v30  ;;  %v5582_v56 = vcvt.s32.f32 %v3662_v13  ;;  %v3783_v44 = vcvt.s32.f32 %v1863_v41  ;;  %v3342_v34 = vunpack.c.1.s8 %v1678_v50  ;;  %v1702_v50 = vld [vmem:[%s12559_s1 + $0xd20] sm:$0xff] }
 0x3c0   :  { %7552 = vmatpush.bf16.msra.mxu1 %v5663_v62  ;;  %v3462_v48 = vunpack.c.0.s8 %v1710_v29  ;;  %v3791_v31 = vcvt.s32.f32 %v1871_v47  ;;  %v5254_v23 = vcvt.s32.f32 %v3334_v1  ;;  %v3470_v28 = vunpack.c.1.s8 %v1710_v29 }
 0x3c1   :  { %7530 = vmatpush.bf16.msra.mxu3 %v6462_v6  ;;  %v3638_v0 = vunpack.c.2.s8 %v1750_v11  ;;  %v6550_v5 = vpack.c.bf16 %v5582_v56, %v5574_v9  ;;  %v5262_v21 = vcvt.s32.f32 %v3342_v34  ;;  %v3646_v39 = vunpack.c.3.s8 %v1750_v11 }
 0x3c2   :  { %v5382_v33 = vcvt.s32.f32 %v3462_v48  ;;  %v5655_v20 = vpack.c.bf16 %v3791_v31, %v3783_v44  ;;  %v5390_v12 = vcvt.s32.f32 %v3470_v28  ;;  %v1847_v40 = vunpack.c.2.s8 %v1303_v43  ;;  %v1343_v44 = vld [vmem:[%s12559_s1 + $0x1e8] sm:$0xff]  ;;  %v11651_v31 = vpop.f32.mrf.mxu2 }
 0x3c3   :  { %v5558_v52 = vcvt.s32.f32 %v3638_v0  ;;  %7540 = vmatpush.bf16.msra.mxu0 %v6550_v5  ;;  %v6390_v38 = vpack.c.bf16 %v5262_v21, %v5254_v23  ;;  %v5566_v29 = vcvt.s32.f32 %v3646_v39  ;;  %v1855_v53 = vunpack.c.3.s8 %v1303_v43  ;;  %v11653_v23 = vpop.f32.mrf.mxu3 }
 0x3c4   :  { %v3318_v14 = vunpack.c.2.s8 %v1670_v18  ;;  %7553 = vmatpush.bf16.msra.mxu1 %v5655_v20  ;;  %v6454_v2 = vpack.c.bf16 %v5390_v12, %v5382_v33  ;;  %v3767_v8 = vcvt.s32.f32 %v1847_v40  ;;  %v3326_v35 = vunpack.c.3.s8 %v1670_v18  ;;  %v1742_v20 = vld [vmem:[%s12559_s1 + $0xe60] sm:$0xff] }
 0x3c5   :  { %v3446_v10 = vunpack.c.2.s8 %v1702_v50  ;;  %7518 = vmatpush.bf16.msrb.mxu2 %v6390_v38  ;;  %v6542_v26 = vpack.c.bf16 %v5566_v29, %v5558_v52  ;;  %v3775_v24 = vcvt.s32.f32 %v1855_v53  ;;  %v3454_v7 = vunpack.c.3.s8 %v1702_v50 }
 0x3c6   :  { %v5238_v17 = vcvt.s32.f32 %v3318_v14  ;;  %7531 = vmatpush.bf16.msra.mxu3 %v6454_v2  ;;  %v5246_v62 = vcvt.s32.f32 %v3326_v35  ;;  %v7289_v63 = vadd.f32 %v11599_v19, %v7276_v4  ;;  %v3622_v59 = vunpack.c.0.s8 %v1750_v11 }
 0x3c7   :  { %v5366_v57 = vcvt.s32.f32 %v3446_v10  ;;  %7541 = vmatpush.bf16.msra.mxu0 %v6542_v26  ;;  %v5647_v16 = vpack.c.bf16 %v3775_v24, %v3767_v8  ;;  %v5374_v13 = vcvt.s32.f32 %v3454_v7  ;;  %v3630_v41 = vunpack.c.1.s8 %v1750_v11 }
 0x3c8   :  { %v1831_v6 = vunpack.c.0.s8 %v1303_v43  ;;  %v6382_v9 = vpack.c.bf16 %v5246_v62, %v5238_v17  ;;  %v11646_v47 = vadd.f32 %v11601_v61, %v7289_v63  ;;  %v5542_v1 = vcvt.s32.f32 %v3622_v59 }
 0x3c9   :  { %v1839_v56 = vunpack.c.1.s8 %v1303_v43  ;;  %7554 = vmatpush.bf16.msra.mxu1 %v5647_v16  ;;  %v6446_v34 = vpack.c.bf16 %v5374_v13, %v5366_v57  ;;  %v5550_v48 = vcvt.s32.f32 %v3630_v41  ;;  %v3302_v4 = vunpack.c.0.s8 %v1670_v18  ;;  %v1375_v43 = vld [vmem:[%s12559_s1 + $0x2e8] sm:$0xff] }
 0x3ca   :  { %v3751_v19 = vcvt.s32.f32 %v1831_v6  ;;  %7519 = vmatpush.bf16.msrb.mxu2 %v6382_v9  ;;  %v3310_v28 = vunpack.c.1.s8 %v1670_v18  ;;  %v3430_v61 = vunpack.c.0.s8 %v1702_v50  ;;  %v3438_v0 = vunpack.c.1.s8 %v1702_v50  ;;  %v1295_v18 = vld [vmem:[%s12559_s1 + $0x68] sm:$0xff]  ;;  %v7316_v9 = vpop.f32.mrf.mxu2 }
 0x3cb   :  { %v3759_v11 = vcvt.s32.f32 %v1839_v56  ;;  %7532 = vmatpush.bf16.msra.mxu3 %v6446_v34  ;;  %v6534_v5 = vpack.c.bf16 %v5550_v48, %v5542_v1  ;;  %v5222_v21 = vcvt.s32.f32 %v3302_v4  ;;  %v2007_v33 = vunpack.c.2.s8 %v1343_v44  ;;  %v7329_v1 = vpop.f32.mrf.mxu3  ;;  %v1335_v4 = vld [vmem:[%s12559_s1 + $0x1a8] sm:$0xff] }
 0x3cc   :  { %v2015_v39 = vunpack.c.3.s8 %v1343_v44  ;;  %v5230_v52 = vcvt.s32.f32 %v3310_v28  ;;  %v5350_v40 = vcvt.s32.f32 %v3430_v61  ;;  %v5358_v38 = vcvt.s32.f32 %v3438_v0 }
 0x3cd   :  { %v5639_v12 = vpack.c.bf16 %v3759_v11, %v3751_v19  ;;  %7542 = vmatpush.bf16.msra.mxu0 %v6534_v5  ;;  %v3927_v50 = vcvt.s32.f32 %v2007_v33  ;;  %v2135_v53 = vunpack.c.2.s8 %v1375_v43  ;;  %v2143_v14 = vunpack.c.3.s8 %v1375_v43 }
 0x3ce   :  { %v3935_v29 = vcvt.s32.f32 %v2015_v39  ;;  %v6374_v2 = vpack.c.bf16 %v5230_v52, %v5222_v21  ;;  %v6438_v8 = vpack.c.bf16 %v5358_v38, %v5350_v40  ;;  %v3606_v35 = vunpack.c.2.s8 %v1742_v20  ;;  %v11672_v39 = vpop.f32.mrf.mxu0 }
 0x3cf   :  { %7555 = vmatpush.bf16.msra.mxu1 %v5639_v12  ;;  %v3614_v10 = vunpack.c.3.s8 %v1742_v20  ;;  %v4055_v24 = vcvt.s32.f32 %v2135_v53  ;;  %v4063_v17 = vcvt.s32.f32 %v2143_v14  ;;  %v1815_v7 = vunpack.c.2.s8 %v1295_v18  ;;  %v11674_v12 = vpop.f32.mrf.mxu1 }
 0x3d0   :  { %v5727_v26 = vpack.c.bf16 %v3935_v29, %v3927_v50  ;;  %7520 = vmatpush.bf16.msrb.mxu2 %v6374_v2  ;;  %7533 = vmatpush.bf16.msra.mxu3 %v6438_v8  ;;  %v5526_v62 = vcvt.s32.f32 %v3606_v35  ;;  %v1823_v63 = vunpack.c.3.s8 %v1295_v18  ;;  %v1991_v59 = vunpack.c.0.s8 %v1343_v44  ;;  %v1287_v2 = vld [vmem:[%s12559_s1 + $0x28] sm:$0xff] }
 0x3d1   :  { %v5534_v57 = vcvt.s32.f32 %v3614_v10  ;;  %v5791_v16 = vpack.c.bf16 %v4063_v17, %v4055_v24  ;;  %v3735_v13 = vcvt.s32.f32 %v1815_v7  ;;  %v1999_v41 = vunpack.c.1.s8 %v1343_v44 }
 0x3d2   :  { %v2119_v6 = vunpack.c.0.s8 %v1375_v43  ;;  %v3743_v34 = vcvt.s32.f32 %v1823_v63  ;;  %v3911_v48 = vcvt.s32.f32 %v1991_v59  ;;  %v2127_v19 = vunpack.c.1.s8 %v1375_v43  ;;  %v1367_v43 = vld [vmem:[%s12559_s1 + $0x2a8] sm:$0xff] }
 0x3d3   :  { %v6526_v56 = vpack.c.bf16 %v5534_v57, %v5526_v62  ;;  %7521 = vmatmul.bf16.vlgmr.msrb.gmra.mxu2 %v10642_v37  ;;  %v3919_v11 = vcvt.s32.f32 %v1999_v41  ;;  %v3590_v61 = vunpack.c.0.s8 %v1742_v20  ;;  %v3598_v0 = vunpack.c.1.s8 %v1742_v20  ;;  %7534 = vmatmul.bf16.vlgmr.msra.gmra.mxu3 %v10644_v46  ;;  %v1734_v20 = vld [vmem:[%s12559_s1 + $0xe20] sm:$0xff] }
 0x3d4   :  { %7565 = vmatpush.bf16.msra.mxu2 %v5727_v26  ;;  %7578 = vmatpush.bf16.msrb.mxu3 %v5791_v16  ;;  %v4039_v28 = vcvt.s32.f32 %v2119_v6  ;;  %v5631_v44 = vpack.c.bf16 %v3743_v34, %v3735_v13  ;;  %v4047_v5 = vcvt.s32.f32 %v2127_v19  ;;  %v1799_v21 = vunpack.c.0.s8 %v1295_v18 }
 0x3d5   :  { %7543 = vmatpush.bf16.msra.mxu0 %v6526_v56  ;;  %v1807_v33 = vunpack.c.1.s8 %v1295_v18  ;;  %v5719_v52 = vpack.c.bf16 %v3919_v11, %v3911_v48  ;;  %v5510_v40 = vcvt.s32.f32 %v3590_v61  ;;  %v5518_v38 = vcvt.s32.f32 %v3598_v0  ;;  %v11685_v0 = vld [vmem:[%s12559_s1 + $0x3e8] sm:$0xff] }
 0x3d6   :  { %v1975_v50 = vunpack.c.2.s8 %v1335_v4  ;;  %7556 = vmatpush.bf16.msra.mxu1 %v5631_v44  ;;  %v5783_v29 = vpack.c.bf16 %v4047_v5, %v4039_v28  ;;  %v3719_v53 = vcvt.s32.f32 %v1799_v21  ;;  %v1983_v14 = vunpack.c.3.s8 %v1335_v4  ;;  %v7342_v44 = vpop.f32.mrf.mxu0 }
 0x3d7   :  { %v3727_v18 = vcvt.s32.f32 %v1807_v33  ;;  %v6518_v8 = vpack.c.bf16 %v5518_v38, %v5510_v40  ;;  %v2103_v10 = vunpack.c.2.s8 %v1367_v43  ;;  %v2111_v26 = vunpack.c.3.s8 %v1367_v43  ;;  %v7355_v5 = vpop.f32.mrf.mxu1 }
 0x3d8   :  { %7566 = vmatpush.bf16.msra.mxu2 %v5719_v52  ;;  %v3895_v35 = vcvt.s32.f32 %v1975_v50  ;;  %7579 = vmatpush.bf16.msrb.mxu3 %v5783_v29  ;;  %v3903_v17 = vcvt.s32.f32 %v1983_v14  ;;  %v3574_v7 = vunpack.c.2.s8 %v1734_v20  ;;  %v3582_v62 = vunpack.c.3.s8 %v1734_v20 }
 0x3d9   :  { %v5623_v24 = vpack.c.bf16 %v3727_v18, %v3719_v53  ;;  %7544 = vmatpush.bf16.msra.mxu0 %v6518_v8  ;;  %v4023_v57 = vcvt.s32.f32 %v2103_v10  ;;  %v4031_v63 = vcvt.s32.f32 %v2111_v26  ;;  %v1783_v59 = vunpack.c.2.s8 %v1287_v2 }
 0x3da   :  { %v1791_v16 = vunpack.c.3.s8 %v1287_v2  ;;  %v5711_v13 = vpack.c.bf16 %v3903_v17, %v3895_v35  ;;  %v5494_v41 = vcvt.s32.f32 %v3574_v7  ;;  %v5502_v6 = vcvt.s32.f32 %v3582_v62  ;;  %v1327_v35 = vld [vmem:[%s12559_s1 + $0x168] sm:$0xff] }
 0x3db   :  { %7557 = vmatpush.bf16.msra.mxu1 %v5623_v24  ;;  %v1959_v9 = vunpack.c.0.s8 %v1335_v4  ;;  %v5775_v1 = vpack.c.bf16 %v4031_v63, %v4023_v57  ;;  %v3703_v56 = vcvt.s32.f32 %v1783_v59  ;;  %v1967_v48 = vunpack.c.1.s8 %v1335_v4 }
 0x3dc   :  { %v3711_v34 = vcvt.s32.f32 %v1791_v16  ;;  %7567 = vmatpush.bf16.msra.mxu2 %v5711_v13  ;;  %v6510_v19 = vpack.c.bf16 %v5502_v6, %v5494_v41  ;;  %v2087_v28 = vunpack.c.0.s8 %v1367_v43  ;;  %v2095_v61 = vunpack.c.1.s8 %v1367_v43  ;;  %v1439_v43 = vld [vmem:[%s12559_s1 + $0x4e8] sm:$0xff] }
 0x3dd   :  { %v3879_v11 = vcvt.s32.f32 %v1959_v9  ;;  %7580 = vmatpush.bf16.msrb.mxu3 %v5775_v1  ;;  %v3887_v33 = vcvt.s32.f32 %v1967_v48  ;;  %v3558_v52 = vunpack.c.0.s8 %v1734_v20  ;;  %v3566_v40 = vunpack.c.1.s8 %v1734_v20 }
 0x3de   :  { %v5615_v21 = vpack.c.bf16 %v3711_v34, %v3703_v56  ;;  %7545 = vmatpush.bf16.msra.mxu0 %v6510_v19  ;;  %v4007_v38 = vcvt.s32.f32 %v2087_v28  ;;  %v4015_v4 = vcvt.s32.f32 %v2095_v61  ;;  %v1767_v50 = vunpack.c.0.s8 %v1287_v2 }
 0x3df   :  { %v1775_v29 = vunpack.c.1.s8 %v1287_v2  ;;  %v5703_v53 = vpack.c.bf16 %v3887_v33, %v3879_v11  ;;  %v5478_v18 = vcvt.s32.f32 %v3558_v52  ;;  %v5486_v14 = vcvt.s32.f32 %v3566_v40  ;;  %v1359_v2 = vld [vmem:[%s12559_s1 + $0x268] sm:$0xff] }
 0x3e0   :  { %7558 = vmatpush.bf16.msra.mxu1 %v5615_v21  ;;  %v2263_v8 = vunpack.c.2.s8 %v11685_v0  ;;  %v5767_v20 = vpack.c.bf16 %v4015_v4, %v4007_v38  ;;  %v3687_v10 = vcvt.s32.f32 %v1767_v50  ;;  %v2271_v24 = vunpack.c.3.s8 %v11685_v0  ;;  %v11706_v40 = vld [vmem:[%s12559_s1 + $0x3a8] sm:$0xff] }
 0x3e1   :  { %v3695_v26 = vcvt.s32.f32 %v1775_v29  ;;  %7568 = vmatpush.bf16.msra.mxu2 %v5703_v53  ;;  %v6502_v17 = vpack.c.bf16 %v5486_v14, %v5478_v18  ;;  %v2391_v62 = vunpack.c.2.s8 %v1439_v43  ;;  %v2399_v57 = vunpack.c.3.s8 %v1439_v43  ;;  %v1431_v53 = vld [vmem:[%s12559_s1 + $0x4a8] sm:$0xff] }
 0x3e2   :  { %v4183_v7 = vcvt.s32.f32 %v2263_v8  ;;  %7581 = vmatpush.bf16.msrb.mxu3 %v5767_v20  ;;  %v4191_v59 = vcvt.s32.f32 %v2271_v24  ;;  %v1943_v16 = vunpack.c.2.s8 %v1327_v35  ;;  %v1951_v13 = vunpack.c.3.s8 %v1327_v35 }
 0x3e3   :  { %v5607_v63 = vpack.c.bf16 %v3695_v26, %v3687_v10  ;;  %7546 = vmatpush.bf16.msra.mxu0 %v6502_v17  ;;  %v4311_v41 = vcvt.s32.f32 %v2391_v62  ;;  %v4319_v6 = vcvt.s32.f32 %v2399_v57  ;;  %v2071_v9 = vunpack.c.2.s8 %v1359_v2  ;;  %v1351_v17 = vld [vmem:[%s12559_s1 + $0x228] sm:$0xff] }
 0x3e4   :  { %v2079_v1 = vunpack.c.3.s8 %v1359_v2  ;;  %v5855_v56 = vpack.c.bf16 %v4191_v59, %v4183_v7  ;;  %v3863_v34 = vcvt.s32.f32 %v1943_v16  ;;  %v3871_v48 = vcvt.s32.f32 %v1951_v13 }
 0x3e5   :  { %7559 = vmatpush.bf16.msra.mxu1 %v5607_v63  ;;  %v7315_v19 = vadd.f32 %v11651_v31, %v11646_v47  ;;  %v5919_v11 = vpack.c.bf16 %v4319_v6, %v4311_v41  ;;  %v3991_v28 = vcvt.s32.f32 %v2071_v9  ;;  %v2247_v44 = vunpack.c.0.s8 %v11685_v0 }
 0x3e6   :  { %v3999_v61 = vcvt.s32.f32 %v2079_v1  ;;  %v5695_v5 = vpack.c.bf16 %v3871_v48, %v3863_v34  ;;  %v2255_v33 = vunpack.c.1.s8 %v11685_v0  ;;  %v2375_v52 = vunpack.c.0.s8 %v1439_v43  ;;  %7547 = vmatmul.bf16.vlgmr.msra.gmra.mxu0 %v10665_v60 }
 0x3e7   :  { %7591 = vmatpush.bf16.msrb.mxu0 %v5855_v56  ;;  %v7328_v21 = vadd.f32 %v11653_v23, %v7315_v19  ;;  %v4167_v47 = vcvt.s32.f32 %v2247_v44  ;;  %v2383_v31 = vunpack.c.1.s8 %v1439_v43  ;;  %v1927_v4 = vunpack.c.0.s8 %v1327_v35  ;;  %v1319_v43 = vld [vmem:[%s12559_s1 + $0x128] sm:$0xff] }
 0x3e8   :  { %v5759_v38 = vpack.c.bf16 %v3999_v61, %v3991_v28  ;;  %7569 = vmatpush.bf16.msra.mxu2 %v5695_v5  ;;  %7560 = vmatmul.bf16.vlgmr.msra.gmra.mxu1 %v12657_v32  ;;  %v4175_v50 = vcvt.s32.f32 %v2255_v33  ;;  %v4295_v23 = vcvt.s32.f32 %v2375_v52  ;;  %v1935_v29 = vunpack.c.1.s8 %v1327_v35 }
 0x3e9   :  { %7604 = vmatpush.bf16.msrb.mxu1 %v5919_v11  ;;  %v2055_v0 = vunpack.c.0.s8 %v1359_v2  ;;  %v4303_v18 = vcvt.s32.f32 %v2383_v31  ;;  %v3847_v14 = vcvt.s32.f32 %v1927_v4  ;;  %v2063_v8 = vunpack.c.1.s8 %v1359_v2 }
 0x3ea   :  { %7582 = vmatpush.bf16.msrb.mxu3 %v5759_v38  ;;  %v2231_v20 = vunpack.c.2.s8 %v11706_v40  ;;  %v5847_v10 = vpack.c.bf16 %v4175_v50, %v4167_v47  ;;  %v3855_v26 = vcvt.s32.f32 %v1935_v29  ;;  %v2239_v35 = vunpack.c.3.s8 %v11706_v40 }
 0x3eb   :  { %v3975_v24 = vcvt.s32.f32 %v2055_v0  ;;  %v5911_v7 = vpack.c.bf16 %v4303_v18, %v4295_v23  ;;  %v3983_v62 = vcvt.s32.f32 %v2063_v8  ;;  %v2359_v63 = vunpack.c.2.s8 %v1431_v53 }
 0x3ec   :  { %v4151_v57 = vcvt.s32.f32 %v2231_v20  ;;  %7592 = vmatpush.bf16.msrb.mxu0 %v5847_v10  ;;  %v5687_v2 = vpack.c.bf16 %v3855_v26, %v3847_v14  ;;  %v4159_v59 = vcvt.s32.f32 %v2239_v35  ;;  %v2367_v16 = vunpack.c.3.s8 %v1431_v53  ;;  %v11733_v10 = vpop.f32.mrf.mxu2 }
 0x3ed   :  { %v1911_v13 = vunpack.c.2.s8 %v1319_v43  ;;  %7605 = vmatpush.bf16.msrb.mxu1 %v5911_v7  ;;  %v5751_v41 = vpack.c.bf16 %v3983_v62, %v3975_v24  ;;  %v4279_v6 = vcvt.s32.f32 %v2359_v63  ;;  %v1919_v9 = vunpack.c.3.s8 %v1319_v43 }
 0x3ee   :  { %v2039_v1 = vunpack.c.2.s8 %v1351_v17  ;;  %7570 = vmatpush.bf16.msra.mxu2 %v5687_v2  ;;  %v5839_v56 = vpack.c.bf16 %v4159_v59, %v4151_v57  ;;  %v4287_v34 = vcvt.s32.f32 %v2367_v16  ;;  %v2047_v19 = vunpack.c.3.s8 %v1351_v17 }
 0x3ef   :  { %v3831_v48 = vcvt.s32.f32 %v1911_v13  ;;  %7583 = vmatpush.bf16.msrb.mxu3 %v5751_v41  ;;  %v3839_v11 = vcvt.s32.f32 %v1919_v9  ;;  %v7341_v61 = vadd.f32 %v11672_v39, %v7328_v21  ;;  %v2215_v33 = vunpack.c.0.s8 %v11706_v40  ;;  %v1471_v39 = vld [vmem:[%s12559_s1 + $0x5e8] sm:$0xff] }
 0x3f0   :  { %v3959_v28 = vcvt.s32.f32 %v2039_v1  ;;  %7593 = vmatpush.bf16.msrb.mxu0 %v5839_v56  ;;  %v5903_v44 = vpack.c.bf16 %v4287_v34, %v4279_v6  ;;  %v3967_v5 = vcvt.s32.f32 %v2047_v19  ;;  %v2223_v47 = vunpack.c.1.s8 %v11706_v40  ;;  %v1503_v40 = vld [vmem:[%s12559_s1 + $0x6e8] sm:$0xff] }
 0x3f1   :  { %v5679_v52 = vpack.c.bf16 %v3839_v11, %v3831_v48  ;;  %v11724_v38 = vadd.f32 %v11674_v12, %v7341_v61  ;;  %v2343_v31 = vunpack.c.0.s8 %v1431_v53  ;;  %v4135_v50 = vcvt.s32.f32 %v2215_v33 }
 0x3f2   :  { %7606 = vmatpush.bf16.msrb.mxu1 %v5903_v44  ;;  %v5743_v4 = vpack.c.bf16 %v3967_v5, %v3959_v28  ;;  %v2351_v23 = vunpack.c.1.s8 %v1431_v53  ;;  %v1895_v29 = vunpack.c.0.s8 %v1319_v43  ;;  %v4143_v21 = vcvt.s32.f32 %v2223_v47  ;;  %v11735_v53 = vpop.f32.mrf.mxu3 }
 0x3f3   :  { %7571 = vmatpush.bf16.msra.mxu2 %v5679_v52  ;;  %v4263_v0 = vcvt.s32.f32 %v2343_v31  ;;  %v1903_v18 = vunpack.c.1.s8 %v1319_v43  ;;  %v2023_v8 = vunpack.c.0.s8 %v1351_v17  ;;  %v2031_v20 = vunpack.c.1.s8 %v1351_v17  ;;  %v1391_v43 = vld [vmem:[%s12559_s1 + $0x368] sm:$0xff] }
 0x3f4   :  { %7584 = vmatpush.bf16.msrb.mxu3 %v5743_v4  ;;  %v4271_v14 = vcvt.s32.f32 %v2351_v23  ;;  %v3815_v12 = vcvt.s32.f32 %v1895_v29  ;;  %v5831_v26 = vpack.c.bf16 %v4143_v21, %v4135_v50  ;;  %v2519_v35 = vunpack.c.2.s8 %v1471_v39  ;;  %v1423_v17 = vld [vmem:[%s12559_s1 + $0x468] sm:$0xff]  ;;  %v7368_v29 = vpop.f32.mrf.mxu2 }
 0x3f5   :  { %v3823_v24 = vcvt.s32.f32 %v1903_v18  ;;  %v3943_v62 = vcvt.s32.f32 %v2023_v8  ;;  %v3951_v57 = vcvt.s32.f32 %v2031_v20  ;;  %v2527_v63 = vunpack.c.3.s8 %v1471_v39  ;;  %v1463_v23 = vld [vmem:[%s12559_s1 + $0x5a8] sm:$0xff] }
 0x3f6   :  { %v5895_v7 = vpack.c.bf16 %v4271_v14, %v4263_v0  ;;  %7594 = vmatpush.bf16.msrb.mxu0 %v5831_v26  ;;  %v4439_v59 = vcvt.s32.f32 %v2519_v35  ;;  %v2647_v16 = vunpack.c.2.s8 %v1503_v40  ;;  %v2655_v6 = vunpack.c.3.s8 %v1503_v40  ;;  %v11753_v35 = vpop.f32.mrf.mxu1 }
 0x3f7   :  { %v5671_v2 = vpack.c.bf16 %v3823_v24, %v3815_v12  ;;  %v5735_v13 = vpack.c.bf16 %v3951_v57, %v3943_v62  ;;  %v4447_v41 = vcvt.s32.f32 %v2527_v63  ;;  %v2199_v9 = vunpack.c.2.s8 %v1391_v43  ;;  %v11751_v24 = vpop.f32.mrf.mxu0 }
 0x3f8   :  { %7607 = vmatpush.bf16.msrb.mxu1 %v5895_v7  ;;  %v4567_v1 = vcvt.s32.f32 %v2647_v16  ;;  %v2207_v56 = vunpack.c.3.s8 %v1391_v43  ;;  %v2327_v34 = vunpack.c.2.s8 %v1423_v17  ;;  %v2335_v48 = vunpack.c.3.s8 %v1423_v17 }
 0x3f9   :  { %7572 = vmatpush.bf16.msra.mxu2 %v5671_v2  ;;  %7585 = vmatpush.bf16.msrb.mxu3 %v5735_v13  ;;  %v5983_v19 = vpack.c.bf16 %v4447_v41, %v4439_v59  ;;  %v4575_v11 = vcvt.s32.f32 %v2655_v6  ;;  %v4119_v28 = vcvt.s32.f32 %v2199_v9  ;;  %v2503_v61 = vunpack.c.0.s8 %v1471_v39  ;;  %v1383_v2 = vld [vmem:[%s12559_s1 + $0x328] sm:$0xff] }
 0x3fa   :  { %v4127_v44 = vcvt.s32.f32 %v2207_v56  ;;  %v4247_v5 = vcvt.s32.f32 %v2327_v34  ;;  %v4255_v33 = vcvt.s32.f32 %v2335_v48  ;;  %v2511_v52 = vunpack.c.1.s8 %v1471_v39  ;;  %v7381_v21 = vpop.f32.mrf.mxu3  ;;  %v1415_v41 = vld [vmem:[%s12559_s1 + $0x428] sm:$0xff] }
 0x3fb   :  { %v6047_v47 = vpack.c.bf16 %v4575_v11, %v4567_v1  ;;  %v4423_v31 = vcvt.s32.f32 %v2503_v61  ;;  %v2631_v4 = vunpack.c.0.s8 %v1503_v40  ;;  %v2639_v50 = vunpack.c.1.s8 %v1503_v40  ;;  %v1495_v40 = vld [vmem:[%s12559_s1 + $0x6a8] sm:$0xff] }
 0x3fc   :  { %7573 = vmatmul.bf16.vlgmr.msra.gmra.mxu2 %v12658_v27  ;;  %7586 = vmatmul.bf16.vlgmr.msrb.gmra.mxu3 %v12639_v25  ;;  %v5823_v0 = vpack.c.bf16 %v4127_v44, %v4119_v28  ;;  %v5887_v18 = vpack.c.bf16 %v4255_v33, %v4247_v5  ;;  %v4431_v14 = vcvt.s32.f32 %v2511_v52  ;;  %v2183_v12 = vunpack.c.0.s8 %v1391_v43 }
 0x3fd   :  { %7617 = vmatpush.bf16.msrb.mxu2 %v5983_v19  ;;  %7630 = vmatpush.bf16.msra.mxu3 %v6047_v47  ;;  %v4551_v39 = vcvt.s32.f32 %v2631_v4  ;;  %v4559_v8 = vcvt.s32.f32 %v2639_v50  ;;  %v2191_v20 = vunpack.c.1.s8 %v1391_v43  ;;  %v2311_v26 = vunpack.c.0.s8 %v1423_v17 }
 0x3fe   :  { %7595 = vmatpush.bf16.msrb.mxu0 %v5823_v0  ;;  %7608 = vmatpush.bf16.msrb.mxu1 %v5887_v18  ;;  %v5975_v7 = vpack.c.bf16 %v4431_v14, %v4423_v31  ;;  %v4103_v62 = vcvt.s32.f32 %v2183_v12  ;;  %v2319_v57 = vunpack.c.1.s8 %v1423_v17  ;;  %v2487_v63 = vunpack.c.2.s8 %v1463_v23 }
 0x3ff   :  { %v6039_v43 = vpack.c.bf16 %v4559_v8, %v4551_v39  ;;  %v4111_v59 = vcvt.s32.f32 %v2191_v20  ;;  %v4231_v16 = vcvt.s32.f32 %v2311_v26  ;;  %v2495_v13 = vunpack.c.3.s8 %v1463_v23  ;;  %v7394_v12 = vpop.f32.mrf.mxu0  ;;  %v7407_v39 = vpop.f32.mrf.mxu1 }
 0x400   :  { %v4239_v6 = vcvt.s32.f32 %v2319_v57  ;;  %v4407_v9 = vcvt.s32.f32 %v2487_v63  ;;  %v2615_v1 = vunpack.c.2.s8 %v1495_v40  ;;  %v2623_v56 = vunpack.c.3.s8 %v1495_v40 }
 0x401   :  { %7618 = vmatpush.bf16.msrb.mxu2 %v5975_v7  ;;  %7631 = vmatpush.bf16.msra.mxu3 %v6039_v43  ;;  %v5815_v17 = vpack.c.bf16 %v4111_v59, %v4103_v62  ;;  %v4415_v34 = vcvt.s32.f32 %v2495_v13  ;;  %v2167_v48 = vunpack.c.2.s8 %v1383_v2  ;;  %v2175_v19 = vunpack.c.3.s8 %v1383_v2  ;;  %v1535_v62 = vld [vmem:[%s12559_s1 + $0x7e8] sm:$0xff] }
 0x402   :  { %v5879_v11 = vpack.c.bf16 %v4239_v6, %v4231_v16  ;;  %v4535_v28 = vcvt.s32.f32 %v2615_v1  ;;  %v4543_v61 = vcvt.s32.f32 %v2623_v56  ;;  %v2295_v44 = vunpack.c.2.s8 %v1415_v41 }
 0x403   :  { %7596 = vmatpush.bf16.msrb.mxu0 %v5815_v17  ;;  %v5967_v5 = vpack.c.bf16 %v4415_v34, %v4407_v9  ;;  %v4087_v33 = vcvt.s32.f32 %v2167_v48  ;;  %v4095_v52 = vcvt.s32.f32 %v2175_v19  ;;  %v2303_v47 = vunpack.c.3.s8 %v1415_v41  ;;  %v1487_v34 = vld [vmem:[%s12559_s1 + $0x668] sm:$0xff] }
 0x404   :  { %7609 = vmatpush.bf16.msrb.mxu1 %v5879_v11  ;;  %v6031_v31 = vpack.c.bf16 %v4543_v61, %v4535_v28  ;;  %v4215_v4 = vcvt.s32.f32 %v2295_v44  ;;  %v2471_v50 = vunpack.c.0.s8 %v1463_v23  ;;  %v2479_v29 = vunpack.c.1.s8 %v1463_v23 }
 0x405   :  { %7619 = vmatpush.bf16.msrb.mxu2 %v5967_v5  ;;  %v5807_v21 = vpack.c.bf16 %v4095_v52, %v4087_v33  ;;  %v4223_v0 = vcvt.s32.f32 %v2303_v47  ;;  %v2599_v18 = vunpack.c.0.s8 %v1495_v40  ;;  %v2607_v14 = vunpack.c.1.s8 %v1495_v40  ;;  %v1567_v40 = vld [vmem:[%s12559_s1 + $0x8e8] sm:$0xff] }
 0x406   :  { %7632 = vmatpush.bf16.msra.mxu3 %v6031_v31  ;;  %v4391_v8 = vcvt.s32.f32 %v2471_v50  ;;  %v4399_v20 = vcvt.s32.f32 %v2479_v29  ;;  %v2151_v26 = vunpack.c.0.s8 %v1383_v2  ;;  %v2159_v7 = vunpack.c.1.s8 %v1383_v2  ;;  %v1455_v2 = vld [vmem:[%s12559_s1 + $0x568] sm:$0xff] }
 0x407   :  { %7597 = vmatpush.bf16.msrb.mxu0 %v5807_v21  ;;  %v5871_v57 = vpack.c.bf16 %v4223_v0, %v4215_v4  ;;  %v4519_v63 = vcvt.s32.f32 %v2599_v18  ;;  %v4527_v23 = vcvt.s32.f32 %v2607_v14  ;;  %v2279_v43 = vunpack.c.0.s8 %v1415_v41 }
 0x408   :  { %v5959_v59 = vpack.c.bf16 %v4399_v20, %v4391_v8  ;;  %v4071_v16 = vcvt.s32.f32 %v2151_v26  ;;  %v4079_v13 = vcvt.s32.f32 %v2159_v7  ;;  %v2287_v6 = vunpack.c.1.s8 %v1415_v41 }
 0x409   :  { %7610 = vmatpush.bf16.msrb.mxu1 %v5871_v57  ;;  %v6023_v9 = vpack.c.bf16 %v4527_v23, %v4519_v63  ;;  %v4199_v1 = vcvt.s32.f32 %v2279_v43  ;;  %v2775_v56 = vunpack.c.2.s8 %v1535_v62  ;;  %v2783_v17 = vunpack.c.3.s8 %v1535_v62  ;;  %v1527_v43 = vld [vmem:[%s12559_s1 + $0x7a8] sm:$0xff] }
 0x40a   :  { %7620 = vmatpush.bf16.msrb.mxu2 %v5959_v59  ;;  %v5799_v48 = vpack.c.bf16 %v4079_v13, %v4071_v16  ;;  %v4207_v19 = vcvt.s32.f32 %v2287_v6  ;;  %v2903_v11 = vunpack.c.2.s8 %v1567_v40  ;;  %v2911_v28 = vunpack.c.3.s8 %v1567_v40 }
 0x40b   :  { %7633 = vmatpush.bf16.msra.mxu3 %v6023_v9  ;;  %v4695_v41 = vcvt.s32.f32 %v2775_v56  ;;  %v4703_v61 = vcvt.s32.f32 %v2783_v17  ;;  %v2455_v44 = vunpack.c.2.s8 %v1455_v2  ;;  %v2463_v5 = vunpack.c.3.s8 %v1455_v2 }
 0x40c   :  { %7598 = vmatpush.bf16.msrb.mxu0 %v5799_v48  ;;  %v5863_v33 = vpack.c.bf16 %v4207_v19, %v4199_v1  ;;  %v4823_v52 = vcvt.s32.f32 %v2903_v11  ;;  %v4831_v47 = vcvt.s32.f32 %v2911_v28  ;;  %v2583_v31 = vunpack.c.2.s8 %v1487_v34  ;;  %v1479_v19 = vld [vmem:[%s12559_s1 + $0x628] sm:$0xff] }
 0x40d   :  { %v6111_v4 = vpack.c.bf16 %v4703_v61, %v4695_v41  ;;  %v4375_v50 = vcvt.s32.f32 %v2455_v44  ;;  %v4383_v29 = vcvt.s32.f32 %v2463_v5  ;;  %v2591_v21 = vunpack.c.3.s8 %v1487_v34 }
 0x40e   :  { %7611 = vmatpush.bf16.msrb.mxu1 %v5863_v33  ;;  %v6175_v0 = vpack.c.bf16 %v4831_v47, %v4823_v52  ;;  %v4503_v18 = vcvt.s32.f32 %v2583_v31  ;;  %v7380_v14 = vadd.f32 %v11735_v53, %v11733_v10  ;;  %v2759_v12 = vunpack.c.0.s8 %v1535_v62 }
 0x40f   :  { %v5951_v39 = vpack.c.bf16 %v4383_v29, %v4375_v50  ;;  %v4511_v8 = vcvt.s32.f32 %v2591_v21  ;;  %v2767_v20 = vunpack.c.1.s8 %v1535_v62  ;;  %v2887_v26 = vunpack.c.0.s8 %v1567_v40  ;;  %7599 = vmatmul.bf16.vlgmr.msrb.gmra.mxu0 %v9894_v55  ;;  %v1559_v62 = vld [vmem:[%s12559_s1 + $0x8a8] sm:$0xff] }
 0x410   :  { %7643 = vmatpush.bf16.msra.mxu0 %v6111_v4  ;;  %v4679_v7 = vcvt.s32.f32 %v2759_v12  ;;  %v2895_v57 = vunpack.c.1.s8 %v1567_v40  ;;  %v2439_v63 = vunpack.c.0.s8 %v1455_v2  ;;  %v2447_v23 = vunpack.c.1.s8 %v1455_v2  ;;  %v1447_v2 = vld [vmem:[%s12559_s1 + $0x528] sm:$0xff] }
 0x411   :  { %7621 = vmatpush.bf16.msrb.mxu2 %v5951_v39  ;;  %v6015_v59 = vpack.c.bf16 %v4511_v8, %v4503_v18  ;;  %7612 = vmatmul.bf16.vlgmr.msrb.gmra.mxu1 %v9969_v58  ;;  %v4687_v10 = vcvt.s32.f32 %v2767_v20  ;;  %v4807_v53 = vcvt.s32.f32 %v2887_v26  ;;  %v2567_v16 = vunpack.c.0.s8 %v1487_v34 }
 0x412   :  { %7656 = vmatpush.bf16.msra.mxu1 %v6175_v0  ;;  %v4815_v13 = vcvt.s32.f32 %v2895_v57  ;;  %v4359_v6 = vcvt.s32.f32 %v2439_v63  ;;  %v4367_v40 = vcvt.s32.f32 %v2447_v23  ;;  %v2575_v9 = vunpack.c.1.s8 %v1487_v34 }
 0x413   :  { %7634 = vmatpush.bf16.msra.mxu3 %v6015_v59  ;;  %v6103_v1 = vpack.c.bf16 %v4687_v10, %v4679_v7  ;;  %v4487_v56 = vcvt.s32.f32 %v2567_v16  ;;  %v2743_v17 = vunpack.c.2.s8 %v1527_v43  ;;  %v2751_v48 = vunpack.c.3.s8 %v1527_v43 }
 0x414   :  { %v6167_v11 = vpack.c.bf16 %v4815_v13, %v4807_v53  ;;  %v5943_v28 = vpack.c.bf16 %v4367_v40, %v4359_v6  ;;  %v4495_v41 = vcvt.s32.f32 %v2575_v9  ;;  %v2871_v61 = vunpack.c.2.s8 %v1559_v62  ;;  %v1599_v53 = vld [vmem:[%s12559_s1 + $0x9e8] sm:$0xff]  ;;  %v11796_v6 = vpop.f32.mrf.mxu2  ;;  %v11798_v40 = vpop.f32.mrf.mxu3 }
 0x415   :  { %7644 = vmatpush.bf16.msra.mxu0 %v6103_v1  ;;  %v4663_v44 = vcvt.s32.f32 %v2743_v17  ;;  %v4671_v34 = vcvt.s32.f32 %v2751_v48  ;;  %v2879_v5 = vunpack.c.3.s8 %v1559_v62  ;;  %v2423_v33 = vunpack.c.2.s8 %v1447_v2 }
 0x416   :  { %7657 = vmatpush.bf16.msra.mxu1 %v6167_v11  ;;  %7622 = vmatpush.bf16.msrb.mxu2 %v5943_v28  ;;  %v6007_v52 = vpack.c.bf16 %v4495_v41, %v4487_v56  ;;  %v4791_v47 = vcvt.s32.f32 %v2871_v61  ;;  %v2431_v31 = vunpack.c.3.s8 %v1447_v2  ;;  %v2551_v4 = vunpack.c.2.s8 %v1479_v19  ;;  %v1519_v28 = vld [vmem:[%s12559_s1 + $0x768] sm:$0xff] }
 0x417   :  { %v6095_v50 = vpack.c.bf16 %v4671_v34, %v4663_v44  ;;  %v4799_v29 = vcvt.s32.f32 %v2879_v5  ;;  %v4343_v21 = vcvt.s32.f32 %v2423_v33  ;;  %v2559_v0 = vunpack.c.3.s8 %v1479_v19 }
 0x418   :  { %7635 = vmatpush.bf16.msra.mxu3 %v6007_v52  ;;  %v4351_v18 = vcvt.s32.f32 %v2431_v31  ;;  %v4471_v12 = vcvt.s32.f32 %v2551_v4  ;;  %v7393_v39 = vadd.f32 %v11751_v24, %v7380_v14  ;;  %v2727_v8 = vunpack.c.0.s8 %v1527_v43 }
 0x419   :  { %7645 = vmatpush.bf16.msra.mxu0 %v6095_v50  ;;  %v6159_v20 = vpack.c.bf16 %v4799_v29, %v4791_v47  ;;  %v4479_v26 = vcvt.s32.f32 %v2559_v0  ;;  %v2735_v7 = vunpack.c.1.s8 %v1527_v43  ;;  %v2855_v57 = vunpack.c.0.s8 %v1559_v62 }
 0x41a   :  { %v5935_v63 = vpack.c.bf16 %v4351_v18, %v4343_v21  ;;  %v11791_v23 = vadd.f32 %v11753_v35, %v7393_v39  ;;  %v4647_v59 = vcvt.s32.f32 %v2727_v8  ;;  %v2863_v10 = vunpack.c.1.s8 %v1559_v62  ;;  %v1631_v62 = vld [vmem:[%s12559_s1 + $0xae8] sm:$0xff] }
 0x41b   :  { %7658 = vmatpush.bf16.msra.mxu1 %v6159_v20  ;;  %v5999_v16 = vpack.c.bf16 %v4479_v26, %v4471_v12  ;;  %v4655_v13 = vcvt.s32.f32 %v2735_v7  ;;  %v4775_v24 = vcvt.s32.f32 %v2855_v57  ;;  %v2407_v14 = vunpack.c.0.s8 %v1447_v2 }
 0x41c   :  { %7623 = vmatpush.bf16.msrb.mxu2 %v5935_v63  ;;  %v4783_v43 = vcvt.s32.f32 %v2863_v10  ;;  %v2415_v9 = vunpack.c.1.s8 %v1447_v2  ;;  %v2535_v35 = vunpack.c.0.s8 %v1479_v19  ;;  %v2543_v1 = vunpack.c.1.s8 %v1479_v19  ;;  %v1551_v2 = vld [vmem:[%s12559_s1 + $0x868] sm:$0xff]  ;;  %v7433_v10 = vpop.f32.mrf.mxu3 }
 0x41d   :  { %7636 = vmatpush.bf16.msra.mxu3 %v5999_v16  ;;  %v6087_v56 = vpack.c.bf16 %v4655_v13, %v4647_v59  ;;  %v4327_v17 = vcvt.s32.f32 %v2407_v14  ;;  %v3031_v48 = vunpack.c.2.s8 %v1599_v53  ;;  %v3039_v11 = vunpack.c.3.s8 %v1599_v53  ;;  %v7420_v59 = vpop.f32.mrf.mxu2 }
 0x41e   :  { %v6151_v41 = vpack.c.bf16 %v4783_v43, %v4775_v24  ;;  %v4335_v61 = vcvt.s32.f32 %v2415_v9  ;;  %v4455_v44 = vcvt.s32.f32 %v2535_v35  ;;  %v4463_v34 = vcvt.s32.f32 %v2543_v1  ;;  %v1591_v43 = vld [vmem:[%s12559_s1 + $0x9a8] sm:$0xff] }
 0x41f   :  { %7646 = vmatpush.bf16.msra.mxu0 %v6087_v56  ;;  %v4951_v19 = vcvt.s32.f32 %v3031_v48  ;;  %v4959_v5 = vcvt.s32.f32 %v3039_v11  ;;  %v3159_v33 = vunpack.c.2.s8 %v1631_v62  ;;  %v3167_v52 = vunpack.c.3.s8 %v1631_v62 }
 0x420   :  { %7659 = vmatpush.bf16.msra.mxu1 %v6151_v41  ;;  %v5927_v47 = vpack.c.bf16 %v4335_v61, %v4327_v17  ;;  %v5991_v31 = vpack.c.bf16 %v4463_v34, %v4455_v44  ;;  %v2711_v4 = vunpack.c.2.s8 %v1519_v28  ;;  %v2719_v50 = vunpack.c.3.s8 %v1519_v28  ;;  %v11817_v41 = vpop.f32.mrf.mxu0  ;;  %v11819_v61 = vpop.f32.mrf.mxu1 }
 0x421   :  { %v6239_v29 = vpack.c.bf16 %v4959_v5, %v4951_v19  ;;  %v5079_v21 = vcvt.s32.f32 %v3159_v33  ;;  %v5087_v0 = vcvt.s32.f32 %v3167_v52  ;;  %v2839_v18 = vunpack.c.2.s8 %v1551_v2 }
 0x422   :  { %7624 = vmatpush.bf16.msrb.mxu2 %v5927_v47  ;;  %7637 = vmatpush.bf16.msra.mxu3 %v5991_v31  ;;  %v4631_v12 = vcvt.s32.f32 %v2711_v4  ;;  %v4639_v39 = vcvt.s32.f32 %v2719_v50  ;;  %v2847_v8 = vunpack.c.3.s8 %v1551_v2  ;;  %v3015_v20 = vunpack.c.0.s8 %v1599_v53  ;;  %v1543_v31 = vld [vmem:[%s12559_s1 + $0x828] sm:$0xff] }
 0x423   :  { %v6303_v26 = vpack.c.bf16 %v5087_v0, %v5079_v21  ;;  %v4759_v7 = vcvt.s32.f32 %v2839_v18  ;;  %v3023_v57 = vunpack.c.1.s8 %v1599_v53  ;;  %v3143_v63 = vunpack.c.0.s8 %v1631_v62 }
 0x424   :  { %v6079_v16 = vpack.c.bf16 %v4639_v39, %v4631_v12  ;;  %v4767_v13 = vcvt.s32.f32 %v2847_v8  ;;  %v4935_v24 = vcvt.s32.f32 %v3015_v20  ;;  %v3151_v14 = vunpack.c.1.s8 %v1631_v62  ;;  %v1623_v62 = vld [vmem:[%s12559_s1 + $0xaa8] sm:$0xff] }
 0x425   :  { %7625 = vmatmul.bf16.vlgmr.msrb.gmra.mxu2 %v9975_v3  ;;  %v4943_v9 = vcvt.s32.f32 %v3023_v57  ;;  %v5063_v35 = vcvt.s32.f32 %v3143_v63  ;;  %v2695_v1 = vunpack.c.0.s8 %v1519_v28  ;;  %v2703_v56 = vunpack.c.1.s8 %v1519_v28  ;;  %7638 = vmatmul.bf16.vlgmr.msra.gmra.mxu3 %v10260_v49  ;;  %v1511_v28 = vld [vmem:[%s12559_s1 + $0x728] sm:$0xff] }
 0x426   :  { %7669 = vmatpush.bf16.msra.mxu2 %v6239_v29  ;;  %7682 = vmatpush.bf16.msrb.mxu3 %v6303_v26  ;;  %v6143_v53 = vpack.c.bf16 %v4767_v13, %v4759_v7  ;;  %v5071_v17 = vcvt.s32.f32 %v3151_v14  ;;  %v2823_v48 = vunpack.c.0.s8 %v1551_v2  ;;  %v2831_v11 = vunpack.c.1.s8 %v1551_v2 }
 0x427   :  { %7647 = vmatpush.bf16.msra.mxu0 %v6079_v16  ;;  %v6231_v44 = vpack.c.bf16 %v4943_v9, %v4935_v24  ;;  %v4615_v34 = vcvt.s32.f32 %v2695_v1  ;;  %v4623_v19 = vcvt.s32.f32 %v2703_v56  ;;  %v2999_v5 = vunpack.c.2.s8 %v1591_v43 }
 0x428   :  { %7660 = vmatpush.bf16.msra.mxu1 %v6143_v53  ;;  %v6295_v33 = vpack.c.bf16 %v5071_v17, %v5063_v35  ;;  %v4743_v52 = vcvt.s32.f32 %v2823_v48  ;;  %v4751_v2 = vcvt.s32.f32 %v2831_v11  ;;  %v3007_v47 = vunpack.c.3.s8 %v1591_v43  ;;  %v11830_v53 = vld [vmem:[%s12559_s1 + $0xbe8] sm:$0xff]  ;;  %v7446_v17 = vpop.f32.mrf.mxu0  ;;  %v7459_v48 = vpop.f32.mrf.mxu1 }
 0x429   :  { %v6071_v4 = vpack.c.bf16 %v4623_v19, %v4615_v34  ;;  %v4919_v50 = vcvt.s32.f32 %v2999_v5  ;;  %v3127_v29 = vunpack.c.2.s8 %v1623_v62  ;;  %v3135_v21 = vunpack.c.3.s8 %v1623_v62 }
 0x42a   :  { %7670 = vmatpush.bf16.msra.mxu2 %v6231_v44  ;;  %7683 = vmatpush.bf16.msrb.mxu3 %v6295_v33  ;;  %v6135_v0 = vpack.c.bf16 %v4751_v2, %v4743_v52  ;;  %v4927_v18 = vcvt.s32.f32 %v3007_v47  ;;  %v2679_v12 = vunpack.c.2.s8 %v1511_v28  ;;  %v2687_v39 = vunpack.c.3.s8 %v1511_v28 }
 0x42b   :  { %7648 = vmatpush.bf16.msra.mxu0 %v6071_v4  ;;  %v5047_v8 = vcvt.s32.f32 %v3127_v29  ;;  %v5055_v20 = vcvt.s32.f32 %v3135_v21  ;;  %v2807_v26 = vunpack.c.2.s8 %v1543_v31  ;;  %v2815_v7 = vunpack.c.3.s8 %v1543_v31  ;;  %v1583_v29 = vld [vmem:[%s12559_s1 + $0x968] sm:$0xff] }
 0x42c   :  { %7661 = vmatpush.bf16.msra.mxu1 %v6135_v0  ;;  %v6223_v57 = vpack.c.bf16 %v4927_v18, %v4919_v50  ;;  %v4599_v63 = vcvt.s32.f32 %v2679_v12  ;;  %v4607_v59 = vcvt.s32.f32 %v2687_v39  ;;  %v2983_v10 = vunpack.c.0.s8 %v1591_v43 }
 0x42d   :  { %v6287_v16 = vpack.c.bf16 %v5055_v20, %v5047_v8  ;;  %v4727_v13 = vcvt.s32.f32 %v2807_v26  ;;  %v4735_v24 = vcvt.s32.f32 %v2815_v7  ;;  %v2991_v14 = vunpack.c.1.s8 %v1591_v43 }
 0x42e   :  { %7671 = vmatpush.bf16.msra.mxu2 %v6223_v57  ;;  %v6063_v9 = vpack.c.bf16 %v4607_v59, %v4599_v63  ;;  %v4903_v35 = vcvt.s32.f32 %v2983_v10  ;;  %v3111_v1 = vunpack.c.0.s8 %v1623_v62  ;;  %v3119_v56 = vunpack.c.1.s8 %v1623_v62  ;;  %v1695_v62 = vld [vmem:[%s12559_s1 + $0xce8] sm:$0xff] }
 0x42f   :  { %7684 = vmatpush.bf16.msrb.mxu3 %v6287_v16  ;;  %v6127_v11 = vpack.c.bf16 %v4735_v24, %v4727_v13  ;;  %v4911_v44 = vcvt.s32.f32 %v2991_v14  ;;  %v2663_v34 = vunpack.c.0.s8 %v1511_v28  ;;  %v2671_v19 = vunpack.c.1.s8 %v1511_v28 }
 0x430   :  { %7649 = vmatpush.bf16.msra.mxu0 %v6063_v9  ;;  %v5031_v5 = vcvt.s32.f32 %v3111_v1  ;;  %v5039_v43 = vcvt.s32.f32 %v3119_v56  ;;  %v2791_v33 = vunpack.c.0.s8 %v1543_v31  ;;  %v2799_v52 = vunpack.c.1.s8 %v1543_v31  ;;  %v1615_v31 = vld [vmem:[%s12559_s1 + $0xa68] sm:$0xff] }
 0x431   :  { %7662 = vmatpush.bf16.msra.mxu1 %v6127_v11  ;;  %v6215_v2 = vpack.c.bf16 %v4911_v44, %v4903_v35  ;;  %v4583_v47 = vcvt.s32.f32 %v2663_v34  ;;  %v4591_v4 = vcvt.s32.f32 %v2671_v19  ;;  %v3287_v50 = vunpack.c.2.s8 %v11830_v53 }
 0x432   :  { %v6279_v28 = vpack.c.bf16 %v5039_v43, %v5031_v5  ;;  %v4711_v21 = vcvt.s32.f32 %v2791_v33  ;;  %v4719_v0 = vcvt.s32.f32 %v2799_v52  ;;  %v3295_v18 = vunpack.c.3.s8 %v11830_v53  ;;  %v1655_v5 = vld [vmem:[%s12559_s1 + $0xba8] sm:$0xff] }
 0x433   :  { %7672 = vmatpush.bf16.msra.mxu2 %v6215_v2  ;;  %v6055_v12 = vpack.c.bf16 %v4591_v4, %v4583_v47  ;;  %v5207_v39 = vcvt.s32.f32 %v3287_v50  ;;  %v3415_v8 = vunpack.c.2.s8 %v1695_v62  ;;  %v3423_v20 = vunpack.c.3.s8 %v1695_v62 }
 0x434   :  { %7685 = vmatpush.bf16.msrb.mxu3 %v6279_v28  ;;  %v6119_v26 = vpack.c.bf16 %v4719_v0, %v4711_v21  ;;  %v5215_v7 = vcvt.s32.f32 %v3295_v18  ;;  %v2967_v57 = vunpack.c.2.s8 %v1583_v29  ;;  %v2975_v63 = vunpack.c.3.s8 %v1583_v29 }
 0x435   :  { %7650 = vmatpush.bf16.msra.mxu0 %v6055_v12  ;;  %v5335_v59 = vcvt.s32.f32 %v3415_v8  ;;  %v5343_v10 = vcvt.s32.f32 %v3423_v20  ;;  %v3095_v16 = vunpack.c.2.s8 %v1615_v31  ;;  %v3103_v13 = vunpack.c.3.s8 %v1615_v31 }
 0x436   :  { %7663 = vmatpush.bf16.msra.mxu1 %v6119_v26  ;;  %v6367_v24 = vpack.c.bf16 %v5215_v7, %v5207_v39  ;;  %v4887_v14 = vcvt.s32.f32 %v2967_v57  ;;  %v4895_v9 = vcvt.s32.f32 %v2975_v63  ;;  %v7419_v35 = vadd.f32 %v11796_v6, %v11791_v23 }
 0x437   :  { %v6431_v1 = vpack.c.bf16 %v5343_v10, %v5335_v59  ;;  %v5015_v56 = vcvt.s32.f32 %v3095_v16  ;;  %v5023_v17 = vcvt.s32.f32 %v3103_v13  ;;  %v3271_v48 = vunpack.c.0.s8 %v11830_v53 }
 0x438   :  { %v6207_v11 = vpack.c.bf16 %v4895_v9, %v4887_v14  ;;  %v7432_v44 = vadd.f32 %v11798_v40, %v7419_v35  ;;  %v3279_v34 = vunpack.c.1.s8 %v11830_v53  ;;  %v3399_v19 = vunpack.c.0.s8 %v1695_v62  ;;  %7651 = vmatmul.bf16.vlgmr.msra.gmra.mxu0 %v10318_v45  ;;  %v1687_v53 = vld [vmem:[%s12559_s1 + $0xca8] sm:$0xff] }
 0x439   :  { %7695 = vmatpush.bf16.msrb.mxu0 %v6367_v24  ;;  %v6271_v43 = vpack.c.bf16 %v5023_v17, %v5015_v56  ;;  %v5191_v23 = vcvt.s32.f32 %v3271_v48  ;;  %v3407_v6 = vunpack.c.1.s8 %v1695_v62  ;;  %v2951_v33 = vunpack.c.0.s8 %v1583_v29  ;;  %7664 = vmatmul.bf16.vlgmr.msra.gmra.mxu1 %v10505_v15  ;;  %v1575_v62 = vld [vmem:[%s12559_s1 + $0x928] sm:$0xff] }
 0x43a   :  { %7708 = vmatpush.bf16.msrb.mxu1 %v6431_v1  ;;  %7673 = vmatpush.bf16.msra.mxu2 %v6207_v11  ;;  %v5199_v52 = vcvt.s32.f32 %v3279_v34  ;;  %v5319_v2 = vcvt.s32.f32 %v3399_v19  ;;  %v2959_v40 = vunpack.c.1.s8 %v1583_v29  ;;  %v3079_v47 = vunpack.c.0.s8 %v1615_v31  ;;  %v1607_v29 = vld [vmem:[%s12559_s1 + $0xa28] sm:$0xff] }
 0x43b   :  { %7686 = vmatpush.bf16.msrb.mxu3 %v6271_v43  ;;  %v5327_v4 = vcvt.s32.f32 %v3407_v6  ;;  %v4871_v50 = vcvt.s32.f32 %v2951_v33  ;;  %v3087_v28 = vunpack.c.1.s8 %v1615_v31  ;;  %v3255_v21 = vunpack.c.2.s8 %v1655_v5 }
 0x43c   :  { %v6359_v0 = vpack.c.bf16 %v5199_v52, %v5191_v23  ;;  %v4879_v18 = vcvt.s32.f32 %v2959_v40  ;;  %v4999_v12 = vcvt.s32.f32 %v3079_v47  ;;  %v3263_v39 = vunpack.c.3.s8 %v1655_v5  ;;  %v1727_v40 = vld [vmem:[%s12559_s1 + $0xde8] sm:$0xff] }
 0x43d   :  { %v6423_v8 = vpack.c.bf16 %v5327_v4, %v5319_v2  ;;  %v5007_v20 = vcvt.s32.f32 %v3087_v28  ;;  %v5175_v26 = vcvt.s32.f32 %v3255_v21  ;;  %v3383_v7 = vunpack.c.2.s8 %v1687_v53  ;;  %v11871_v28 = vpop.f32.mrf.mxu3 }
 0x43e   :  { %7696 = vmatpush.bf16.msrb.mxu0 %v6359_v0  ;;  %v6199_v57 = vpack.c.bf16 %v4879_v18, %v4871_v50  ;;  %v5183_v31 = vcvt.s32.f32 %v3263_v39  ;;  %v3391_v63 = vunpack.c.3.s8 %v1687_v53  ;;  %v2935_v59 = vunpack.c.2.s8 %v1575_v62  ;;  %v11869_v50 = vpop.f32.mrf.mxu2 }
 0x43f   :  { %7709 = vmatpush.bf16.msrb.mxu1 %v6423_v8  ;;  %v6263_v10 = vpack.c.bf16 %v5007_v20, %v4999_v12  ;;  %v5303_v16 = vcvt.s32.f32 %v3383_v7  ;;  %v2943_v13 = vunpack.c.3.s8 %v1575_v62  ;;  %v3063_v24 = vunpack.c.2.s8 %v1607_v29  ;;  %v1647_v20 = vld [vmem:[%s12559_s1 + $0xb68] sm:$0xff] }
 0x440   :  { %7674 = vmatpush.bf16.msra.mxu2 %v6199_v57  ;;  %v6351_v14 = vpack.c.bf16 %v5183_v31, %v5175_v26  ;;  %v5311_v9 = vcvt.s32.f32 %v3391_v63  ;;  %v4855_v35 = vcvt.s32.f32 %v2935_v59  ;;  %v3071_v1 = vunpack.c.3.s8 %v1607_v29 }
 0x441   :  { %7687 = vmatpush.bf16.msrb.mxu3 %v6263_v10  ;;  %v4863_v56 = vcvt.s32.f32 %v2943_v13  ;;  %v4983_v17 = vcvt.s32.f32 %v3063_v24  ;;  %v7445_v48 = vadd.f32 %v11817_v41, %v7432_v44  ;;  %v3239_v11 = vunpack.c.0.s8 %v1655_v5 }
 0x442   :  { %7697 = vmatpush.bf16.msrb.mxu0 %v6351_v14  ;;  %v6415_v34 = vpack.c.bf16 %v5311_v9, %v5303_v16  ;;  %v4991_v19 = vcvt.s32.f32 %v3071_v1  ;;  %v3247_v43 = vunpack.c.1.s8 %v1655_v5  ;;  %v3367_v23 = vunpack.c.0.s8 %v1687_v53 }
 0x443   :  { %v6191_v6 = vpack.c.bf16 %v4863_v56, %v4855_v35  ;;  %v11864_v33 = vadd.f32 %v11819_v61, %v7445_v48  ;;  %v5159_v52 = vcvt.s32.f32 %v3239_v11  ;;  %v3375_v2 = vunpack.c.1.s8 %v1687_v53  ;;  %v1759_v53 = vld [vmem:[%s12559_s1 + $0xee8] sm:$0xff] }
 0x444   :  { %7710 = vmatpush.bf16.msrb.mxu1 %v6415_v34  ;;  %v6255_v47 = vpack.c.bf16 %v4991_v19, %v4983_v17  ;;  %v5167_v4 = vcvt.s32.f32 %v3247_v43  ;;  %v5287_v41 = vcvt.s32.f32 %v3367_v23  ;;  %v2919_v44 = vunpack.c.0.s8 %v1575_v62 }
 0x445   :  { %7675 = vmatpush.bf16.msra.mxu2 %v6191_v6  ;;  %v5295_v5 = vcvt.s32.f32 %v3375_v2  ;;  %v2927_v21 = vunpack.c.1.s8 %v1575_v62  ;;  %v3047_v61 = vunpack.c.0.s8 %v1607_v29  ;;  %v3055_v0 = vunpack.c.1.s8 %v1607_v29  ;;  %v1679_v62 = vld [vmem:[%s12559_s1 + $0xc68] sm:$0xff]  ;;  %v7485_v2 = vpop.f32.mrf.mxu3 }
 0x446   :  { %7688 = vmatpush.bf16.msrb.mxu3 %v6255_v47  ;;  %v6343_v18 = vpack.c.bf16 %v5167_v4, %v5159_v52  ;;  %v4839_v12 = vcvt.s32.f32 %v2919_v44  ;;  %v3543_v39 = vunpack.c.2.s8 %v1727_v40  ;;  %v3551_v8 = vunpack.c.3.s8 %v1727_v40  ;;  %v7472_v52 = vpop.f32.mrf.mxu2 }
 0x447   :  { %v6407_v26 = vpack.c.bf16 %v5295_v5, %v5287_v41  ;;  %v4847_v7 = vcvt.s32.f32 %v2927_v21  ;;  %v4967_v57 = vcvt.s32.f32 %v3047_v61  ;;  %v4975_v31 = vcvt.s32.f32 %v3055_v0  ;;  %v1719_v5 = vld [vmem:[%s12559_s1 + $0xda8] sm:$0xff] }
 0x448   :  { %7698 = vmatpush.bf16.msrb.mxu0 %v6343_v18  ;;  %v5463_v29 = vcvt.s32.f32 %v3543_v39  ;;  %v5471_v63 = vcvt.s32.f32 %v3551_v8  ;;  %v3671_v59 = vunpack.c.2.s8 %v1759_v53  ;;  %v3679_v10 = vunpack.c.3.s8 %v1759_v53 }
 0x449   :  { %7711 = vmatpush.bf16.msrb.mxu1 %v6407_v26  ;;  %v6183_v16 = vpack.c.bf16 %v4847_v7, %v4839_v12  ;;  %v6247_v13 = vpack.c.bf16 %v4975_v31, %v4967_v57  ;;  %v3223_v24 = vunpack.c.2.s8 %v1647_v20  ;;  %v3231_v14 = vunpack.c.3.s8 %v1647_v20  ;;  %v11890_v26 = vpop.f32.mrf.mxu0  ;;  %v11892_v7 = vpop.f32.mrf.mxu1 }
 0x44a   :  { %v6495_v9 = vpack.c.bf16 %v5471_v63, %v5463_v29  ;;  %v5591_v35 = vcvt.s32.f32 %v3671_v59  ;;  %v5599_v1 = vcvt.s32.f32 %v3679_v10  ;;  %v3351_v56 = vunpack.c.2.s8 %v1679_v62 }
 0x44b   :  { %7676 = vmatpush.bf16.msra.mxu2 %v6183_v16  ;;  %7689 = vmatpush.bf16.msrb.mxu3 %v6247_v13  ;;  %v5143_v17 = vcvt.s32.f32 %v3223_v24  ;;  %v5151_v48 = vcvt.s32.f32 %v3231_v14  ;;  %v3359_v11 = vunpack.c.3.s8 %v1679_v62  ;;  %v3527_v34 = vunpack.c.0.s8 %v1727_v40  ;;  %v1671_v13 = vld [vmem:[%s12559_s1 + $0xc28] sm:$0xff] }
 0x44c   :  { %v6559_v19 = vpack.c.bf16 %v5599_v1, %v5591_v35  ;;  %v5271_v43 = vcvt.s32.f32 %v3351_v56  ;;  %v3535_v23 = vunpack.c.1.s8 %v1727_v40  ;;  %v3655_v6 = vunpack.c.0.s8 %v1759_v53 }
 0x44d   :  { %v6335_v47 = vpack.c.bf16 %v5151_v48, %v5143_v17  ;;  %v5279_v4 = vcvt.s32.f32 %v3359_v11  ;;  %v5447_v41 = vcvt.s32.f32 %v3527_v34  ;;  %v3663_v44 = vunpack.c.1.s8 %v1759_v53  ;;  %v1751_v53 = vld [vmem:[%s12559_s1 + $0xea8] sm:$0xff] }
 0x44e   :  { %7677 = vmatmul.bf16.vlgmr.msra.gmra.mxu2 %v10510_v36  ;;  %v5455_v21 = vcvt.s32.f32 %v3535_v23  ;;  %v5575_v61 = vcvt.s32.f32 %v3655_v6  ;;  %v3207_v0 = vunpack.c.0.s8 %v1647_v20  ;;  %v3215_v18 = vunpack.c.1.s8 %v1647_v20  ;;  %7690 = vmatmul.bf16.vlgmr.msrb.gmra.mxu3 %v10545_v22  ;;  %v1639_v20 = vld [vmem:[%s12559_s1 + $0xb28] sm:$0xff] }
 0x44f   :  { %7721 = vmatpush.bf16.msrb.mxu2 %v6495_v9  ;;  %7734 = vmatpush.bf16.msra.mxu3 %v6559_v19  ;;  %v6399_v40 = vpack.c.bf16 %v5279_v4, %v5271_v43  ;;  %v5583_v12 = vcvt.s32.f32 %v3663_v44  ;;  %v3335_v39 = vunpack.c.0.s8 %v1679_v62  ;;  %v3343_v8 = vunpack.c.1.s8 %v1679_v62 }
 0x450   :  { %7699 = vmatpush.bf16.msrb.mxu0 %v6335_v47  ;;  %v6487_v57 = vpack.c.bf16 %v5455_v21, %v5447_v41  ;;  %v5127_v31 = vcvt.s32.f32 %v3207_v0  ;;  %v5135_v29 = vcvt.s32.f32 %v3215_v18  ;;  %v3511_v63 = vunpack.c.2.s8 %v1719_v5 }
 0x451   :  { %7712 = vmatpush.bf16.msrb.mxu1 %v6399_v40  ;;  %v6551_v59 = vpack.c.bf16 %v5583_v12, %v5575_v61  ;;  %v5255_v10 = vcvt.s32.f32 %v3335_v39  ;;  %v5263_v62 = vcvt.s32.f32 %v3343_v8  ;;  %v3519_v16 = vunpack.c.3.s8 %v1719_v5  ;;  %v11903_v40 = vld [vmem:[%s12559_s1 + $0xf0] sm:$0xff]  ;;  %v7498_v12 = vpop.f32.mrf.mxu0  ;;  %v7511_v39 = vpop.f32.mrf.mxu1 }
 0x452   :  { %v6327_v24 = vpack.c.bf16 %v5135_v29, %v5127_v31  ;;  %v5431_v14 = vcvt.s32.f32 %v3511_v63  ;;  %v3639_v9 = vunpack.c.2.s8 %v1751_v53  ;;  %v3647_v35 = vunpack.c.3.s8 %v1751_v53 }
 0x453   :  { %7722 = vmatpush.bf16.msrb.mxu2 %v6487_v57  ;;  %7735 = vmatpush.bf16.msra.mxu3 %v6551_v59  ;;  %v6391_v1 = vpack.c.bf16 %v5263_v62, %v5255_v10  ;;  %v5439_v56 = vcvt.s32.f32 %v3519_v16  ;;  %v3191_v17 = vunpack.c.2.s8 %v1639_v20  ;;  %v3199_v48 = vunpack.c.3.s8 %v1639_v20 }
 0x454   :  { %7700 = vmatpush.bf16.msrb.mxu0 %v6327_v24  ;;  %v5559_v11 = vcvt.s32.f32 %v3639_v9  ;;  %v5567_v34 = vcvt.s32.f32 %v3647_v35  ;;  %v3319_v19 = vunpack.c.2.s8 %v1671_v13  ;;  %v3327_v43 = vunpack.c.3.s8 %v1671_v13  ;;  %v1711_v9 = vld [vmem:[%s12559_s1 + $0xd68] sm:$0xff] }
 0x455   :  { %7713 = vmatpush.bf16.msrb.mxu1 %v6391_v1  ;;  %v6479_v23 = vpack.c.bf16 %v5439_v56, %v5431_v14  ;;  %v5111_v6 = vcvt.s32.f32 %v3191_v17  ;;  %v5119_v52 = vcvt.s32.f32 %v3199_v48  ;;  %v3495_v2 = vunpack.c.0.s8 %v1719_v5 }
 0x456   :  { %v6543_v47 = vpack.c.bf16 %v5567_v34, %v5559_v11  ;;  %v5239_v4 = vcvt.s32.f32 %v3319_v19  ;;  %v5247_v41 = vcvt.s32.f32 %v3327_v43  ;;  %v3503_v44 = vunpack.c.1.s8 %v1719_v5 }
 0x457   :  { %7723 = vmatpush.bf16.msrb.mxu2 %v6479_v23  ;;  %v6319_v21 = vpack.c.bf16 %v5119_v52, %v5111_v6  ;;  %v5415_v61 = vcvt.s32.f32 %v3495_v2  ;;  %v3623_v0 = vunpack.c.0.s8 %v1751_v53  ;;  %v3631_v18 = vunpack.c.1.s8 %v1751_v53  ;;  %v1344_v53 = vld [vmem:[%s12559_s1 + $0x1f0] sm:$0xff] }
 0x458   :  { %7736 = vmatpush.bf16.msra.mxu3 %v6543_v47  ;;  %v6383_v8 = vpack.c.bf16 %v5247_v41, %v5239_v4  ;;  %v5423_v57 = vcvt.s32.f32 %v3503_v44  ;;  %v3175_v31 = vunpack.c.0.s8 %v1639_v20  ;;  %v3183_v29 = vunpack.c.1.s8 %v1639_v20 }
 0x459   :  { %7701 = vmatpush.bf16.msrb.mxu0 %v6319_v21  ;;  %v5543_v63 = vcvt.s32.f32 %v3623_v0  ;;  %v5551_v5 = vcvt.s32.f32 %v3631_v18  ;;  %v3303_v59 = vunpack.c.0.s8 %v1671_v13  ;;  %v3311_v10 = vunpack.c.1.s8 %v1671_v13  ;;  %v1743_v13 = vld [vmem:[%s12559_s1 + $0xe68] sm:$0xff] }
 0x45a   :  { %7714 = vmatpush.bf16.msrb.mxu1 %v6383_v8  ;;  %v6471_v62 = vpack.c.bf16 %v5423_v57, %v5415_v61  ;;  %v5095_v16 = vcvt.s32.f32 %v3175_v31  ;;  %v5103_v24 = vcvt.s32.f32 %v3183_v29  ;;  %v1880_v14 = vunpack.c.2.s8 %v11903_v40 }
 0x45b   :  { %v6535_v20 = vpack.c.bf16 %v5551_v5, %v5543_v63  ;;  %v5223_v35 = vcvt.s32.f32 %v3303_v59  ;;  %v5231_v1 = vcvt.s32.f32 %v3311_v10  ;;  %v1888_v56 = vunpack.c.3.s8 %v11903_v40  ;;  %v1304_v63 = vld [vmem:[%s12559_s1 + $0xb0] sm:$0xff] }
 0x45c   :  { %7724 = vmatpush.bf16.msrb.mxu2 %v6471_v62  ;;  %v6311_v17 = vpack.c.bf16 %v5103_v24, %v5095_v16  ;;  %v3800_v48 = vcvt.s32.f32 %v1880_v14  ;;  %v2008_v11 = vunpack.c.2.s8 %v1344_v53  ;;  %v2016_v34 = vunpack.c.3.s8 %v1344_v53 }
 0x45d   :  { %7737 = vmatpush.bf16.msra.mxu3 %v6535_v20  ;;  %v6375_v19 = vpack.c.bf16 %v5231_v1, %v5223_v35  ;;  %v3808_v43 = vcvt.s32.f32 %v1888_v56  ;;  %v3479_v23 = vunpack.c.2.s8 %v1711_v9  ;;  %v3487_v6 = vunpack.c.3.s8 %v1711_v9 }
 0x45e   :  { %7702 = vmatpush.bf16.msrb.mxu0 %v6311_v17  ;;  %v3928_v52 = vcvt.s32.f32 %v2008_v11  ;;  %v3936_v2 = vcvt.s32.f32 %v2016_v34  ;;  %v3607_v47 = vunpack.c.2.s8 %v1743_v13  ;;  %v3615_v4 = vunpack.c.3.s8 %v1743_v13 }
 0x45f   :  { %7715 = vmatpush.bf16.msrb.mxu1 %v6375_v19  ;;  %v5664_v41 = vpack.c.bf16 %v3808_v43, %v3800_v48  ;;  %v5399_v44 = vcvt.s32.f32 %v3479_v23  ;;  %v5407_v21 = vcvt.s32.f32 %v3487_v6  ;;  %v7471_v61 = vadd.f32 %v11869_v50, %v11864_v33 }
 0x460   :  { %v5728_v0 = vpack.c.bf16 %v3936_v2, %v3928_v52  ;;  %v5527_v18 = vcvt.s32.f32 %v3607_v47  ;;  %v5535_v12 = vcvt.s32.f32 %v3615_v4  ;;  %v1864_v39 = vunpack.c.0.s8 %v11903_v40 }
 0x461   :  { %v6463_v8 = vpack.c.bf16 %v5407_v21, %v5399_v44  ;;  %v7484_v57 = vadd.f32 %v11871_v28, %v7471_v61  ;;  %v1872_v31 = vunpack.c.1.s8 %v11903_v40  ;;  %v1992_v29 = vunpack.c.0.s8 %v1344_v53  ;;  %7703 = vmatmul.bf16.vlgmr.msrb.gmra.mxu0 %v10564_v30  ;;  %v1336_v40 = vld [vmem:[%s12559_s1 + $0x1b0] sm:$0xff] }
 0x462   :  { %7747 = vmatpush.bf16.msra.mxu0 %v5664_v41  ;;  %v6527_v5 = vpack.c.bf16 %v5535_v12, %v5527_v18  ;;  %v3784_v33 = vcvt.s32.f32 %v1864_v39  ;;  %v2000_v50 = vunpack.c.1.s8 %v1344_v53  ;;  %v3463_v59 = vunpack.c.0.s8 %v1711_v9  ;;  %7716 = vmatmul.bf16.vlgmr.msrb.gmra.mxu1 %v10642_v37  ;;  %v1703_v53 = vld [vmem:[%s12559_s1 + $0xd28] sm:$0xff] }
 0x463   :  { %7760 = vmatpush.bf16.msra.mxu1 %v5728_v0  ;;  %7725 = vmatpush.bf16.msrb.mxu2 %v6463_v8  ;;  %v3792_v10 = vcvt.s32.f32 %v1872_v31  ;;  %v3912_v62 = vcvt.s32.f32 %v1992_v29  ;;  %v3471_v28 = vunpack.c.1.s8 %v1711_v9  ;;  %v3591_v16 = vunpack.c.0.s8 %v1743_v13  ;;  %v1735_v9 = vld [vmem:[%s12559_s1 + $0xe28] sm:$0xff] }
 0x464   :  { %7738 = vmatpush.bf16.msra.mxu3 %v6527_v5  ;;  %v3920_v24 = vcvt.s32.f32 %v2000_v50  ;;  %v5383_v14 = vcvt.s32.f32 %v3463_v59  ;;  %v3599_v20 = vunpack.c.1.s8 %v1743_v13  ;;  %v1848_v35 = vunpack.c.2.s8 %v1304_v63 }
 0x465   :  { %v5656_v1 = vpack.c.bf16 %v3792_v10, %v3784_v33  ;;  %v5391_v56 = vcvt.s32.f32 %v3471_v28  ;;  %v5511_v17 = vcvt.s32.f32 %v3591_v16  ;;  %v1856_v48 = vunpack.c.3.s8 %v1304_v63  ;;  %v1376_v28 = vld [vmem:[%s12559_s1 + $0x2f0] sm:$0xff] }
 0x466   :  { %v5720_v11 = vpack.c.bf16 %v3920_v24, %v3912_v62  ;;  %v5519_v34 = vcvt.s32.f32 %v3599_v20  ;;  %v3768_v19 = vcvt.s32.f32 %v1848_v35  ;;  %v1976_v43 = vunpack.c.2.s8 %v1336_v40  ;;  %v11944_v20 = vpop.f32.mrf.mxu3 }
 0x467   :  { %7748 = vmatpush.bf16.msra.mxu0 %v5656_v1  ;;  %v6455_v23 = vpack.c.bf16 %v5391_v56, %v5383_v14  ;;  %v3776_v13 = vcvt.s32.f32 %v1856_v48  ;;  %v1984_v6 = vunpack.c.3.s8 %v1336_v40  ;;  %v3447_v52 = vunpack.c.2.s8 %v1703_v53  ;;  %v11942_v14 = vpop.f32.mrf.mxu2 }
 0x468   :  { %7761 = vmatpush.bf16.msra.mxu1 %v5720_v11  ;;  %v6519_v2 = vpack.c.bf16 %v5519_v34, %v5511_v17  ;;  %v3896_v47 = vcvt.s32.f32 %v1976_v43  ;;  %v3455_v4 = vunpack.c.3.s8 %v1703_v53  ;;  %v3575_v41 = vunpack.c.2.s8 %v1735_v9  ;;  %v1296_v34 = vld [vmem:[%s12559_s1 + $0x70] sm:$0xff] }
 0x469   :  { %7726 = vmatpush.bf16.msrb.mxu2 %v6455_v23  ;;  %v5648_v44 = vpack.c.bf16 %v3776_v13, %v3768_v19  ;;  %v3904_v21 = vcvt.s32.f32 %v1984_v6  ;;  %v5367_v61 = vcvt.s32.f32 %v3447_v52  ;;  %v3583_v0 = vunpack.c.3.s8 %v1735_v9 }
 0x46a   :  { %7739 = vmatpush.bf16.msra.mxu3 %v6519_v2  ;;  %v5375_v18 = vcvt.s32.f32 %v3455_v4  ;;  %v5495_v12 = vcvt.s32.f32 %v3575_v41  ;;  %v7497_v39 = vadd.f32 %v11890_v26, %v7484_v57  ;;  %v1832_v8 = vunpack.c.0.s8 %v1304_v63 }
 0x46b   :  { %7749 = vmatpush.bf16.msra.mxu0 %v5648_v44  ;;  %v5712_v31 = vpack.c.bf16 %v3904_v21, %v3896_v47  ;;  %v5503_v29 = vcvt.s32.f32 %v3583_v0  ;;  %v1840_v5 = vunpack.c.1.s8 %v1304_v63  ;;  %v1960_v33 = vunpack.c.0.s8 %v1336_v40 }
 0x46c   :  { %v6447_v50 = vpack.c.bf16 %v5375_v18, %v5367_v61  ;;  %v11937_v59 = vadd.f32 %v11892_v7, %v7497_v39  ;;  %v3752_v10 = vcvt.s32.f32 %v1832_v8  ;;  %v1968_v62 = vunpack.c.1.s8 %v1336_v40  ;;  %v1408_v40 = vld [vmem:[%s12559_s1 + $0x3f0] sm:$0xff] }
 0x46d   :  { %7762 = vmatpush.bf16.msra.mxu1 %v5712_v31  ;;  %v6511_v16 = vpack.c.bf16 %v5503_v29, %v5495_v12  ;;  %v3760_v24 = vcvt.s32.f32 %v1840_v5  ;;  %v3880_v26 = vcvt.s32.f32 %v1960_v33  ;;  %v3431_v57 = vunpack.c.0.s8 %v1703_v53 }
 0x46e   :  { %7727 = vmatpush.bf16.msrb.mxu2 %v6447_v50  ;;  %v3888_v63 = vcvt.s32.f32 %v1968_v62  ;;  %v3439_v35 = vunpack.c.1.s8 %v1703_v53  ;;  %v3559_v7 = vunpack.c.0.s8 %v1735_v9  ;;  %v3567_v1 = vunpack.c.1.s8 %v1735_v9  ;;  %v1328_v53 = vld [vmem:[%s12559_s1 + $0x170] sm:$0xff]  ;;  %v7537_v62 = vpop.f32.mrf.mxu3 }
 0x46f   :  { %7740 = vmatpush.bf16.msra.mxu3 %v6511_v16  ;;  %v5640_v56 = vpack.c.bf16 %v3760_v24, %v3752_v10  ;;  %v5351_v17 = vcvt.s32.f32 %v3431_v57  ;;  %v2136_v48 = vunpack.c.2.s8 %v1376_v28  ;;  %v2144_v11 = vunpack.c.3.s8 %v1376_v28  ;;  %v7524_v10 = vpop.f32.mrf.mxu2 }
 0x470   :  { %v5704_v19 = vpack.c.bf16 %v3888_v63, %v3880_v26  ;;  %v5359_v43 = vcvt.s32.f32 %v3439_v35  ;;  %v5479_v23 = vcvt.s32.f32 %v3559_v7  ;;  %v5487_v13 = vcvt.s32.f32 %v3567_v1  ;;  %v1368_v63 = vld [vmem:[%s12559_s1 + $0x2b0] sm:$0xff] }
 0x471   :  { %7750 = vmatpush.bf16.msra.mxu0 %v5640_v56  ;;  %v4056_v9 = vcvt.s32.f32 %v2136_v48  ;;  %v4064_v6 = vcvt.s32.f32 %v2144_v11  ;;  %v2264_v52 = vunpack.c.2.s8 %v1408_v40  ;;  %v2272_v2 = vunpack.c.3.s8 %v1408_v40 }
 0x472   :  { %7763 = vmatpush.bf16.msra.mxu1 %v5704_v19  ;;  %v6439_v47 = vpack.c.bf16 %v5359_v43, %v5351_v17  ;;  %v6503_v4 = vpack.c.bf16 %v5487_v13, %v5479_v23  ;;  %v1816_v41 = vunpack.c.2.s8 %v1296_v34  ;;  %v1824_v44 = vunpack.c.3.s8 %v1296_v34  ;;  %v11963_v19 = vpop.f32.mrf.mxu0 }
 0x473   :  { %v5792_v21 = vpack.c.bf16 %v4064_v6, %v4056_v9  ;;  %v4184_v61 = vcvt.s32.f32 %v2264_v52  ;;  %v4192_v0 = vcvt.s32.f32 %v2272_v2  ;;  %v1944_v18 = vunpack.c.2.s8 %v1328_v53  ;;  %v11968_v6 = vpop.f32.mrf.mxu1 }
 0x474   :  { %7728 = vmatpush.bf16.msrb.mxu2 %v6439_v47  ;;  %7741 = vmatpush.bf16.msra.mxu3 %v6503_v4  ;;  %v3736_v12 = vcvt.s32.f32 %v1816_v41  ;;  %v3744_v39 = vcvt.s32.f32 %v1824_v44  ;;  %v1952_v8 = vunpack.c.3.s8 %v1328_v53  ;;  %v2120_v31 = vunpack.c.0.s8 %v1376_v28  ;;  %v1320_v4 = vld [vmem:[%s12559_s1 + $0x130] sm:$0xff] }
 0x475   :  { %v5856_v29 = vpack.c.bf16 %v4192_v0, %v4184_v61  ;;  %v3864_v5 = vcvt.s32.f32 %v1944_v18  ;;  %v2128_v33 = vunpack.c.1.s8 %v1376_v28  ;;  %v2248_v50 = vunpack.c.0.s8 %v1408_v40 }
 0x476   :  { %v5632_v16 = vpack.c.bf16 %v3744_v39, %v3736_v12  ;;  %v3872_v24 = vcvt.s32.f32 %v1952_v8  ;;  %v4040_v26 = vcvt.s32.f32 %v2120_v31  ;;  %v2256_v57 = vunpack.c.1.s8 %v1408_v40  ;;  %v1400_v40 = vld [vmem:[%s12559_s1 + $0x3b0] sm:$0xff] }
 0x477   :  { %7729 = vmatmul.bf16.vlgmr.msrb.gmra.mxu2 %v10644_v46  ;;  %v4048_v35 = vcvt.s32.f32 %v2128_v33  ;;  %v4168_v7 = vcvt.s32.f32 %v2248_v50  ;;  %v1800_v1 = vunpack.c.0.s8 %v1296_v34  ;;  %v1808_v56 = vunpack.c.1.s8 %v1296_v34  ;;  %7742 = vmatmul.bf16.vlgmr.msra.gmra.mxu3 %v10665_v60  ;;  %v1288_v34 = vld [vmem:[%s12559_s1 + $0x30] sm:$0xff] }
 0x478   :  { %7773 = vmatpush.bf16.msra.mxu2 %v5792_v21  ;;  %7786 = vmatpush.bf16.msrb.mxu3 %v5856_v29  ;;  %v5696_v28 = vpack.c.bf16 %v3872_v24, %v3864_v5  ;;  %v4176_v17 = vcvt.s32.f32 %v2256_v57  ;;  %v1928_v48 = vunpack.c.0.s8 %v1328_v53  ;;  %v1936_v11 = vunpack.c.1.s8 %v1328_v53 }
 0x479   :  { %7751 = vmatpush.bf16.msra.mxu0 %v5632_v16  ;;  %v5784_v43 = vpack.c.bf16 %v4048_v35, %v4040_v26  ;;  %v3720_v23 = vcvt.s32.f32 %v1800_v1  ;;  %v3728_v13 = vcvt.s32.f32 %v1808_v56  ;;  %v2104_v9 = vunpack.c.2.s8 %v1368_v63 }
 0x47a   :  { %7764 = vmatpush.bf16.msra.mxu1 %v5696_v28  ;;  %v5848_v52 = vpack.c.bf16 %v4176_v17, %v4168_v7  ;;  %v3848_v2 = vcvt.s32.f32 %v1928_v48  ;;  %v3856_v53 = vcvt.s32.f32 %v1936_v11  ;;  %v2112_v47 = vunpack.c.3.s8 %v1368_v63  ;;  %v11976_v28 = vld [vmem:[%s12559_s1 + $0x4f0] sm:$0xff]  ;;  %v7550_v17 = vpop.f32.mrf.mxu0 }
 0x47b   :  { %v5624_v41 = vpack.c.bf16 %v3728_v13, %v3720_v23  ;;  %v4024_v44 = vcvt.s32.f32 %v2104_v9  ;;  %v2232_v21 = vunpack.c.2.s8 %v1400_v40  ;;  %v2240_v61 = vunpack.c.3.s8 %v1400_v40  ;;  %v7563_v13 = vpop.f32.mrf.mxu1 }
 0x47c   :  { %7774 = vmatpush.bf16.msra.mxu2 %v5784_v43  ;;  %7787 = vmatpush.bf16.msrb.mxu3 %v5848_v52  ;;  %v5688_v0 = vpack.c.bf16 %v3856_v53, %v3848_v2  ;;  %v4032_v18 = vcvt.s32.f32 %v2112_v47  ;;  %v1784_v12 = vunpack.c.2.s8 %v1288_v34  ;;  %v1792_v39 = vunpack.c.3.s8 %v1288_v34 }
 0x47d   :  { %7752 = vmatpush.bf16.msra.mxu0 %v5624_v41  ;;  %v4152_v8 = vcvt.s32.f32 %v2232_v21  ;;  %v4160_v31 = vcvt.s32.f32 %v2240_v61  ;;  %v1912_v29 = vunpack.c.2.s8 %v1320_v4  ;;  %v1920_v5 = vunpack.c.3.s8 %v1320_v4 }
 0x47e   :  { %7765 = vmatpush.bf16.msra.mxu1 %v5688_v0  ;;  %v5776_v33 = vpack.c.bf16 %v4032_v18, %v4024_v44  ;;  %v3704_v50 = vcvt.s32.f32 %v1784_v12  ;;  %v3712_v10 = vcvt.s32.f32 %v1792_v39  ;;  %v2088_v62 = vunpack.c.0.s8 %v1368_v63 }
 0x47f   :  { %v5840_v16 = vpack.c.bf16 %v4160_v31, %v4152_v8  ;;  %v3832_v24 = vcvt.s32.f32 %v1912_v29  ;;  %v3840_v26 = vcvt.s32.f32 %v1920_v5  ;;  %v2096_v57 = vunpack.c.1.s8 %v1368_v63 }
 0x480   :  { %7775 = vmatpush.bf16.msra.mxu2 %v5776_v33  ;;  %v5616_v35 = vpack.c.bf16 %v3712_v10, %v3704_v50  ;;  %v4008_v7 = vcvt.s32.f32 %v2088_v62  ;;  %v2216_v1 = vunpack.c.0.s8 %v1400_v40  ;;  %v2224_v56 = vunpack.c.1.s8 %v1400_v40  ;;  %v1472_v40 = vld [vmem:[%s12559_s1 + $0x5f0] sm:$0xff] }
 0x481   :  { %7788 = vmatpush.bf16.msrb.mxu3 %v5840_v16  ;;  %v5680_v48 = vpack.c.bf16 %v3840_v26, %v3832_v24  ;;  %v4016_v11 = vcvt.s32.f32 %v2096_v57  ;;  %v1768_v43 = vunpack.c.0.s8 %v1288_v34  ;;  %v1776_v23 = vunpack.c.1.s8 %v1288_v34  ;;  %v1360_v34 = vld [vmem:[%s12559_s1 + $0x270] sm:$0xff] }
 0x482   :  { %7753 = vmatpush.bf16.msra.mxu0 %v5616_v35  ;;  %v4136_v9 = vcvt.s32.f32 %v2216_v1  ;;  %v4144_v63 = vcvt.s32.f32 %v2224_v56  ;;  %v1896_v52 = vunpack.c.0.s8 %v1320_v4  ;;  %v1904_v2 = vunpack.c.1.s8 %v1320_v4  ;;  %v1392_v4 = vld [vmem:[%s12559_s1 + $0x370] sm:$0xff] }
 0x483   :  { %7766 = vmatpush.bf16.msra.mxu1 %v5680_v48  ;;  %v5768_v53 = vpack.c.bf16 %v4016_v11, %v4008_v7  ;;  %v3688_v47 = vcvt.s32.f32 %v1768_v43  ;;  %v3696_v41 = vcvt.s32.f32 %v1776_v23  ;;  %v2392_v44 = vunpack.c.2.s8 %v11976_v28 }
 0x484   :  { %v5832_v21 = vpack.c.bf16 %v4144_v63, %v4136_v9  ;;  %v3816_v61 = vcvt.s32.f32 %v1896_v52  ;;  %v3824_v0 = vcvt.s32.f32 %v1904_v2  ;;  %v2400_v18 = vunpack.c.3.s8 %v11976_v28  ;;  %v11997_v9 = vld [vmem:[%s12559_s1 + $0x4b0] sm:$0xff] }
 0x485   :  { %7776 = vmatpush.bf16.msra.mxu2 %v5768_v53  ;;  %v5608_v12 = vpack.c.bf16 %v3696_v41, %v3688_v47  ;;  %v4312_v39 = vcvt.s32.f32 %v2392_v44  ;;  %v2520_v8 = vunpack.c.2.s8 %v1472_v40  ;;  %v2528_v31 = vunpack.c.3.s8 %v1472_v40  ;;  %v1464_v47 = vld [vmem:[%s12559_s1 + $0x5b0] sm:$0xff] }
 0x486   :  { %7789 = vmatpush.bf16.msrb.mxu3 %v5832_v21  ;;  %v5672_v29 = vpack.c.bf16 %v3824_v0, %v3816_v61  ;;  %v4320_v5 = vcvt.s32.f32 %v2400_v18  ;;  %v2072_v33 = vunpack.c.2.s8 %v1360_v34  ;;  %v2080_v50 = vunpack.c.3.s8 %v1360_v34 }
 0x487   :  { %7754 = vmatpush.bf16.msra.mxu0 %v5608_v12  ;;  %v4440_v10 = vcvt.s32.f32 %v2520_v8  ;;  %v4448_v62 = vcvt.s32.f32 %v2528_v31  ;;  %v2200_v16 = vunpack.c.2.s8 %v1392_v4  ;;  %v2208_v24 = vunpack.c.3.s8 %v1392_v4 }
 0x488   :  { %7767 = vmatpush.bf16.msra.mxu1 %v5672_v29  ;;  %v5920_v26 = vpack.c.bf16 %v4320_v5, %v4312_v39  ;;  %v3992_v57 = vcvt.s32.f32 %v2072_v33  ;;  %v4000_v35 = vcvt.s32.f32 %v2080_v50  ;;  %v7523_v7 = vadd.f32 %v11942_v14, %v11937_v59  ;;  %v1384_v39 = vld [vmem:[%s12559_s1 + $0x330] sm:$0xff] }
 0x489   :  { %v5984_v1 = vpack.c.bf16 %v4448_v62, %v4440_v10  ;;  %v4120_v56 = vcvt.s32.f32 %v2200_v16  ;;  %v4128_v17 = vcvt.s32.f32 %v2208_v24  ;;  %v2376_v48 = vunpack.c.0.s8 %v11976_v28 }
 0x48a   :  { %v5760_v11 = vpack.c.bf16 %v4000_v35, %v3992_v57  ;;  %v7536_v43 = vadd.f32 %v11944_v20, %v7523_v7  ;;  %v2384_v23 = vunpack.c.1.s8 %v11976_v28  ;;  %v2504_v13 = vunpack.c.0.s8 %v1472_v40  ;;  %7755 = vmatmul.bf16.vlgmr.msra.gmra.mxu0 %v12657_v32 }
 0x48b   :  { %7799 = vmatpush.bf16.msrb.mxu0 %v5920_v26  ;;  %v5824_v63 = vpack.c.bf16 %v4128_v17, %v4120_v56  ;;  %v4296_v59 = vcvt.s32.f32 %v2376_v48  ;;  %v2512_v14 = vunpack.c.1.s8 %v1472_v40  ;;  %v2056_v52 = vunpack.c.0.s8 %v1360_v34  ;;  %7768 = vmatmul.bf16.vlgmr.msra.gmra.mxu1 %v12658_v27  ;;  %v1352_v40 = vld [vmem:[%s12559_s1 + $0x230] sm:$0xff] }
 0x48c   :  { %7812 = vmatpush.bf16.msrb.mxu1 %v5984_v1  ;;  %7777 = vmatpush.bf16.msra.mxu2 %v5760_v11  ;;  %v4304_v2 = vcvt.s32.f32 %v2384_v23  ;;  %v4424_v20 = vcvt.s32.f32 %v2504_v13  ;;  %v2064_v53 = vunpack.c.1.s8 %v1360_v34  ;;  %v2184_v28 = vunpack.c.0.s8 %v1392_v4  ;;  %v8137_v11 = vld [vmem:[%s12560_s2] sm:$0xff] }
 0x48d   :  { %7790 = vmatpush.bf16.msrb.mxu3 %v5824_v63  ;;  %v4432_v41 = vcvt.s32.f32 %v2512_v14  ;;  %v3976_v44 = vcvt.s32.f32 %v2056_v52  ;;  %v2192_v21 = vunpack.c.1.s8 %v1392_v4  ;;  %v2360_v61 = vunpack.c.2.s8 %v11997_v9 }
 0x48e   :  { %v5912_v0 = vpack.c.bf16 %v4304_v2, %v4296_v59  ;;  %v3984_v18 = vcvt.s32.f32 %v2064_v53  ;;  %v4104_v12 = vcvt.s32.f32 %v2184_v28  ;;  %v2368_v34 = vunpack.c.3.s8 %v11997_v9 }
 0x48f   :  { %v5976_v8 = vpack.c.bf16 %v4432_v41, %v4424_v20  ;;  %v4112_v31 = vcvt.s32.f32 %v2192_v21  ;;  %v4280_v29 = vcvt.s32.f32 %v2360_v61  ;;  %v2488_v5 = vunpack.c.2.s8 %v1464_v47  ;;  %v12023_v20 = vld [vmem:[%s12561_s3] sm:$0xff]  ;;  %v1504_v41 = vld [vmem:[%s12559_s1 + $0x6f0] sm:$0xff] }
 0x490   :  { %7800 = vmatpush.bf16.msrb.mxu0 %v5912_v0  ;;  %v5752_v4 = vpack.c.bf16 %v3984_v18, %v3976_v44  ;;  %v4288_v33 = vcvt.s32.f32 %v2368_v34  ;;  %v2496_v50 = vunpack.c.3.s8 %v1464_v47  ;;  %v2040_v10 = vunpack.c.2.s8 %v1352_v40  ;;  %v12029_v0 = vpop.f32.mrf.mxu2  ;;  %v12031_v18 = vpop.f32.mrf.mxu3 }
 0x491   :  { %7813 = vmatpush.bf16.msrb.mxu1 %v5976_v8  ;;  %v5816_v62 = vpack.c.bf16 %v4112_v31, %v4104_v12  ;;  %v4408_v16 = vcvt.s32.f32 %v2488_v5  ;;  %v2048_v24 = vunpack.c.3.s8 %v1352_v40  ;;  %v2168_v26 = vunpack.c.2.s8 %v1384_v39  ;;  %v1536_v31 = vld [vmem:[%s12559_s1 + $0x7f0] sm:$0xff] }
 0x492   :  { %7778 = vmatpush.bf16.msra.mxu2 %v5752_v4  ;;  %v5904_v57 = vpack.c.bf16 %v4288_v33, %v4280_v29  ;;  %v4416_v35 = vcvt.s32.f32 %v2496_v50  ;;  %v3960_v7 = vcvt.s32.f32 %v2040_v10  ;;  %v2176_v1 = vunpack.c.3.s8 %v1384_v39 }
 0x493   :  { %7791 = vmatpush.bf16.msrb.mxu3 %v5816_v62  ;;  %v3968_v56 = vcvt.s32.f32 %v2048_v24  ;;  %v4088_v17 = vcvt.s32.f32 %v2168_v26  ;;  %v12013_v48 = vadd.f32 %v11963_v19, %v7536_v43  ;;  %v2344_v63 = vunpack.c.0.s8 %v11997_v9 }
 0x494   :  { %7801 = vmatpush.bf16.msrb.mxu0 %v5904_v57  ;;  %v5968_v23 = vpack.c.bf16 %v4416_v35, %v4408_v16  ;;  %v4096_v13 = vcvt.s32.f32 %v2176_v1  ;;  %v8140_v59 = vperm.slane %v8137_v11, 1  ;;  %v2352_v52 = vunpack.c.1.s8 %v11997_v9 }
 0x495   :  { %v5744_v14 = vpack.c.bf16 %v3968_v56, %v3960_v7  ;;  %v2472_v2 = vunpack.c.0.s8 %v1464_v47  ;;  %v4264_v43 = vcvt.s32.f32 %v2344_v63  ;;  %v2480_v53 = vunpack.c.1.s8 %v1464_v47 }
 0x496   :  { %7814 = vmatpush.bf16.msrb.mxu1 %v5968_v23  ;;  %v5808_v19 = vpack.c.bf16 %v4096_v13, %v4088_v17  ;;  %v2024_v28 = vunpack.c.0.s8 %v1352_v40  ;;  %v8166_v44 = vperm.slane %v12023_v20, 1  ;;  %v4272_v21 = vcvt.s32.f32 %v2352_v52 }
 0x497   :  { %7779 = vmatpush.bf16.msra.mxu2 %v5744_v14  ;;  %v4392_v9 = vcvt.s32.f32 %v2472_v2  ;;  %v2032_v61 = vunpack.c.1.s8 %v1352_v40  ;;  %v4400_v12 = vcvt.s32.f32 %v2480_v53  ;;  %v2152_v8 = vunpack.c.0.s8 %v1384_v39  ;;  %v1424_v40 = vld [vmem:[%s12559_s1 + $0x470] sm:$0xff] }
 0x498   :  { %7792 = vmatpush.bf16.msrb.mxu3 %v5808_v19  ;;  %v3944_v34 = vcvt.s32.f32 %v2024_v28  ;;  %v2160_v47 = vunpack.c.1.s8 %v1384_v39  ;;  %v12037_v29 = vmul.f32 %v8140_v59, %v11192_v42  ;;  %v5896_v5 = vpack.c.bf16 %v4272_v21, %v4264_v43  ;;  %v1456_v39 = vld [vmem:[%s12559_s1 + $0x570] sm:$0xff]  ;;  %v7576_v28 = vpop.f32.mrf.mxu2  ;;  %v7589_v21 = vpop.f32.mrf.mxu3 }
 0x499   :  { %v3952_v4 = vcvt.s32.f32 %v2032_v61  ;;  %v2648_v33 = vunpack.c.2.s8 %v1504_v41  ;;  %v5960_v50 = vpack.c.bf16 %v4400_v12, %v4392_v9  ;;  %v4072_v10 = vcvt.s32.f32 %v2152_v8  ;;  %v1496_v8 = vld [vmem:[%s12559_s1 + $0x6b0] sm:$0xff] }
 0x49a   :  { %v4080_v62 = vcvt.s32.f32 %v2160_v47  ;;  %v2656_v16 = vunpack.c.3.s8 %v1504_v41  ;;  %7802 = vmatpush.bf16.msrb.mxu0 %v5896_v5  ;;  %v2776_v42 = vunpack.c.2.s8 %v1536_v31  ;;  %v2784_v57 = vunpack.c.3.s8 %v1536_v31 }
 0x49b   :  { %v5736_v24 = vpack.c.bf16 %v3952_v4, %v3944_v34  ;;  %v4568_v26 = vcvt.s32.f32 %v2648_v33  ;;  %7815 = vmatpush.bf16.msrb.mxu1 %v5960_v50  ;;  %v2328_v1 = vunpack.c.2.s8 %v1424_v40  ;;  %v2336_v56 = vunpack.c.3.s8 %v1424_v40 }
 0x49c   :  { %v5800_v35 = vpack.c.bf16 %v4080_v62, %v4072_v10  ;;  %v4576_v7 = vcvt.s32.f32 %v2656_v16  ;;  %v4696_v17 = vcvt.s32.f32 %v2776_v42  ;;  %v4704_v11 = vcvt.s32.f32 %v2784_v57  ;;  %v12053_v16 = vpop.f32.mrf.mxu0 }
 0x49d   :  { %7780 = vmatpush.bf16.msra.mxu2 %v5736_v24  ;;  %v2456_v23 = vunpack.c.2.s8 %v1456_v39  ;;  %v2464_v13 = vunpack.c.3.s8 %v1456_v39  ;;  %v4248_v59 = vcvt.s32.f32 %v2328_v1  ;;  %v4256_v14 = vcvt.s32.f32 %v2336_v56  ;;  %v12055_v24 = vpop.f32.mrf.mxu1 }
 0x49e   :  { %7793 = vmatpush.bf16.msrb.mxu3 %v5800_v35  ;;  %v6048_v63 = vpack.c.bf16 %v4576_v7, %v4568_v26  ;;  %v2632_v52 = vunpack.c.0.s8 %v1504_v41  ;;  %v6112_v2 = vpack.c.bf16 %v4704_v11, %v4696_v17  ;;  %v2640_v53 = vunpack.c.1.s8 %v1504_v41  ;;  %v1416_v35 = vld [vmem:[%s12559_s1 + $0x430] sm:$0xff] }
 0x49f   :  { %v4376_v19 = vcvt.s32.f32 %v2456_v23  ;;  %v4384_v43 = vcvt.s32.f32 %v2464_v13  ;;  %v5888_v9 = vpack.c.bf16 %v4256_v14, %v4248_v59  ;;  %v2760_v12 = vunpack.c.0.s8 %v1536_v31  ;;  %v1448_v17 = vld [vmem:[%s12559_s1 + $0x530] sm:$0xff] }
 0x4a0   :  { %v4552_v61 = vcvt.s32.f32 %v2632_v52  ;;  %v2768_v34 = vunpack.c.1.s8 %v1536_v31  ;;  %7781 = vmatmul.bf16.vlgmr.msra.gmra.mxu2 %v12639_v25  ;;  %v4560_v5 = vcvt.s32.f32 %v2640_v53  ;;  %v2312_v4 = vunpack.c.0.s8 %v1424_v40  ;;  %v1528_v31 = vld [vmem:[%s12559_s1 + $0x7b0] sm:$0xff] }
 0x4a1   :  { %7825 = vmatpush.bf16.msrb.mxu2 %v6048_v63  ;;  %v5952_v47 = vpack.c.bf16 %v4384_v43, %v4376_v19  ;;  %v2320_v33 = vunpack.c.1.s8 %v1424_v40  ;;  %7794 = vmatmul.bf16.vlgmr.msrb.gmra.mxu3 %v9894_v55  ;;  %v4680_v41 = vcvt.s32.f32 %v2760_v12  ;;  %v2440_v10 = vunpack.c.0.s8 %v1456_v39 }
 0x4a2   :  { %7838 = vmatpush.bf16.msra.mxu3 %v6112_v2  ;;  %7803 = vmatpush.bf16.msrb.mxu0 %v5888_v9  ;;  %v4688_v50 = vcvt.s32.f32 %v2768_v34  ;;  %v2448_v62 = vunpack.c.1.s8 %v1456_v39  ;;  %v6040_v26 = vpack.c.bf16 %v4560_v5, %v4552_v61  ;;  %v4232_v42 = vcvt.s32.f32 %v2312_v4 }
 0x4a3   :  { %7816 = vmatpush.bf16.msrb.mxu1 %v5952_v47  ;;  %v4240_v57 = vcvt.s32.f32 %v2320_v33  ;;  %v2616_v40 = vunpack.c.2.s8 %v1496_v8  ;;  %v4360_v1 = vcvt.s32.f32 %v2440_v10  ;;  %v2624_v56 = vunpack.c.3.s8 %v1496_v8 }
 0x4a4   :  { %v6104_v7 = vpack.c.bf16 %v4688_v50, %v4680_v41  ;;  %v4368_v39 = vcvt.s32.f32 %v2448_v62  ;;  %v2744_v13 = vunpack.c.2.s8 %v1528_v31  ;;  %v2752_v63 = vunpack.c.3.s8 %v1528_v31  ;;  %v12066_v62 = vld [vmem:[%s12559_s1 + $0x8f0] sm:$0xff] }
 0x4a5   :  { %7826 = vmatpush.bf16.msrb.mxu2 %v6040_v26  ;;  %v5880_v11 = vpack.c.bf16 %v4240_v57, %v4232_v42  ;;  %v4536_v23 = vcvt.s32.f32 %v2616_v40  ;;  %v4544_v14 = vcvt.s32.f32 %v2624_v56  ;;  %v2296_v52 = vunpack.c.2.s8 %v1416_v35  ;;  %v7602_v26 = vpop.f32.mrf.mxu0  ;;  %v7615_v42 = vpop.f32.mrf.mxu1 }
 0x4a6   :  { %7839 = vmatpush.bf16.msra.mxu3 %v6104_v7  ;;  %v5944_v59 = vpack.c.bf16 %v4368_v39, %v4360_v1  ;;  %v2304_v2 = vunpack.c.3.s8 %v1416_v35  ;;  %v4664_v19 = vcvt.s32.f32 %v2744_v13  ;;  %v4672_v43 = vcvt.s32.f32 %v2752_v63 }
 0x4a7   :  { %7804 = vmatpush.bf16.msrb.mxu0 %v5880_v11  ;;  %v2424_v53 = vunpack.c.2.s8 %v1448_v17  ;;  %v2432_v28 = vunpack.c.3.s8 %v1448_v17  ;;  %v6032_v21 = vpack.c.bf16 %v4544_v14, %v4536_v23  ;;  %v4216_v9 = vcvt.s32.f32 %v2296_v52  ;;  %v1488_v14 = vld [vmem:[%s12559_s1 + $0x670] sm:$0xff] }
 0x4a8   :  { %7817 = vmatpush.bf16.msrb.mxu1 %v5944_v59  ;;  %v4224_v61 = vcvt.s32.f32 %v2304_v2  ;;  %v2600_v12 = vunpack.c.0.s8 %v1496_v8  ;;  %v6096_v34 = vpack.c.bf16 %v4672_v43, %v4664_v19  ;;  %v2608_v4 = vunpack.c.1.s8 %v1496_v8 }
 0x4a9   :  { %v4344_v47 = vcvt.s32.f32 %v2424_v53  ;;  %v4352_v5 = vcvt.s32.f32 %v2432_v28  ;;  %7827 = vmatpush.bf16.msrb.mxu2 %v6032_v21  ;;  %v2728_v50 = vunpack.c.0.s8 %v1528_v31  ;;  %v2736_v10 = vunpack.c.1.s8 %v1528_v31  ;;  %v1600_v31 = vld [vmem:[%s12559_s1 + $0x9f0] sm:$0xff] }
 0x4aa   :  { %v5872_v33 = vpack.c.bf16 %v4224_v61, %v4216_v9  ;;  %v4520_v41 = vcvt.s32.f32 %v2600_v12  ;;  %7840 = vmatpush.bf16.msra.mxu3 %v6096_v34  ;;  %v4528_v40 = vcvt.s32.f32 %v2608_v4  ;;  %v2280_v7 = vunpack.c.0.s8 %v1416_v35 }
 0x4ab   :  { %v5936_v57 = vpack.c.bf16 %v4352_v5, %v4344_v47  ;;  %v2288_v1 = vunpack.c.1.s8 %v1416_v35  ;;  %v4648_v39 = vcvt.s32.f32 %v2728_v50  ;;  %v4656_v8 = vcvt.s32.f32 %v2736_v10 }
 0x4ac   :  { %7805 = vmatpush.bf16.msrb.mxu0 %v5872_v33  ;;  %v2408_v56 = vunpack.c.0.s8 %v1448_v17  ;;  %v2416_v11 = vunpack.c.1.s8 %v1448_v17  ;;  %v6024_v23 = vpack.c.bf16 %v4528_v40, %v4520_v41  ;;  %v4200_v13 = vcvt.s32.f32 %v2280_v7  ;;  %v1520_v17 = vld [vmem:[%s12559_s1 + $0x770] sm:$0xff] }
 0x4ad   :  { %7818 = vmatpush.bf16.msrb.mxu1 %v5936_v57  ;;  %v4208_v63 = vcvt.s32.f32 %v2288_v1  ;;  %v2904_v59 = vunpack.c.2.s8 %v12066_v62  ;;  %v6088_v35 = vpack.c.bf16 %v4656_v8, %v4648_v39  ;;  %v2912_v19 = vunpack.c.3.s8 %v12066_v62 }
 0x4ae   :  { %v4328_v52 = vcvt.s32.f32 %v2408_v56  ;;  %v4336_v2 = vcvt.s32.f32 %v2416_v11  ;;  %7828 = vmatpush.bf16.msrb.mxu2 %v6024_v23  ;;  %v3032_v28 = vunpack.c.2.s8 %v1600_v31  ;;  %v3040_v21 = vunpack.c.3.s8 %v1600_v31  ;;  %v1560_v11 = vld [vmem:[%s12559_s1 + $0x8b0] sm:$0xff] }
 0x4af   :  { %v5864_v43 = vpack.c.bf16 %v4208_v63, %v4200_v13  ;;  %v4824_v53 = vcvt.s32.f32 %v2904_v59  ;;  %7841 = vmatpush.bf16.msra.mxu3 %v6088_v35  ;;  %v4832_v61 = vcvt.s32.f32 %v2912_v19  ;;  %v2584_v12 = vunpack.c.2.s8 %v1488_v14 }
 0x4b0   :  { %v5928_v9 = vpack.c.bf16 %v4336_v2, %v4328_v52  ;;  %v2592_v34 = vunpack.c.3.s8 %v1488_v14  ;;  %v4952_v47 = vcvt.s32.f32 %v3032_v28  ;;  %v4960_v5 = vcvt.s32.f32 %v3040_v21 }
 0x4b1   :  { %7806 = vmatpush.bf16.msrb.mxu0 %v5864_v43  ;;  %v2712_v4 = vunpack.c.2.s8 %v1520_v17  ;;  %v2720_v33 = vunpack.c.3.s8 %v1520_v17  ;;  %v6176_v41 = vpack.c.bf16 %v4832_v61, %v4824_v53  ;;  %v4504_v50 = vcvt.s32.f32 %v2584_v12 }
 0x4b2   :  { %7819 = vmatpush.bf16.msrb.mxu1 %v5928_v9  ;;  %v4512_v10 = vcvt.s32.f32 %v2592_v34  ;;  %v7575_v26 = vadd.f32 %v12029_v0, %v11968_v6  ;;  %v6240_v42 = vpack.c.bf16 %v4960_v5, %v4952_v47  ;;  %v2888_v7 = vunpack.c.0.s8 %v12066_v62 }
 0x4b3   :  { %v4632_v57 = vcvt.s32.f32 %v2712_v4  ;;  %v4640_v40 = vcvt.s32.f32 %v2720_v33  ;;  %v2896_v8 = vunpack.c.1.s8 %v12066_v62  ;;  %v3016_v56 = vunpack.c.0.s8 %v1600_v31  ;;  %v1592_v62 = vld [vmem:[%s12559_s1 + $0x9b0] sm:$0xff] }
 0x4b4   :  { %v6016_v1 = vpack.c.bf16 %v4512_v10, %v4504_v50  ;;  %v7588_v39 = vadd.f32 %v12031_v18, %v7575_v26  ;;  %7807 = vmatmul.bf16.vlgmr.msrb.gmra.mxu0 %v9969_v58  ;;  %v4808_v6 = vcvt.s32.f32 %v2888_v7  ;;  %v3024_v0 = vunpack.c.1.s8 %v1600_v31  ;;  %v1480_v31 = vld [vmem:[%s12559_s1 + $0x630] sm:$0xff] }
 0x4b5   :  { %7851 = vmatpush.bf16.msra.mxu0 %v6176_v41  ;;  %v6080_v23 = vpack.c.bf16 %v4640_v40, %v4632_v57  ;;  %v2568_v13 = vunpack.c.0.s8 %v1488_v14  ;;  %7820 = vmatmul.bf16.vlgmr.msrb.gmra.mxu1 %v9975_v3  ;;  %v4816_v63 = vcvt.s32.f32 %v2896_v8  ;;  %v4936_v59 = vcvt.s32.f32 %v3016_v56 }
 0x4b6   :  { %7864 = vmatpush.bf16.msra.mxu1 %v6240_v42  ;;  %7829 = vmatpush.bf16.msrb.mxu2 %v6016_v1  ;;  %v2576_v18 = vunpack.c.1.s8 %v1488_v14  ;;  %v2696_v35 = vunpack.c.0.s8 %v1520_v17  ;;  %v4944_v52 = vcvt.s32.f32 %v3024_v0  ;;  %v2704_v19 = vunpack.c.1.s8 %v1520_v17  ;;  %v1512_v14 = vld [vmem:[%s12559_s1 + $0x730] sm:$0xff] }
 0x4b7   :  { %7842 = vmatpush.bf16.msra.mxu3 %v6080_v23  ;;  %v4488_v2 = vcvt.s32.f32 %v2568_v13  ;;  %v2872_v43 = vunpack.c.2.s8 %v1560_v11  ;;  %v6168_v53 = vpack.c.bf16 %v4816_v63, %v4808_v6  ;;  %v2880_v9 = vunpack.c.3.s8 %v1560_v11 }
 0x4b8   :  { %v4496_v28 = vcvt.s32.f32 %v2576_v18  ;;  %v4616_v21 = vcvt.s32.f32 %v2696_v35  ;;  %v6232_v61 = vpack.c.bf16 %v4944_v52, %v4936_v59  ;;  %v4624_v12 = vcvt.s32.f32 %v2704_v19 }
 0x4b9   :  { %v4792_v34 = vcvt.s32.f32 %v2872_v43  ;;  %v3000_v47 = vunpack.c.2.s8 %v1592_v62  ;;  %7852 = vmatpush.bf16.msra.mxu0 %v6168_v53  ;;  %v4800_v17 = vcvt.s32.f32 %v2880_v9  ;;  %v3008_v4 = vunpack.c.3.s8 %v1592_v62  ;;  %v12105_v53 = vpop.f32.mrf.mxu2 }
 0x4ba   :  { %v6008_v5 = vpack.c.bf16 %v4496_v28, %v4488_v2  ;;  %v2552_v33 = vunpack.c.2.s8 %v1480_v31  ;;  %7865 = vmatpush.bf16.msra.mxu1 %v6232_v61  ;;  %v6072_v41 = vpack.c.bf16 %v4624_v12, %v4616_v21  ;;  %v2560_v10 = vunpack.c.3.s8 %v1480_v31  ;;  %v1632_v2 = vld [vmem:[%s12559_s1 + $0xaf0] sm:$0xff]  ;;  %v12107_v28 = vpop.f32.mrf.mxu3 }
 0x4bb   :  { %v4920_v50 = vcvt.s32.f32 %v3000_v47  ;;  %v2680_v26 = vunpack.c.2.s8 %v1512_v14  ;;  %v6160_v42 = vpack.c.bf16 %v4800_v17, %v4792_v34  ;;  %v4928_v57 = vcvt.s32.f32 %v3008_v4 }
 0x4bc   :  { %7830 = vmatpush.bf16.msrb.mxu2 %v6008_v5  ;;  %v4472_v40 = vcvt.s32.f32 %v2552_v33  ;;  %v2688_v7 = vunpack.c.3.s8 %v1512_v14  ;;  %7843 = vmatpush.bf16.msra.mxu3 %v6072_v41  ;;  %v4480_v1 = vcvt.s32.f32 %v2560_v10  ;;  %v7601_v56 = vadd.f32 %v12053_v16, %v7588_v39  ;;  %v1552_v5 = vld [vmem:[%s12559_s1 + $0x870] sm:$0xff] }
 0x4bd   :  { %v4600_v8 = vcvt.s32.f32 %v2680_v26  ;;  %v2856_v23 = vunpack.c.0.s8 %v1560_v11  ;;  %7853 = vmatpush.bf16.msra.mxu0 %v6160_v42  ;;  %v6224_v6 = vpack.c.bf16 %v4928_v57, %v4920_v50  ;;  %v2864_v13 = vunpack.c.1.s8 %v1560_v11 }
 0x4be   :  { %v4608_v0 = vcvt.s32.f32 %v2688_v7  ;;  %v2984_v63 = vunpack.c.0.s8 %v1592_v62  ;;  %v6000_v59 = vpack.c.bf16 %v4480_v1, %v4472_v40  ;;  %v12100_v18 = vadd.f32 %v12055_v24, %v7601_v56 }
 0x4bf   :  { %v4776_v35 = vcvt.s32.f32 %v2856_v23  ;;  %v2992_v52 = vunpack.c.1.s8 %v1592_v62  ;;  %7866 = vmatpush.bf16.msra.mxu1 %v6224_v6  ;;  %v4784_v43 = vcvt.s32.f32 %v2864_v13  ;;  %v2536_v39 = vunpack.c.0.s8 %v1480_v31  ;;  %v1664_v62 = vld [vmem:[%s12559_s1 + $0xbf0] sm:$0xff] }
 0x4c0   :  { %v6064_v19 = vpack.c.bf16 %v4608_v0, %v4600_v8  ;;  %v4904_v16 = vcvt.s32.f32 %v2984_v63  ;;  %7831 = vmatpush.bf16.msrb.mxu2 %v6000_v59  ;;  %v2544_v21 = vunpack.c.1.s8 %v1480_v31  ;;  %v2664_v24 = vunpack.c.0.s8 %v1512_v14  ;;  %v1584_v31 = vld [vmem:[%s12559_s1 + $0x970] sm:$0xff] }
 0x4c1   :  { %v4912_v11 = vcvt.s32.f32 %v2992_v52  ;;  %v2672_v9 = vunpack.c.1.s8 %v1512_v14  ;;  %v6152_v61 = vpack.c.bf16 %v4784_v43, %v4776_v35  ;;  %v4456_v12 = vcvt.s32.f32 %v2536_v39  ;;  %v7628_v43 = vpop.f32.mrf.mxu2 }
 0x4c2   :  { %7844 = vmatpush.bf16.msra.mxu3 %v6064_v19  ;;  %v3160_v34 = vunpack.c.2.s8 %v1632_v2  ;;  %v3168_v47 = vunpack.c.3.s8 %v1632_v2  ;;  %v4464_v4 = vcvt.s32.f32 %v2544_v21  ;;  %v4584_v33 = vcvt.s32.f32 %v2664_v24 }
 0x4c3   :  { %v6216_v17 = vpack.c.bf16 %v4912_v11, %v4904_v16  ;;  %v4592_v41 = vcvt.s32.f32 %v2672_v9  ;;  %7854 = vmatpush.bf16.msra.mxu0 %v6152_v61  ;;  %v3288_v10 = vunpack.c.2.s8 %v1664_v62  ;;  %v3296_v26 = vunpack.c.3.s8 %v1664_v62  ;;  %v7641_v16 = vpop.f32.mrf.mxu3  ;;  %v1624_v9 = vld [vmem:[%s12559_s1 + $0xab0] sm:$0xff] }
 0x4c4   :  { %v5080_v14 = vcvt.s32.f32 %v3160_v34  ;;  %v5088_v50 = vcvt.s32.f32 %v3168_v47  ;;  %v5992_v42 = vpack.c.bf16 %v4464_v4, %v4456_v12  ;;  %v2840_v40 = vunpack.c.2.s8 %v1552_v5 }
 0x4c5   :  { %7867 = vmatpush.bf16.msra.mxu1 %v6216_v17  ;;  %v6056_v57 = vpack.c.bf16 %v4592_v41, %v4584_v33  ;;  %v2848_v7 = vunpack.c.3.s8 %v1552_v5  ;;  %v5208_v8 = vcvt.s32.f32 %v3288_v10  ;;  %v5216_v56 = vcvt.s32.f32 %v3296_v26  ;;  %v12126_v41 = vpop.f32.mrf.mxu0 }
 0x4c6   :  { %v6304_v1 = vpack.c.bf16 %v5088_v50, %v5080_v14  ;;  %v2968_v23 = vunpack.c.2.s8 %v1584_v31  ;;  %7832 = vmatpush.bf16.msrb.mxu2 %v5992_v42  ;;  %v4760_v6 = vcvt.s32.f32 %v2840_v40  ;;  %v2976_v13 = vunpack.c.3.s8 %v1584_v31  ;;  %v12128_v14 = vpop.f32.mrf.mxu1 }
 0x4c7   :  { %7845 = vmatpush.bf16.msra.mxu3 %v6056_v57  ;;  %v4768_v0 = vcvt.s32.f32 %v2848_v7  ;;  %v3144_v63 = vunpack.c.0.s8 %v1632_v2  ;;  %v6368_v59 = vpack.c.bf16 %v5216_v56, %v5208_v8  ;;  %v3152_v52 = vunpack.c.1.s8 %v1632_v2 }
 0x4c8   :  { %v4888_v35 = vcvt.s32.f32 %v2968_v23  ;;  %v3272_v19 = vunpack.c.0.s8 %v1664_v62  ;;  %v4896_v11 = vcvt.s32.f32 %v2976_v13  ;;  %v3280_v24 = vunpack.c.1.s8 %v1664_v62  ;;  %v1656_v62 = vld [vmem:[%s12559_s1 + $0xbb0] sm:$0xff] }
 0x4c9   :  { %v6144_v39 = vpack.c.bf16 %v4768_v0, %v4760_v6  ;;  %v5064_v21 = vcvt.s32.f32 %v3144_v63  ;;  %7833 = vmatmul.bf16.vlgmr.msrb.gmra.mxu2 %v10260_v49  ;;  %v5072_v61 = vcvt.s32.f32 %v3152_v52  ;;  %v2824_v34 = vunpack.c.0.s8 %v1552_v5 }
 0x4ca   :  { %7877 = vmatpush.bf16.msra.mxu2 %v6304_v1  ;;  %v5192_v12 = vcvt.s32.f32 %v3272_v19  ;;  %v2832_v47 = vunpack.c.1.s8 %v1552_v5  ;;  %7846 = vmatmul.bf16.vlgmr.msra.gmra.mxu3 %v10318_v45  ;;  %v6208_v2 = vpack.c.bf16 %v4896_v11, %v4888_v35  ;;  %v5200_v17 = vcvt.s32.f32 %v3280_v24  ;;  %v1544_v5 = vld [vmem:[%s12559_s1 + $0x830] sm:$0xff] }
 0x4cb   :  { %7890 = vmatpush.bf16.msrb.mxu3 %v6368_v59  ;;  %7855 = vmatpush.bf16.msra.mxu0 %v6144_v39  ;;  %v2952_v4 = vunpack.c.0.s8 %v1584_v31  ;;  %v2960_v33 = vunpack.c.1.s8 %v1584_v31  ;;  %v6296_v50 = vpack.c.bf16 %v5072_v61, %v5064_v21  ;;  %v4744_v10 = vcvt.s32.f32 %v2824_v34  ;;  %v1576_v1 = vld [vmem:[%s12559_s1 + $0x930] sm:$0xff] }
 0x4cc   :  { %v4752_v26 = vcvt.s32.f32 %v2832_v47  ;;  %v3128_v42 = vunpack.c.2.s8 %v1624_v9  ;;  %7868 = vmatpush.bf16.msra.mxu1 %v6208_v2  ;;  %v6360_v57 = vpack.c.bf16 %v5200_v17, %v5192_v12  ;;  %v3136_v7 = vunpack.c.3.s8 %v1624_v9 }
 0x4cd   :  { %v4872_v40 = vcvt.s32.f32 %v2952_v4  ;;  %v4880_v31 = vcvt.s32.f32 %v2960_v33  ;;  %v3256_v23 = vunpack.c.2.s8 %v1656_v62  ;;  %v3264_v6 = vunpack.c.3.s8 %v1656_v62  ;;  %v12139_v33 = vld [vmem:[%s12559_s1 + $0xcf0] sm:$0xff] }
 0x4ce   :  { %7878 = vmatpush.bf16.msra.mxu2 %v6296_v50  ;;  %v6136_v8 = vpack.c.bf16 %v4752_v26, %v4744_v10  ;;  %v5048_v56 = vcvt.s32.f32 %v3128_v42  ;;  %v5056_v13 = vcvt.s32.f32 %v3136_v7  ;;  %v2808_v63 = vunpack.c.2.s8 %v1544_v5  ;;  %v7654_v50 = vpop.f32.mrf.mxu0  ;;  %v7667_v10 = vpop.f32.mrf.mxu1 }
 0x4cf   :  { %7891 = vmatpush.bf16.msrb.mxu3 %v6360_v57  ;;  %v6200_v0 = vpack.c.bf16 %v4880_v31, %v4872_v40  ;;  %v2816_v59 = vunpack.c.3.s8 %v1544_v5  ;;  %v5176_v35 = vcvt.s32.f32 %v3256_v23  ;;  %v5184_v52 = vcvt.s32.f32 %v3264_v6 }
 0x4d0   :  { %7856 = vmatpush.bf16.msra.mxu0 %v6136_v8  ;;  %v2936_v19 = vunpack.c.2.s8 %v1576_v1  ;;  %v2944_v43 = vunpack.c.3.s8 %v1576_v1  ;;  %v6288_v16 = vpack.c.bf16 %v5056_v13, %v5048_v56  ;;  %v4728_v39 = vcvt.s32.f32 %v2808_v63  ;;  %v1616_v13 = vld [vmem:[%s12559_s1 + $0xa70] sm:$0xff] }
 0x4d1   :  { %7869 = vmatpush.bf16.msra.mxu1 %v6200_v0  ;;  %v4736_v11 = vcvt.s32.f32 %v2816_v59  ;;  %v3112_v21 = vunpack.c.0.s8 %v1624_v9  ;;  %v6352_v24 = vpack.c.bf16 %v5184_v52, %v5176_v35  ;;  %v3120_v34 = vunpack.c.1.s8 %v1624_v9 }
 0x4d2   :  { %v4856_v61 = vcvt.s32.f32 %v2936_v19  ;;  %v4864_v12 = vcvt.s32.f32 %v2944_v43  ;;  %7879 = vmatpush.bf16.msra.mxu2 %v6288_v16  ;;  %v3240_v17 = vunpack.c.0.s8 %v1656_v62  ;;  %v3248_v4 = vunpack.c.1.s8 %v1656_v62  ;;  %v1728_v62 = vld [vmem:[%s12559_s1 + $0xdf0] sm:$0xff] }
 0x4d3   :  { %v6128_v47 = vpack.c.bf16 %v4736_v11, %v4728_v39  ;;  %v5032_v2 = vcvt.s32.f32 %v3112_v21  ;;  %7892 = vmatpush.bf16.msrb.mxu3 %v6352_v24  ;;  %v5040_v42 = vcvt.s32.f32 %v3120_v34  ;;  %v2792_v57 = vunpack.c.0.s8 %v1544_v5 }
 0x4d4   :  { %v6192_v26 = vpack.c.bf16 %v4864_v12, %v4856_v61  ;;  %v2800_v40 = vunpack.c.1.s8 %v1544_v5  ;;  %v5160_v31 = vcvt.s32.f32 %v3240_v17  ;;  %v5168_v9 = vcvt.s32.f32 %v3248_v4 }
 0x4d5   :  { %7857 = vmatpush.bf16.msra.mxu0 %v6128_v47  ;;  %v2920_v7 = vunpack.c.0.s8 %v1576_v1  ;;  %v2928_v8 = vunpack.c.1.s8 %v1576_v1  ;;  %v6280_v56 = vpack.c.bf16 %v5040_v42, %v5032_v2  ;;  %v4712_v23 = vcvt.s32.f32 %v2792_v57  ;;  %v1648_v1 = vld [vmem:[%s12559_s1 + $0xb70] sm:$0xff] }
 0x4d6   :  { %7870 = vmatpush.bf16.msra.mxu1 %v6192_v26  ;;  %v4720_v6 = vcvt.s32.f32 %v2800_v40  ;;  %v3416_v0 = vunpack.c.2.s8 %v12139_v33  ;;  %v6344_v5 = vpack.c.bf16 %v5168_v9, %v5160_v31  ;;  %v3424_v35 = vunpack.c.3.s8 %v12139_v33 }
 0x4d7   :  { %v4840_v63 = vcvt.s32.f32 %v2920_v7  ;;  %v4848_v59 = vcvt.s32.f32 %v2928_v8  ;;  %7880 = vmatpush.bf16.msra.mxu2 %v6280_v56  ;;  %v3544_v43 = vunpack.c.2.s8 %v1728_v62  ;;  %v3552_v16 = vunpack.c.3.s8 %v1728_v62  ;;  %v1688_v8 = vld [vmem:[%s12559_s1 + $0xcb0] sm:$0xff] }
 0x4d8   :  { %v6120_v52 = vpack.c.bf16 %v4720_v6, %v4712_v23  ;;  %v5336_v19 = vcvt.s32.f32 %v3416_v0  ;;  %7893 = vmatpush.bf16.msrb.mxu3 %v6344_v5  ;;  %v5344_v11 = vcvt.s32.f32 %v3424_v35  ;;  %v3096_v21 = vunpack.c.2.s8 %v1616_v13 }
 0x4d9   :  { %v6184_v39 = vpack.c.bf16 %v4848_v59, %v4840_v63  ;;  %v3104_v24 = vunpack.c.3.s8 %v1616_v13  ;;  %v5464_v61 = vcvt.s32.f32 %v3544_v43  ;;  %v5472_v12 = vcvt.s32.f32 %v3552_v16 }
 0x4da   :  { %7858 = vmatpush.bf16.msra.mxu0 %v6120_v52  ;;  %v3224_v34 = vunpack.c.2.s8 %v1648_v1  ;;  %v3232_v47 = vunpack.c.3.s8 %v1648_v1  ;;  %v6432_v2 = vpack.c.bf16 %v5344_v11, %v5336_v19  ;;  %v5016_v17 = vcvt.s32.f32 %v3096_v21 }
 0x4db   :  { %7871 = vmatpush.bf16.msra.mxu1 %v6184_v39  ;;  %v5024_v4 = vcvt.s32.f32 %v3104_v24  ;;  %v7627_v50 = vadd.f32 %v12105_v53, %v12100_v18  ;;  %v6496_v10 = vpack.c.bf16 %v5472_v12, %v5464_v61  ;;  %v3400_v57 = vunpack.c.0.s8 %v12139_v33 }
 0x4dc   :  { %v5144_v26 = vcvt.s32.f32 %v3224_v34  ;;  %v5152_v42 = vcvt.s32.f32 %v3232_v47  ;;  %v3408_v9 = vunpack.c.1.s8 %v12139_v33  ;;  %v3528_v7 = vunpack.c.0.s8 %v1728_v62  ;;  %v1720_v33 = vld [vmem:[%s12559_s1 + $0xdb0] sm:$0xff] }
 0x4dd   :  { %v6272_v40 = vpack.c.bf16 %v5024_v4, %v5016_v17  ;;  %v7640_v31 = vadd.f32 %v12107_v28, %v7627_v50  ;;  %7859 = vmatmul.bf16.vlgmr.msra.gmra.mxu0 %v10505_v15  ;;  %v5320_v18 = vcvt.s32.f32 %v3400_v57  ;;  %v3536_v53 = vunpack.c.1.s8 %v1728_v62  ;;  %v1608_v62 = vld [vmem:[%s12559_s1 + $0xa30] sm:$0xff] }
 0x4de   :  { %7903 = vmatpush.bf16.msrb.mxu0 %v6432_v2  ;;  %v6336_v56 = vpack.c.bf16 %v5152_v42, %v5144_v26  ;;  %v3080_v23 = vunpack.c.0.s8 %v1616_v13  ;;  %7872 = vmatmul.bf16.vlgmr.msra.gmra.mxu1 %v10510_v36  ;;  %v5328_v6 = vcvt.s32.f32 %v3408_v9  ;;  %v5448_v0 = vcvt.s32.f32 %v3528_v7 }
 0x4df   :  { %7916 = vmatpush.bf16.msrb.mxu1 %v6496_v10  ;;  %7881 = vmatpush.bf16.msra.mxu2 %v6272_v40  ;;  %v3088_v28 = vunpack.c.1.s8 %v1616_v13  ;;  %v3208_v5 = vunpack.c.0.s8 %v1648_v1  ;;  %v5456_v63 = vcvt.s32.f32 %v3536_v53  ;;  %v3216_v35 = vunpack.c.1.s8 %v1648_v1  ;;  %v1640_v13 = vld [vmem:[%s12559_s1 + $0xb30] sm:$0xff] }
 0x4e0   :  { %7894 = vmatpush.bf16.msrb.mxu3 %v6336_v56  ;;  %v5000_v59 = vcvt.s32.f32 %v3080_v23  ;;  %v3384_v52 = vunpack.c.2.s8 %v1688_v8  ;;  %v6424_v19 = vpack.c.bf16 %v5328_v6, %v5320_v18  ;;  %v3392_v39 = vunpack.c.3.s8 %v1688_v8 }
 0x4e1   :  { %v5008_v43 = vcvt.s32.f32 %v3088_v28  ;;  %v5128_v16 = vcvt.s32.f32 %v3208_v5  ;;  %v6488_v11 = vpack.c.bf16 %v5456_v63, %v5448_v0  ;;  %v5136_v21 = vcvt.s32.f32 %v3216_v35 }
 0x4e2   :  { %v5304_v24 = vcvt.s32.f32 %v3384_v52  ;;  %v3512_v61 = vunpack.c.2.s8 %v1720_v33  ;;  %7904 = vmatpush.bf16.msrb.mxu0 %v6424_v19  ;;  %v5312_v1 = vcvt.s32.f32 %v3392_v39  ;;  %v3520_v34 = vunpack.c.3.s8 %v1720_v33  ;;  %v12178_v19 = vpop.f32.mrf.mxu2 }
 0x4e3   :  { %v6264_v12 = vpack.c.bf16 %v5008_v43, %v5000_v59  ;;  %v3064_v47 = vunpack.c.2.s8 %v1608_v62  ;;  %7917 = vmatpush.bf16.msrb.mxu1 %v6488_v11  ;;  %v6328_v2 = vpack.c.bf16 %v5136_v21, %v5128_v16  ;;  %v3072_v4 = vunpack.c.3.s8 %v1608_v62  ;;  %v1760_v59 = vld [vmem:[%s12559_s1 + $0xef0] sm:$0xff]  ;;  %v12180_v43 = vpop.f32.mrf.mxu3 }
 0x4e4   :  { %v5432_v17 = vcvt.s32.f32 %v3512_v61  ;;  %v3192_v50 = vunpack.c.2.s8 %v1640_v13  ;;  %v6416_v10 = vpack.c.bf16 %v5312_v1, %v5304_v24  ;;  %v5440_v26 = vcvt.s32.f32 %v3520_v34 }
 0x4e5   :  { %7882 = vmatpush.bf16.msra.mxu2 %v6264_v12  ;;  %v4984_v42 = vcvt.s32.f32 %v3064_v47  ;;  %v3200_v57 = vunpack.c.3.s8 %v1640_v13  ;;  %7895 = vmatpush.bf16.msrb.mxu3 %v6328_v2  ;;  %v4992_v40 = vcvt.s32.f32 %v3072_v4  ;;  %v7653_v7 = vadd.f32 %v12126_v41, %v7640_v31  ;;  %v1680_v12 = vld [vmem:[%s12559_s1 + $0xc70] sm:$0xff] }
 0x4e6   :  { %v5112_v9 = vcvt.s32.f32 %v3192_v50  ;;  %v3368_v56 = vunpack.c.0.s8 %v1688_v8  ;;  %7905 = vmatpush.bf16.msrb.mxu0 %v6416_v10  ;;  %v6480_v18 = vpack.c.bf16 %v5440_v26, %v5432_v17  ;;  %v3376_v23 = vunpack.c.1.s8 %v1688_v8 }
 0x4e7   :  { %v5120_v53 = vcvt.s32.f32 %v3200_v57  ;;  %v3496_v6 = vunpack.c.0.s8 %v1720_v33  ;;  %v6256_v0 = vpack.c.bf16 %v4992_v40, %v4984_v42  ;;  %v12173_v28 = vadd.f32 %v12128_v14, %v7653_v7 }
 0x4e8   :  { %v5288_v5 = vcvt.s32.f32 %v3368_v56  ;;  %v3504_v63 = vunpack.c.1.s8 %v1720_v33  ;;  %7918 = vmatpush.bf16.msrb.mxu1 %v6480_v18  ;;  %v5296_v52 = vcvt.s32.f32 %v3376_v23  ;;  %v3048_v31 = vunpack.c.0.s8 %v1608_v62  ;;  %v1313_v33 = vld [vmem:[%s12559_s1 + $0xf8] sm:$0xff] }
 0x4e9   :  { %v6320_v35 = vpack.c.bf16 %v5120_v53, %v5112_v9  ;;  %v5416_v41 = vcvt.s32.f32 %v3496_v6  ;;  %7883 = vmatpush.bf16.msra.mxu2 %v6256_v0  ;;  %v3056_v16 = vunpack.c.1.s8 %v1608_v62  ;;  %v3176_v14 = vunpack.c.0.s8 %v1640_v13  ;;  %v1712_v62 = vld [vmem:[%s12559_s1 + $0xd70] sm:$0xff] }
 0x4ea   :  { %v5424_v8 = vcvt.s32.f32 %v3504_v63  ;;  %v3184_v39 = vunpack.c.1.s8 %v1640_v13  ;;  %v6408_v11 = vpack.c.bf16 %v5296_v52, %v5288_v5  ;;  %v4968_v21 = vcvt.s32.f32 %v3048_v31  ;;  %v7680_v52 = vpop.f32.mrf.mxu2 }
 0x4eb   :  { %7896 = vmatpush.bf16.msrb.mxu3 %v6320_v35  ;;  %v3672_v24 = vunpack.c.2.s8 %v1760_v59  ;;  %v3680_v61 = vunpack.c.3.s8 %v1760_v59  ;;  %v4976_v34 = vcvt.s32.f32 %v3056_v16  ;;  %v5096_v47 = vcvt.s32.f32 %v3176_v14 }
 0x4ec   :  { %v6472_v1 = vpack.c.bf16 %v5424_v8, %v5416_v41  ;;  %v5104_v2 = vcvt.s32.f32 %v3184_v39  ;;  %7906 = vmatpush.bf16.msrb.mxu0 %v6408_v11  ;;  %v1881_v4 = vunpack.c.2.s8 %v1313_v33  ;;  %v1889_v50 = vunpack.c.3.s8 %v1313_v33  ;;  %v7693_v41 = vpop.f32.mrf.mxu3  ;;  %v1752_v39 = vld [vmem:[%s12559_s1 + $0xeb0] sm:$0xff] }
 0x4ed   :  { %v5592_v13 = vcvt.s32.f32 %v3672_v24  ;;  %v5600_v17 = vcvt.s32.f32 %v3680_v61  ;;  %v6248_v10 = vpack.c.bf16 %v4976_v34, %v4968_v21  ;;  %v3352_v42 = vunpack.c.2.s8 %v1680_v12 }
 0x4ee   :  { %7919 = vmatpush.bf16.msrb.mxu1 %v6472_v1  ;;  %v6312_v26 = vpack.c.bf16 %v5104_v2, %v5096_v47  ;;  %v3360_v57 = vunpack.c.3.s8 %v1680_v12  ;;  %v3801_v9 = vcvt.s32.f32 %v1881_v4  ;;  %v3809_v7 = vcvt.s32.f32 %v1889_v50  ;;  %v12199_v2 = vpop.f32.mrf.mxu0 }
 0x4ef   :  { %v6560_v40 = vpack.c.bf16 %v5600_v17, %v5592_v13  ;;  %v3480_v56 = vunpack.c.2.s8 %v1712_v62  ;;  %7884 = vmatpush.bf16.msra.mxu2 %v6248_v10  ;;  %v5272_v18 = vcvt.s32.f32 %v3352_v42  ;;  %v3488_v23 = vunpack.c.3.s8 %v1712_v62  ;;  %v12201_v13 = vpop.f32.mrf.mxu1 }
 0x4f0   :  { %7897 = vmatpush.bf16.msrb.mxu3 %v6312_v26  ;;  %v5280_v53 = vcvt.s32.f32 %v3360_v57  ;;  %v3656_v6 = vunpack.c.0.s8 %v1760_v59  ;;  %v5665_v0 = vpack.c.bf16 %v3809_v7, %v3801_v9  ;;  %v3664_v63 = vunpack.c.1.s8 %v1760_v59 }
 0x4f1   :  { %v5400_v5 = vcvt.s32.f32 %v3480_v56  ;;  %v1865_v35 = vunpack.c.0.s8 %v1313_v33  ;;  %v5408_v8 = vcvt.s32.f32 %v3488_v23  ;;  %v1873_v14 = vunpack.c.1.s8 %v1313_v33  ;;  %v1305_v33 = vld [vmem:[%s12559_s1 + $0xb8] sm:$0xff] }
 0x4f2   :  { %v6400_v31 = vpack.c.bf16 %v5280_v53, %v5272_v18  ;;  %v5576_v16 = vcvt.s32.f32 %v3656_v6  ;;  %7885 = vmatmul.bf16.vlgmr.msra.gmra.mxu2 %v10545_v22  ;;  %v5584_v11 = vcvt.s32.f32 %v3664_v63  ;;  %v3336_v24 = vunpack.c.0.s8 %v1680_v12 }
 0x4f3   :  { %7929 = vmatpush.bf16.msrb.mxu2 %v6560_v40  ;;  %v3785_v21 = vcvt.s32.f32 %v1865_v35  ;;  %v3344_v61 = vunpack.c.1.s8 %v1680_v12  ;;  %7898 = vmatmul.bf16.vlgmr.msrb.gmra.mxu3 %v10564_v30  ;;  %v6464_v59 = vpack.c.bf16 %v5408_v8, %v5400_v5  ;;  %v3793_v1 = vcvt.s32.f32 %v1873_v14  ;;  %v1672_v12 = vld [vmem:[%s12559_s1 + $0xc30] sm:$0xff] }
 0x4f4   :  { %7942 = vmatpush.bf16.msra.mxu3 %v5665_v0  ;;  %7907 = vmatpush.bf16.msrb.mxu0 %v6400_v31  ;;  %v3464_v34 = vunpack.c.0.s8 %v1712_v62  ;;  %v3472_v47 = vunpack.c.1.s8 %v1712_v62  ;;  %v6552_v17 = vpack.c.bf16 %v5584_v11, %v5576_v16  ;;  %v5256_v4 = vcvt.s32.f32 %v3336_v24  ;;  %v1704_v40 = vld [vmem:[%s12559_s1 + $0xd30] sm:$0xff] }
 0x4f5   :  { %v5264_v50 = vcvt.s32.f32 %v3344_v61  ;;  %v3640_v10 = vunpack.c.2.s8 %v1752_v39  ;;  %7920 = vmatpush.bf16.msrb.mxu1 %v6464_v59  ;;  %v5657_v26 = vpack.c.bf16 %v3793_v1, %v3785_v21  ;;  %v3648_v57 = vunpack.c.3.s8 %v1752_v39 }
 0x4f6   :  { %v5384_v42 = vcvt.s32.f32 %v3464_v34  ;;  %v5392_v62 = vcvt.s32.f32 %v3472_v47  ;;  %v1849_v56 = vunpack.c.2.s8 %v1305_v33  ;;  %v1857_v18 = vunpack.c.3.s8 %v1305_v33  ;;  %v12212_v47 = vld [vmem:[%s12559_s1 + $0x1f8] sm:$0xff] }
 0x4f7   :  { %7930 = vmatpush.bf16.msrb.mxu2 %v6552_v17  ;;  %v6392_v9 = vpack.c.bf16 %v5264_v50, %v5256_v4  ;;  %v5560_v7 = vcvt.s32.f32 %v3640_v10  ;;  %v5568_v23 = vcvt.s32.f32 %v3648_v57  ;;  %v3320_v6 = vunpack.c.2.s8 %v1672_v12  ;;  %v7706_v17 = vpop.f32.mrf.mxu0  ;;  %v7719_v4 = vpop.f32.mrf.mxu1 }
 0x4f8   :  { %7943 = vmatpush.bf16.msra.mxu3 %v5657_v26  ;;  %v6456_v53 = vpack.c.bf16 %v5392_v62, %v5384_v42  ;;  %v3328_v0 = vunpack.c.3.s8 %v1672_v12  ;;  %v3769_v5 = vcvt.s32.f32 %v1849_v56  ;;  %v3777_v63 = vcvt.s32.f32 %v1857_v18 }
 0x4f9   :  { %7908 = vmatpush.bf16.msrb.mxu0 %v6392_v9  ;;  %v3448_v35 = vunpack.c.2.s8 %v1704_v40  ;;  %v3456_v52 = vunpack.c.3.s8 %v1704_v40  ;;  %v6544_v41 = vpack.c.bf16 %v5568_v23, %v5560_v7  ;;  %v5240_v31 = vcvt.s32.f32 %v3320_v6  ;;  %v1744_v23 = vld [vmem:[%s12559_s1 + $0xe70] sm:$0xff] }
 0x4fa   :  { %7921 = vmatpush.bf16.msrb.mxu1 %v6456_v53  ;;  %v5248_v8 = vcvt.s32.f32 %v3328_v0  ;;  %v3624_v16 = vunpack.c.0.s8 %v1752_v39  ;;  %v5649_v14 = vpack.c.bf16 %v3777_v63, %v3769_v5  ;;  %v3632_v24 = vunpack.c.1.s8 %v1752_v39 }
 0x4fb   :  { %v5368_v11 = vcvt.s32.f32 %v3448_v35  ;;  %v5376_v21 = vcvt.s32.f32 %v3456_v52  ;;  %7931 = vmatpush.bf16.msrb.mxu2 %v6544_v41  ;;  %v1833_v1 = vunpack.c.0.s8 %v1305_v33  ;;  %v1841_v34 = vunpack.c.1.s8 %v1305_v33  ;;  %v1377_v33 = vld [vmem:[%s12559_s1 + $0x2f8] sm:$0xff] }
 0x4fc   :  { %v6384_v61 = vpack.c.bf16 %v5248_v8, %v5240_v31  ;;  %v5544_v59 = vcvt.s32.f32 %v3624_v16  ;;  %7944 = vmatpush.bf16.msra.mxu3 %v5649_v14  ;;  %v5552_v10 = vcvt.s32.f32 %v3632_v24  ;;  %v3304_v26 = vunpack.c.0.s8 %v1672_v12 }
 0x4fd   :  { %v6448_v50 = vpack.c.bf16 %v5376_v21, %v5368_v11  ;;  %v3312_v42 = vunpack.c.1.s8 %v1672_v12  ;;  %v3753_v62 = vcvt.s32.f32 %v1833_v1  ;;  %v3761_v39 = vcvt.s32.f32 %v1841_v34 }
 0x4fe   :  { %7909 = vmatpush.bf16.msrb.mxu0 %v6384_v61  ;;  %v3432_v57 = vunpack.c.0.s8 %v1704_v40  ;;  %v3440_v9 = vunpack.c.1.s8 %v1704_v40  ;;  %v6536_v7 = vpack.c.bf16 %v5552_v10, %v5544_v59  ;;  %v5224_v56 = vcvt.s32.f32 %v3304_v26  ;;  %v1297_v40 = vld [vmem:[%s12559_s1 + $0x78] sm:$0xff] }
 0x4ff   :  { %7922 = vmatpush.bf16.msrb.mxu1 %v6448_v50  ;;  %v5232_v18 = vcvt.s32.f32 %v3312_v42  ;;  %v2009_v53 = vunpack.c.2.s8 %v12212_v47  ;;  %v5641_v12 = vpack.c.bf16 %v3761_v39, %v3753_v62  ;;  %v2017_v5 = vunpack.c.3.s8 %v12212_v47 }
 0x500   :  { %v5352_v6 = vcvt.s32.f32 %v3432_v57  ;;  %v5360_v0 = vcvt.s32.f32 %v3440_v9  ;;  %7932 = vmatpush.bf16.msrb.mxu2 %v6536_v7  ;;  %v2137_v52 = vunpack.c.2.s8 %v1377_v33  ;;  %v2145_v41 = vunpack.c.3.s8 %v1377_v33  ;;  %v1337_v9 = vld [vmem:[%s12559_s1 + $0x1b8] sm:$0xff] }
 0x501   :  { %v6376_v63 = vpack.c.bf16 %v5232_v18, %v5224_v56  ;;  %v3929_v35 = vcvt.s32.f32 %v2009_v53  ;;  %7945 = vmatpush.bf16.msra.mxu3 %v5641_v12  ;;  %v3937_v8 = vcvt.s32.f32 %v2017_v5  ;;  %v3608_v16 = vunpack.c.2.s8 %v1744_v23 }
 0x502   :  { %v6440_v31 = vpack.c.bf16 %v5360_v0, %v5352_v6  ;;  %v3616_v14 = vunpack.c.3.s8 %v1744_v23  ;;  %v4057_v11 = vcvt.s32.f32 %v2137_v52  ;;  %v4065_v21 = vcvt.s32.f32 %v2145_v41 }
 0x503   :  { %7910 = vmatpush.bf16.msrb.mxu0 %v6376_v63  ;;  %v1817_v24 = vunpack.c.2.s8 %v1297_v40  ;;  %v1825_v61 = vunpack.c.3.s8 %v1297_v40  ;;  %v5729_v59 = vpack.c.bf16 %v3937_v8, %v3929_v35  ;;  %v5528_v1 = vcvt.s32.f32 %v3608_v16 }
 0x504   :  { %7923 = vmatpush.bf16.msrb.mxu1 %v6440_v31  ;;  %v5536_v34 = vcvt.s32.f32 %v3616_v14  ;;  %v7679_v17 = vadd.f32 %v12178_v19, %v12173_v28  ;;  %v5793_v4 = vpack.c.bf16 %v4065_v21, %v4057_v11  ;;  %v1993_v26 = vunpack.c.0.s8 %v12212_v47 }
 0x505   :  { %v3737_v50 = vcvt.s32.f32 %v1817_v24  ;;  %v3745_v10 = vcvt.s32.f32 %v1825_v61  ;;  %v2001_v39 = vunpack.c.1.s8 %v12212_v47  ;;  %v2121_v57 = vunpack.c.0.s8 %v1377_v33  ;;  %v1369_v47 = vld [vmem:[%s12559_s1 + $0x2b8] sm:$0xff] }
 0x506   :  { %v6528_v42 = vpack.c.bf16 %v5536_v34, %v5528_v1  ;;  %v7692_v62 = vadd.f32 %v12180_v43, %v7679_v17  ;;  %7911 = vmatmul.bf16.vlgmr.msrb.gmra.mxu0 %v10642_v37  ;;  %v3913_v28 = vcvt.s32.f32 %v1993_v26  ;;  %v2129_v19 = vunpack.c.1.s8 %v1377_v33  ;;  %v1736_v33 = vld [vmem:[%s12559_s1 + $0xe30] sm:$0xff] }
 0x507   :  { %7955 = vmatpush.bf16.msra.mxu0 %v5729_v59  ;;  %v5633_v7 = vpack.c.bf16 %v3745_v10, %v3737_v50  ;;  %v3592_v56 = vunpack.c.0.s8 %v1744_v23  ;;  %7924 = vmatmul.bf16.vlgmr.msrb.gmra.mxu1 %v10644_v46  ;;  %v3921_v18 = vcvt.s32.f32 %v2001_v39  ;;  %v4041_v53 = vcvt.s32.f32 %v2121_v57 }
 0x508   :  { %7968 = vmatpush.bf16.msra.mxu1 %v5793_v4  ;;  %7933 = vmatpush.bf16.msrb.mxu2 %v6528_v42  ;;  %v3600_v43 = vunpack.c.1.s8 %v1744_v23  ;;  %v1801_v12 = vunpack.c.0.s8 %v1297_v40  ;;  %v4049_v6 = vcvt.s32.f32 %v2129_v19  ;;  %v1809_v5 = vunpack.c.1.s8 %v1297_v40  ;;  %v1289_v23 = vld [vmem:[%s12559_s1 + $0x38] sm:$0xff] }
 0x509   :  { %7946 = vmatpush.bf16.msra.mxu3 %v5633_v7  ;;  %v5512_v0 = vcvt.s32.f32 %v3592_v56  ;;  %v1977_v63 = vunpack.c.2.s8 %v1337_v9  ;;  %v5721_v35 = vpack.c.bf16 %v3921_v18, %v3913_v28  ;;  %v1985_v31 = vunpack.c.3.s8 %v1337_v9 }
 0x50a   :  { %v5520_v52 = vcvt.s32.f32 %v3600_v43  ;;  %v3721_v41 = vcvt.s32.f32 %v1801_v12  ;;  %v5785_v8 = vpack.c.bf16 %v4049_v6, %v4041_v53  ;;  %v3729_v16 = vcvt.s32.f32 %v1809_v5 }
 0x50b   :  { %v3897_v14 = vcvt.s32.f32 %v1977_v63  ;;  %v2105_v11 = vunpack.c.2.s8 %v1369_v47  ;;  %7956 = vmatpush.bf16.msra.mxu0 %v5721_v35  ;;  %v3905_v40 = vcvt.s32.f32 %v1985_v31  ;;  %v2113_v24 = vunpack.c.3.s8 %v1369_v47  ;;  %v12251_v35 = vpop.f32.mrf.mxu2 }
 0x50c   :  { %v6520_v21 = vpack.c.bf16 %v5520_v52, %v5512_v0  ;;  %v3576_v61 = vunpack.c.2.s8 %v1736_v33  ;;  %7969 = vmatpush.bf16.msra.mxu1 %v5785_v8  ;;  %v5625_v59 = vpack.c.bf16 %v3729_v16, %v3721_v41  ;;  %v3584_v34 = vunpack.c.3.s8 %v1736_v33  ;;  %v1409_v0 = vld [vmem:[%s12559_s1 + $0x3f8] sm:$0xff]  ;;  %v12253_v52 = vpop.f32.mrf.mxu3 }
 0x50d   :  { %v4025_v1 = vcvt.s32.f32 %v2105_v11  ;;  %v1785_v17 = vunpack.c.2.s8 %v1289_v23  ;;  %v5713_v4 = vpack.c.bf16 %v3905_v40, %v3897_v14  ;;  %v4033_v50 = vcvt.s32.f32 %v2113_v24 }
 0x50e   :  { %7934 = vmatpush.bf16.msrb.mxu2 %v6520_v21  ;;  %v5496_v10 = vcvt.s32.f32 %v3576_v61  ;;  %v1793_v26 = vunpack.c.3.s8 %v1289_v23  ;;  %7947 = vmatpush.bf16.msra.mxu3 %v5625_v59  ;;  %v5504_v42 = vcvt.s32.f32 %v3584_v34  ;;  %v7705_v57 = vadd.f32 %v12199_v2, %v7692_v62  ;;  %v1329_v21 = vld [vmem:[%s12559_s1 + $0x178] sm:$0xff] }
 0x50f   :  { %v3705_v39 = vcvt.s32.f32 %v1785_v17  ;;  %v1961_v7 = vunpack.c.0.s8 %v1337_v9  ;;  %7957 = vmatpush.bf16.msra.mxu0 %v5713_v4  ;;  %v5777_v28 = vpack.c.bf16 %v4033_v50, %v4025_v1  ;;  %v1969_v56 = vunpack.c.1.s8 %v1337_v9 }
 0x510   :  { %v3713_v19 = vcvt.s32.f32 %v1793_v26  ;;  %v2089_v18 = vunpack.c.0.s8 %v1369_v47  ;;  %v6512_v53 = vpack.c.bf16 %v5504_v42, %v5496_v10  ;;  %v12246_v43 = vadd.f32 %v12201_v13, %v7705_v57 }
 0x511   :  { %v3881_v12 = vcvt.s32.f32 %v1961_v7  ;;  %v2097_v6 = vunpack.c.1.s8 %v1369_v47  ;;  %7970 = vmatpush.bf16.msra.mxu1 %v5777_v28  ;;  %v3889_v63 = vcvt.s32.f32 %v1969_v56  ;;  %v3560_v62 = vunpack.c.0.s8 %v1736_v33  ;;  %v1441_v47 = vld [vmem:[%s12559_s1 + $0x4f8] sm:$0xff] }
 0x512   :  { %v5617_v5 = vpack.c.bf16 %v3713_v19, %v3705_v39  ;;  %v4009_v2 = vcvt.s32.f32 %v2089_v18  ;;  %7935 = vmatpush.bf16.msrb.mxu2 %v6512_v53  ;;  %v3568_v41 = vunpack.c.1.s8 %v1736_v33  ;;  %v1769_v13 = vunpack.c.0.s8 %v1289_v23  ;;  %v1361_v33 = vld [vmem:[%s12559_s1 + $0x278] sm:$0xff] }
 0x513   :  { %v4017_v9 = vcvt.s32.f32 %v2097_v6  ;;  %v1777_v31 = vunpack.c.1.s8 %v1289_v23  ;;  %v5705_v8 = vpack.c.bf16 %v3889_v63, %v3881_v12  ;;  %v5480_v16 = vcvt.s32.f32 %v3560_v62  ;;  %v7732_v63 = vpop.f32.mrf.mxu2 }
 0x514   :  { %7948 = vmatpush.bf16.msra.mxu3 %v5617_v5  ;;  %v2265_v14 = vunpack.c.2.s8 %v1409_v0  ;;  %v2273_v11 = vunpack.c.3.s8 %v1409_v0  ;;  %v5488_v24 = vcvt.s32.f32 %v3568_v41  ;;  %v3689_v61 = vcvt.s32.f32 %v1769_v13 }
 0x515   :  { %v5769_v40 = vpack.c.bf16 %v4017_v9, %v4009_v2  ;;  %v3697_v59 = vcvt.s32.f32 %v1777_v31  ;;  %7958 = vmatpush.bf16.msra.mxu0 %v5705_v8  ;;  %v2393_v34 = vunpack.c.2.s8 %v1441_v47  ;;  %v2401_v17 = vunpack.c.3.s8 %v1441_v47  ;;  %v7745_v2 = vpop.f32.mrf.mxu3  ;;  %v1401_v31 = vld [vmem:[%s12559_s1 + $0x3b8] sm:$0xff] }
 0x516   :  { %v4185_v23 = vcvt.s32.f32 %v2265_v14  ;;  %v4193_v1 = vcvt.s32.f32 %v2273_v11  ;;  %v6504_v4 = vpack.c.bf16 %v5488_v24, %v5480_v16  ;;  %v1945_v10 = vunpack.c.2.s8 %v1329_v21 }
 0x517   :  { %7971 = vmatpush.bf16.msra.mxu1 %v5769_v40  ;;  %v5609_v50 = vpack.c.bf16 %v3697_v59, %v3689_v61  ;;  %v1953_v26 = vunpack.c.3.s8 %v1329_v21  ;;  %v4313_v39 = vcvt.s32.f32 %v2393_v34  ;;  %v4321_v57 = vcvt.s32.f32 %v2401_v17  ;;  %v1321_v17 = vld [vmem:[%s12559_s1 + $0x138] sm:$0xff] }
 0x518   :  { %v5857_v42 = vpack.c.bf16 %v4193_v1, %v4185_v23  ;;  %v2073_v7 = vunpack.c.2.s8 %v1361_v33  ;;  %7936 = vmatpush.bf16.msrb.mxu2 %v6504_v4  ;;  %v3865_v28 = vcvt.s32.f32 %v1945_v10  ;;  %v2081_v56 = vunpack.c.3.s8 %v1361_v33 }
 0x519   :  { %7949 = vmatpush.bf16.msra.mxu3 %v5609_v50  ;;  %v3873_v19 = vcvt.s32.f32 %v1953_v26  ;;  %v2249_v18 = vunpack.c.0.s8 %v1409_v0  ;;  %v5921_v53 = vpack.c.bf16 %v4321_v57, %v4313_v39  ;;  %v2257_v6 = vunpack.c.1.s8 %v1409_v0  ;;  %v1353_v26 = vld [vmem:[%s12559_s1 + $0x238] sm:$0xff] }
 0x51a   :  { %v3993_v12 = vcvt.s32.f32 %v2073_v7  ;;  %v2377_v5 = vunpack.c.0.s8 %v1441_v47  ;;  %v4001_v9 = vcvt.s32.f32 %v2081_v56  ;;  %v2385_v13 = vunpack.c.1.s8 %v1441_v47  ;;  %v1433_v47 = vld [vmem:[%s12559_s1 + $0x4b8] sm:$0xff] }
 0x51b   :  { %v5697_v62 = vpack.c.bf16 %v3873_v19, %v3865_v28  ;;  %v4169_v41 = vcvt.s32.f32 %v2249_v18  ;;  %7937 = vmatmul.bf16.vlgmr.msrb.gmra.mxu2 %v10665_v60  ;;  %v4177_v8 = vcvt.s32.f32 %v2257_v6  ;;  %v1929_v14 = vunpack.c.0.s8 %v1329_v21 }
 0x51c   :  { %7981 = vmatpush.bf16.msra.mxu2 %v5857_v42  ;;  %v4297_v16 = vcvt.s32.f32 %v2377_v5  ;;  %v1937_v11 = vunpack.c.1.s8 %v1329_v21  ;;  %7950 = vmatmul.bf16.vlgmr.msra.gmra.mxu3 %v12657_v32  ;;  %v5761_v0 = vpack.c.bf16 %v4001_v9, %v3993_v12  ;;  %v4305_v40 = vcvt.s32.f32 %v2385_v13  ;;  %v12275_v21 = vpop.f32.mrf.mxu0  ;;  %v12277_v32 = vpop.f32.mrf.mxu1 }
 0x51d   :  { %7994 = vmatpush.bf16.msrb.mxu3 %v5921_v53  ;;  %7959 = vmatpush.bf16.msra.mxu0 %v5697_v62  ;;  %v2057_v24 = vunpack.c.0.s8 %v1361_v33  ;;  %v2065_v61 = vunpack.c.1.s8 %v1361_v33  ;;  %v5849_v59 = vpack.c.bf16 %v4177_v8, %v4169_v41  ;;  %v3849_v23 = vcvt.s32.f32 %v1929_v14 }
 0x51e   :  { %v3857_v1 = vcvt.s32.f32 %v1937_v11  ;;  %v2233_v34 = vunpack.c.2.s8 %v1401_v31  ;;  %7972 = vmatpush.bf16.msra.mxu1 %v5761_v0  ;;  %v5913_v4 = vpack.c.bf16 %v4305_v40, %v4297_v16  ;;  %v2241_v10 = vunpack.c.3.s8 %v1401_v31 }
 0x51f   :  { %v3977_v50 = vcvt.s32.f32 %v2057_v24  ;;  %v3985_v33 = vcvt.s32.f32 %v2065_v61  ;;  %v2361_v57 = vunpack.c.2.s8 %v1433_v47  ;;  %v2369_v7 = vunpack.c.3.s8 %v1433_v47  ;;  %v12285_v24 = vld [vmem:[%s12559_s1 + $0x5f8] sm:$0xff] }
 0x520   :  { %7982 = vmatpush.bf16.msra.mxu2 %v5849_v59  ;;  %v5689_v42 = vpack.c.bf16 %v3857_v1, %v3849_v23  ;;  %v4153_v39 = vcvt.s32.f32 %v2233_v34  ;;  %v4161_v19 = vcvt.s32.f32 %v2241_v10  ;;  %v1913_v56 = vunpack.c.2.s8 %v1321_v17 }
 0x521   :  { %7995 = vmatpush.bf16.msrb.mxu3 %v5913_v4  ;;  %v5753_v28 = vpack.c.bf16 %v3985_v33, %v3977_v50  ;;  %v1921_v18 = vunpack.c.3.s8 %v1321_v17  ;;  %v4281_v53 = vcvt.s32.f32 %v2361_v57  ;;  %v4289_v12 = vcvt.s32.f32 %v2369_v7 }
 0x522   :  { %7960 = vmatpush.bf16.msra.mxu0 %v5689_v42  ;;  %v2041_v6 = vunpack.c.2.s8 %v1353_v26  ;;  %v2049_v5 = vunpack.c.3.s8 %v1353_v26  ;;  %v5841_v63 = vpack.c.bf16 %v4161_v19, %v4153_v39  ;;  %v3833_v2 = vcvt.s32.f32 %v1913_v56 }
 0x523   :  { %7973 = vmatpush.bf16.msra.mxu1 %v5753_v28  ;;  %v3841_v62 = vcvt.s32.f32 %v1921_v18  ;;  %v2217_v9 = vunpack.c.0.s8 %v1401_v31  ;;  %v5905_v41 = vpack.c.bf16 %v4289_v12, %v4281_v53  ;;  %v2225_v16 = vunpack.c.1.s8 %v1401_v31 }
 0x524   :  { %v3961_v13 = vcvt.s32.f32 %v2041_v6  ;;  %v3969_v8 = vcvt.s32.f32 %v2049_v5  ;;  %7983 = vmatpush.bf16.msra.mxu2 %v5841_v63  ;;  %v2345_v0 = vunpack.c.0.s8 %v1433_v47  ;;  %v2353_v40 = vunpack.c.1.s8 %v1433_v47  ;;  %v7758_v34 = vpop.f32.mrf.mxu0  ;;  %v7771_v4 = vpop.f32.mrf.mxu1  ;;  %v1505_v47 = vld [vmem:[%s12559_s1 + $0x6f8] sm:$0xff] }
 0x525   :  { %v5681_v14 = vpack.c.bf16 %v3841_v62, %v3833_v2  ;;  %v4137_v11 = vcvt.s32.f32 %v2217_v9  ;;  %7996 = vmatpush.bf16.msrb.mxu3 %v5905_v41  ;;  %v4145_v59 = vcvt.s32.f32 %v2225_v16  ;;  %v1897_v23 = vunpack.c.0.s8 %v1321_v17  ;;  %v12310_v4 = vld [vmem:[%s12561_s3] sm:$0xff] }
 0x526   :  { %v5745_v61 = vpack.c.bf16 %v3969_v8, %v3961_v13  ;;  %v1905_v1 = vunpack.c.1.s8 %v1321_v17  ;;  %v4265_v50 = vcvt.s32.f32 %v2345_v0  ;;  %v4273_v31 = vcvt.s32.f32 %v2353_v40  ;;  %v1393_v17 = vld [vmem:[%s12559_s1 + $0x378] sm:$0xff] }
 0x527   :  { %7961 = vmatpush.bf16.msra.mxu0 %v5681_v14  ;;  %v2025_v33 = vunpack.c.0.s8 %v1353_v26  ;;  %v2033_v10 = vunpack.c.1.s8 %v1353_v26  ;;  %v5833_v42 = vpack.c.bf16 %v4145_v59, %v4137_v11  ;;  %v3817_v39 = vcvt.s32.f32 %v1897_v23  ;;  %v12298_v26 = vld [vmem:[%s12559_s1 + $0x478] sm:$0xff] }
 0x528   :  { %7974 = vmatpush.bf16.msra.mxu1 %v5745_v61  ;;  %v3825_v57 = vcvt.s32.f32 %v1905_v1  ;;  %v2521_v7 = vunpack.c.2.s8 %v12285_v24  ;;  %v5897_v28 = vpack.c.bf16 %v4273_v31, %v4265_v50  ;;  %v2529_v18 = vunpack.c.3.s8 %v12285_v24  ;;  %v8493_v61 = vld [vmem:[%s12560_s2] sm:$0xff] }
 0x529   :  { %v3945_v19 = vcvt.s32.f32 %v2025_v33  ;;  %v3953_v56 = vcvt.s32.f32 %v2033_v10  ;;  %7984 = vmatpush.bf16.msra.mxu2 %v5833_v42  ;;  %v2649_v6 = vunpack.c.2.s8 %v1505_v47  ;;  %v2657_v5 = vunpack.c.3.s8 %v1505_v47 }
 0x52a   :  { %v5673_v53 = vpack.c.bf16 %v3825_v57, %v3817_v39  ;;  %v4441_v12 = vcvt.s32.f32 %v2521_v7  ;;  %7997 = vmatpush.bf16.msrb.mxu3 %v5897_v28  ;;  %v4449_v2 = vcvt.s32.f32 %v2529_v18  ;;  %v2201_v62 = vunpack.c.2.s8 %v1393_v17  ;;  %v1385_v18 = vld [vmem:[%s12559_s1 + $0x338] sm:$0xff] }
 0x52b   :  { %v5737_v63 = vpack.c.bf16 %v3953_v56, %v3945_v19  ;;  %v2209_v9 = vunpack.c.3.s8 %v1393_v17  ;;  %v4569_v41 = vcvt.s32.f32 %v2649_v6  ;;  %v4577_v13 = vcvt.s32.f32 %v2657_v5  ;;  %v1465_v19 = vld [vmem:[%s12559_s1 + $0x5b8] sm:$0xff] }
 0x52c   :  { %7962 = vmatpush.bf16.msra.mxu0 %v5673_v53  ;;  %v2329_v8 = vunpack.c.2.s8 %v12298_v26  ;;  %v2337_v16 = vunpack.c.3.s8 %v12298_v26  ;;  %v5985_v14 = vpack.c.bf16 %v4449_v2, %v4441_v12  ;;  %v4121_v11 = vcvt.s32.f32 %v2201_v62 }
 0x52d   :  { %7975 = vmatpush.bf16.msra.mxu1 %v5737_v63  ;;  %v4129_v0 = vcvt.s32.f32 %v2209_v9  ;;  %v7731_v40 = vadd.f32 %v12251_v35, %v12246_v43  ;;  %v8139_v59 = vperm.slane %v8493_v61, 0  ;;  %v6049_v23 = vpack.c.bf16 %v4577_v13, %v4569_v41 }
 0x52e   :  { %v4249_v1 = vcvt.s32.f32 %v2329_v8  ;;  %v4257_v34 = vcvt.s32.f32 %v2337_v16  ;;  %v8165_v50 = vperm.slane %v12310_v4, 0  ;;  %v2505_v43 = vunpack.c.0.s8 %v12285_v24 }
 0x52f   :  { %v5825_v31 = vpack.c.bf16 %v4129_v0, %v4121_v11  ;;  %v12314_v33 = vadd.f32 %v12253_v52, %v7731_v40  ;;  %7963 = vmatmul.bf16.vlgmr.msra.gmra.mxu0 %v12658_v27  ;;  %v2513_v10 = vunpack.c.1.s8 %v12285_v24  ;;  %v2633_v42 = vunpack.c.0.s8 %v1505_v47 }
 0x530   :  { %8007 = vmatpush.bf16.msrb.mxu0 %v5985_v14  ;;  %v5889_v35 = vpack.c.bf16 %v4257_v34, %v4249_v1  ;;  %v2641_v39 = vunpack.c.1.s8 %v1505_v47  ;;  %v12322_v57 = vadd.f32 %v8166_v44, %v12037_v29  ;;  %7976 = vmatmul.bf16.vlgmr.msra.gmra.mxu1 %v12639_v25  ;;  %v4425_v52 = vcvt.s32.f32 %v2505_v43 }
 0x531   :  { %8020 = vmatpush.bf16.msrb.mxu1 %v6049_v23  ;;  %7985 = vmatpush.bf16.msra.mxu2 %v5825_v31  ;;  %v2185_v7 = vunpack.c.0.s8 %v1393_v17  ;;  %v2193_v28 = vunpack.c.1.s8 %v1393_v17  ;;  %v4433_v27 = vcvt.s32.f32 %v2513_v10  ;;  %v4553_v24 = vcvt.s32.f32 %v2633_v42  ;;  %v1497_v17 = vld [vmem:[%s12559_s1 + $0x6b8] sm:$0xff] }
 0x532   :  { %7998 = vmatpush.bf16.msrb.mxu3 %v5889_v35  ;;  %v4561_v56 = vcvt.s32.f32 %v2641_v39  ;;  %v2313_v47 = vunpack.c.0.s8 %v12298_v26  ;;  %v12330_v20 = vmul.f32 %v8139_v59, %v10970_v51  ;;  %v2321_v25 = vunpack.c.1.s8 %v12298_v26  ;;  %v1417_v51 = vld [vmem:[%s12559_s1 + $0x438] sm:$0xff] }
 0x533   :  { %v4105_v44 = vcvt.s32.f32 %v2185_v7  ;;  %v4113_v29 = vcvt.s32.f32 %v2193_v28  ;;  %v5977_v53 = vpack.c.bf16 %v4433_v27, %v4425_v52  ;;  %v2489_v5 = vunpack.c.2.s8 %v1465_v19 }
 0x534   :  { %v6041_v12 = vpack.c.bf16 %v4561_v56, %v4553_v24  ;;  %v4233_v6 = vcvt.s32.f32 %v2313_v47  ;;  %v8197_v63 = vrot.slane %v12322_v57, 7  ;;  %v4241_v26 = vcvt.s32.f32 %v2321_v25  ;;  %v1537_v24 = vld [vmem:[%s12559_s1 + $0x7f8] sm:$0xff] }
 0x535   :  { %v5817_v2 = vpack.c.bf16 %v4113_v29, %v4105_v44  ;;  %v2497_v62 = vunpack.c.3.s8 %v1465_v19  ;;  %8008 = vmatpush.bf16.msrb.mxu0 %v5977_v53  ;;  %v4409_v9 = vcvt.s32.f32 %v2489_v5  ;;  %v2617_v41 = vunpack.c.2.s8 %v1497_v17 }
 0x536   :  { %8021 = vmatpush.bf16.msrb.mxu1 %v6041_v12  ;;  %v2625_v13 = vunpack.c.3.s8 %v1497_v17  ;;  %v2169_v8 = vunpack.c.2.s8 %v1385_v18  ;;  %v5881_v16 = vpack.c.bf16 %v4241_v26, %v4233_v6  ;;  %v2177_v11 = vunpack.c.3.s8 %v1385_v18 }
 0x537   :  { %7986 = vmatpush.bf16.msra.mxu2 %v5817_v2  ;;  %v4417_v14 = vcvt.s32.f32 %v2497_v62  ;;  %v2297_v0 = vunpack.c.2.s8 %v1417_v51  ;;  %v4537_v40 = vcvt.s32.f32 %v2617_v41  ;;  %v2305_v23 = vunpack.c.3.s8 %v1417_v51 }
 0x538   :  { %v4545_v61 = vcvt.s32.f32 %v2625_v13  ;;  %v4089_v59 = vcvt.s32.f32 %v2169_v8  ;;  %7999 = vmatpush.bf16.msrb.mxu3 %v5881_v16  ;;  %v4097_v34 = vcvt.s32.f32 %v2177_v11  ;;  %v12345_v43 = vadd.f32 %v12277_v32, %v12275_v21  ;;  %v1569_v21 = vld [vmem:[%s12559_s1 + $0x8f8] sm:$0xff]  ;;  %v12353_v32 = vpop.f32.mrf.mxu2 }
 0x539   :  { %v5969_v1 = vpack.c.bf16 %v4417_v14, %v4409_v9  ;;  %v4217_v31 = vcvt.s32.f32 %v2297_v0  ;;  %v4225_v10 = vcvt.s32.f32 %v2305_v23  ;;  %v2473_v42 = vunpack.c.0.s8 %v1465_v19  ;;  %v1489_v8 = vld [vmem:[%s12559_s1 + $0x678] sm:$0xff] }
 0x53a   :  { %v6033_v35 = vpack.c.bf16 %v4545_v61, %v4537_v40  ;;  %v2481_v39 = vunpack.c.1.s8 %v1465_v19  ;;  %v5809_v52 = vpack.c.bf16 %v4097_v34, %v4089_v59  ;;  %v2601_v7 = vunpack.c.0.s8 %v1497_v17  ;;  %v12355_v19 = vpop.f32.mrf.mxu3 }
 0x53b   :  { %8009 = vmatpush.bf16.msrb.mxu0 %v5969_v1  ;;  %v2609_v28 = vunpack.c.1.s8 %v1497_v17  ;;  %v2153_v27 = vunpack.c.0.s8 %v1385_v18  ;;  %v5873_v56 = vpack.c.bf16 %v4225_v10, %v4217_v31  ;;  %v4393_v47 = vcvt.s32.f32 %v2473_v42 }
 0x53c   :  { %8022 = vmatpush.bf16.msrb.mxu1 %v6033_v35  ;;  %v4401_v44 = vcvt.s32.f32 %v2481_v39  ;;  %v2161_v29 = vunpack.c.1.s8 %v1385_v18  ;;  %7987 = vmatpush.bf16.msra.mxu2 %v5809_v52  ;;  %v4521_v25 = vcvt.s32.f32 %v2601_v7  ;;  %v2281_v12 = vunpack.c.0.s8 %v1417_v51  ;;  %v1457_v18 = vld [vmem:[%s12559_s1 + $0x578] sm:$0xff] }
 0x53d   :  { %v4529_v17 = vcvt.s32.f32 %v2609_v28  ;;  %v4073_v53 = vcvt.s32.f32 %v2153_v27  ;;  %8000 = vmatpush.bf16.msrb.mxu3 %v5873_v56  ;;  %v2289_v2 = vunpack.c.1.s8 %v1417_v51  ;;  %v2777_v26 = vunpack.c.2.s8 %v1537_v24 }
 0x53e   :  { %v5961_v6 = vpack.c.bf16 %v4401_v44, %v4393_v47  ;;  %v4081_v5 = vcvt.s32.f32 %v2161_v29  ;;  %v4201_v9 = vcvt.s32.f32 %v2281_v12  ;;  %v2785_v41 = vunpack.c.3.s8 %v1537_v24 }
 0x53f   :  { %v6025_v62 = vpack.c.bf16 %v4529_v17, %v4521_v25  ;;  %v2905_v13 = vunpack.c.2.s8 %v1569_v21  ;;  %v4209_v14 = vcvt.s32.f32 %v2289_v2  ;;  %v4697_v11 = vcvt.s32.f32 %v2777_v26 }
 0x540   :  { %8010 = vmatpush.bf16.msrb.mxu0 %v5961_v6  ;;  %v5801_v16 = vpack.c.bf16 %v4081_v5, %v4073_v53  ;;  %v2913_v0 = vunpack.c.3.s8 %v1569_v21  ;;  %v4705_v51 = vcvt.s32.f32 %v2785_v41  ;;  %v2457_v61 = vunpack.c.2.s8 %v1457_v18  ;;  %v7784_v56 = vpop.f32.mrf.mxu2  ;;  %v1529_v53 = vld [vmem:[%s12559_s1 + $0x7b8] sm:$0xff]  ;;  %v12371_v41 = vpop.f32.mrf.mxu0 }
 0x541   :  { %8023 = vmatpush.bf16.msrb.mxu1 %v6025_v62  ;;  %v4825_v40 = vcvt.s32.f32 %v2905_v13  ;;  %v2465_v59 = vunpack.c.3.s8 %v1457_v18  ;;  %v5865_v23 = vpack.c.bf16 %v4209_v14, %v4201_v9  ;;  %v2585_v34 = vunpack.c.2.s8 %v1489_v8  ;;  %v12373_v13 = vpop.f32.mrf.mxu1 }
 0x542   :  { %7988 = vmatpush.bf16.msra.mxu2 %v5801_v16  ;;  %v4833_v1 = vcvt.s32.f32 %v2913_v0  ;;  %v2593_v31 = vunpack.c.3.s8 %v1489_v8  ;;  %v6113_v35 = vpack.c.bf16 %v4705_v51, %v4697_v11  ;;  %v4377_v10 = vcvt.s32.f32 %v2457_v61  ;;  %v7797_v47 = vpop.f32.mrf.mxu3 }
 0x543   :  { %v4385_v42 = vcvt.s32.f32 %v2465_v59  ;;  %v2761_v39 = vunpack.c.0.s8 %v1537_v24  ;;  %8001 = vmatpush.bf16.msrb.mxu3 %v5865_v23  ;;  %v4505_v7 = vcvt.s32.f32 %v2585_v34  ;;  %v2769_v27 = vunpack.c.1.s8 %v1537_v24 }
 0x544   :  { %v6177_v52 = vpack.c.bf16 %v4833_v1, %v4825_v40  ;;  %v4513_v28 = vcvt.s32.f32 %v2593_v31  ;;  %v2889_v25 = vunpack.c.0.s8 %v1569_v21  ;;  %v2897_v17 = vunpack.c.1.s8 %v1569_v21  ;;  %v1561_v21 = vld [vmem:[%s12559_s1 + $0x8b8] sm:$0xff] }
 0x545   :  { %v5953_v44 = vpack.c.bf16 %v4385_v42, %v4377_v10  ;;  %v4681_v29 = vcvt.s32.f32 %v2761_v39  ;;  %7989 = vmatmul.bf16.vlgmr.msra.gmra.mxu2 %v9894_v55  ;;  %v4689_v6 = vcvt.s32.f32 %v2769_v27  ;;  %v2441_v5 = vunpack.c.0.s8 %v1457_v18  ;;  %v1481_v40 = vld [vmem:[%s12559_s1 + $0x638] sm:$0xff] }
 0x546   :  { %8033 = vmatpush.bf16.msrb.mxu2 %v6113_v35  ;;  %v6017_v12 = vpack.c.bf16 %v4513_v28, %v4505_v7  ;;  %v2449_v2 = vunpack.c.1.s8 %v1457_v18  ;;  %8002 = vmatmul.bf16.vlgmr.msrb.gmra.mxu3 %v9969_v58  ;;  %v4809_v24 = vcvt.s32.f32 %v2889_v25  ;;  %v4817_v26 = vcvt.s32.f32 %v2897_v17  ;;  %v1449_v58 = vld [vmem:[%s12559_s1 + $0x538] sm:$0xff] }
 0x547   :  { %8046 = vmatpush.bf16.msra.mxu3 %v6177_v52  ;;  %8011 = vmatpush.bf16.msrb.mxu0 %v5953_v44  ;;  %v2569_v62 = vunpack.c.0.s8 %v1489_v8  ;;  %v2577_v9 = vunpack.c.1.s8 %v1489_v8  ;;  %v6105_v55 = vpack.c.bf16 %v4689_v6, %v4681_v29  ;;  %v4361_v16 = vcvt.s32.f32 %v2441_v5 }
 0x548   :  { %8024 = vmatpush.bf16.msrb.mxu1 %v6017_v12  ;;  %v4369_v14 = vcvt.s32.f32 %v2449_v2  ;;  %v2745_v18 = vunpack.c.2.s8 %v1529_v53  ;;  %v6169_v11 = vpack.c.bf16 %v4817_v26, %v4809_v24  ;;  %v2753_v51 = vunpack.c.3.s8 %v1529_v53  ;;  %v12384_v24 = vld [vmem:[%s12559_s1 + $0x9f8] sm:$0xff]  ;;  %v7810_v26 = vpop.f32.mrf.mxu0 }
 0x549   :  { %v4489_v0 = vcvt.s32.f32 %v2569_v62  ;;  %v4497_v8 = vcvt.s32.f32 %v2577_v9  ;;  %v2873_v23 = vunpack.c.2.s8 %v1561_v21  ;;  %v2881_v1 = vunpack.c.3.s8 %v1561_v21  ;;  %v7823_v62 = vpop.f32.mrf.mxu1 }
 0x54a   :  { %8034 = vmatpush.bf16.msrb.mxu2 %v6105_v55  ;;  %v5945_v61 = vpack.c.bf16 %v4369_v14, %v4361_v16  ;;  %v4665_v59 = vcvt.s32.f32 %v2745_v18  ;;  %v4673_v31 = vcvt.s32.f32 %v2753_v51  ;;  %v2425_v35 = vunpack.c.2.s8 %v1449_v58 }
 0x54b   :  { %8047 = vmatpush.bf16.msra.mxu3 %v6169_v11  ;;  %v6009_v34 = vpack.c.bf16 %v4497_v8, %v4489_v0  ;;  %v2433_v10 = vunpack.c.3.s8 %v1449_v58  ;;  %v4793_v42 = vcvt.s32.f32 %v2873_v23  ;;  %v4801_v39 = vcvt.s32.f32 %v2881_v1  ;;  %v1521_v23 = vld [vmem:[%s12559_s1 + $0x778] sm:$0xff] }
 0x54c   :  { %8012 = vmatpush.bf16.msrb.mxu0 %v5945_v61  ;;  %v2553_v52 = vunpack.c.2.s8 %v1481_v40  ;;  %v2561_v7 = vunpack.c.3.s8 %v1481_v40  ;;  %v6097_v28 = vpack.c.bf16 %v4673_v31, %v4665_v59  ;;  %v4345_v27 = vcvt.s32.f32 %v2425_v35 }
 0x54d   :  { %8025 = vmatpush.bf16.msrb.mxu1 %v6009_v34  ;;  %v4353_v56 = vcvt.s32.f32 %v2433_v10  ;;  %v2729_v47 = vunpack.c.0.s8 %v1529_v53  ;;  %v6161_v44 = vpack.c.bf16 %v4801_v39, %v4793_v42  ;;  %v2737_v17 = vunpack.c.1.s8 %v1529_v53 }
 0x54e   :  { %v4473_v29 = vcvt.s32.f32 %v2553_v52  ;;  %v4481_v25 = vcvt.s32.f32 %v2561_v7  ;;  %8035 = vmatpush.bf16.msrb.mxu2 %v6097_v28  ;;  %v2857_v5 = vunpack.c.0.s8 %v1561_v21  ;;  %v2865_v2 = vunpack.c.1.s8 %v1561_v21  ;;  %v1633_v21 = vld [vmem:[%s12559_s1 + $0xaf8] sm:$0xff] }
 0x54f   :  { %v5937_v12 = vpack.c.bf16 %v4353_v56, %v4345_v27  ;;  %v4649_v6 = vcvt.s32.f32 %v2729_v47  ;;  %8048 = vmatpush.bf16.msra.mxu3 %v6161_v44  ;;  %v4657_v55 = vcvt.s32.f32 %v2737_v17  ;;  %v2409_v16 = vunpack.c.0.s8 %v1449_v58 }
 0x550   :  { %v6001_v9 = vpack.c.bf16 %v4481_v25, %v4473_v29  ;;  %v2417_v14 = vunpack.c.1.s8 %v1449_v58  ;;  %v4777_v18 = vcvt.s32.f32 %v2857_v5  ;;  %v4785_v53 = vcvt.s32.f32 %v2865_v2 }
 0x551   :  { %8013 = vmatpush.bf16.msrb.mxu0 %v5937_v12  ;;  %v2537_v11 = vunpack.c.0.s8 %v1481_v40  ;;  %v2545_v0 = vunpack.c.1.s8 %v1481_v40  ;;  %v6089_v8 = vpack.c.bf16 %v4657_v55, %v4649_v6  ;;  %v4329_v51 = vcvt.s32.f32 %v2409_v16  ;;  %v1553_v40 = vld [vmem:[%s12559_s1 + $0x878] sm:$0xff] }
 0x552   :  { %8026 = vmatpush.bf16.msrb.mxu1 %v6001_v9  ;;  %v4337_v61 = vcvt.s32.f32 %v2417_v14  ;;  %v3033_v59 = vunpack.c.2.s8 %v12384_v24  ;;  %v6153_v58 = vpack.c.bf16 %v4785_v53, %v4777_v18  ;;  %v3041_v31 = vunpack.c.3.s8 %v12384_v24  ;;  %v1593_v18 = vld [vmem:[%s12559_s1 + $0x9b8] sm:$0xff] }
 0x553   :  { %v4457_v1 = vcvt.s32.f32 %v2537_v11  ;;  %v4465_v34 = vcvt.s32.f32 %v2545_v0  ;;  %8036 = vmatpush.bf16.msrb.mxu2 %v6089_v8  ;;  %v3161_v42 = vunpack.c.2.s8 %v1633_v21  ;;  %v3169_v39 = vunpack.c.3.s8 %v1633_v21 }
 0x554   :  { %v5929_v35 = vpack.c.bf16 %v4337_v61, %v4329_v51  ;;  %v4953_v10 = vcvt.s32.f32 %v3033_v59  ;;  %8049 = vmatpush.bf16.msra.mxu3 %v6153_v58  ;;  %v4961_v7 = vcvt.s32.f32 %v3041_v31  ;;  %v2713_v28 = vunpack.c.2.s8 %v1521_v23 }
 0x555   :  { %v5993_v52 = vpack.c.bf16 %v4465_v34, %v4457_v1  ;;  %v2721_v27 = vunpack.c.3.s8 %v1521_v23  ;;  %v5081_v56 = vcvt.s32.f32 %v3161_v42  ;;  %v5089_v47 = vcvt.s32.f32 %v3169_v39 }
 0x556   :  { %8014 = vmatpush.bf16.msrb.mxu0 %v5929_v35  ;;  %v2841_v44 = vunpack.c.2.s8 %v1553_v40  ;;  %v2849_v29 = vunpack.c.3.s8 %v1553_v40  ;;  %v6241_v25 = vpack.c.bf16 %v4961_v7, %v4953_v10  ;;  %v4633_v17 = vcvt.s32.f32 %v2713_v28 }
 0x557   :  { %8027 = vmatpush.bf16.msrb.mxu1 %v5993_v52  ;;  %v4641_v12 = vcvt.s32.f32 %v2721_v27  ;;  %v7783_v6 = vadd.f32 %v12353_v32, %v12345_v43  ;;  %v6305_v5 = vpack.c.bf16 %v5089_v47, %v5081_v56  ;;  %v3017_v62 = vunpack.c.0.s8 %v12384_v24 }
 0x558   :  { %v4761_v2 = vcvt.s32.f32 %v2841_v44  ;;  %v4769_v26 = vcvt.s32.f32 %v2849_v29  ;;  %v3025_v16 = vunpack.c.1.s8 %v12384_v24  ;;  %v3145_v14 = vunpack.c.0.s8 %v1633_v21  ;;  %v1625_v24 = vld [vmem:[%s12559_s1 + $0xab8] sm:$0xff] }
 0x559   :  { %v6081_v9 = vpack.c.bf16 %v4641_v12, %v4633_v17  ;;  %v7796_v55 = vadd.f32 %v12355_v19, %v7783_v6  ;;  %8015 = vmatmul.bf16.vlgmr.msrb.gmra.mxu0 %v9975_v3  ;;  %v4937_v43 = vcvt.s32.f32 %v3017_v62  ;;  %v3153_v32 = vunpack.c.1.s8 %v1633_v21  ;;  %v1513_v3 = vld [vmem:[%s12559_s1 + $0x738] sm:$0xff] }
 0x55a   :  { %8059 = vmatpush.bf16.msra.mxu0 %v6241_v25  ;;  %v6145_v53 = vpack.c.bf16 %v4769_v26, %v4761_v2  ;;  %v2697_v11 = vunpack.c.0.s8 %v1521_v23  ;;  %8028 = vmatmul.bf16.vlgmr.msrb.gmra.mxu1 %v10260_v49  ;;  %v4945_v0 = vcvt.s32.f32 %v3025_v16  ;;  %v5065_v8 = vcvt.s32.f32 %v3145_v14 }
 0x55b   :  { %8072 = vmatpush.bf16.msra.mxu1 %v6305_v5  ;;  %8037 = vmatpush.bf16.msrb.mxu2 %v6081_v9  ;;  %v2705_v19 = vunpack.c.1.s8 %v1521_v23  ;;  %v2825_v51 = vunpack.c.0.s8 %v1553_v40  ;;  %v5073_v61 = vcvt.s32.f32 %v3153_v32  ;;  %v2833_v58 = vunpack.c.1.s8 %v1553_v40  ;;  %v1545_v23 = vld [vmem:[%s12559_s1 + $0x838] sm:$0xff] }
 0x55c   :  { %8050 = vmatpush.bf16.msra.mxu3 %v6145_v53  ;;  %v4617_v59 = vcvt.s32.f32 %v2697_v11  ;;  %v3001_v1 = vunpack.c.2.s8 %v1593_v18  ;;  %v6233_v21 = vpack.c.bf16 %v4945_v0, %v4937_v43  ;;  %v3009_v31 = vunpack.c.3.s8 %v1593_v18  ;;  %v1665_v0 = vld [vmem:[%s12559_s1 + $0xbf8] sm:$0xff] }
 0x55d   :  { %v4625_v34 = vcvt.s32.f32 %v2705_v19  ;;  %v4745_v49 = vcvt.s32.f32 %v2825_v51  ;;  %v6297_v35 = vpack.c.bf16 %v5073_v61, %v5065_v8  ;;  %v4753_v10 = vcvt.s32.f32 %v2833_v58  ;;  %v12423_v51 = vpop.f32.mrf.mxu2  ;;  %v12425_v61 = vpop.f32.mrf.mxu3 }
 0x55e   :  { %v4921_v42 = vcvt.s32.f32 %v3001_v1  ;;  %v3129_v39 = vunpack.c.2.s8 %v1625_v24  ;;  %8060 = vmatpush.bf16.msra.mxu0 %v6233_v21  ;;  %v4929_v40 = vcvt.s32.f32 %v3009_v31  ;;  %v3137_v7 = vunpack.c.3.s8 %v1625_v24  ;;  %v1585_v31 = vld [vmem:[%s12559_s1 + $0x978] sm:$0xff] }
 0x55f   :  { %v6073_v52 = vpack.c.bf16 %v4625_v34, %v4617_v59  ;;  %v2681_v28 = vunpack.c.2.s8 %v1513_v3  ;;  %8073 = vmatpush.bf16.msra.mxu1 %v6297_v35  ;;  %v6137_v27 = vpack.c.bf16 %v4753_v10, %v4745_v49  ;;  %v2689_v47 = vunpack.c.3.s8 %v1513_v3 }
 0x560   :  { %v5049_v56 = vcvt.s32.f32 %v3129_v39  ;;  %v2809_v44 = vunpack.c.2.s8 %v1545_v23  ;;  %v6225_v29 = vpack.c.bf16 %v4929_v40, %v4921_v42  ;;  %v5057_v25 = vcvt.s32.f32 %v3137_v7 }
 0x561   :  { %8038 = vmatpush.bf16.msrb.mxu2 %v6073_v52  ;;  %v4601_v17 = vcvt.s32.f32 %v2681_v28  ;;  %v2817_v12 = vunpack.c.3.s8 %v1545_v23  ;;  %8051 = vmatpush.bf16.msra.mxu3 %v6137_v27  ;;  %v4609_v6 = vcvt.s32.f32 %v2689_v47  ;;  %v7809_v2 = vadd.f32 %v12371_v41, %v7796_v55 }
 0x562   :  { %v4729_v5 = vcvt.s32.f32 %v2809_v44  ;;  %v2985_v26 = vunpack.c.0.s8 %v1593_v18  ;;  %8061 = vmatpush.bf16.msra.mxu0 %v6225_v29  ;;  %v6289_v62 = vpack.c.bf16 %v5057_v25, %v5049_v56  ;;  %v2993_v16 = vunpack.c.1.s8 %v1593_v18 }
 0x563   :  { %v4737_v9 = vcvt.s32.f32 %v2817_v12  ;;  %v3113_v14 = vunpack.c.0.s8 %v1625_v24  ;;  %v6065_v53 = vpack.c.bf16 %v4609_v6, %v4601_v17  ;;  %v12418_v43 = vadd.f32 %v12373_v13, %v7809_v2 }
 0x564   :  { %v4905_v32 = vcvt.s32.f32 %v2985_v26  ;;  %v3121_v11 = vunpack.c.1.s8 %v1625_v24  ;;  %8074 = vmatpush.bf16.msra.mxu1 %v6289_v62  ;;  %v4913_v19 = vcvt.s32.f32 %v2993_v16  ;;  %v2665_v55 = vunpack.c.0.s8 %v1513_v3  ;;  %v1697_v24 = vld [vmem:[%s12559_s1 + $0xcf8] sm:$0xff] }
 0x565   :  { %v6129_v8 = vpack.c.bf16 %v4737_v9, %v4729_v5  ;;  %v5033_v41 = vcvt.s32.f32 %v3113_v14  ;;  %8039 = vmatpush.bf16.msrb.mxu2 %v6065_v53  ;;  %v2673_v59 = vunpack.c.1.s8 %v1513_v3  ;;  %v2793_v13 = vunpack.c.0.s8 %v1545_v23  ;;  %v1617_v3 = vld [vmem:[%s12559_s1 + $0xa78] sm:$0xff]  ;;  %v7836_v14 = vpop.f32.mrf.mxu2  ;;  %v7849_v53 = vpop.f32.mrf.mxu3 }
 0x566   :  { %v5041_v18 = vcvt.s32.f32 %v3121_v11  ;;  %v2801_v58 = vunpack.c.1.s8 %v1545_v23  ;;  %v6217_v1 = vpack.c.bf16 %v4913_v19, %v4905_v32  ;;  %v4585_v21 = vcvt.s32.f32 %v2665_v55 }
 0x567   :  { %8052 = vmatpush.bf16.msra.mxu3 %v6129_v8  ;;  %v3289_v34 = vunpack.c.2.s8 %v1665_v0  ;;  %v3297_v49 = vunpack.c.3.s8 %v1665_v0  ;;  %v4593_v10 = vcvt.s32.f32 %v2673_v59  ;;  %v4713_v42 = vcvt.s32.f32 %v2793_v13 }
 0x568   :  { %v6281_v35 = vpack.c.bf16 %v5041_v18, %v5033_v41  ;;  %v4721_v39 = vcvt.s32.f32 %v2801_v58  ;;  %8062 = vmatpush.bf16.msra.mxu0 %v6217_v1  ;;  %v3417_v40 = vunpack.c.2.s8 %v1697_v24  ;;  %v3425_v7 = vunpack.c.3.s8 %v1697_v24  ;;  %v1657_v41 = vld [vmem:[%s12559_s1 + $0xbb8] sm:$0xff] }
 0x569   :  { %v5209_v23 = vcvt.s32.f32 %v3289_v34  ;;  %v5217_v52 = vcvt.s32.f32 %v3297_v49  ;;  %v6057_v28 = vpack.c.bf16 %v4593_v10, %v4585_v21  ;;  %v2969_v56 = vunpack.c.2.s8 %v1585_v31  ;;  %v12444_v34 = vpop.f32.mrf.mxu0  ;;  %v12446_v49 = vpop.f32.mrf.mxu1 }
 0x56a   :  { %8075 = vmatpush.bf16.msra.mxu1 %v6281_v35  ;;  %v6121_v27 = vpack.c.bf16 %v4721_v39, %v4713_v42  ;;  %v2977_v47 = vunpack.c.3.s8 %v1585_v31  ;;  %v5337_v29 = vcvt.s32.f32 %v3417_v40  ;;  %v5345_v25 = vcvt.s32.f32 %v3425_v7 }
 0x56b   :  { %v6369_v44 = vpack.c.bf16 %v5217_v52, %v5209_v23  ;;  %v3097_v17 = vunpack.c.2.s8 %v1617_v3  ;;  %8040 = vmatpush.bf16.msrb.mxu2 %v6057_v28  ;;  %v4889_v12 = vcvt.s32.f32 %v2969_v56  ;;  %v3105_v5 = vunpack.c.3.s8 %v1617_v3  ;;  %v1609_v52 = vld [vmem:[%s12559_s1 + $0xa38] sm:$0xff] }
 0x56c   :  { %8053 = vmatpush.bf16.msra.mxu3 %v6121_v27  ;;  %v4897_v6 = vcvt.s32.f32 %v2977_v47  ;;  %v3273_v2 = vunpack.c.0.s8 %v1665_v0  ;;  %v6433_v26 = vpack.c.bf16 %v5345_v25, %v5337_v29  ;;  %v3281_v9 = vunpack.c.1.s8 %v1665_v0 }
 0x56d   :  { %v5017_v62 = vcvt.s32.f32 %v3097_v17  ;;  %v3401_v16 = vunpack.c.0.s8 %v1697_v24  ;;  %v5025_v11 = vcvt.s32.f32 %v3105_v5  ;;  %v3409_v19 = vunpack.c.1.s8 %v1697_v24  ;;  %v1689_v24 = vld [vmem:[%s12559_s1 + $0xcb8] sm:$0xff] }
 0x56e   :  { %v6209_v32 = vpack.c.bf16 %v4897_v6, %v4889_v12  ;;  %v5193_v8 = vcvt.s32.f32 %v3273_v2  ;;  %8041 = vmatmul.bf16.vlgmr.msrb.gmra.mxu2 %v10318_v45  ;;  %v5201_v55 = vcvt.s32.f32 %v3281_v9  ;;  %v2953_v59 = vunpack.c.0.s8 %v1585_v31 }
 0x56f   :  { %8085 = vmatpush.bf16.msra.mxu2 %v6369_v44  ;;  %v5321_v18 = vcvt.s32.f32 %v3401_v16  ;;  %v2961_v13 = vunpack.c.1.s8 %v1585_v31  ;;  %8054 = vmatmul.bf16.vlgmr.msra.gmra.mxu3 %v10505_v15  ;;  %v6273_v0 = vpack.c.bf16 %v5025_v11, %v5017_v62  ;;  %v5329_v58 = vcvt.s32.f32 %v3409_v19  ;;  %v1577_v15 = vld [vmem:[%s12559_s1 + $0x938] sm:$0xff] }
 0x570   :  { %8098 = vmatpush.bf16.msrb.mxu3 %v6433_v26  ;;  %8063 = vmatpush.bf16.msra.mxu0 %v6209_v32  ;;  %v3081_v1 = vunpack.c.0.s8 %v1617_v3  ;;  %v3089_v21 = vunpack.c.1.s8 %v1617_v3  ;;  %v6361_v45 = vpack.c.bf16 %v5201_v55, %v5193_v8  ;;  %v4873_v35 = vcvt.s32.f32 %v2953_v59  ;;  %v12457_v55 = vld [vmem:[%s12559_s1 + $0xdf8] sm:$0xff] }
 0x571   :  { %v4881_v10 = vcvt.s32.f32 %v2961_v13  ;;  %v3257_v42 = vunpack.c.2.s8 %v1657_v41  ;;  %8076 = vmatpush.bf16.msra.mxu1 %v6273_v0  ;;  %v6425_v31 = vpack.c.bf16 %v5329_v58, %v5321_v18  ;;  %v3265_v23 = vunpack.c.3.s8 %v1657_v41  ;;  %v7862_v18 = vpop.f32.mrf.mxu0  ;;  %v7875_v59 = vpop.f32.mrf.mxu1 }
 0x572   :  { %v5001_v39 = vcvt.s32.f32 %v3081_v1  ;;  %v5009_v3 = vcvt.s32.f32 %v3089_v21  ;;  %v3385_v28 = vunpack.c.2.s8 %v1689_v24  ;;  %v3393_v27 = vunpack.c.3.s8 %v1689_v24 }
 0x573   :  { %8086 = vmatpush.bf16.msra.mxu2 %v6361_v45  ;;  %v6201_v40 = vpack.c.bf16 %v4881_v10, %v4873_v35  ;;  %v5177_v7 = vcvt.s32.f32 %v3257_v42  ;;  %v5185_v47 = vcvt.s32.f32 %v3265_v23  ;;  %v2937_v44 = vunpack.c.2.s8 %v1577_v15 }
 0x574   :  { %8099 = vmatpush.bf16.msrb.mxu3 %v6425_v31  ;;  %v6265_v56 = vpack.c.bf16 %v5009_v3, %v5001_v39  ;;  %v2945_v29 = vunpack.c.3.s8 %v1577_v15  ;;  %v5305_v25 = vcvt.s32.f32 %v3385_v28  ;;  %v5313_v17 = vcvt.s32.f32 %v3393_v27  ;;  %v1649_v3 = vld [vmem:[%s12559_s1 + $0xb78] sm:$0xff] }
 0x575   :  { %8064 = vmatpush.bf16.msra.mxu0 %v6201_v40  ;;  %v3065_v12 = vunpack.c.2.s8 %v1609_v52  ;;  %v3073_v6 = vunpack.c.3.s8 %v1609_v52  ;;  %v6353_v5 = vpack.c.bf16 %v5185_v47, %v5177_v7  ;;  %v4857_v2 = vcvt.s32.f32 %v2937_v44 }
 0x576   :  { %8077 = vmatpush.bf16.msra.mxu1 %v6265_v56  ;;  %v4865_v26 = vcvt.s32.f32 %v2945_v29  ;;  %v3241_v62 = vunpack.c.0.s8 %v1657_v41  ;;  %v6417_v9 = vpack.c.bf16 %v5313_v17, %v5305_v25  ;;  %v3249_v53 = vunpack.c.1.s8 %v1657_v41 }
 0x577   :  { %v4985_v16 = vcvt.s32.f32 %v3065_v12  ;;  %v4993_v14 = vcvt.s32.f32 %v3073_v6  ;;  %8087 = vmatpush.bf16.msra.mxu2 %v6353_v5  ;;  %v3369_v8 = vunpack.c.0.s8 %v1689_v24  ;;  %v3377_v19 = vunpack.c.1.s8 %v1689_v24  ;;  %v1761_v24 = vld [vmem:[%s12559_s1 + $0xef8] sm:$0xff] }
 0x578   :  { %v6193_v32 = vpack.c.bf16 %v4865_v26, %v4857_v2  ;;  %v5161_v11 = vcvt.s32.f32 %v3241_v62  ;;  %8100 = vmatpush.bf16.msrb.mxu3 %v6417_v9  ;;  %v5169_v0 = vcvt.s32.f32 %v3249_v53  ;;  %v2921_v58 = vunpack.c.0.s8 %v1577_v15 }
 0x579   :  { %v6257_v13 = vpack.c.bf16 %v4993_v14, %v4985_v16  ;;  %v2929_v1 = vunpack.c.1.s8 %v1577_v15  ;;  %v5289_v21 = vcvt.s32.f32 %v3369_v8  ;;  %v5297_v41 = vcvt.s32.f32 %v3377_v19 }
 0x57a   :  { %8065 = vmatpush.bf16.msra.mxu0 %v6193_v32  ;;  %v3049_v45 = vunpack.c.0.s8 %v1609_v52  ;;  %v3057_v35 = vunpack.c.1.s8 %v1609_v52  ;;  %v6345_v10 = vpack.c.bf16 %v5169_v0, %v5161_v11  ;;  %v4841_v42 = vcvt.s32.f32 %v2921_v58  ;;  %v1681_v52 = vld [vmem:[%s12559_s1 + $0xc78] sm:$0xff] }
 0x57b   :  { %8078 = vmatpush.bf16.msra.mxu1 %v6257_v13  ;;  %v4849_v31 = vcvt.s32.f32 %v2929_v1  ;;  %v3545_v39 = vunpack.c.2.s8 %v12457_v55  ;;  %v6409_v15 = vpack.c.bf16 %v5297_v41, %v5289_v21  ;;  %v3553_v7 = vunpack.c.3.s8 %v12457_v55  ;;  %v12478_v13 = vld [vmem:[%s12559_s1 + $0xdb8] sm:$0xff] }
 0x57c   :  { %v4969_v23 = vcvt.s32.f32 %v3049_v45  ;;  %v4977_v40 = vcvt.s32.f32 %v3057_v35  ;;  %8088 = vmatpush.bf16.msra.mxu2 %v6345_v10  ;;  %v3673_v56 = vunpack.c.2.s8 %v1761_v24  ;;  %v3681_v47 = vunpack.c.3.s8 %v1761_v24  ;;  %v1753_v41 = vld [vmem:[%s12559_s1 + $0xeb8] sm:$0xff] }
 0x57d   :  { %v6185_v28 = vpack.c.bf16 %v4849_v31, %v4841_v42  ;;  %v5465_v27 = vcvt.s32.f32 %v3545_v39  ;;  %8101 = vmatpush.bf16.msrb.mxu3 %v6409_v15  ;;  %v5473_v29 = vcvt.s32.f32 %v3553_v7  ;;  %v3225_v25 = vunpack.c.2.s8 %v1649_v3  ;;  %v12493_v42 = vpop.f32.mrf.mxu3 }
 0x57e   :  { %v6249_v44 = vpack.c.bf16 %v4977_v40, %v4969_v23  ;;  %v3233_v17 = vunpack.c.3.s8 %v1649_v3  ;;  %v5593_v12 = vcvt.s32.f32 %v3673_v56  ;;  %v5601_v6 = vcvt.s32.f32 %v3681_v47  ;;  %v1673_v23 = vld [vmem:[%s12559_s1 + $0xc38] sm:$0xff] }
 0x57f   :  { %8066 = vmatpush.bf16.msra.mxu0 %v6185_v28  ;;  %v3353_v5 = vunpack.c.2.s8 %v1681_v52  ;;  %v3361_v2 = vunpack.c.3.s8 %v1681_v52  ;;  %v6497_v26 = vpack.c.bf16 %v5473_v29, %v5465_v27  ;;  %v5145_v62 = vcvt.s32.f32 %v3225_v25 }
 0x580   :  { %8079 = vmatpush.bf16.msra.mxu1 %v6249_v44  ;;  %v5153_v9 = vcvt.s32.f32 %v3233_v17  ;;  %v7835_v16 = vadd.f32 %v12423_v51, %v12418_v43  ;;  %v6561_v14 = vpack.c.bf16 %v5601_v6, %v5593_v12  ;;  %v3529_v11 = vunpack.c.0.s8 %v12457_v55 }
 0x581   :  { %v5273_v53 = vcvt.s32.f32 %v3353_v5  ;;  %v5281_v32 = vcvt.s32.f32 %v3361_v2  ;;  %v3537_v18 = vunpack.c.1.s8 %v12457_v55  ;;  %v3657_v59 = vunpack.c.0.s8 %v1761_v24 }
 0x582   :  { %v6337_v8 = vpack.c.bf16 %v5153_v9, %v5145_v62  ;;  %v7848_v19 = vadd.f32 %v12425_v61, %v7835_v16  ;;  %8067 = vmatmul.bf16.vlgmr.msra.gmra.mxu0 %v10510_v36  ;;  %v5449_v43 = vcvt.s32.f32 %v3529_v11  ;;  %v3665_v51 = vunpack.c.1.s8 %v1761_v24  ;;  %v12489_v24 = vld [vmem:[%s12559_s1 + $0xb38] sm:$0xff] }
 0x583   :  { %8111 = vmatpush.bf16.msrb.mxu0 %v6497_v26  ;;  %v6401_v0 = vpack.c.bf16 %v5281_v32, %v5273_v53  ;;  %v3209_v58 = vunpack.c.0.s8 %v1649_v3  ;;  %8080 = vmatmul.bf16.vlgmr.msra.gmra.mxu1 %v10545_v22  ;;  %v5457_v1 = vcvt.s32.f32 %v3537_v18  ;;  %v5577_v61 = vcvt.s32.f32 %v3657_v59  ;;  %v12491_v22 = vpop.f32.mrf.mxu2  ;;  %v12500_v29 = vpop.f32.mrf.mxu0 }
 0x584   :  { %8124 = vmatpush.bf16.msrb.mxu1 %v6561_v14  ;;  %8089 = vmatpush.bf16.msra.mxu2 %v6337_v8  ;;  %v3217_v21 = vunpack.c.1.s8 %v1649_v3  ;;  %v3337_v55 = vunpack.c.0.s8 %v1681_v52  ;;  %v5585_v45 = vcvt.s32.f32 %v3665_v51  ;;  %v3345_v10 = vunpack.c.1.s8 %v1681_v52  ;;  %v12502_v25 = vpop.f32.mrf.mxu1 }
 0x585   :  { %8102 = vmatpush.bf16.msrb.mxu3 %v6401_v0  ;;  %v5129_v35 = vcvt.s32.f32 %v3209_v58  ;;  %v3513_v36 = vunpack.c.2.s8 %v12478_v13  ;;  %v6489_v31 = vpack.c.bf16 %v5457_v1, %v5449_v43  ;;  %v3521_v15 = vunpack.c.3.s8 %v12478_v13  ;;  %v1713_v1 = vld [vmem:[%s12559_s1 + $0xd78] sm:$0xff] }
 0x586   :  { %v5137_v39 = vcvt.s32.f32 %v3217_v21  ;;  %v5257_v3 = vcvt.s32.f32 %v3337_v55  ;;  %v6553_v40 = vpack.c.bf16 %v5585_v45, %v5577_v61  ;;  %v5265_v7 = vcvt.s32.f32 %v3345_v10 }
 0x587   :  { %v5433_v52 = vcvt.s32.f32 %v3513_v36  ;;  %v3641_v28 = vunpack.c.2.s8 %v1753_v41  ;;  %8112 = vmatpush.bf16.msrb.mxu0 %v6489_v31  ;;  %v5441_v56 = vcvt.s32.f32 %v3521_v15  ;;  %v3649_v47 = vunpack.c.3.s8 %v1753_v41 }
 0x588   :  { %v6329_v27 = vpack.c.bf16 %v5137_v39, %v5129_v35  ;;  %v3193_v44 = vunpack.c.2.s8 %v12489_v24  ;;  %8125 = vmatpush.bf16.msrb.mxu1 %v6553_v40  ;;  %v6393_v17 = vpack.c.bf16 %v5265_v7, %v5257_v3  ;;  %v3201_v6 = vunpack.c.3.s8 %v12489_v24 }
 0x589   :  { %v5561_v12 = vcvt.s32.f32 %v3641_v28  ;;  %v3321_v5 = vunpack.c.2.s8 %v1673_v23  ;;  %v6481_v2 = vpack.c.bf16 %v5441_v56, %v5433_v52  ;;  %v5569_v26 = vcvt.s32.f32 %v3649_v47 }
 0x58a   :  { %8090 = vmatpush.bf16.msra.mxu2 %v6329_v27  ;;  %v5113_v62 = vcvt.s32.f32 %v3193_v44  ;;  %v3329_v9 = vunpack.c.3.s8 %v1673_v23  ;;  %8103 = vmatpush.bf16.msrb.mxu3 %v6393_v17  ;;  %v5121_v16 = vcvt.s32.f32 %v3201_v6  ;;  %v7861_v53 = vadd.f32 %v12444_v34, %v7848_v19  ;;  %v7901_v34 = vpop.f32.mrf.mxu3  ;;  %v1705_v44 = vld [vmem:[%s12559_s1 + $0xd38] sm:$0xff] }
 0x58b   :  { %v5241_v14 = vcvt.s32.f32 %v3321_v5  ;;  %v3497_v32 = vunpack.c.0.s8 %v12478_v13  ;;  %8113 = vmatpush.bf16.msrb.mxu0 %v6481_v2  ;;  %v6545_v11 = vpack.c.bf16 %v5569_v26, %v5561_v12  ;;  %v3505_v18 = vunpack.c.1.s8 %v12478_v13  ;;  %v7888_v61 = vpop.f32.mrf.mxu2  ;;  %v7914_v15 = vpop.f32.mrf.mxu0  ;;  %v1737_v2 = vld [vmem:[%s12559_s1 + $0xe38] sm:$0xff] }
 0x58c   :  { %v5249_v8 = vcvt.s32.f32 %v3329_v9  ;;  %v3625_v59 = vunpack.c.0.s8 %v1753_v41  ;;  %v6321_v0 = vpack.c.bf16 %v5121_v16, %v5113_v62  ;;  %v12509_v43 = vadd.f32 %v12446_v49, %v7861_v53  ;;  %v7927_v40 = vpop.f32.mrf.mxu1 }
 0x58d   :  { %v5417_v51 = vcvt.s32.f32 %v3497_v32  ;;  %v3633_v58 = vunpack.c.1.s8 %v1753_v41  ;;  %8126 = vmatpush.bf16.msrb.mxu1 %v6545_v11  ;;  %v5425_v21 = vcvt.s32.f32 %v3505_v18  ;;  %v3177_v45 = vunpack.c.0.s8 %v12489_v24  ;;  %v1745_v41 = vld [vmem:[%s12559_s1 + $0xe78] sm:$0xff] }
 0x58e   :  { %v6385_v19 = vpack.c.bf16 %v5249_v8, %v5241_v14  ;;  %v5545_v55 = vcvt.s32.f32 %v3625_v59  ;;  %8091 = vmatpush.bf16.msra.mxu2 %v6321_v0  ;;  %v3185_v35 = vunpack.c.1.s8 %v12489_v24  ;;  %v3305_v49 = vunpack.c.0.s8 %v1673_v23 }
 0x58f   :  { %v5553_v13 = vcvt.s32.f32 %v3633_v58  ;;  %v3313_v10 = vunpack.c.1.s8 %v1673_v23  ;;  %v6473_v36 = vpack.c.bf16 %v5425_v21, %v5417_v51  ;;  %v5097_v31 = vcvt.s32.f32 %v3177_v45 }
 0x590   :  { %8104 = vmatpush.bf16.msrb.mxu3 %v6385_v19  ;;  %v3481_v39 = vunpack.c.2.s8 %v1713_v1  ;;  %v3489_v3 = vunpack.c.3.s8 %v1713_v1  ;;  %v5105_v52 = vcvt.s32.f32 %v3185_v35  ;;  %v5225_v28 = vcvt.s32.f32 %v3305_v49 }
 0x591   :  { %v6537_v7 = vpack.c.bf16 %v5553_v13, %v5545_v55  ;;  %v5233_v27 = vcvt.s32.f32 %v3313_v10  ;;  %8114 = vmatpush.bf16.msrb.mxu0 %v6473_v36  ;;  %v3609_v47 = vunpack.c.2.s8 %v1745_v41  ;;  %v3617_v23 = vunpack.c.3.s8 %v1745_v41 }
 0x592   :  { %v5401_v56 = vcvt.s32.f32 %v3481_v39  ;;  %v5409_v24 = vcvt.s32.f32 %v3489_v3  ;;  %v6313_v17 = vpack.c.bf16 %v5105_v52, %v5097_v31  ;;  %v3465_v6 = vunpack.c.0.s8 %v1713_v1 }
 0x593   :  { %8127 = vmatpush.bf16.msrb.mxu1 %v6537_v7  ;;  %v6377_v12 = vpack.c.bf16 %v5233_v27, %v5225_v28  ;;  %v3473_v5 = vunpack.c.1.s8 %v1713_v1  ;;  %v5529_v62 = vcvt.s32.f32 %v3609_v47  ;;  %v5537_v9 = vcvt.s32.f32 %v3617_v23 }
 0x594   :  { %v6465_v26 = vpack.c.bf16 %v5409_v24, %v5401_v56  ;;  %v3593_v16 = vunpack.c.0.s8 %v1745_v41  ;;  %8092 = vmatpush.bf16.msra.mxu2 %v6313_v17  ;;  %v5385_v14 = vcvt.s32.f32 %v3465_v6  ;;  %v3601_v32 = vunpack.c.1.s8 %v1745_v41 }
 0x595   :  { %8105 = vmatpush.bf16.msrb.mxu3 %v6377_v12  ;;  %v5393_v53 = vcvt.s32.f32 %v3473_v5  ;;  %v3449_v11 = vunpack.c.2.s8 %v1705_v44  ;;  %v6529_v8 = vpack.c.bf16 %v5537_v9, %v5529_v62  ;;  %v3457_v59 = vunpack.c.3.s8 %v1705_v44 }
 0x596   :  { %8115 = vmatpush.bf16.msrb.mxu0 %v6465_v26  ;;  %v5513_v18 = vcvt.s32.f32 %v3593_v16  ;;  %v3577_v0 = vunpack.c.2.s8 %v1737_v2  ;;  %v5521_v58 = vcvt.s32.f32 %v3601_v32  ;;  %v3585_v61 = vunpack.c.3.s8 %v1737_v2  ;;  %v8495_v16 = vld [vmem:[%s12560_s2] sm:$0xff]  ;;  %s8524_s2 = smov [#allocation2]  }
 0x597   :  { %v6457_v51 = vpack.c.bf16 %v5393_v53, %v5385_v14  ;;  %v5369_v1 = vcvt.s32.f32 %v3449_v11  ;;  %8093 = vmatmul.bf16.vlgmr.msra.gmra.mxu2 %v10564_v30  ;;  %v5377_v34 = vcvt.s32.f32 %v3457_v59  ;;  %v3433_v21 = vunpack.c.0.s8 %v1705_v44  ;;  %8128 = vmatpush.bf16.msrb.mxu1 %v6529_v8 }
 0x598   :  { %8106 = vmatmul.bf16.vlgmr.msrb.gmra.mxu3 %v10642_v37  ;;  %v5497_v19 = vcvt.s32.f32 %v3577_v0  ;;  %v3441_v55 = vunpack.c.1.s8 %v1705_v44  ;;  %v6521_v45 = vpack.c.bf16 %v5521_v58, %v5513_v18  ;;  %v5505_v13 = vcvt.s32.f32 %v3585_v61  ;;  %v8496_v0 = vld [vmem:[%s12561_s3] sm:$0xff]  ;;  %s8225_s3 = sshll.u32 %s8524_s2, 4  ;;  %s8226_s3 = int_to_ptr.vmem [resolvable:$true] %s8225_s3 }
 0x599   :  { %v3561_v35 = vunpack.c.0.s8 %v1737_v2  ;;  %v3569_v49 = vunpack.c.1.s8 %v1737_v2  ;;  %v6449_v10 = vpack.c.bf16 %v5377_v34, %v5369_v1  ;;  %v5353_v41 = vcvt.s32.f32 %v3433_v21 }
 0x59a   :  { %8116 = vmatpush.bf16.msrb.mxu0 %v6457_v51  ;;  %v5361_v36 = vcvt.s32.f32 %v3441_v55  ;;  %v7887_v31 = vadd.f32 %v12491_v22, %v12509_v43  ;;  %v8181_v30 = vadd.f32 %v8165_v50, %v12330_v20  ;;  %v6513_v39 = vpack.c.bf16 %v5505_v13, %v5497_v19 }
 0x59b   :  { %8129 = vmatpush.bf16.msrb.mxu1 %v6521_v45  ;;  %v5481_v3 = vcvt.s32.f32 %v3561_v35  ;;  %v5489_v15 = vcvt.s32.f32 %v3569_v49  ;;  %v8142_v14 = vperm.slane %v8495_v16, 3  ;;  %v8144_v53 = vperm.slane %v8495_v16, 5 }
 0x59c   :  { %v7900_v37 = vadd.f32 %v12493_v42, %v7887_v31  ;;  %v12535_v40 = vsel %vm8204_vm1, %v8181_v30, %v8197_v63  ;;  %v6441_v7 = vpack.c.bf16 %v5361_v36, %v5353_v41  ;;  %v8141_v32 = vperm.slane %v8495_v16, 2 }
 0x59d   :  { %v6505_v50 = vpack.c.bf16 %v5489_v15, %v5481_v3  ;;  %v8143_v11 = vperm.slane %v8495_v16, 4  ;;  %v8158_v59 = vmul.f32 %v8142_v14, %v11724_v38  ;;  %v8168_v51 = vperm.slane %v8496_v0, 3 }
 0x59e   :  { %8117 = vmatpush.bf16.msrb.mxu0 %v6449_v10  ;;  %v7913_v52 = vadd.f32 %v12500_v29, %v7900_v37  ;;  %v7938_v22 = vpop.f32.mrf.mxu2  ;;  %v8160_v58 = vmul.f32 %v8144_v53, %v12314_v33  ;;  %v8170_v1 = vperm.slane %v8496_v0, 5  ;;  %v8157_v61 = vmul.f32 %v8141_v32, %v11481_v54 }
 0x59f   :  { %v7951_v4 = vpop.f32.mrf.mxu3  ;;  %8130 = vmatpush.bf16.msrb.mxu1 %v6513_v39  ;;  %v8167_v34 = vperm.slane %v8496_v0, 2  ;;  %v8159_v19 = vmul.f32 %v8143_v11, %v12013_v48  ;;  %v8169_v21 = vperm.slane %v8496_v0, 4  ;;  %v8184_v55 = vadd.f32 %v8168_v51, %v8158_v59 }
 0x5a0   :  { %v7926_v43 = vadd.f32 %v12502_v25, %v7913_v52  ;;  %v8186_v45 = vadd.f32 %v8170_v1, %v8160_v58 }
 0x5a1   :  { %v8183_v13 = vadd.f32 %v8167_v34, %v8157_v61  ;;  %v8185_v35 = vadd.f32 %v8169_v21, %v8159_v19  ;;  %v8199_v10 = vrot.slane %v8184_v55, 5 }
 0x5a2   :  { %8118 = vmatpush.bf16.msrb.mxu0 %v6441_v7  ;;  %v12539_v20 = vadd.f32 %v7938_v22, %v7926_v43  ;;  %v8201_v41 = vrot.slane %v8186_v45, 3 }
 0x5a3   :  { %8131 = vmatpush.bf16.msrb.mxu1 %v6505_v50  ;;  %v8198_v31 = vrot.slane %v8183_v13, 6  ;;  %v8200_v30 = vrot.slane %v8185_v35, 4 }
 0x5a5   :  { %8119 = vmatmul.bf16.vlgmr.msrb.gmra.mxu0 %v10644_v46  ;;  %v8207_v33 = vsel %vm8206_vm2, %v8198_v31, %v8199_v10  ;;  %v8211_v54 = vsel %vm8210_vm4, %v8200_v30, %v8201_v41 }
 0x5a6   :  { %v7940_v42 = vpop.f32.mrf.mxu2  ;;  %8132 = vmatmul.bf16.vlgmr.msrb.gmra.mxu1 %v10665_v60  ;;  %v8209_v48 = vsel %vm8208_vm3, %v12535_v40, %v8207_v33  ;;  %v8172_v40 = vperm.slane %v8496_v0, 7 }
 0x5a7   :  { %v7953_v57 = vpop.f32.mrf.mxu3 }
 0x5ac   :  { %v7964_v63 = vpop.f32.mrf.mxu0 }
 0x5ad   :  { %v7965_v28 = vadd.f32 %v7964_v63, %v7951_v4  ;;  %v7977_v27 = vpop.f32.mrf.mxu1  ;;  %v8145_v4 = vperm.slane %v8495_v16, 6 }
 0x5af   :  { %v7978_v29 = vadd.f32 %v7977_v27, %v7965_v28  ;;  %v8161_v27 = vmul.f32 %v8145_v4, %v12539_v20 }
 0x5b4   :  { %v7966_v56 = vpop.f32.mrf.mxu0 }
 0x5b5   :  { %v7979_v24 = vpop.f32.mrf.mxu1  ;;  %v8146_v56 = vperm.slane %v8495_v16, 7 }
 0x5c8   :  { %v7990_v25 = vpop.f32.mrf.mxu2 }
 0x5c9   :  { %v7991_v47 = vadd.f32 %v7990_v25, %v7978_v29  ;;  %v8003_v23 = vpop.f32.mrf.mxu3  ;;  %v8171_v29 = vperm.slane %v8496_v0, 6 }
 0x5cb   :  { %v8004_v44 = vadd.f32 %v8003_v23, %v7991_v47  ;;  %v8187_v47 = vadd.f32 %v8171_v29, %v8161_v27 }
 0x5d0   :  { %v7992_v17 = vpop.f32.mrf.mxu2 }
 0x5d1   :  { %v8005_v12 = vpop.f32.mrf.mxu3 }
 0x5d2   :  { %v8202_v12 = vrot.slane %v8187_v47, 2 }
 0x5d6   :  { %v8016_v6 = vpop.f32.mrf.mxu0 }
 0x5d7   :  { %v8029_v5 = vpop.f32.mrf.mxu1  ;;  %v8017_v36 = vadd.f32 %v8016_v6, %v8004_v44 }
 0x5d9   :  { %v8030_v37 = vadd.f32 %v8029_v5, %v8017_v36 }
 0x5de   :  { %v8018_v2 = vpop.f32.mrf.mxu0 }
 0x5df   :  { %v8031_v46 = vpop.f32.mrf.mxu1 }
 0x5f1   :  { %v8042_v26 = vpop.f32.mrf.mxu2 }
 0x5f2   :  { %v8055_v62 = vpop.f32.mrf.mxu3  ;;  %v8043_v39 = vadd.f32 %v8042_v26, %v8030_v37 }
 0x5f4   :  { %v8056_v3 = vadd.f32 %v8055_v62, %v8043_v39 }
 0x5f9   :  { %v8044_v60 = vpop.f32.mrf.mxu2 }
 0x5fa   :  { %v8057_v9 = vpop.f32.mrf.mxu3 }
 0x5ff   :  { %v8068_v8 = vpop.f32.mrf.mxu0 }
 0x600   :  { %v8081_v18 = vpop.f32.mrf.mxu1  ;;  %v8069_v15 = vadd.f32 %v8068_v8, %v8056_v3 }
 0x602   :  { %v8082_v7 = vadd.f32 %v8081_v18, %v8069_v15 }
 0x607   :  { %v8070_v49 = vpop.f32.mrf.mxu0 }
 0x608   :  { %v8083_v38 = vpop.f32.mrf.mxu1 }
 0x61a   :  { %v8094_v52 = vpop.f32.mrf.mxu2 }
 0x61b   :  { %v8107_v22 = vpop.f32.mrf.mxu3  ;;  %v8095_v43 = vadd.f32 %v8094_v52, %v8082_v7 }
 0x61d   :  { %v8108_v50 = vadd.f32 %v8107_v22, %v8095_v43 }
 0x622   :  { %v8120_v42 = vpop.f32.mrf.mxu0  ;;  %v8096_v57 = vpop.f32.mrf.mxu2 }
 0x623   :  { %v8109_v63 = vpop.f32.mrf.mxu3  ;;  %v8121_v28 = vadd.f32 %v8120_v42, %v8108_v50  ;;  %v8133_v24 = vpop.f32.mrf.mxu1 }
 0x625   :  { %v8134_v25 = vadd.f32 %v8133_v24, %v8121_v28 }
 0x627   :  { %v8162_v23 = vmul.f32 %v8146_v56, %v8134_v25 }
 0x629   :  { %v8188_v44 = vadd.f32 %v8172_v40, %v8162_v23 }
 0x62a   :  { %v8122_v17 = vpop.f32.mrf.mxu0 }
 0x62b   :  { %v8203_v6 = vrot.slane %v8188_v44, 1  ;;  %v8135_v20 = vpop.f32.mrf.mxu1 }
 0x62d   :  { %v8213_v5 = vsel %vm8212_vm5, %v8202_v12, %v8203_v6 }
 0x62e   :  { %v8215_v2 = vsel %vm8214_vm6, %v8211_v54, %v8213_v5 }
 0x62f   :  { %v8217_v46 = vsel %vm8216_vm7, %v8209_v48, %v8215_v2 }
 0x630   :  { %8219 = vst [vmem:[#allocation2] sm:$0xff] %v8217_v46 }
 0x631   :  { %8230 = dma.vmem_to_hbm [thread:$0]  %s8226_s3, 128, %s8228_s29, [#allocation3]  }
 0x632   :  { %8521 = dma.done.wait [#allocation3], 128  }
 0x633   :  { %8522 = vsyncadd [#allocation3], 4294967168 }
 0x634   :  { %8235 = vsyncpa [#allocation3], 1 }

</bundles_post_ra>
